<compile_context>
chip_gen: v7x
topology: tpu7x:2x2x1
jax: 0.10.0
libtpu: 0.0.40
codegen_flags: <defaults>
</compile_context>

<pallas_src>
import functools

import jax
import jax.numpy as jnp
from jax.experimental import pallas as pl
from jax.experimental.pallas import tpu as pltpu


def _round_up(a, b):
    return (a + b - 1) // b * b


# ----------------------------------------------------------------------------
# Pallas kernels
# ----------------------------------------------------------------------------

def _conv_kernel(x_ref, w_ref, b_ref, o_ref, acc_ref, *, relu):
    """Tap-reduced conv matmul: acc += x_tap @ w_tap; epilogue = +bias (+ReLU)."""
    t = pl.program_id(2)

    @pl.when(t == 0)
    def _():
        acc_ref[...] = jnp.zeros_like(acc_ref)

    acc_ref[...] += jnp.dot(x_ref[0], w_ref[0],
                            preferred_element_type=jnp.float32)

    @pl.when(t == pl.num_programs(2) - 1)
    def _():
        r = acc_ref[...] + b_ref[...]
        if relu:
            r = jnp.maximum(r, 0.0)
        o_ref[...] = r.astype(o_ref.dtype)


def _conv_residual_kernel(x_ref, w_ref, b_ref, id_ref, o_ref, acc_ref):
    """Same as _conv_kernel but fuses the residual add + ReLU in the epilogue."""
    t = pl.program_id(2)

    @pl.when(t == 0)
    def _():
        acc_ref[...] = jnp.zeros_like(acc_ref)

    acc_ref[...] += jnp.dot(x_ref[0], w_ref[0],
                            preferred_element_type=jnp.float32)

    @pl.when(t == pl.num_programs(2) - 1)
    def _():
        r = acc_ref[...] + b_ref[...] + id_ref[...].astype(jnp.float32)
        o_ref[...] = jnp.maximum(r, 0.0).astype(o_ref.dtype)


def _maxpool_kernel(x_ref, o_ref):
    """Max over the kernel-tap axis: (taps, tm, C) -> (tm, C)."""
    o_ref[...] = jnp.max(x_ref[...], axis=0)


def _avgpool_kernel(x_ref, o_ref):
    """Global average pool: (N, HW, C) -> (N, C), accumulate in f32."""
    o_ref[...] = jnp.mean(x_ref[...].astype(jnp.float32), axis=1)


# ----------------------------------------------------------------------------
# Pallas wrappers
# ----------------------------------------------------------------------------

def conv_matmul(patches, w_taps, bias, identity=None, *, relu=True,
                out_dtype=jnp.bfloat16, tm=256, tn=256):
    """patches: (taps, M, Cin) bf16, w_taps: (taps, Cin, Cout) bf16 (BN scale
    folded), bias: (1, Cout) f32, identity: optional (M, Cout) bf16.

    Grid = (M tiles, Cout tiles, taps); taps is the reduction ("arbitrary")
    axis with a VMEM f32 accumulator.  tm=256 feeds the 256-wide MXU on
    v6e/v7x; the Cout-tile axis gives a second parallel axis for v7x's 2 TCs.
    """
    taps, m, cin = patches.shape
    _, _, cout = w_taps.shape

    tm_eff = min(tm, _round_up(m, 8))
    m_pad = _round_up(m, tm_eff)
    tn_eff = cout if cout <= tn else tn
    assert cout % tn_eff == 0

    if m_pad != m:
        patches = jnp.pad(patches, ((0, 0), (0, m_pad - m), (0, 0)))
        if identity is not None:
            identity = jnp.pad(identity, ((0, m_pad - m), (0, 0)))

    grid = (m_pad // tm_eff, cout // tn_eff, taps)

    # TODO(synk): consider pipeline_mode=pl.Buffered(3) on the LHS spec for
    # the early, DMA-exposed layers on v5e.
    in_specs = [
        pl.BlockSpec((1, tm_eff, cin), lambda i, j, t: (t, i, 0)),
        pl.BlockSpec((1, cin, tn_eff), lambda i, j, t: (t, 0, j)),
        pl.BlockSpec((1, tn_eff), lambda i, j, t: (0, j)),
    ]
    inputs = [patches, w_taps, bias]
    if identity is not None:
        in_specs.append(pl.BlockSpec((tm_eff, tn_eff), lambda i, j, t: (i, j)))
        inputs.append(identity)
        kernel = _conv_residual_kernel
    else:
        kernel = functools.partial(_conv_kernel, relu=relu)

    out = pl.pallas_call(
        kernel,
        out_shape=jax.ShapeDtypeStruct((m_pad, cout), out_dtype),
        grid_spec=pltpu.PrefetchScalarGridSpec(
            num_scalar_prefetch=0,
            grid=grid,
            in_specs=in_specs,
            out_specs=pl.BlockSpec((tm_eff, tn_eff), lambda i, j, t: (i, j)),
            scratch_shapes=[pltpu.VMEM((tm_eff, tn_eff), jnp.float32)],
        ),
        compiler_params=pltpu.CompilerParams(
            dimension_semantics=("parallel", "parallel", "arbitrary"),
            vmem_limit_bytes=32 * 1024 * 1024,   # fits v7x's 64 MiB with headroom
        ),
    )(*inputs)
    return out[:m]


# ----------------------------------------------------------------------------
# im2col tap extraction (plain-JAX slicing) + conv / pool layers
# ----------------------------------------------------------------------------

def extract_patches(x, kh, kw, stride, pad, pad_value=0.0):
    """x: (N, H, W, C) -> (kh*kw, N, OH, OW, C) tap-stacked strided slices."""
    n, h, w, c = x.shape
    x = jnp.pad(x, ((0, 0), (pad, pad), (pad, pad), (0, 0)),
                constant_values=pad_value)
    hp, wp = h + 2 * pad, w + 2 * pad
    oh = (hp - kh) // stride + 1
    ow = (wp - kw) // stride + 1
    taps = []
    for i in range(kh):
        for j in range(kw):
            taps.append(x[:, i:i + stride * (oh - 1) + 1:stride,
                          j:j + stride * (ow - 1) + 1:stride, :])
    return jnp.stack(taps, axis=0), oh, ow


def conv2d_bn(x, w_hwio, bn_scale, bn_bias, *, stride, pad, relu,
              identity=None):
    """Conv(bias=False) + folded BatchNorm (+ ReLU / + fused residual).

    x: NHWC bf16, w: HWIO f32 (BN scale folded here, then cast to bf16).
    """
    kh, kw, cin, cout = w_hwio.shape
    p, oh, ow = extract_patches(x, kh, kw, stride, pad)
    n = x.shape[0]
    patches = p.reshape(kh * kw, n * oh * ow, cin).astype(jnp.bfloat16)
    w_taps = (w_hwio.reshape(kh * kw, cin, cout)
              * bn_scale.reshape(1, 1, cout)).astype(jnp.bfloat16)
    bias = bn_bias.reshape(1, cout).astype(jnp.float32)
    id2 = None
    if identity is not None:
        id2 = identity.reshape(n * oh * ow, cout).astype(jnp.bfloat16)
    out = conv_matmul(patches, w_taps, bias, id2, relu=relu,
                      out_dtype=jnp.bfloat16)
    return out.reshape(n, oh, ow, cout)


def maxpool2d(x, k=3, stride=2, pad=1):
    n, _, _, c = x.shape
    p, oh, ow = extract_patches(x, k, k, stride, pad, pad_value=-jnp.inf)
    m = n * oh * ow
    p = p.reshape(k * k, m, c)
    tm = min(512, _round_up(m, 8))
    m_pad = _round_up(m, tm)
    if m_pad != m:
        p = jnp.pad(p, ((0, 0), (0, m_pad - m), (0, 0)),
                    constant_values=-jnp.inf)
    out = pl.pallas_call(
        _maxpool_kernel,
        out_shape=jax.ShapeDtypeStruct((m_pad, c), x.dtype),
        grid_spec=pltpu.PrefetchScalarGridSpec(
            num_scalar_prefetch=0,
            grid=(m_pad // tm,),
            in_specs=[pl.BlockSpec((k * k, tm, c), lambda i: (0, i, 0))],
            out_specs=pl.BlockSpec((tm, c), lambda i: (i, 0)),
        ),
        compiler_params=pltpu.CompilerParams(
            dimension_semantics=("parallel",),
            vmem_limit_bytes=32 * 1024 * 1024,
        ),
    )(p)
    return out[:m].reshape(n, oh, ow, c)


def global_avgpool(x):
    # (N, HW, 512) is <= ~100 KB even at 224x224 inputs -> single block is fine.
    n, h, w, c = x.shape
    return pl.pallas_call(
        _avgpool_kernel,
        out_shape=jax.ShapeDtypeStruct((n, c), jnp.float32),
    )(x.reshape(n, h * w, c))


def linear(pooled, fc_w, fc_b):
    """Final FC; output padded to 128 lanes for dense stores, sliced after."""
    n, k = pooled.shape
    nc = fc_w.shape[1]
    cpad = 128
    w_p = jnp.zeros((k, cpad), jnp.float32).at[:, :nc].set(fc_w)
    b_p = jnp.zeros((1, cpad), jnp.float32).at[0, :nc].set(fc_b)
    patches = pooled.astype(jnp.bfloat16)[None]          # (1, N, 512)
    w_taps = w_p.astype(jnp.bfloat16)[None]              # (1, 512, 128)
    out = conv_matmul(patches, w_taps, b_p, None, relu=False,
                      out_dtype=jnp.float32)
    return out[:, :nc]


# ----------------------------------------------------------------------------
# ResNet-34 parameters (deterministic synthetic init) and forward pass
# ----------------------------------------------------------------------------

BLOCKS = (3, 4, 6, 3)
WIDTHS = (64, 128, 256, 512)
BN_EPS = 1e-5


def _fold_bn(gamma, beta, mean, var):
    scale = gamma / jnp.sqrt(var + BN_EPS)
    bias = beta - mean * scale
    return scale, bias


def _init_conv(key, kh, kw, cin, cout):
    return (jax.random.normal(key, (kh, kw, cin, cout), jnp.float32)
            * (1.0 / jnp.sqrt(kh * kw * cin)))


def _init_bn(key, c):
    k1, k2, k3, k4 = jax.random.split(key, 4)
    gamma = 1.0 + 0.1 * jax.random.normal(k1, (c,), jnp.float32)
    beta = 0.1 * jax.random.normal(k2, (c,), jnp.float32)
    mean = 0.1 * jax.random.normal(k3, (c,), jnp.float32)
    var = jnp.abs(jax.random.normal(k4, (c,), jnp.float32)) + 0.5
    return _fold_bn(gamma, beta, mean, var)


def init_params(key, num_classes=2):
    keys = iter(jax.random.split(key, 128))
    params = {
        "conv1_w": _init_conv(next(keys), 7, 7, 3, 64),
        "bn1": _init_bn(next(keys), 64),
        "layers": [],
    }
    in_c = 64
    for stage, (nblk, width) in enumerate(zip(BLOCKS, WIDTHS)):
        blocks = []
        for b in range(nblk):
            stride = 2 if (stage > 0 and b == 0) else 1
            blk = {
                "conv1_w": _init_conv(next(keys), 3, 3, in_c, width),
                "bn1": _init_bn(next(keys), width),
                "conv2_w": _init_conv(next(keys), 3, 3, width, width),
                "bn2": _init_bn(next(keys), width),
            }
            if stride != 1 or in_c != width:
                blk["down_w"] = _init_conv(next(keys), 1, 1, in_c, width)
                blk["down_bn"] = _init_bn(next(keys), width)
            blocks.append(blk)
            in_c = width
        params["layers"].append(blocks)
    kfc_w, kfc_b = jax.random.split(next(keys))
    params["fc_w"] = (jax.random.normal(kfc_w, (512, num_classes), jnp.float32)
                      * (1.0 / jnp.sqrt(512.0)))
    params["fc_b"] = 0.01 * jax.random.normal(kfc_b, (num_classes,), jnp.float32)
    return params


def basic_block(x, blk, stride):
    if "down_w" in blk:
        identity = conv2d_bn(x, blk["down_w"], *blk["down_bn"],
                             stride=stride, pad=0, relu=False)
    else:
        identity = x
    out = conv2d_bn(x, blk["conv1_w"], *blk["bn1"], stride=stride, pad=1,
                    relu=True)
    # Second conv: residual add + ReLU fused into the matmul epilogue.
    out = conv2d_bn(out, blk["conv2_w"], *blk["bn2"], stride=1, pad=1,
                    relu=True, identity=identity)
    return out


def resnet34_forward(params, x_nchw):
    # NCHW (PyTorch) -> NHWC bf16 internally; conv weights HWIO, BN folded.
    x = jnp.transpose(x_nchw, (0, 2, 3, 1)).astype(jnp.bfloat16)
    x = conv2d_bn(x, params["conv1_w"], *params["bn1"], stride=2, pad=3,
                  relu=True)
    x = maxpool2d(x, k=3, stride=2, pad=1)
    for stage, blocks in enumerate(params["layers"]):
        for b, blk in enumerate(blocks):
            stride = 2 if (stage > 0 and b == 0) else 1
            x = basic_block(x, blk, stride)
    pooled = global_avgpool(x)                           # (N, 512) f32
    logits = linear(pooled, params["fc_w"], params["fc_b"])
    return logits


if __name__ == "__main__":
    key = jax.random.PRNGKey(0)
    pkey, xkey = jax.random.split(key)
    # TODO(synk): weights are deterministic synthetic values, not the pretrained
    # torchvision resnet34 checkpoint (no file loading allowed).
    params = init_params(pkey, num_classes=2)
    x = jax.random.normal(xkey, (2, 3, 32, 32), jnp.float32)  # NCHW, like PyTorch
    logits = jax.jit(resnet34_forward)(params, x)
    jax.block_until_ready(logits)
    assert logits.shape == (2, 2) and logits.dtype == jnp.float32
    print("KERNEL_OK")
</pallas_src>

<mosaic_0001>
module attributes {stable_mosaic.version = 11 : i64} {
  func.func @_conv_kernel(%arg0: i32, %arg1: i32, %arg2: i32, %arg3: memref<1x256x3xbf16, #tpu.memory_space<vmem>>, %arg4: memref<1x3x64xbf16, #tpu.memory_space<vmem>>, %arg5: memref<1x64xf32, #tpu.memory_space<vmem>>, %arg6: memref<256x64xbf16, #tpu.memory_space<vmem>>, %arg7: memref<256x64xf32, #tpu.memory_space<vmem>>) attributes {dimension_semantics = [#tpu.dimension_semantics<parallel>, #tpu.dimension_semantics<parallel>, #tpu.dimension_semantics<arbitrary>], iteration_bounds = array<i64: 2, 1, 49>, scalar_prefetch = 0 : i64, scratch_operands = 1 : i64, tpu.core_type = #tpu.core_type<tc>, window_params = [{transform_indices = @transform_0, window_bounds = array<i64: 1, 256, 3>}, {transform_indices = @transform_1, window_bounds = array<i64: 1, 3, 64>}, {transform_indices = @transform_2, window_bounds = array<i64: 1, 64>}, {transform_indices = @transform_3, window_bounds = array<i64: 256, 64>}]} {
    %c0_i32 = arith.constant 0 : i32
    %0 = arith.cmpi eq, %arg2, %c0_i32 : i32
    %1 = arith.extui %0 : i1 to i32
    %c0_i32_0 = arith.constant 0 : i32
    %2 = arith.cmpi ne, %1, %c0_i32_0 : i32
    scf.if %2 {
      %cst_11 = arith.constant 0.000000e+00 : f32
      %14 = vector.broadcast %cst_11 : f32 to vector<256x64xf32>
      %c0_12 = arith.constant 0 : index
      %c0_13 = arith.constant 0 : index
      %15 = vector.load %arg7[%c0_12, %c0_13] : memref<256x64xf32, #tpu.memory_space<vmem>>, vector<256x64xf32>
      tpu.vector_store %arg7[%c0_12, %c0_13], %14 {strides = array<i32>} : memref<256x64xf32, #tpu.memory_space<vmem>>, vector<256x64xf32>,
    } else {
    }
    %c0 = arith.constant 0 : index
    %c0_1 = arith.constant 0 : index
    %3 = vector.load %arg7[%c0, %c0_1] : memref<256x64xf32, #tpu.memory_space<vmem>>, vector<256x64xf32>
    %c0_2 = arith.constant 0 : index
    %c0_3 = arith.constant 0 : index
    %c0_4 = arith.constant 0 : index
    %4 = vector.load %arg3[%c0_2, %c0_3, %c0_4] : memref<1x256x3xbf16, #tpu.memory_space<vmem>>, vector<1x256x3xbf16>
    %5 = vector.shape_cast %4 : vector<1x256x3xbf16> to vector<256x3xbf16>
    %c0_5 = arith.constant 0 : index
    %c0_6 = arith.constant 0 : index
    %c0_7 = arith.constant 0 : index
    %6 = vector.load %arg4[%c0_5, %c0_6, %c0_7] : memref<1x3x64xbf16, #tpu.memory_space<vmem>>, vector<1x3x64xbf16>
    %7 = vector.shape_cast %6 : vector<1x3x64xbf16> to vector<3x64xbf16>
    %cst = arith.constant dense<0.000000e+00> : vector<256x64xf32>
    %8 = tpu.matmul %5, %7, %cst {dimension_numbers = #tpu.dot_dimension_numbers<[1], [0], [0], [1], [0, 0, 1, 1], [], []>} : vector<256x3xbf16>, vector<3x64xbf16>, vector<256x64xf32> -> vector<256x64xf32>
    %9 = arith.addf %3, %8 : vector<256x64xf32>
    %c0_8 = arith.constant 0 : index
    %c0_9 = arith.constant 0 : index
    %10 = vector.load %arg7[%c0_8, %c0_9] : memref<256x64xf32, #tpu.memory_space<vmem>>, vector<256x64xf32>
    tpu.vector_store %arg7[%c0_8, %c0_9], %9 {strides = array<i32>} : memref<256x64xf32, #tpu.memory_space<vmem>>, vector<256x64xf32>,
    %c48_i32 = arith.constant 48 : i32
    %11 = arith.cmpi eq, %arg2, %c48_i32 : i32
    %12 = arith.extui %11 : i1 to i32
    %c0_i32_10 = arith.constant 0 : i32
    %13 = arith.cmpi ne, %12, %c0_i32_10 : i32
    scf.if %13 {
      %c0_11 = arith.constant 0 : index
      %c0_12 = arith.constant 0 : index
      %14 = vector.load %arg7[%c0_11, %c0_12] : memref<256x64xf32, #tpu.memory_space<vmem>>, vector<256x64xf32>
      %c0_13 = arith.constant 0 : index
      %c0_14 = arith.constant 0 : index
      %15 = vector.load %arg5[%c0_13, %c0_14] : memref<1x64xf32, #tpu.memory_space<vmem>>, vector<1x64xf32>
      %16 = vector.broadcast %15 : vector<1x64xf32> to vector<256x64xf32>
      %17 = arith.addf %14, %16 : vector<256x64xf32>
      %cst_15 = arith.constant 0.000000e+00 : f32
      %18 = vector.broadcast %cst_15 : f32 to vector<256x64xf32>
      %19 = arith.maximumf %17, %18 : vector<256x64xf32>
      %20 = arith.truncf %19 : vector<256x64xf32> to vector<256x64xbf16>
      %c0_16 = arith.constant 0 : index
      %c0_17 = arith.constant 0 : index
      %21 = vector.load %arg6[%c0_16, %c0_17] : memref<256x64xbf16, #tpu.memory_space<vmem>>, vector<256x64xbf16>
      tpu.vector_store %arg6[%c0_16, %c0_17], %20 {strides = array<i32>} : memref<256x64xbf16, #tpu.memory_space<vmem>>, vector<256x64xbf16>,
    } else {
    }
    return
  }
  func.func @transform_0(%arg0: i32, %arg1: i32, %arg2: i32) -> (i32, i32, i32) {
    %c0_i32 = arith.constant 0 : i32
    %c0_i32_0 = arith.constant 0 : i32
    return %arg2, %arg0, %c0_i32 : i32, i32, i32
  }
  func.func @transform_1(%arg0: i32, %arg1: i32, %arg2: i32) -> (i32, i32, i32) {
    %c0_i32 = arith.constant 0 : i32
    %c0_i32_0 = arith.constant 0 : i32
    return %arg2, %c0_i32, %arg1 : i32, i32, i32
  }
  func.func @transform_2(%arg0: i32, %arg1: i32, %arg2: i32) -> (i32, i32) {
    %c0_i32 = arith.constant 0 : i32
    %c0_i32_0 = arith.constant 0 : i32
    return %c0_i32, %arg1 : i32, i32
  }
  func.func @transform_3(%arg0: i32, %arg1: i32, %arg2: i32) -> (i32, i32) {
    %c0_i32 = arith.constant 0 : i32
    return %arg0, %arg1 : i32, i32
  }
}

module attributes {stable_mosaic.version = 11 : i64} {
  func.func @_maxpool_kernel(%arg0: i32, %arg1: memref<9x128x64xbf16, #tpu.memory_space<vmem>>, %arg2: memref<128x64xbf16, #tpu.memory_space<vmem>>) attributes {dimension_semantics = [#tpu.dimension_semantics<parallel>], iteration_bounds = array<i64: 1>, scalar_prefetch = 0 : i64, scratch_operands = 0 : i64, tpu.core_type = #tpu.core_type<tc>, window_params = [{transform_indices = @transform_0, window_bounds = array<i64: 9, 128, 64>}, {transform_indices = @transform_1, window_bounds = array<i64: 128, 64>}]} {
    %c0 = arith.constant 0 : index
    %c0_0 = arith.constant 0 : index
    %c0_1 = arith.constant 0 : index
    %0 = vector.load %arg1[%c0, %c0_0, %c0_1] : memref<9x128x64xbf16, #tpu.memory_space<vmem>>, vector<9x128x64xbf16>
    %cst = arith.constant dense<0xFF80> : vector<128x64xbf16>
    %1 = vector.multi_reduction <maximumf>, %0, %cst [0] : vector<9x128x64xbf16> to vector<128x64xbf16>
    %c0_2 = arith.constant 0 : index
    %c0_3 = arith.constant 0 : index
    %2 = vector.load %arg2[%c0_2, %c0_3] : memref<128x64xbf16, #tpu.memory_space<vmem>>, vector<128x64xbf16>
    tpu.vector_store %arg2[%c0_2, %c0_3], %1 {strides = array<i32>} : memref<128x64xbf16, #tpu.memory_space<vmem>>, vector<128x64xbf16>,
    return
  }
  func.func @transform_0(%arg0: i32) -> (i32, i32, i32) {
    %c0_i32 = arith.constant 0 : i32
    %c0_i32_0 = arith.constant 0 : i32
    %c0_i32_1 = arith.constant 0 : i32
    return %c0_i32, %arg0, %c0_i32_0 : i32, i32, i32
  }
  func.func @transform_1(%arg0: i32) -> (i32, i32) {
    %c0_i32 = arith.constant 0 : i32
    %c0_i32_0 = arith.constant 0 : i32
    return %arg0, %c0_i32 : i32, i32
  }
}

module attributes {stable_mosaic.version = 11 : i64} {
  func.func @_conv_kernel(%arg0: i32, %arg1: i32, %arg2: i32, %arg3: memref<1x128x64xbf16, #tpu.memory_space<vmem>>, %arg4: memref<1x64x64xbf16, #tpu.memory_space<vmem>>, %arg5: memref<1x64xf32, #tpu.memory_space<vmem>>, %arg6: memref<128x64xbf16, #tpu.memory_space<vmem>>, %arg7: memref<128x64xf32, #tpu.memory_space<vmem>>) attributes {dimension_semantics = [#tpu.dimension_semantics<parallel>, #tpu.dimension_semantics<parallel>, #tpu.dimension_semantics<arbitrary>], iteration_bounds = array<i64: 1, 1, 9>, scalar_prefetch = 0 : i64, scratch_operands = 1 : i64, tpu.core_type = #tpu.core_type<tc>, window_params = [{transform_indices = @transform_0, window_bounds = array<i64: 1, 128, 64>}, {transform_indices = @transform_1, window_bounds = array<i64: 1, 64, 64>}, {transform_indices = @transform_2, window_bounds = array<i64: 1, 64>}, {transform_indices = @transform_3, window_bounds = array<i64: 128, 64>}]} {
    %c0_i32 = arith.constant 0 : i32
    %0 = arith.cmpi eq, %arg2, %c0_i32 : i32
    %1 = arith.extui %0 : i1 to i32
    %c0_i32_0 = arith.constant 0 : i32
    %2 = arith.cmpi ne, %1, %c0_i32_0 : i32
    scf.if %2 {
      %cst_11 = arith.constant 0.000000e+00 : f32
      %14 = vector.broadcast %cst_11 : f32 to vector<128x64xf32>
      %c0_12 = arith.constant 0 : index
      %c0_13 = arith.constant 0 : index
      %15 = vector.load %arg7[%c0_12, %c0_13] : memref<128x64xf32, #tpu.memory_space<vmem>>, vector<128x64xf32>
      tpu.vector_store %arg7[%c0_12, %c0_13], %14 {strides = array<i32>} : memref<128x64xf32, #tpu.memory_space<vmem>>, vector<128x64xf32>,
    } else {
    }
    %c0 = arith.constant 0 : index
    %c0_1 = arith.constant 0 : index
    %3 = vector.load %arg7[%c0, %c0_1] : memref<128x64xf32, #tpu.memory_space<vmem>>, vector<128x64xf32>
    %c0_2 = arith.constant 0 : index
    %c0_3 = arith.constant 0 : index
    %c0_4 = arith.constant 0 : index
    %4 = vector.load %arg3[%c0_2, %c0_3, %c0_4] : memref<1x128x64xbf16, #tpu.memory_space<vmem>>, vector<1x128x64xbf16>
    %5 = vector.shape_cast %4 : vector<1x128x64xbf16> to vector<128x64xbf16>
    %c0_5 = arith.constant 0 : index
    %c0_6 = arith.constant 0 : index
    %c0_7 = arith.constant 0 : index
    %6 = vector.load %arg4[%c0_5, %c0_6, %c0_7] : memref<1x64x64xbf16, #tpu.memory_space<vmem>>, vector<1x64x64xbf16>
    %7 = vector.shape_cast %6 : vector<1x64x64xbf16> to vector<64x64xbf16>
    %cst = arith.constant dense<0.000000e+00> : vector<128x64xf32>
    %8 = tpu.matmul %5, %7, %cst {dimension_numbers = #tpu.dot_dimension_numbers<[1], [0], [0], [1], [0, 0, 1, 1], [], []>} : vector<128x64xbf16>, vector<64x64xbf16>, vector<128x64xf32> -> vector<128x64xf32>
    %9 = arith.addf %3, %8 : vector<128x64xf32>
    %c0_8 = arith.constant 0 : index
    %c0_9 = arith.constant 0 : index
    %10 = vector.load %arg7[%c0_8, %c0_9] : memref<128x64xf32, #tpu.memory_space<vmem>>, vector<128x64xf32>
    tpu.vector_store %arg7[%c0_8, %c0_9], %9 {strides = array<i32>} : memref<128x64xf32, #tpu.memory_space<vmem>>, vector<128x64xf32>,
    %c8_i32 = arith.constant 8 : i32
    %11 = arith.cmpi eq, %arg2, %c8_i32 : i32
    %12 = arith.extui %11 : i1 to i32
    %c0_i32_10 = arith.constant 0 : i32
    %13 = arith.cmpi ne, %12, %c0_i32_10 : i32
    scf.if %13 {
      %c0_11 = arith.constant 0 : index
      %c0_12 = arith.constant 0 : index
      %14 = vector.load %arg7[%c0_11, %c0_12] : memref<128x64xf32, #tpu.memory_space<vmem>>, vector<128x64xf32>
      %c0_13 = arith.constant 0 : index
      %c0_14 = arith.constant 0 : index
      %15 = vector.load %arg5[%c0_13, %c0_14] : memref<1x64xf32, #tpu.memory_space<vmem>>, vector<1x64xf32>
      %16 = vector.broadcast %15 : vector<1x64xf32> to vector<128x64xf32>
      %17 = arith.addf %14, %16 : vector<128x64xf32>
      %cst_15 = arith.constant 0.000000e+00 : f32
      %18 = vector.broadcast %cst_15 : f32 to vector<128x64xf32>
      %19 = arith.maximumf %17, %18 : vector<128x64xf32>
      %20 = arith.truncf %19 : vector<128x64xf32> to vector<128x64xbf16>
      %c0_16 = arith.constant 0 : index
      %c0_17 = arith.constant 0 : index
      %21 = vector.load %arg6[%c0_16, %c0_17] : memref<128x64xbf16, #tpu.memory_space<vmem>>, vector<128x64xbf16>
      tpu.vector_store %arg6[%c0_16, %c0_17], %20 {strides = array<i32>} : memref<128x64xbf16, #tpu.memory_space<vmem>>, vector<128x64xbf16>,
    } else {
    }
    return
  }
  func.func @transform_0(%arg0: i32, %arg1: i32, %arg2: i32) -> (i32, i32, i32) {
    %c0_i32 = arith.constant 0 : i32
    %c0_i32_0 = arith.constant 0 : i32
    return %arg2, %arg0, %c0_i32 : i32, i32, i32
  }
  func.func @transform_1(%arg0: i32, %arg1: i32, %arg2: i32) -> (i32, i32, i32) {
    %c0_i32 = arith.constant 0 : i32
    %c0_i32_0 = arith.constant 0 : i32
    return %arg2, %c0_i32, %arg1 : i32, i32, i32
  }
  func.func @transform_2(%arg0: i32, %arg1: i32, %arg2: i32) -> (i32, i32) {
    %c0_i32 = arith.constant 0 : i32
    %c0_i32_0 = arith.constant 0 : i32
    return %c0_i32, %arg1 : i32, i32
  }
  func.func @transform_3(%arg0: i32, %arg1: i32, %arg2: i32) -> (i32, i32) {
    %c0_i32 = arith.constant 0 : i32
    return %arg0, %arg1 : i32, i32
  }
}

module attributes {stable_mosaic.version = 11 : i64} {
  func.func @_conv_residual_kernel(%arg0: i32, %arg1: i32, %arg2: i32, %arg3: memref<1x128x64xbf16, #tpu.memory_space<vmem>>, %arg4: memref<1x64x64xbf16, #tpu.memory_space<vmem>>, %arg5: memref<1x64xf32, #tpu.memory_space<vmem>>, %arg6: memref<128x64xbf16, #tpu.memory_space<vmem>>, %arg7: memref<128x64xbf16, #tpu.memory_space<vmem>>, %arg8: memref<128x64xf32, #tpu.memory_space<vmem>>) attributes {dimension_semantics = [#tpu.dimension_semantics<parallel>, #tpu.dimension_semantics<parallel>, #tpu.dimension_semantics<arbitrary>], iteration_bounds = array<i64: 1, 1, 9>, scalar_prefetch = 0 : i64, scratch_operands = 1 : i64, tpu.core_type = #tpu.core_type<tc>, window_params = [{transform_indices = @transform_0, window_bounds = array<i64: 1, 128, 64>}, {transform_indices = @transform_1, window_bounds = array<i64: 1, 64, 64>}, {transform_indices = @transform_2, window_bounds = array<i64: 1, 64>}, {transform_indices = @transform_3, window_bounds = array<i64: 128, 64>}, {transform_indices = @transform_4, window_bounds = array<i64: 128, 64>}]} {
    %c0_i32 = arith.constant 0 : i32
    %0 = arith.cmpi eq, %arg2, %c0_i32 : i32
    %1 = arith.extui %0 : i1 to i32
    %c0_i32_0 = arith.constant 0 : i32
    %2 = arith.cmpi ne, %1, %c0_i32_0 : i32
    scf.if %2 {
      %cst_11 = arith.constant 0.000000e+00 : f32
      %14 = vector.broadcast %cst_11 : f32 to vector<128x64xf32>
      %c0_12 = arith.constant 0 : index
      %c0_13 = arith.constant 0 : index
      %15 = vector.load %arg8[%c0_12, %c0_13] : memref<128x64xf32, #tpu.memory_space<vmem>>, vector<128x64xf32>
      tpu.vector_store %arg8[%c0_12, %c0_13], %14 {strides = array<i32>} : memref<128x64xf32, #tpu.memory_space<vmem>>, vector<128x64xf32>,
    } else {
    }
    %c0 = arith.constant 0 : index
    %c0_1 = arith.constant 0 : index
    %3 = vector.load %arg8[%c0, %c0_1] : memref<128x64xf32, #tpu.memory_space<vmem>>, vector<128x64xf32>
    %c0_2 = arith.constant 0 : index
    %c0_3 = arith.constant 0 : index
    %c0_4 = arith.constant 0 : index
    %4 = vector.load %arg3[%c0_2, %c0_3, %c0_4] : memref<1x128x64xbf16, #tpu.memory_space<vmem>>, vector<1x128x64xbf16>
    %5 = vector.shape_cast %4 : vector<1x128x64xbf16> to vector<128x64xbf16>
    %c0_5 = arith.constant 0 : index
    %c0_6 = arith.constant 0 : index
    %c0_7 = arith.constant 0 : index
    %6 = vector.load %arg4[%c0_5, %c0_6, %c0_7] : memref<1x64x64xbf16, #tpu.memory_space<vmem>>, vector<1x64x64xbf16>
    %7 = vector.shape_cast %6 : vector<1x64x64xbf16> to vector<64x64xbf16>
    %cst = arith.constant dense<0.000000e+00> : vector<128x64xf32>
    %8 = tpu.matmul %5, %7, %cst {dimension_numbers = #tpu.dot_dimension_numbers<[1], [0], [0], [1], [0, 0, 1, 1], [], []>} : vector<128x64xbf16>, vector<64x64xbf16>, vector<128x64xf32> -> vector<128x64xf32>
    %9 = arith.addf %3, %8 : vector<128x64xf32>
    %c0_8 = arith.constant 0 : index
    %c0_9 = arith.constant 0 : index
    %10 = vector.load %arg8[%c0_8, %c0_9] : memref<128x64xf32, #tpu.memory_space<vmem>>, vector<128x64xf32>
    tpu.vector_store %arg8[%c0_8, %c0_9], %9 {strides = array<i32>} : memref<128x64xf32, #tpu.memory_space<vmem>>, vector<128x64xf32>,
    %c8_i32 = arith.constant 8 : i32
    %11 = arith.cmpi eq, %arg2, %c8_i32 : i32
    %12 = arith.extui %11 : i1 to i32
    %c0_i32_10 = arith.constant 0 : i32
    %13 = arith.cmpi ne, %12, %c0_i32_10 : i32
    scf.if %13 {
      %c0_11 = arith.constant 0 : index
      %c0_12 = arith.constant 0 : index
      %14 = vector.load %arg8[%c0_11, %c0_12] : memref<128x64xf32, #tpu.memory_space<vmem>>, vector<128x64xf32>
      %c0_13 = arith.constant 0 : index
      %c0_14 = arith.constant 0 : index
      %15 = vector.load %arg5[%c0_13, %c0_14] : memref<1x64xf32, #tpu.memory_space<vmem>>, vector<1x64xf32>
      %16 = vector.broadcast %15 : vector<1x64xf32> to vector<128x64xf32>
      %17 = arith.addf %14, %16 : vector<128x64xf32>
      %c0_15 = arith.constant 0 : index
      %c0_16 = arith.constant 0 : index
      %18 = vector.load %arg6[%c0_15, %c0_16] : memref<128x64xbf16, #tpu.memory_space<vmem>>, vector<128x64xbf16>
      %19 = arith.extf %18 : vector<128x64xbf16> to vector<128x64xf32>
      %20 = arith.addf %17, %19 : vector<128x64xf32>
      %cst_17 = arith.constant 0.000000e+00 : f32
      %21 = vector.broadcast %cst_17 : f32 to vector<128x64xf32>
      %22 = arith.maximumf %20, %21 : vector<128x64xf32>
      %23 = arith.truncf %22 : vector<128x64xf32> to vector<128x64xbf16>
      %c0_18 = arith.constant 0 : index
      %c0_19 = arith.constant 0 : index
      %24 = vector.load %arg7[%c0_18, %c0_19] : memref<128x64xbf16, #tpu.memory_space<vmem>>, vector<128x64xbf16>
      tpu.vector_store %arg7[%c0_18, %c0_19], %23 {strides = array<i32>} : memref<128x64xbf16, #tpu.memory_space<vmem>>, vector<128x64xbf16>,
    } else {
    }
    return
  }
  func.func @transform_0(%arg0: i32, %arg1: i32, %arg2: i32) -> (i32, i32, i32) {
    %c0_i32 = arith.constant 0 : i32
    %c0_i32_0 = arith.constant 0 : i32
    return %arg2, %arg0, %c0_i32 : i32, i32, i32
  }
  func.func @transform_1(%arg0: i32, %arg1: i32, %arg2: i32) -> (i32, i32, i32) {
    %c0_i32 = arith.constant 0 : i32
    %c0_i32_0 = arith.constant 0 : i32
    return %arg2, %c0_i32, %arg1 : i32, i32, i32
  }
  func.func @transform_2(%arg0: i32, %arg1: i32, %arg2: i32) -> (i32, i32) {
    %c0_i32 = arith.constant 0 : i32
    %c0_i32_0 = arith.constant 0 : i32
    return %c0_i32, %arg1 : i32, i32
  }
  func.func @transform_3(%arg0: i32, %arg1: i32, %arg2: i32) -> (i32, i32) {
    %c0_i32 = arith.constant 0 : i32
    return %arg0, %arg1 : i32, i32
  }
  func.func @transform_4(%arg0: i32, %arg1: i32, %arg2: i32) -> (i32, i32) {
    %c0_i32 = arith.constant 0 : i32
    return %arg0, %arg1 : i32, i32
  }
}

module attributes {stable_mosaic.version = 11 : i64} {
  func.func @_conv_kernel(%arg0: i32, %arg1: i32, %arg2: i32, %arg3: memref<1x32x64xbf16, #tpu.memory_space<vmem>>, %arg4: memref<1x64x128xbf16, #tpu.memory_space<vmem>>, %arg5: memref<1x128xf32, #tpu.memory_space<vmem>>, %arg6: memref<32x128xbf16, #tpu.memory_space<vmem>>, %arg7: memref<32x128xf32, #tpu.memory_space<vmem>>) attributes {dimension_semantics = [#tpu.dimension_semantics<parallel>, #tpu.dimension_semantics<parallel>, #tpu.dimension_semantics<arbitrary>], iteration_bounds = array<i64: 1, 1, 9>, scalar_prefetch = 0 : i64, scratch_operands = 1 : i64, tpu.core_type = #tpu.core_type<tc>, window_params = [{transform_indices = @transform_0, window_bounds = array<i64: 1, 32, 64>}, {transform_indices = @transform_1, window_bounds = array<i64: 1, 64, 128>}, {transform_indices = @transform_2, window_bounds = array<i64: 1, 128>}, {transform_indices = @transform_3, window_bounds = array<i64: 32, 128>}]} {
    %c0_i32 = arith.constant 0 : i32
    %0 = arith.cmpi eq, %arg2, %c0_i32 : i32
    %1 = arith.extui %0 : i1 to i32
    %c0_i32_0 = arith.constant 0 : i32
    %2 = arith.cmpi ne, %1, %c0_i32_0 : i32
    scf.if %2 {
      %cst_11 = arith.constant 0.000000e+00 : f32
      %14 = vector.broadcast %cst_11 : f32 to vector<32x128xf32>
      %c0_12 = arith.constant 0 : index
      %c0_13 = arith.constant 0 : index
      %15 = vector.load %arg7[%c0_12, %c0_13] : memref<32x128xf32, #tpu.memory_space<vmem>>, vector<32x128xf32>
      tpu.vector_store %arg7[%c0_12, %c0_13], %14 {strides = array<i32>} : memref<32x128xf32, #tpu.memory_space<vmem>>, vector<32x128xf32>,
    } else {
    }
    %c0 = arith.constant 0 : index
    %c0_1 = arith.constant 0 : index
    %3 = vector.load %arg7[%c0, %c0_1] : memref<32x128xf32, #tpu.memory_space<vmem>>, vector<32x128xf32>
    %c0_2 = arith.constant 0 : index
    %c0_3 = arith.constant 0 : index
    %c0_4 = arith.constant 0 : index
    %4 = vector.load %arg3[%c0_2, %c0_3, %c0_4] : memref<1x32x64xbf16, #tpu.memory_space<vmem>>, vector<1x32x64xbf16>
    %5 = vector.shape_cast %4 : vector<1x32x64xbf16> to vector<32x64xbf16>
    %c0_5 = arith.constant 0 : index
    %c0_6 = arith.constant 0 : index
    %c0_7 = arith.constant 0 : index
    %6 = vector.load %arg4[%c0_5, %c0_6, %c0_7] : memref<1x64x128xbf16, #tpu.memory_space<vmem>>, vector<1x64x128xbf16>
    %7 = vector.shape_cast %6 : vector<1x64x128xbf16> to vector<64x128xbf16>
    %cst = arith.constant dense<0.000000e+00> : vector<32x128xf32>
    %8 = tpu.matmul %5, %7, %cst {dimension_numbers = #tpu.dot_dimension_numbers<[1], [0], [0], [1], [0, 0, 1, 1], [], []>} : vector<32x64xbf16>, vector<64x128xbf16>, vector<32x128xf32> -> vector<32x128xf32>
    %9 = arith.addf %3, %8 : vector<32x128xf32>
    %c0_8 = arith.constant 0 : index
    %c0_9 = arith.constant 0 : index
    %10 = vector.load %arg7[%c0_8, %c0_9] : memref<32x128xf32, #tpu.memory_space<vmem>>, vector<32x128xf32>
    tpu.vector_store %arg7[%c0_8, %c0_9], %9 {strides = array<i32>} : memref<32x128xf32, #tpu.memory_space<vmem>>, vector<32x128xf32>,
    %c8_i32 = arith.constant 8 : i32
    %11 = arith.cmpi eq, %arg2, %c8_i32 : i32
    %12 = arith.extui %11 : i1 to i32
    %c0_i32_10 = arith.constant 0 : i32
    %13 = arith.cmpi ne, %12, %c0_i32_10 : i32
    scf.if %13 {
      %c0_11 = arith.constant 0 : index
      %c0_12 = arith.constant 0 : index
      %14 = vector.load %arg7[%c0_11, %c0_12] : memref<32x128xf32, #tpu.memory_space<vmem>>, vector<32x128xf32>
      %c0_13 = arith.constant 0 : index
      %c0_14 = arith.constant 0 : index
      %15 = vector.load %arg5[%c0_13, %c0_14] : memref<1x128xf32, #tpu.memory_space<vmem>>, vector<1x128xf32>
      %16 = vector.broadcast %15 : vector<1x128xf32> to vector<32x128xf32>
      %17 = arith.addf %14, %16 : vector<32x128xf32>
      %cst_15 = arith.constant 0.000000e+00 : f32
      %18 = vector.broadcast %cst_15 : f32 to vector<32x128xf32>
      %19 = arith.maximumf %17, %18 : vector<32x128xf32>
      %20 = arith.truncf %19 : vector<32x128xf32> to vector<32x128xbf16>
      %c0_16 = arith.constant 0 : index
      %c0_17 = arith.constant 0 : index
      %21 = vector.load %arg6[%c0_16, %c0_17] : memref<32x128xbf16, #tpu.memory_space<vmem>>, vector<32x128xbf16>
      tpu.vector_store %arg6[%c0_16, %c0_17], %20 {strides = array<i32>} : memref<32x128xbf16, #tpu.memory_space<vmem>>, vector<32x128xbf16>,
    } else {
    }
    return
  }
  func.func @transform_0(%arg0: i32, %arg1: i32, %arg2: i32) -> (i32, i32, i32) {
    %c0_i32 = arith.constant 0 : i32
    %c0_i32_0 = arith.constant 0 : i32
    return %arg2, %arg0, %c0_i32 : i32, i32, i32
  }
  func.func @transform_1(%arg0: i32, %arg1: i32, %arg2: i32) -> (i32, i32, i32) {
    %c0_i32 = arith.constant 0 : i32
    %c0_i32_0 = arith.constant 0 : i32
    return %arg2, %c0_i32, %arg1 : i32, i32, i32
  }
  func.func @transform_2(%arg0: i32, %arg1: i32, %arg2: i32) -> (i32, i32) {
    %c0_i32 = arith.constant 0 : i32
    %c0_i32_0 = arith.constant 0 : i32
    return %c0_i32, %arg1 : i32, i32
  }
  func.func @transform_3(%arg0: i32, %arg1: i32, %arg2: i32) -> (i32, i32) {
    %c0_i32 = arith.constant 0 : i32
    return %arg0, %arg1 : i32, i32
  }
}

module attributes {stable_mosaic.version = 11 : i64} {
  func.func @_conv_kernel(%arg0: i32, %arg1: i32, %arg2: i32, %arg3: memref<1x32x64xbf16, #tpu.memory_space<vmem>>, %arg4: memref<1x64x128xbf16, #tpu.memory_space<vmem>>, %arg5: memref<1x128xf32, #tpu.memory_space<vmem>>, %arg6: memref<32x128xbf16, #tpu.memory_space<vmem>>, %arg7: memref<32x128xf32, #tpu.memory_space<vmem>>) attributes {dimension_semantics = [#tpu.dimension_semantics<parallel>, #tpu.dimension_semantics<parallel>, #tpu.dimension_semantics<arbitrary>], iteration_bounds = array<i64: 1, 1, 1>, scalar_prefetch = 0 : i64, scratch_operands = 1 : i64, tpu.core_type = #tpu.core_type<tc>, window_params = [{transform_indices = @transform_0, window_bounds = array<i64: 1, 32, 64>}, {transform_indices = @transform_1, window_bounds = array<i64: 1, 64, 128>}, {transform_indices = @transform_2, window_bounds = array<i64: 1, 128>}, {transform_indices = @transform_3, window_bounds = array<i64: 32, 128>}]} {
    %c0_i32 = arith.constant 0 : i32
    %0 = arith.cmpi eq, %arg2, %c0_i32 : i32
    %1 = arith.extui %0 : i1 to i32
    %c0_i32_0 = arith.constant 0 : i32
    %2 = arith.cmpi ne, %1, %c0_i32_0 : i32
    scf.if %2 {
      %cst_12 = arith.constant 0.000000e+00 : f32
      %14 = vector.broadcast %cst_12 : f32 to vector<32x128xf32>
      %c0_13 = arith.constant 0 : index
      %c0_14 = arith.constant 0 : index
      %15 = vector.load %arg7[%c0_13, %c0_14] : memref<32x128xf32, #tpu.memory_space<vmem>>, vector<32x128xf32>
      tpu.vector_store %arg7[%c0_13, %c0_14], %14 {strides = array<i32>} : memref<32x128xf32, #tpu.memory_space<vmem>>, vector<32x128xf32>,
    } else {
    }
    %c0 = arith.constant 0 : index
    %c0_1 = arith.constant 0 : index
    %3 = vector.load %arg7[%c0, %c0_1] : memref<32x128xf32, #tpu.memory_space<vmem>>, vector<32x128xf32>
    %c0_2 = arith.constant 0 : index
    %c0_3 = arith.constant 0 : index
    %c0_4 = arith.constant 0 : index
    %4 = vector.load %arg3[%c0_2, %c0_3, %c0_4] : memref<1x32x64xbf16, #tpu.memory_space<vmem>>, vector<1x32x64xbf16>
    %5 = vector.shape_cast %4 : vector<1x32x64xbf16> to vector<32x64xbf16>
    %c0_5 = arith.constant 0 : index
    %c0_6 = arith.constant 0 : index
    %c0_7 = arith.constant 0 : index
    %6 = vector.load %arg4[%c0_5, %c0_6, %c0_7] : memref<1x64x128xbf16, #tpu.memory_space<vmem>>, vector<1x64x128xbf16>
    %7 = vector.shape_cast %6 : vector<1x64x128xbf16> to vector<64x128xbf16>
    %cst = arith.constant dense<0.000000e+00> : vector<32x128xf32>
    %8 = tpu.matmul %5, %7, %cst {dimension_numbers = #tpu.dot_dimension_numbers<[1], [0], [0], [1], [0, 0, 1, 1], [], []>} : vector<32x64xbf16>, vector<64x128xbf16>, vector<32x128xf32> -> vector<32x128xf32>
    %9 = arith.addf %3, %8 : vector<32x128xf32>
    %c0_8 = arith.constant 0 : index
    %c0_9 = arith.constant 0 : index
    %10 = vector.load %arg7[%c0_8, %c0_9] : memref<32x128xf32, #tpu.memory_space<vmem>>, vector<32x128xf32>
    tpu.vector_store %arg7[%c0_8, %c0_9], %9 {strides = array<i32>} : memref<32x128xf32, #tpu.memory_space<vmem>>, vector<32x128xf32>,
    %c0_i32_10 = arith.constant 0 : i32
    %11 = arith.cmpi eq, %arg2, %c0_i32_10 : i32
    %12 = arith.extui %11 : i1 to i32
    %c0_i32_11 = arith.constant 0 : i32
    %13 = arith.cmpi ne, %12, %c0_i32_11 : i32
    scf.if %13 {
      %c0_12 = arith.constant 0 : index
      %c0_13 = arith.constant 0 : index
      %14 = vector.load %arg7[%c0_12, %c0_13] : memref<32x128xf32, #tpu.memory_space<vmem>>, vector<32x128xf32>
      %c0_14 = arith.constant 0 : index
      %c0_15 = arith.constant 0 : index
      %15 = vector.load %arg5[%c0_14, %c0_15] : memref<1x128xf32, #tpu.memory_space<vmem>>, vector<1x128xf32>
      %16 = vector.broadcast %15 : vector<1x128xf32> to vector<32x128xf32>
      %17 = arith.addf %14, %16 : vector<32x128xf32>
      %18 = arith.truncf %17 : vector<32x128xf32> to vector<32x128xbf16>
      %c0_16 = arith.constant 0 : index
      %c0_17 = arith.constant 0 : index
      %19 = vector.load %arg6[%c0_16, %c0_17] : memref<32x128xbf16, #tpu.memory_space<vmem>>, vector<32x128xbf16>
      tpu.vector_store %arg6[%c0_16, %c0_17], %18 {strides = array<i32>} : memref<32x128xbf16, #tpu.memory_space<vmem>>, vector<32x128xbf16>,
    } else {
    }
    return
  }
  func.func @transform_0(%arg0: i32, %arg1: i32, %arg2: i32) -> (i32, i32, i32) {
    %c0_i32 = arith.constant 0 : i32
    %c0_i32_0 = arith.constant 0 : i32
    return %arg2, %arg0, %c0_i32 : i32, i32, i32
  }
  func.func @transform_1(%arg0: i32, %arg1: i32, %arg2: i32) -> (i32, i32, i32) {
    %c0_i32 = arith.constant 0 : i32
    %c0_i32_0 = arith.constant 0 : i32
    return %arg2, %c0_i32, %arg1 : i32, i32, i32
  }
  func.func @transform_2(%arg0: i32, %arg1: i32, %arg2: i32) -> (i32, i32) {
    %c0_i32 = arith.constant 0 : i32
    %c0_i32_0 = arith.constant 0 : i32
    return %c0_i32, %arg1 : i32, i32
  }
  func.func @transform_3(%arg0: i32, %arg1: i32, %arg2: i32) -> (i32, i32) {
    %c0_i32 = arith.constant 0 : i32
    return %arg0, %arg1 : i32, i32
  }
}

module attributes {stable_mosaic.version = 11 : i64} {
  func.func @_conv_residual_kernel(%arg0: i32, %arg1: i32, %arg2: i32, %arg3: memref<1x32x128xbf16, #tpu.memory_space<vmem>>, %arg4: memref<1x128x128xbf16, #tpu.memory_space<vmem>>, %arg5: memref<1x128xf32, #tpu.memory_space<vmem>>, %arg6: memref<32x128xbf16, #tpu.memory_space<vmem>>, %arg7: memref<32x128xbf16, #tpu.memory_space<vmem>>, %arg8: memref<32x128xf32, #tpu.memory_space<vmem>>) attributes {dimension_semantics = [#tpu.dimension_semantics<parallel>, #tpu.dimension_semantics<parallel>, #tpu.dimension_semantics<arbitrary>], iteration_bounds = array<i64: 1, 1, 9>, scalar_prefetch = 0 : i64, scratch_operands = 1 : i64, tpu.core_type = #tpu.core_type<tc>, window_params = [{transform_indices = @transform_0, window_bounds = array<i64: 1, 32, 128>}, {transform_indices = @transform_1, window_bounds = array<i64: 1, 128, 128>}, {transform_indices = @transform_2, window_bounds = array<i64: 1, 128>}, {transform_indices = @transform_3, window_bounds = array<i64: 32, 128>}, {transform_indices = @transform_4, window_bounds = array<i64: 32, 128>}]} {
    %c0_i32 = arith.constant 0 : i32
    %0 = arith.cmpi eq, %arg2, %c0_i32 : i32
    %1 = arith.extui %0 : i1 to i32
    %c0_i32_0 = arith.constant 0 : i32
    %2 = arith.cmpi ne, %1, %c0_i32_0 : i32
    scf.if %2 {
      %cst_11 = arith.constant 0.000000e+00 : f32
      %14 = vector.broadcast %cst_11 : f32 to vector<32x128xf32>
      %c0_12 = arith.constant 0 : index
      %c0_13 = arith.constant 0 : index
      %15 = vector.load %arg8[%c0_12, %c0_13] : memref<32x128xf32, #tpu.memory_space<vmem>>, vector<32x128xf32>
      tpu.vector_store %arg8[%c0_12, %c0_13], %14 {strides = array<i32>} : memref<32x128xf32, #tpu.memory_space<vmem>>, vector<32x128xf32>,
    } else {
    }
    %c0 = arith.constant 0 : index
    %c0_1 = arith.constant 0 : index
    %3 = vector.load %arg8[%c0, %c0_1] : memref<32x128xf32, #tpu.memory_space<vmem>>, vector<32x128xf32>
    %c0_2 = arith.constant 0 : index
    %c0_3 = arith.constant 0 : index
    %c0_4 = arith.constant 0 : index
    %4 = vector.load %arg3[%c0_2, %c0_3, %c0_4] : memref<1x32x128xbf16, #tpu.memory_space<vmem>>, vector<1x32x128xbf16>
    %5 = vector.shape_cast %4 : vector<1x32x128xbf16> to vector<32x128xbf16>
    %c0_5 = arith.constant 0 : index
    %c0_6 = arith.constant 0 : index
    %c0_7 = arith.constant 0 : index
    %6 = vector.load %arg4[%c0_5, %c0_6, %c0_7] : memref<1x128x128xbf16, #tpu.memory_space<vmem>>, vector<1x128x128xbf16>
    %7 = vector.shape_cast %6 : vector<1x128x128xbf16> to vector<128x128xbf16>
    %cst = arith.constant dense<0.000000e+00> : vector<32x128xf32>
    %8 = tpu.matmul %5, %7, %cst {dimension_numbers = #tpu.dot_dimension_numbers<[1], [0], [0], [1], [0, 0, 1, 1], [], []>} : vector<32x128xbf16>, vector<128x128xbf16>, vector<32x128xf32> -> vector<32x128xf32>
    %9 = arith.addf %3, %8 : vector<32x128xf32>
    %c0_8 = arith.constant 0 : index
    %c0_9 = arith.constant 0 : index
    %10 = vector.load %arg8[%c0_8, %c0_9] : memref<32x128xf32, #tpu.memory_space<vmem>>, vector<32x128xf32>
    tpu.vector_store %arg8[%c0_8, %c0_9], %9 {strides = array<i32>} : memref<32x128xf32, #tpu.memory_space<vmem>>, vector<32x128xf32>,
    %c8_i32 = arith.constant 8 : i32
    %11 = arith.cmpi eq, %arg2, %c8_i32 : i32
    %12 = arith.extui %11 : i1 to i32
    %c0_i32_10 = arith.constant 0 : i32
    %13 = arith.cmpi ne, %12, %c0_i32_10 : i32
    scf.if %13 {
      %c0_11 = arith.constant 0 : index
      %c0_12 = arith.constant 0 : index
      %14 = vector.load %arg8[%c0_11, %c0_12] : memref<32x128xf32, #tpu.memory_space<vmem>>, vector<32x128xf32>
      %c0_13 = arith.constant 0 : index
      %c0_14 = arith.constant 0 : index
      %15 = vector.load %arg5[%c0_13, %c0_14] : memref<1x128xf32, #tpu.memory_space<vmem>>, vector<1x128xf32>
      %16 = vector.broadcast %15 : vector<1x128xf32> to vector<32x128xf32>
      %17 = arith.addf %14, %16 : vector<32x128xf32>
      %c0_15 = arith.constant 0 : index
      %c0_16 = arith.constant 0 : index
      %18 = vector.load %arg6[%c0_15, %c0_16] : memref<32x128xbf16, #tpu.memory_space<vmem>>, vector<32x128xbf16>
      %19 = arith.extf %18 : vector<32x128xbf16> to vector<32x128xf32>
      %20 = arith.addf %17, %19 : vector<32x128xf32>
      %cst_17 = arith.constant 0.000000e+00 : f32
      %21 = vector.broadcast %cst_17 : f32 to vector<32x128xf32>
      %22 = arith.maximumf %20, %21 : vector<32x128xf32>
      %23 = arith.truncf %22 : vector<32x128xf32> to vector<32x128xbf16>
      %c0_18 = arith.constant 0 : index
      %c0_19 = arith.constant 0 : index
      %24 = vector.load %arg7[%c0_18, %c0_19] : memref<32x128xbf16, #tpu.memory_space<vmem>>, vector<32x128xbf16>
      tpu.vector_store %arg7[%c0_18, %c0_19], %23 {strides = array<i32>} : memref<32x128xbf16, #tpu.memory_space<vmem>>, vector<32x128xbf16>,
    } else {
    }
    return
  }
  func.func @transform_0(%arg0: i32, %arg1: i32, %arg2: i32) -> (i32, i32, i32) {
    %c0_i32 = arith.constant 0 : i32
    %c0_i32_0 = arith.constant 0 : i32
    return %arg2, %arg0, %c0_i32 : i32, i32, i32
  }
  func.func @transform_1(%arg0: i32, %arg1: i32, %arg2: i32) -> (i32, i32, i32) {
    %c0_i32 = arith.constant 0 : i32
    %c0_i32_0 = arith.constant 0 : i32
    return %arg2, %c0_i32, %arg1 : i32, i32, i32
  }
  func.func @transform_2(%arg0: i32, %arg1: i32, %arg2: i32) -> (i32, i32) {
    %c0_i32 = arith.constant 0 : i32
    %c0_i32_0 = arith.constant 0 : i32
    return %c0_i32, %arg1 : i32, i32
  }
  func.func @transform_3(%arg0: i32, %arg1: i32, %arg2: i32) -> (i32, i32) {
    %c0_i32 = arith.constant 0 : i32
    return %arg0, %arg1 : i32, i32
  }
  func.func @transform_4(%arg0: i32, %arg1: i32, %arg2: i32) -> (i32, i32) {
    %c0_i32 = arith.constant 0 : i32
    return %arg0, %arg1 : i32, i32
  }
}

module attributes {stable_mosaic.version = 11 : i64} {
  func.func @_conv_kernel(%arg0: i32, %arg1: i32, %arg2: i32, %arg3: memref<1x32x128xbf16, #tpu.memory_space<vmem>>, %arg4: memref<1x128x128xbf16, #tpu.memory_space<vmem>>, %arg5: memref<1x128xf32, #tpu.memory_space<vmem>>, %arg6: memref<32x128xbf16, #tpu.memory_space<vmem>>, %arg7: memref<32x128xf32, #tpu.memory_space<vmem>>) attributes {dimension_semantics = [#tpu.dimension_semantics<parallel>, #tpu.dimension_semantics<parallel>, #tpu.dimension_semantics<arbitrary>], iteration_bounds = array<i64: 1, 1, 9>, scalar_prefetch = 0 : i64, scratch_operands = 1 : i64, tpu.core_type = #tpu.core_type<tc>, window_params = [{transform_indices = @transform_0, window_bounds = array<i64: 1, 32, 128>}, {transform_indices = @transform_1, window_bounds = array<i64: 1, 128, 128>}, {transform_indices = @transform_2, window_bounds = array<i64: 1, 128>}, {transform_indices = @transform_3, window_bounds = array<i64: 32, 128>}]} {
    %c0_i32 = arith.constant 0 : i32
    %0 = arith.cmpi eq, %arg2, %c0_i32 : i32
    %1 = arith.extui %0 : i1 to i32
    %c0_i32_0 = arith.constant 0 : i32
    %2 = arith.cmpi ne, %1, %c0_i32_0 : i32
    scf.if %2 {
      %cst_11 = arith.constant 0.000000e+00 : f32
      %14 = vector.broadcast %cst_11 : f32 to vector<32x128xf32>
      %c0_12 = arith.constant 0 : index
      %c0_13 = arith.constant 0 : index
      %15 = vector.load %arg7[%c0_12, %c0_13] : memref<32x128xf32, #tpu.memory_space<vmem>>, vector<32x128xf32>
      tpu.vector_store %arg7[%c0_12, %c0_13], %14 {strides = array<i32>} : memref<32x128xf32, #tpu.memory_space<vmem>>, vector<32x128xf32>,
    } else {
    }
    %c0 = arith.constant 0 : index
    %c0_1 = arith.constant 0 : index
    %3 = vector.load %arg7[%c0, %c0_1] : memref<32x128xf32, #tpu.memory_space<vmem>>, vector<32x128xf32>
    %c0_2 = arith.constant 0 : index
    %c0_3 = arith.constant 0 : index
    %c0_4 = arith.constant 0 : index
    %4 = vector.load %arg3[%c0_2, %c0_3, %c0_4] : memref<1x32x128xbf16, #tpu.memory_space<vmem>>, vector<1x32x128xbf16>
    %5 = vector.shape_cast %4 : vector<1x32x128xbf16> to vector<32x128xbf16>
    %c0_5 = arith.constant 0 : index
    %c0_6 = arith.constant 0 : index
    %c0_7 = arith.constant 0 : index
    %6 = vector.load %arg4[%c0_5, %c0_6, %c0_7] : memref<1x128x128xbf16, #tpu.memory_space<vmem>>, vector<1x128x128xbf16>
    %7 = vector.shape_cast %6 : vector<1x128x128xbf16> to vector<128x128xbf16>
    %cst = arith.constant dense<0.000000e+00> : vector<32x128xf32>
    %8 = tpu.matmul %5, %7, %cst {dimension_numbers = #tpu.dot_dimension_numbers<[1], [0], [0], [1], [0, 0, 1, 1], [], []>} : vector<32x128xbf16>, vector<128x128xbf16>, vector<32x128xf32> -> vector<32x128xf32>
    %9 = arith.addf %3, %8 : vector<32x128xf32>
    %c0_8 = arith.constant 0 : index
    %c0_9 = arith.constant 0 : index
    %10 = vector.load %arg7[%c0_8, %c0_9] : memref<32x128xf32, #tpu.memory_space<vmem>>, vector<32x128xf32>
    tpu.vector_store %arg7[%c0_8, %c0_9], %9 {strides = array<i32>} : memref<32x128xf32, #tpu.memory_space<vmem>>, vector<32x128xf32>,
    %c8_i32 = arith.constant 8 : i32
    %11 = arith.cmpi eq, %arg2, %c8_i32 : i32
    %12 = arith.extui %11 : i1 to i32
    %c0_i32_10 = arith.constant 0 : i32
    %13 = arith.cmpi ne, %12, %c0_i32_10 : i32
    scf.if %13 {
      %c0_11 = arith.constant 0 : index
      %c0_12 = arith.constant 0 : index
      %14 = vector.load %arg7[%c0_11, %c0_12] : memref<32x128xf32, #tpu.memory_space<vmem>>, vector<32x128xf32>
      %c0_13 = arith.constant 0 : index
      %c0_14 = arith.constant 0 : index
      %15 = vector.load %arg5[%c0_13, %c0_14] : memref<1x128xf32, #tpu.memory_space<vmem>>, vector<1x128xf32>
      %16 = vector.broadcast %15 : vector<1x128xf32> to vector<32x128xf32>
      %17 = arith.addf %14, %16 : vector<32x128xf32>
      %cst_15 = arith.constant 0.000000e+00 : f32
      %18 = vector.broadcast %cst_15 : f32 to vector<32x128xf32>
      %19 = arith.maximumf %17, %18 : vector<32x128xf32>
      %20 = arith.truncf %19 : vector<32x128xf32> to vector<32x128xbf16>
      %c0_16 = arith.constant 0 : index
      %c0_17 = arith.constant 0 : index
      %21 = vector.load %arg6[%c0_16, %c0_17] : memref<32x128xbf16, #tpu.memory_space<vmem>>, vector<32x128xbf16>
      tpu.vector_store %arg6[%c0_16, %c0_17], %20 {strides = array<i32>} : memref<32x128xbf16, #tpu.memory_space<vmem>>, vector<32x128xbf16>,
    } else {
    }
    return
  }
  func.func @transform_0(%arg0: i32, %arg1: i32, %arg2: i32) -> (i32, i32, i32) {
    %c0_i32 = arith.constant 0 : i32
    %c0_i32_0 = arith.constant 0 : i32
    return %arg2, %arg0, %c0_i32 : i32, i32, i32
  }
  func.func @transform_1(%arg0: i32, %arg1: i32, %arg2: i32) -> (i32, i32, i32) {
    %c0_i32 = arith.constant 0 : i32
    %c0_i32_0 = arith.constant 0 : i32
    return %arg2, %c0_i32, %arg1 : i32, i32, i32
  }
  func.func @transform_2(%arg0: i32, %arg1: i32, %arg2: i32) -> (i32, i32) {
    %c0_i32 = arith.constant 0 : i32
    %c0_i32_0 = arith.constant 0 : i32
    return %c0_i32, %arg1 : i32, i32
  }
  func.func @transform_3(%arg0: i32, %arg1: i32, %arg2: i32) -> (i32, i32) {
    %c0_i32 = arith.constant 0 : i32
    return %arg0, %arg1 : i32, i32
  }
}

module attributes {stable_mosaic.version = 11 : i64} {
  func.func @_conv_kernel(%arg0: i32, %arg1: i32, %arg2: i32, %arg3: memref<1x8x128xbf16, #tpu.memory_space<vmem>>, %arg4: memref<1x128x256xbf16, #tpu.memory_space<vmem>>, %arg5: memref<1x256xf32, #tpu.memory_space<vmem>>, %arg6: memref<8x256xbf16, #tpu.memory_space<vmem>>, %arg7: memref<8x256xf32, #tpu.memory_space<vmem>>) attributes {dimension_semantics = [#tpu.dimension_semantics<parallel>, #tpu.dimension_semantics<parallel>, #tpu.dimension_semantics<arbitrary>], iteration_bounds = array<i64: 1, 1, 9>, scalar_prefetch = 0 : i64, scratch_operands = 1 : i64, tpu.core_type = #tpu.core_type<tc>, window_params = [{transform_indices = @transform_0, window_bounds = array<i64: 1, 8, 128>}, {transform_indices = @transform_1, window_bounds = array<i64: 1, 128, 256>}, {transform_indices = @transform_2, window_bounds = array<i64: 1, 256>}, {transform_indices = @transform_3, window_bounds = array<i64: 8, 256>}]} {
    %c0_i32 = arith.constant 0 : i32
    %0 = arith.cmpi eq, %arg2, %c0_i32 : i32
    %1 = arith.extui %0 : i1 to i32
    %c0_i32_0 = arith.constant 0 : i32
    %2 = arith.cmpi ne, %1, %c0_i32_0 : i32
    scf.if %2 {
      %cst_11 = arith.constant 0.000000e+00 : f32
      %14 = vector.broadcast %cst_11 : f32 to vector<8x256xf32>
      %c0_12 = arith.constant 0 : index
      %c0_13 = arith.constant 0 : index
      %15 = vector.load %arg7[%c0_12, %c0_13] : memref<8x256xf32, #tpu.memory_space<vmem>>, vector<8x256xf32>
      tpu.vector_store %arg7[%c0_12, %c0_13], %14 {strides = array<i32>} : memref<8x256xf32, #tpu.memory_space<vmem>>, vector<8x256xf32>,
    } else {
    }
    %c0 = arith.constant 0 : index
    %c0_1 = arith.constant 0 : index
    %3 = vector.load %arg7[%c0, %c0_1] : memref<8x256xf32, #tpu.memory_space<vmem>>, vector<8x256xf32>
    %c0_2 = arith.constant 0 : index
    %c0_3 = arith.constant 0 : index
    %c0_4 = arith.constant 0 : index
    %4 = vector.load %arg3[%c0_2, %c0_3, %c0_4] : memref<1x8x128xbf16, #tpu.memory_space<vmem>>, vector<1x8x128xbf16>
    %5 = vector.shape_cast %4 : vector<1x8x128xbf16> to vector<8x128xbf16>
    %c0_5 = arith.constant 0 : index
    %c0_6 = arith.constant 0 : index
    %c0_7 = arith.constant 0 : index
    %6 = vector.load %arg4[%c0_5, %c0_6, %c0_7] : memref<1x128x256xbf16, #tpu.memory_space<vmem>>, vector<1x128x256xbf16>
    %7 = vector.shape_cast %6 : vector<1x128x256xbf16> to vector<128x256xbf16>
    %cst = arith.constant dense<0.000000e+00> : vector<8x256xf32>
    %8 = tpu.matmul %5, %7, %cst {dimension_numbers = #tpu.dot_dimension_numbers<[1], [0], [0], [1], [0, 0, 1, 1], [], []>} : vector<8x128xbf16>, vector<128x256xbf16>, vector<8x256xf32> -> vector<8x256xf32>
    %9 = arith.addf %3, %8 : vector<8x256xf32>
    %c0_8 = arith.constant 0 : index
    %c0_9 = arith.constant 0 : index
    %10 = vector.load %arg7[%c0_8, %c0_9] : memref<8x256xf32, #tpu.memory_space<vmem>>, vector<8x256xf32>
    tpu.vector_store %arg7[%c0_8, %c0_9], %9 {strides = array<i32>} : memref<8x256xf32, #tpu.memory_space<vmem>>, vector<8x256xf32>,
    %c8_i32 = arith.constant 8 : i32
    %11 = arith.cmpi eq, %arg2, %c8_i32 : i32
    %12 = arith.extui %11 : i1 to i32
    %c0_i32_10 = arith.constant 0 : i32
    %13 = arith.cmpi ne, %12, %c0_i32_10 : i32
    scf.if %13 {
      %c0_11 = arith.constant 0 : index
      %c0_12 = arith.constant 0 : index
      %14 = vector.load %arg7[%c0_11, %c0_12] : memref<8x256xf32, #tpu.memory_space<vmem>>, vector<8x256xf32>
      %c0_13 = arith.constant 0 : index
      %c0_14 = arith.constant 0 : index
      %15 = vector.load %arg5[%c0_13, %c0_14] : memref<1x256xf32, #tpu.memory_space<vmem>>, vector<1x256xf32>
      %16 = vector.broadcast %15 : vector<1x256xf32> to vector<8x256xf32>
      %17 = arith.addf %14, %16 : vector<8x256xf32>
      %cst_15 = arith.constant 0.000000e+00 : f32
      %18 = vector.broadcast %cst_15 : f32 to vector<8x256xf32>
      %19 = arith.maximumf %17, %18 : vector<8x256xf32>
      %20 = arith.truncf %19 : vector<8x256xf32> to vector<8x256xbf16>
      %c0_16 = arith.constant 0 : index
      %c0_17 = arith.constant 0 : index
      %21 = vector.load %arg6[%c0_16, %c0_17] : memref<8x256xbf16, #tpu.memory_space<vmem>>, vector<8x256xbf16>
      tpu.vector_store %arg6[%c0_16, %c0_17], %20 {strides = array<i32>} : memref<8x256xbf16, #tpu.memory_space<vmem>>, vector<8x256xbf16>,
    } else {
    }
    return
  }
  func.func @transform_0(%arg0: i32, %arg1: i32, %arg2: i32) -> (i32, i32, i32) {
    %c0_i32 = arith.constant 0 : i32
    %c0_i32_0 = arith.constant 0 : i32
    return %arg2, %arg0, %c0_i32 : i32, i32, i32
  }
  func.func @transform_1(%arg0: i32, %arg1: i32, %arg2: i32) -> (i32, i32, i32) {
    %c0_i32 = arith.constant 0 : i32
    %c0_i32_0 = arith.constant 0 : i32
    return %arg2, %c0_i32, %arg1 : i32, i32, i32
  }
  func.func @transform_2(%arg0: i32, %arg1: i32, %arg2: i32) -> (i32, i32) {
    %c0_i32 = arith.constant 0 : i32
    %c0_i32_0 = arith.constant 0 : i32
    return %c0_i32, %arg1 : i32, i32
  }
  func.func @transform_3(%arg0: i32, %arg1: i32, %arg2: i32) -> (i32, i32) {
    %c0_i32 = arith.constant 0 : i32
    return %arg0, %arg1 : i32, i32
  }
}

module attributes {stable_mosaic.version = 11 : i64} {
  func.func @_conv_kernel(%arg0: i32, %arg1: i32, %arg2: i32, %arg3: memref<1x8x128xbf16, #tpu.memory_space<vmem>>, %arg4: memref<1x128x256xbf16, #tpu.memory_space<vmem>>, %arg5: memref<1x256xf32, #tpu.memory_space<vmem>>, %arg6: memref<8x256xbf16, #tpu.memory_space<vmem>>, %arg7: memref<8x256xf32, #tpu.memory_space<vmem>>) attributes {dimension_semantics = [#tpu.dimension_semantics<parallel>, #tpu.dimension_semantics<parallel>, #tpu.dimension_semantics<arbitrary>], iteration_bounds = array<i64: 1, 1, 1>, scalar_prefetch = 0 : i64, scratch_operands = 1 : i64, tpu.core_type = #tpu.core_type<tc>, window_params = [{transform_indices = @transform_0, window_bounds = array<i64: 1, 8, 128>}, {transform_indices = @transform_1, window_bounds = array<i64: 1, 128, 256>}, {transform_indices = @transform_2, window_bounds = array<i64: 1, 256>}, {transform_indices = @transform_3, window_bounds = array<i64: 8, 256>}]} {
    %c0_i32 = arith.constant 0 : i32
    %0 = arith.cmpi eq, %arg2, %c0_i32 : i32
    %1 = arith.extui %0 : i1 to i32
    %c0_i32_0 = arith.constant 0 : i32
    %2 = arith.cmpi ne, %1, %c0_i32_0 : i32
    scf.if %2 {
      %cst_12 = arith.constant 0.000000e+00 : f32
      %14 = vector.broadcast %cst_12 : f32 to vector<8x256xf32>
      %c0_13 = arith.constant 0 : index
      %c0_14 = arith.constant 0 : index
      %15 = vector.load %arg7[%c0_13, %c0_14] : memref<8x256xf32, #tpu.memory_space<vmem>>, vector<8x256xf32>
      tpu.vector_store %arg7[%c0_13, %c0_14], %14 {strides = array<i32>} : memref<8x256xf32, #tpu.memory_space<vmem>>, vector<8x256xf32>,
    } else {
    }
    %c0 = arith.constant 0 : index
    %c0_1 = arith.constant 0 : index
    %3 = vector.load %arg7[%c0, %c0_1] : memref<8x256xf32, #tpu.memory_space<vmem>>, vector<8x256xf32>
    %c0_2 = arith.constant 0 : index
    %c0_3 = arith.constant 0 : index
    %c0_4 = arith.constant 0 : index
    %4 = vector.load %arg3[%c0_2, %c0_3, %c0_4] : memref<1x8x128xbf16, #tpu.memory_space<vmem>>, vector<1x8x128xbf16>
    %5 = vector.shape_cast %4 : vector<1x8x128xbf16> to vector<8x128xbf16>
    %c0_5 = arith.constant 0 : index
    %c0_6 = arith.constant 0 : index
    %c0_7 = arith.constant 0 : index
    %6 = vector.load %arg4[%c0_5, %c0_6, %c0_7] : memref<1x128x256xbf16, #tpu.memory_space<vmem>>, vector<1x128x256xbf16>
    %7 = vector.shape_cast %6 : vector<1x128x256xbf16> to vector<128x256xbf16>
    %cst = arith.constant dense<0.000000e+00> : vector<8x256xf32>
    %8 = tpu.matmul %5, %7, %cst {dimension_numbers = #tpu.dot_dimension_numbers<[1], [0], [0], [1], [0, 0, 1, 1], [], []>} : vector<8x128xbf16>, vector<128x256xbf16>, vector<8x256xf32> -> vector<8x256xf32>
    %9 = arith.addf %3, %8 : vector<8x256xf32>
    %c0_8 = arith.constant 0 : index
    %c0_9 = arith.constant 0 : index
    %10 = vector.load %arg7[%c0_8, %c0_9] : memref<8x256xf32, #tpu.memory_space<vmem>>, vector<8x256xf32>
    tpu.vector_store %arg7[%c0_8, %c0_9], %9 {strides = array<i32>} : memref<8x256xf32, #tpu.memory_space<vmem>>, vector<8x256xf32>,
    %c0_i32_10 = arith.constant 0 : i32
    %11 = arith.cmpi eq, %arg2, %c0_i32_10 : i32
    %12 = arith.extui %11 : i1 to i32
    %c0_i32_11 = arith.constant 0 : i32
    %13 = arith.cmpi ne, %12, %c0_i32_11 : i32
    scf.if %13 {
      %c0_12 = arith.constant 0 : index
      %c0_13 = arith.constant 0 : index
      %14 = vector.load %arg7[%c0_12, %c0_13] : memref<8x256xf32, #tpu.memory_space<vmem>>, vector<8x256xf32>
      %c0_14 = arith.constant 0 : index
      %c0_15 = arith.constant 0 : index
      %15 = vector.load %arg5[%c0_14, %c0_15] : memref<1x256xf32, #tpu.memory_space<vmem>>, vector<1x256xf32>
      %16 = vector.broadcast %15 : vector<1x256xf32> to vector<8x256xf32>
      %17 = arith.addf %14, %16 : vector<8x256xf32>
      %18 = arith.truncf %17 : vector<8x256xf32> to vector<8x256xbf16>
      %c0_16 = arith.constant 0 : index
      %c0_17 = arith.constant 0 : index
      %19 = vector.load %arg6[%c0_16, %c0_17] : memref<8x256xbf16, #tpu.memory_space<vmem>>, vector<8x256xbf16>
      tpu.vector_store %arg6[%c0_16, %c0_17], %18 {strides = array<i32>} : memref<8x256xbf16, #tpu.memory_space<vmem>>, vector<8x256xbf16>,
    } else {
    }
    return
  }
  func.func @transform_0(%arg0: i32, %arg1: i32, %arg2: i32) -> (i32, i32, i32) {
    %c0_i32 = arith.constant 0 : i32
    %c0_i32_0 = arith.constant 0 : i32
    return %arg2, %arg0, %c0_i32 : i32, i32, i32
  }
  func.func @transform_1(%arg0: i32, %arg1: i32, %arg2: i32) -> (i32, i32, i32) {
    %c0_i32 = arith.constant 0 : i32
    %c0_i32_0 = arith.constant 0 : i32
    return %arg2, %c0_i32, %arg1 : i32, i32, i32
  }
  func.func @transform_2(%arg0: i32, %arg1: i32, %arg2: i32) -> (i32, i32) {
    %c0_i32 = arith.constant 0 : i32
    %c0_i32_0 = arith.constant 0 : i32
    return %c0_i32, %arg1 : i32, i32
  }
  func.func @transform_3(%arg0: i32, %arg1: i32, %arg2: i32) -> (i32, i32) {
    %c0_i32 = arith.constant 0 : i32
    return %arg0, %arg1 : i32, i32
  }
}

module attributes {stable_mosaic.version = 11 : i64} {
  func.func @_conv_residual_kernel(%arg0: i32, %arg1: i32, %arg2: i32, %arg3: memref<1x8x256xbf16, #tpu.memory_space<vmem>>, %arg4: memref<1x256x256xbf16, #tpu.memory_space<vmem>>, %arg5: memref<1x256xf32, #tpu.memory_space<vmem>>, %arg6: memref<8x256xbf16, #tpu.memory_space<vmem>>, %arg7: memref<8x256xbf16, #tpu.memory_space<vmem>>, %arg8: memref<8x256xf32, #tpu.memory_space<vmem>>) attributes {dimension_semantics = [#tpu.dimension_semantics<parallel>, #tpu.dimension_semantics<parallel>, #tpu.dimension_semantics<arbitrary>], iteration_bounds = array<i64: 1, 1, 9>, scalar_prefetch = 0 : i64, scratch_operands = 1 : i64, tpu.core_type = #tpu.core_type<tc>, window_params = [{transform_indices = @transform_0, window_bounds = array<i64: 1, 8, 256>}, {transform_indices = @transform_1, window_bounds = array<i64: 1, 256, 256>}, {transform_indices = @transform_2, window_bounds = array<i64: 1, 256>}, {transform_indices = @transform_3, window_bounds = array<i64: 8, 256>}, {transform_indices = @transform_4, window_bounds = array<i64: 8, 256>}]} {
    %c0_i32 = arith.constant 0 : i32
    %0 = arith.cmpi eq, %arg2, %c0_i32 : i32
    %1 = arith.extui %0 : i1 to i32
    %c0_i32_0 = arith.constant 0 : i32
    %2 = arith.cmpi ne, %1, %c0_i32_0 : i32
    scf.if %2 {
      %cst_11 = arith.constant 0.000000e+00 : f32
      %14 = vector.broadcast %cst_11 : f32 to vector<8x256xf32>
      %c0_12 = arith.constant 0 : index
      %c0_13 = arith.constant 0 : index
      %15 = vector.load %arg8[%c0_12, %c0_13] : memref<8x256xf32, #tpu.memory_space<vmem>>, vector<8x256xf32>
      tpu.vector_store %arg8[%c0_12, %c0_13], %14 {strides = array<i32>} : memref<8x256xf32, #tpu.memory_space<vmem>>, vector<8x256xf32>,
    } else {
    }
    %c0 = arith.constant 0 : index
    %c0_1 = arith.constant 0 : index
    %3 = vector.load %arg8[%c0, %c0_1] : memref<8x256xf32, #tpu.memory_space<vmem>>, vector<8x256xf32>
    %c0_2 = arith.constant 0 : index
    %c0_3 = arith.constant 0 : index
    %c0_4 = arith.constant 0 : index
    %4 = vector.load %arg3[%c0_2, %c0_3, %c0_4] : memref<1x8x256xbf16, #tpu.memory_space<vmem>>, vector<1x8x256xbf16>
    %5 = vector.shape_cast %4 : vector<1x8x256xbf16> to vector<8x256xbf16>
    %c0_5 = arith.constant 0 : index
    %c0_6 = arith.constant 0 : index
    %c0_7 = arith.constant 0 : index
    %6 = vector.load %arg4[%c0_5, %c0_6, %c0_7] : memref<1x256x256xbf16, #tpu.memory_space<vmem>>, vector<1x256x256xbf16>
    %7 = vector.shape_cast %6 : vector<1x256x256xbf16> to vector<256x256xbf16>
    %cst = arith.constant dense<0.000000e+00> : vector<8x256xf32>
    %8 = tpu.matmul %5, %7, %cst {dimension_numbers = #tpu.dot_dimension_numbers<[1], [0], [0], [1], [0, 0, 1, 1], [], []>} : vector<8x256xbf16>, vector<256x256xbf16>, vector<8x256xf32> -> vector<8x256xf32>
    %9 = arith.addf %3, %8 : vector<8x256xf32>
    %c0_8 = arith.constant 0 : index
    %c0_9 = arith.constant 0 : index
    %10 = vector.load %arg8[%c0_8, %c0_9] : memref<8x256xf32, #tpu.memory_space<vmem>>, vector<8x256xf32>
    tpu.vector_store %arg8[%c0_8, %c0_9], %9 {strides = array<i32>} : memref<8x256xf32, #tpu.memory_space<vmem>>, vector<8x256xf32>,
    %c8_i32 = arith.constant 8 : i32
    %11 = arith.cmpi eq, %arg2, %c8_i32 : i32
    %12 = arith.extui %11 : i1 to i32
    %c0_i32_10 = arith.constant 0 : i32
    %13 = arith.cmpi ne, %12, %c0_i32_10 : i32
    scf.if %13 {
      %c0_11 = arith.constant 0 : index
      %c0_12 = arith.constant 0 : index
      %14 = vector.load %arg8[%c0_11, %c0_12] : memref<8x256xf32, #tpu.memory_space<vmem>>, vector<8x256xf32>
      %c0_13 = arith.constant 0 : index
      %c0_14 = arith.constant 0 : index
      %15 = vector.load %arg5[%c0_13, %c0_14] : memref<1x256xf32, #tpu.memory_space<vmem>>, vector<1x256xf32>
      %16 = vector.broadcast %15 : vector<1x256xf32> to vector<8x256xf32>
      %17 = arith.addf %14, %16 : vector<8x256xf32>
      %c0_15 = arith.constant 0 : index
      %c0_16 = arith.constant 0 : index
      %18 = vector.load %arg6[%c0_15, %c0_16] : memref<8x256xbf16, #tpu.memory_space<vmem>>, vector<8x256xbf16>
      %19 = arith.extf %18 : vector<8x256xbf16> to vector<8x256xf32>
      %20 = arith.addf %17, %19 : vector<8x256xf32>
      %cst_17 = arith.constant 0.000000e+00 : f32
      %21 = vector.broadcast %cst_17 : f32 to vector<8x256xf32>
      %22 = arith.maximumf %20, %21 : vector<8x256xf32>
      %23 = arith.truncf %22 : vector<8x256xf32> to vector<8x256xbf16>
      %c0_18 = arith.constant 0 : index
      %c0_19 = arith.constant 0 : index
      %24 = vector.load %arg7[%c0_18, %c0_19] : memref<8x256xbf16, #tpu.memory_space<vmem>>, vector<8x256xbf16>
      tpu.vector_store %arg7[%c0_18, %c0_19], %23 {strides = array<i32>} : memref<8x256xbf16, #tpu.memory_space<vmem>>, vector<8x256xbf16>,
    } else {
    }
    return
  }
  func.func @transform_0(%arg0: i32, %arg1: i32, %arg2: i32) -> (i32, i32, i32) {
    %c0_i32 = arith.constant 0 : i32
    %c0_i32_0 = arith.constant 0 : i32
    return %arg2, %arg0, %c0_i32 : i32, i32, i32
  }
  func.func @transform_1(%arg0: i32, %arg1: i32, %arg2: i32) -> (i32, i32, i32) {
    %c0_i32 = arith.constant 0 : i32
    %c0_i32_0 = arith.constant 0 : i32
    return %arg2, %c0_i32, %arg1 : i32, i32, i32
  }
  func.func @transform_2(%arg0: i32, %arg1: i32, %arg2: i32) -> (i32, i32) {
    %c0_i32 = arith.constant 0 : i32
    %c0_i32_0 = arith.constant 0 : i32
    return %c0_i32, %arg1 : i32, i32
  }
  func.func @transform_3(%arg0: i32, %arg1: i32, %arg2: i32) -> (i32, i32) {
    %c0_i32 = arith.constant 0 : i32
    return %arg0, %arg1 : i32, i32
  }
  func.func @transform_4(%arg0: i32, %arg1: i32, %arg2: i32) -> (i32, i32) {
    %c0_i32 = arith.constant 0 : i32
    return %arg0, %arg1 : i32, i32
  }
}

module attributes {stable_mosaic.version = 11 : i64} {
  func.func @_conv_kernel(%arg0: i32, %arg1: i32, %arg2: i32, %arg3: memref<1x8x256xbf16, #tpu.memory_space<vmem>>, %arg4: memref<1x256x256xbf16, #tpu.memory_space<vmem>>, %arg5: memref<1x256xf32, #tpu.memory_space<vmem>>, %arg6: memref<8x256xbf16, #tpu.memory_space<vmem>>, %arg7: memref<8x256xf32, #tpu.memory_space<vmem>>) attributes {dimension_semantics = [#tpu.dimension_semantics<parallel>, #tpu.dimension_semantics<parallel>, #tpu.dimension_semantics<arbitrary>], iteration_bounds = array<i64: 1, 1, 9>, scalar_prefetch = 0 : i64, scratch_operands = 1 : i64, tpu.core_type = #tpu.core_type<tc>, window_params = [{transform_indices = @transform_0, window_bounds = array<i64: 1, 8, 256>}, {transform_indices = @transform_1, window_bounds = array<i64: 1, 256, 256>}, {transform_indices = @transform_2, window_bounds = array<i64: 1, 256>}, {transform_indices = @transform_3, window_bounds = array<i64: 8, 256>}]} {
    %c0_i32 = arith.constant 0 : i32
    %0 = arith.cmpi eq, %arg2, %c0_i32 : i32
    %1 = arith.extui %0 : i1 to i32
    %c0_i32_0 = arith.constant 0 : i32
    %2 = arith.cmpi ne, %1, %c0_i32_0 : i32
    scf.if %2 {
      %cst_11 = arith.constant 0.000000e+00 : f32
      %14 = vector.broadcast %cst_11 : f32 to vector<8x256xf32>
      %c0_12 = arith.constant 0 : index
      %c0_13 = arith.constant 0 : index
      %15 = vector.load %arg7[%c0_12, %c0_13] : memref<8x256xf32, #tpu.memory_space<vmem>>, vector<8x256xf32>
      tpu.vector_store %arg7[%c0_12, %c0_13], %14 {strides = array<i32>} : memref<8x256xf32, #tpu.memory_space<vmem>>, vector<8x256xf32>,
    } else {
    }
    %c0 = arith.constant 0 : index
    %c0_1 = arith.constant 0 : index
    %3 = vector.load %arg7[%c0, %c0_1] : memref<8x256xf32, #tpu.memory_space<vmem>>, vector<8x256xf32>
    %c0_2 = arith.constant 0 : index
    %c0_3 = arith.constant 0 : index
    %c0_4 = arith.constant 0 : index
    %4 = vector.load %arg3[%c0_2, %c0_3, %c0_4] : memref<1x8x256xbf16, #tpu.memory_space<vmem>>, vector<1x8x256xbf16>
    %5 = vector.shape_cast %4 : vector<1x8x256xbf16> to vector<8x256xbf16>
    %c0_5 = arith.constant 0 : index
    %c0_6 = arith.constant 0 : index
    %c0_7 = arith.constant 0 : index
    %6 = vector.load %arg4[%c0_5, %c0_6, %c0_7] : memref<1x256x256xbf16, #tpu.memory_space<vmem>>, vector<1x256x256xbf16>
    %7 = vector.shape_cast %6 : vector<1x256x256xbf16> to vector<256x256xbf16>
    %cst = arith.constant dense<0.000000e+00> : vector<8x256xf32>
    %8 = tpu.matmul %5, %7, %cst {dimension_numbers = #tpu.dot_dimension_numbers<[1], [0], [0], [1], [0, 0, 1, 1], [], []>} : vector<8x256xbf16>, vector<256x256xbf16>, vector<8x256xf32> -> vector<8x256xf32>
    %9 = arith.addf %3, %8 : vector<8x256xf32>
    %c0_8 = arith.constant 0 : index
    %c0_9 = arith.constant 0 : index
    %10 = vector.load %arg7[%c0_8, %c0_9] : memref<8x256xf32, #tpu.memory_space<vmem>>, vector<8x256xf32>
    tpu.vector_store %arg7[%c0_8, %c0_9], %9 {strides = array<i32>} : memref<8x256xf32, #tpu.memory_space<vmem>>, vector<8x256xf32>,
    %c8_i32 = arith.constant 8 : i32
    %11 = arith.cmpi eq, %arg2, %c8_i32 : i32
    %12 = arith.extui %11 : i1 to i32
    %c0_i32_10 = arith.constant 0 : i32
    %13 = arith.cmpi ne, %12, %c0_i32_10 : i32
    scf.if %13 {
      %c0_11 = arith.constant 0 : index
      %c0_12 = arith.constant 0 : index
      %14 = vector.load %arg7[%c0_11, %c0_12] : memref<8x256xf32, #tpu.memory_space<vmem>>, vector<8x256xf32>
      %c0_13 = arith.constant 0 : index
      %c0_14 = arith.constant 0 : index
      %15 = vector.load %arg5[%c0_13, %c0_14] : memref<1x256xf32, #tpu.memory_space<vmem>>, vector<1x256xf32>
      %16 = vector.broadcast %15 : vector<1x256xf32> to vector<8x256xf32>
      %17 = arith.addf %14, %16 : vector<8x256xf32>
      %cst_15 = arith.constant 0.000000e+00 : f32
      %18 = vector.broadcast %cst_15 : f32 to vector<8x256xf32>
      %19 = arith.maximumf %17, %18 : vector<8x256xf32>
      %20 = arith.truncf %19 : vector<8x256xf32> to vector<8x256xbf16>
      %c0_16 = arith.constant 0 : index
      %c0_17 = arith.constant 0 : index
      %21 = vector.load %arg6[%c0_16, %c0_17] : memref<8x256xbf16, #tpu.memory_space<vmem>>, vector<8x256xbf16>
      tpu.vector_store %arg6[%c0_16, %c0_17], %20 {strides = array<i32>} : memref<8x256xbf16, #tpu.memory_space<vmem>>, vector<8x256xbf16>,
    } else {
    }
    return
  }
  func.func @transform_0(%arg0: i32, %arg1: i32, %arg2: i32) -> (i32, i32, i32) {
    %c0_i32 = arith.constant 0 : i32
    %c0_i32_0 = arith.constant 0 : i32
    return %arg2, %arg0, %c0_i32 : i32, i32, i32
  }
  func.func @transform_1(%arg0: i32, %arg1: i32, %arg2: i32) -> (i32, i32, i32) {
    %c0_i32 = arith.constant 0 : i32
    %c0_i32_0 = arith.constant 0 : i32
    return %arg2, %c0_i32, %arg1 : i32, i32, i32
  }
  func.func @transform_2(%arg0: i32, %arg1: i32, %arg2: i32) -> (i32, i32) {
    %c0_i32 = arith.constant 0 : i32
    %c0_i32_0 = arith.constant 0 : i32
    return %c0_i32, %arg1 : i32, i32
  }
  func.func @transform_3(%arg0: i32, %arg1: i32, %arg2: i32) -> (i32, i32) {
    %c0_i32 = arith.constant 0 : i32
    return %arg0, %arg1 : i32, i32
  }
}

module attributes {stable_mosaic.version = 11 : i64} {
  func.func @_conv_kernel(%arg0: i32, %arg1: i32, %arg2: i32, %arg3: memref<1x8x256xbf16, #tpu.memory_space<vmem>>, %arg4: memref<1x256x256xbf16, #tpu.memory_space<vmem>>, %arg5: memref<1x256xf32, #tpu.memory_space<vmem>>, %arg6: memref<8x256xbf16, #tpu.memory_space<vmem>>, %arg7: memref<8x256xf32, #tpu.memory_space<vmem>>) attributes {dimension_semantics = [#tpu.dimension_semantics<parallel>, #tpu.dimension_semantics<parallel>, #tpu.dimension_semantics<arbitrary>], iteration_bounds = array<i64: 1, 2, 9>, scalar_prefetch = 0 : i64, scratch_operands = 1 : i64, tpu.core_type = #tpu.core_type<tc>, window_params = [{transform_indices = @transform_0, window_bounds = array<i64: 1, 8, 256>}, {transform_indices = @transform_1, window_bounds = array<i64: 1, 256, 256>}, {transform_indices = @transform_2, window_bounds = array<i64: 1, 256>}, {transform_indices = @transform_3, window_bounds = array<i64: 8, 256>}]} {
    %c0_i32 = arith.constant 0 : i32
    %0 = arith.cmpi eq, %arg2, %c0_i32 : i32
    %1 = arith.extui %0 : i1 to i32
    %c0_i32_0 = arith.constant 0 : i32
    %2 = arith.cmpi ne, %1, %c0_i32_0 : i32
    scf.if %2 {
      %cst_11 = arith.constant 0.000000e+00 : f32
      %14 = vector.broadcast %cst_11 : f32 to vector<8x256xf32>
      %c0_12 = arith.constant 0 : index
      %c0_13 = arith.constant 0 : index
      %15 = vector.load %arg7[%c0_12, %c0_13] : memref<8x256xf32, #tpu.memory_space<vmem>>, vector<8x256xf32>
      tpu.vector_store %arg7[%c0_12, %c0_13], %14 {strides = array<i32>} : memref<8x256xf32, #tpu.memory_space<vmem>>, vector<8x256xf32>,
    } else {
    }
    %c0 = arith.constant 0 : index
    %c0_1 = arith.constant 0 : index
    %3 = vector.load %arg7[%c0, %c0_1] : memref<8x256xf32, #tpu.memory_space<vmem>>, vector<8x256xf32>
    %c0_2 = arith.constant 0 : index
    %c0_3 = arith.constant 0 : index
    %c0_4 = arith.constant 0 : index
    %4 = vector.load %arg3[%c0_2, %c0_3, %c0_4] : memref<1x8x256xbf16, #tpu.memory_space<vmem>>, vector<1x8x256xbf16>
    %5 = vector.shape_cast %4 : vector<1x8x256xbf16> to vector<8x256xbf16>
    %c0_5 = arith.constant 0 : index
    %c0_6 = arith.constant 0 : index
    %c0_7 = arith.constant 0 : index
    %6 = vector.load %arg4[%c0_5, %c0_6, %c0_7] : memref<1x256x256xbf16, #tpu.memory_space<vmem>>, vector<1x256x256xbf16>
    %7 = vector.shape_cast %6 : vector<1x256x256xbf16> to vector<256x256xbf16>
    %cst = arith.constant dense<0.000000e+00> : vector<8x256xf32>
    %8 = tpu.matmul %5, %7, %cst {dimension_numbers = #tpu.dot_dimension_numbers<[1], [0], [0], [1], [0, 0, 1, 1], [], []>} : vector<8x256xbf16>, vector<256x256xbf16>, vector<8x256xf32> -> vector<8x256xf32>
    %9 = arith.addf %3, %8 : vector<8x256xf32>
    %c0_8 = arith.constant 0 : index
    %c0_9 = arith.constant 0 : index
    %10 = vector.load %arg7[%c0_8, %c0_9] : memref<8x256xf32, #tpu.memory_space<vmem>>, vector<8x256xf32>
    tpu.vector_store %arg7[%c0_8, %c0_9], %9 {strides = array<i32>} : memref<8x256xf32, #tpu.memory_space<vmem>>, vector<8x256xf32>,
    %c8_i32 = arith.constant 8 : i32
    %11 = arith.cmpi eq, %arg2, %c8_i32 : i32
    %12 = arith.extui %11 : i1 to i32
    %c0_i32_10 = arith.constant 0 : i32
    %13 = arith.cmpi ne, %12, %c0_i32_10 : i32
    scf.if %13 {
      %c0_11 = arith.constant 0 : index
      %c0_12 = arith.constant 0 : index
      %14 = vector.load %arg7[%c0_11, %c0_12] : memref<8x256xf32, #tpu.memory_space<vmem>>, vector<8x256xf32>
      %c0_13 = arith.constant 0 : index
      %c0_14 = arith.constant 0 : index
      %15 = vector.load %arg5[%c0_13, %c0_14] : memref<1x256xf32, #tpu.memory_space<vmem>>, vector<1x256xf32>
      %16 = vector.broadcast %15 : vector<1x256xf32> to vector<8x256xf32>
      %17 = arith.addf %14, %16 : vector<8x256xf32>
      %cst_15 = arith.constant 0.000000e+00 : f32
      %18 = vector.broadcast %cst_15 : f32 to vector<8x256xf32>
      %19 = arith.maximumf %17, %18 : vector<8x256xf32>
      %20 = arith.truncf %19 : vector<8x256xf32> to vector<8x256xbf16>
      %c0_16 = arith.constant 0 : index
      %c0_17 = arith.constant 0 : index
      %21 = vector.load %arg6[%c0_16, %c0_17] : memref<8x256xbf16, #tpu.memory_space<vmem>>, vector<8x256xbf16>
      tpu.vector_store %arg6[%c0_16, %c0_17], %20 {strides = array<i32>} : memref<8x256xbf16, #tpu.memory_space<vmem>>, vector<8x256xbf16>,
    } else {
    }
    return
  }
  func.func @transform_0(%arg0: i32, %arg1: i32, %arg2: i32) -> (i32, i32, i32) {
    %c0_i32 = arith.constant 0 : i32
    %c0_i32_0 = arith.constant 0 : i32
    return %arg2, %arg0, %c0_i32 : i32, i32, i32
  }
  func.func @transform_1(%arg0: i32, %arg1: i32, %arg2: i32) -> (i32, i32, i32) {
    %c0_i32 = arith.constant 0 : i32
    %c0_i32_0 = arith.constant 0 : i32
    return %arg2, %c0_i32, %arg1 : i32, i32, i32
  }
  func.func @transform_2(%arg0: i32, %arg1: i32, %arg2: i32) -> (i32, i32) {
    %c0_i32 = arith.constant 0 : i32
    %c0_i32_0 = arith.constant 0 : i32
    return %c0_i32, %arg1 : i32, i32
  }
  func.func @transform_3(%arg0: i32, %arg1: i32, %arg2: i32) -> (i32, i32) {
    %c0_i32 = arith.constant 0 : i32
    return %arg0, %arg1 : i32, i32
  }
}

module attributes {stable_mosaic.version = 11 : i64} {
  func.func @_conv_kernel(%arg0: i32, %arg1: i32, %arg2: i32, %arg3: memref<1x8x256xbf16, #tpu.memory_space<vmem>>, %arg4: memref<1x256x256xbf16, #tpu.memory_space<vmem>>, %arg5: memref<1x256xf32, #tpu.memory_space<vmem>>, %arg6: memref<8x256xbf16, #tpu.memory_space<vmem>>, %arg7: memref<8x256xf32, #tpu.memory_space<vmem>>) attributes {dimension_semantics = [#tpu.dimension_semantics<parallel>, #tpu.dimension_semantics<parallel>, #tpu.dimension_semantics<arbitrary>], iteration_bounds = array<i64: 1, 2, 1>, scalar_prefetch = 0 : i64, scratch_operands = 1 : i64, tpu.core_type = #tpu.core_type<tc>, window_params = [{transform_indices = @transform_0, window_bounds = array<i64: 1, 8, 256>}, {transform_indices = @transform_1, window_bounds = array<i64: 1, 256, 256>}, {transform_indices = @transform_2, window_bounds = array<i64: 1, 256>}, {transform_indices = @transform_3, window_bounds = array<i64: 8, 256>}]} {
    %c0_i32 = arith.constant 0 : i32
    %0 = arith.cmpi eq, %arg2, %c0_i32 : i32
    %1 = arith.extui %0 : i1 to i32
    %c0_i32_0 = arith.constant 0 : i32
    %2 = arith.cmpi ne, %1, %c0_i32_0 : i32
    scf.if %2 {
      %cst_12 = arith.constant 0.000000e+00 : f32
      %14 = vector.broadcast %cst_12 : f32 to vector<8x256xf32>
      %c0_13 = arith.constant 0 : index
      %c0_14 = arith.constant 0 : index
      %15 = vector.load %arg7[%c0_13, %c0_14] : memref<8x256xf32, #tpu.memory_space<vmem>>, vector<8x256xf32>
      tpu.vector_store %arg7[%c0_13, %c0_14], %14 {strides = array<i32>} : memref<8x256xf32, #tpu.memory_space<vmem>>, vector<8x256xf32>,
    } else {
    }
    %c0 = arith.constant 0 : index
    %c0_1 = arith.constant 0 : index
    %3 = vector.load %arg7[%c0, %c0_1] : memref<8x256xf32, #tpu.memory_space<vmem>>, vector<8x256xf32>
    %c0_2 = arith.constant 0 : index
    %c0_3 = arith.constant 0 : index
    %c0_4 = arith.constant 0 : index
    %4 = vector.load %arg3[%c0_2, %c0_3, %c0_4] : memref<1x8x256xbf16, #tpu.memory_space<vmem>>, vector<1x8x256xbf16>
    %5 = vector.shape_cast %4 : vector<1x8x256xbf16> to vector<8x256xbf16>
    %c0_5 = arith.constant 0 : index
    %c0_6 = arith.constant 0 : index
    %c0_7 = arith.constant 0 : index
    %6 = vector.load %arg4[%c0_5, %c0_6, %c0_7] : memref<1x256x256xbf16, #tpu.memory_space<vmem>>, vector<1x256x256xbf16>
    %7 = vector.shape_cast %6 : vector<1x256x256xbf16> to vector<256x256xbf16>
    %cst = arith.constant dense<0.000000e+00> : vector<8x256xf32>
    %8 = tpu.matmul %5, %7, %cst {dimension_numbers = #tpu.dot_dimension_numbers<[1], [0], [0], [1], [0, 0, 1, 1], [], []>} : vector<8x256xbf16>, vector<256x256xbf16>, vector<8x256xf32> -> vector<8x256xf32>
    %9 = arith.addf %3, %8 : vector<8x256xf32>
    %c0_8 = arith.constant 0 : index
    %c0_9 = arith.constant 0 : index
    %10 = vector.load %arg7[%c0_8, %c0_9] : memref<8x256xf32, #tpu.memory_space<vmem>>, vector<8x256xf32>
    tpu.vector_store %arg7[%c0_8, %c0_9], %9 {strides = array<i32>} : memref<8x256xf32, #tpu.memory_space<vmem>>, vector<8x256xf32>,
    %c0_i32_10 = arith.constant 0 : i32
    %11 = arith.cmpi eq, %arg2, %c0_i32_10 : i32
    %12 = arith.extui %11 : i1 to i32
    %c0_i32_11 = arith.constant 0 : i32
    %13 = arith.cmpi ne, %12, %c0_i32_11 : i32
    scf.if %13 {
      %c0_12 = arith.constant 0 : index
      %c0_13 = arith.constant 0 : index
      %14 = vector.load %arg7[%c0_12, %c0_13] : memref<8x256xf32, #tpu.memory_space<vmem>>, vector<8x256xf32>
      %c0_14 = arith.constant 0 : index
      %c0_15 = arith.constant 0 : index
      %15 = vector.load %arg5[%c0_14, %c0_15] : memref<1x256xf32, #tpu.memory_space<vmem>>, vector<1x256xf32>
      %16 = vector.broadcast %15 : vector<1x256xf32> to vector<8x256xf32>
      %17 = arith.addf %14, %16 : vector<8x256xf32>
      %18 = arith.truncf %17 : vector<8x256xf32> to vector<8x256xbf16>
      %c0_16 = arith.constant 0 : index
      %c0_17 = arith.constant 0 : index
      %19 = vector.load %arg6[%c0_16, %c0_17] : memref<8x256xbf16, #tpu.memory_space<vmem>>, vector<8x256xbf16>
      tpu.vector_store %arg6[%c0_16, %c0_17], %18 {strides = array<i32>} : memref<8x256xbf16, #tpu.memory_space<vmem>>, vector<8x256xbf16>,
    } else {
    }
    return
  }
  func.func @transform_0(%arg0: i32, %arg1: i32, %arg2: i32) -> (i32, i32, i32) {
    %c0_i32 = arith.constant 0 : i32
    %c0_i32_0 = arith.constant 0 : i32
    return %arg2, %arg0, %c0_i32 : i32, i32, i32
  }
  func.func @transform_1(%arg0: i32, %arg1: i32, %arg2: i32) -> (i32, i32, i32) {
    %c0_i32 = arith.constant 0 : i32
    %c0_i32_0 = arith.constant 0 : i32
    return %arg2, %c0_i32, %arg1 : i32, i32, i32
  }
  func.func @transform_2(%arg0: i32, %arg1: i32, %arg2: i32) -> (i32, i32) {
    %c0_i32 = arith.constant 0 : i32
    %c0_i32_0 = arith.constant 0 : i32
    return %c0_i32, %arg1 : i32, i32
  }
  func.func @transform_3(%arg0: i32, %arg1: i32, %arg2: i32) -> (i32, i32) {
    %c0_i32 = arith.constant 0 : i32
    return %arg0, %arg1 : i32, i32
  }
}

module attributes {stable_mosaic.version = 11 : i64} {
  func.func @_conv_residual_kernel(%arg0: i32, %arg1: i32, %arg2: i32, %arg3: memref<1x8x512xbf16, #tpu.memory_space<vmem>>, %arg4: memref<1x512x256xbf16, #tpu.memory_space<vmem>>, %arg5: memref<1x256xf32, #tpu.memory_space<vmem>>, %arg6: memref<8x256xbf16, #tpu.memory_space<vmem>>, %arg7: memref<8x256xbf16, #tpu.memory_space<vmem>>, %arg8: memref<8x256xf32, #tpu.memory_space<vmem>>) attributes {dimension_semantics = [#tpu.dimension_semantics<parallel>, #tpu.dimension_semantics<parallel>, #tpu.dimension_semantics<arbitrary>], iteration_bounds = array<i64: 1, 2, 9>, scalar_prefetch = 0 : i64, scratch_operands = 1 : i64, tpu.core_type = #tpu.core_type<tc>, window_params = [{transform_indices = @transform_0, window_bounds = array<i64: 1, 8, 512>}, {transform_indices = @transform_1, window_bounds = array<i64: 1, 512, 256>}, {transform_indices = @transform_2, window_bounds = array<i64: 1, 256>}, {transform_indices = @transform_3, window_bounds = array<i64: 8, 256>}, {transform_indices = @transform_4, window_bounds = array<i64: 8, 256>}]} {
    %c0_i32 = arith.constant 0 : i32
    %0 = arith.cmpi eq, %arg2, %c0_i32 : i32
    %1 = arith.extui %0 : i1 to i32
    %c0_i32_0 = arith.constant 0 : i32
    %2 = arith.cmpi ne, %1, %c0_i32_0 : i32
    scf.if %2 {
      %cst_11 = arith.constant 0.000000e+00 : f32
      %14 = vector.broadcast %cst_11 : f32 to vector<8x256xf32>
      %c0_12 = arith.constant 0 : index
      %c0_13 = arith.constant 0 : index
      %15 = vector.load %arg8[%c0_12, %c0_13] : memref<8x256xf32, #tpu.memory_space<vmem>>, vector<8x256xf32>
      tpu.vector_store %arg8[%c0_12, %c0_13], %14 {strides = array<i32>} : memref<8x256xf32, #tpu.memory_space<vmem>>, vector<8x256xf32>,
    } else {
    }
    %c0 = arith.constant 0 : index
    %c0_1 = arith.constant 0 : index
    %3 = vector.load %arg8[%c0, %c0_1] : memref<8x256xf32, #tpu.memory_space<vmem>>, vector<8x256xf32>
    %c0_2 = arith.constant 0 : index
    %c0_3 = arith.constant 0 : index
    %c0_4 = arith.constant 0 : index
    %4 = vector.load %arg3[%c0_2, %c0_3, %c0_4] : memref<1x8x512xbf16, #tpu.memory_space<vmem>>, vector<1x8x512xbf16>
    %5 = vector.shape_cast %4 : vector<1x8x512xbf16> to vector<8x512xbf16>
    %c0_5 = arith.constant 0 : index
    %c0_6 = arith.constant 0 : index
    %c0_7 = arith.constant 0 : index
    %6 = vector.load %arg4[%c0_5, %c0_6, %c0_7] : memref<1x512x256xbf16, #tpu.memory_space<vmem>>, vector<1x512x256xbf16>
    %7 = vector.shape_cast %6 : vector<1x512x256xbf16> to vector<512x256xbf16>
    %cst = arith.constant dense<0.000000e+00> : vector<8x256xf32>
    %8 = tpu.matmul %5, %7, %cst {dimension_numbers = #tpu.dot_dimension_numbers<[1], [0], [0], [1], [0, 0, 1, 1], [], []>} : vector<8x512xbf16>, vector<512x256xbf16>, vector<8x256xf32> -> vector<8x256xf32>
    %9 = arith.addf %3, %8 : vector<8x256xf32>
    %c0_8 = arith.constant 0 : index
    %c0_9 = arith.constant 0 : index
    %10 = vector.load %arg8[%c0_8, %c0_9] : memref<8x256xf32, #tpu.memory_space<vmem>>, vector<8x256xf32>
    tpu.vector_store %arg8[%c0_8, %c0_9], %9 {strides = array<i32>} : memref<8x256xf32, #tpu.memory_space<vmem>>, vector<8x256xf32>,
    %c8_i32 = arith.constant 8 : i32
    %11 = arith.cmpi eq, %arg2, %c8_i32 : i32
    %12 = arith.extui %11 : i1 to i32
    %c0_i32_10 = arith.constant 0 : i32
    %13 = arith.cmpi ne, %12, %c0_i32_10 : i32
    scf.if %13 {
      %c0_11 = arith.constant 0 : index
      %c0_12 = arith.constant 0 : index
      %14 = vector.load %arg8[%c0_11, %c0_12] : memref<8x256xf32, #tpu.memory_space<vmem>>, vector<8x256xf32>
      %c0_13 = arith.constant 0 : index
      %c0_14 = arith.constant 0 : index
      %15 = vector.load %arg5[%c0_13, %c0_14] : memref<1x256xf32, #tpu.memory_space<vmem>>, vector<1x256xf32>
      %16 = vector.broadcast %15 : vector<1x256xf32> to vector<8x256xf32>
      %17 = arith.addf %14, %16 : vector<8x256xf32>
      %c0_15 = arith.constant 0 : index
      %c0_16 = arith.constant 0 : index
      %18 = vector.load %arg6[%c0_15, %c0_16] : memref<8x256xbf16, #tpu.memory_space<vmem>>, vector<8x256xbf16>
      %19 = arith.extf %18 : vector<8x256xbf16> to vector<8x256xf32>
      %20 = arith.addf %17, %19 : vector<8x256xf32>
      %cst_17 = arith.constant 0.000000e+00 : f32
      %21 = vector.broadcast %cst_17 : f32 to vector<8x256xf32>
      %22 = arith.maximumf %20, %21 : vector<8x256xf32>
      %23 = arith.truncf %22 : vector<8x256xf32> to vector<8x256xbf16>
      %c0_18 = arith.constant 0 : index
      %c0_19 = arith.constant 0 : index
      %24 = vector.load %arg7[%c0_18, %c0_19] : memref<8x256xbf16, #tpu.memory_space<vmem>>, vector<8x256xbf16>
      tpu.vector_store %arg7[%c0_18, %c0_19], %23 {strides = array<i32>} : memref<8x256xbf16, #tpu.memory_space<vmem>>, vector<8x256xbf16>,
    } else {
    }
    return
  }
  func.func @transform_0(%arg0: i32, %arg1: i32, %arg2: i32) -> (i32, i32, i32) {
    %c0_i32 = arith.constant 0 : i32
    %c0_i32_0 = arith.constant 0 : i32
    return %arg2, %arg0, %c0_i32 : i32, i32, i32
  }
  func.func @transform_1(%arg0: i32, %arg1: i32, %arg2: i32) -> (i32, i32, i32) {
    %c0_i32 = arith.constant 0 : i32
    %c0_i32_0 = arith.constant 0 : i32
    return %arg2, %c0_i32, %arg1 : i32, i32, i32
  }
  func.func @transform_2(%arg0: i32, %arg1: i32, %arg2: i32) -> (i32, i32) {
    %c0_i32 = arith.constant 0 : i32
    %c0_i32_0 = arith.constant 0 : i32
    return %c0_i32, %arg1 : i32, i32
  }
  func.func @transform_3(%arg0: i32, %arg1: i32, %arg2: i32) -> (i32, i32) {
    %c0_i32 = arith.constant 0 : i32
    return %arg0, %arg1 : i32, i32
  }
  func.func @transform_4(%arg0: i32, %arg1: i32, %arg2: i32) -> (i32, i32) {
    %c0_i32 = arith.constant 0 : i32
    return %arg0, %arg1 : i32, i32
  }
}

module attributes {stable_mosaic.version = 11 : i64} {
  func.func @_conv_kernel(%arg0: i32, %arg1: i32, %arg2: i32, %arg3: memref<1x8x512xbf16, #tpu.memory_space<vmem>>, %arg4: memref<1x512x256xbf16, #tpu.memory_space<vmem>>, %arg5: memref<1x256xf32, #tpu.memory_space<vmem>>, %arg6: memref<8x256xbf16, #tpu.memory_space<vmem>>, %arg7: memref<8x256xf32, #tpu.memory_space<vmem>>) attributes {dimension_semantics = [#tpu.dimension_semantics<parallel>, #tpu.dimension_semantics<parallel>, #tpu.dimension_semantics<arbitrary>], iteration_bounds = array<i64: 1, 2, 9>, scalar_prefetch = 0 : i64, scratch_operands = 1 : i64, tpu.core_type = #tpu.core_type<tc>, window_params = [{transform_indices = @transform_0, window_bounds = array<i64: 1, 8, 512>}, {transform_indices = @transform_1, window_bounds = array<i64: 1, 512, 256>}, {transform_indices = @transform_2, window_bounds = array<i64: 1, 256>}, {transform_indices = @transform_3, window_bounds = array<i64: 8, 256>}]} {
    %c0_i32 = arith.constant 0 : i32
    %0 = arith.cmpi eq, %arg2, %c0_i32 : i32
    %1 = arith.extui %0 : i1 to i32
    %c0_i32_0 = arith.constant 0 : i32
    %2 = arith.cmpi ne, %1, %c0_i32_0 : i32
    scf.if %2 {
      %cst_11 = arith.constant 0.000000e+00 : f32
      %14 = vector.broadcast %cst_11 : f32 to vector<8x256xf32>
      %c0_12 = arith.constant 0 : index
      %c0_13 = arith.constant 0 : index
      %15 = vector.load %arg7[%c0_12, %c0_13] : memref<8x256xf32, #tpu.memory_space<vmem>>, vector<8x256xf32>
      tpu.vector_store %arg7[%c0_12, %c0_13], %14 {strides = array<i32>} : memref<8x256xf32, #tpu.memory_space<vmem>>, vector<8x256xf32>,
    } else {
    }
    %c0 = arith.constant 0 : index
    %c0_1 = arith.constant 0 : index
    %3 = vector.load %arg7[%c0, %c0_1] : memref<8x256xf32, #tpu.memory_space<vmem>>, vector<8x256xf32>
    %c0_2 = arith.constant 0 : index
    %c0_3 = arith.constant 0 : index
    %c0_4 = arith.constant 0 : index
    %4 = vector.load %arg3[%c0_2, %c0_3, %c0_4] : memref<1x8x512xbf16, #tpu.memory_space<vmem>>, vector<1x8x512xbf16>
    %5 = vector.shape_cast %4 : vector<1x8x512xbf16> to vector<8x512xbf16>
    %c0_5 = arith.constant 0 : index
    %c0_6 = arith.constant 0 : index
    %c0_7 = arith.constant 0 : index
    %6 = vector.load %arg4[%c0_5, %c0_6, %c0_7] : memref<1x512x256xbf16, #tpu.memory_space<vmem>>, vector<1x512x256xbf16>
    %7 = vector.shape_cast %6 : vector<1x512x256xbf16> to vector<512x256xbf16>
    %cst = arith.constant dense<0.000000e+00> : vector<8x256xf32>
    %8 = tpu.matmul %5, %7, %cst {dimension_numbers = #tpu.dot_dimension_numbers<[1], [0], [0], [1], [0, 0, 1, 1], [], []>} : vector<8x512xbf16>, vector<512x256xbf16>, vector<8x256xf32> -> vector<8x256xf32>
    %9 = arith.addf %3, %8 : vector<8x256xf32>
    %c0_8 = arith.constant 0 : index
    %c0_9 = arith.constant 0 : index
    %10 = vector.load %arg7[%c0_8, %c0_9] : memref<8x256xf32, #tpu.memory_space<vmem>>, vector<8x256xf32>
    tpu.vector_store %arg7[%c0_8, %c0_9], %9 {strides = array<i32>} : memref<8x256xf32, #tpu.memory_space<vmem>>, vector<8x256xf32>,
    %c8_i32 = arith.constant 8 : i32
    %11 = arith.cmpi eq, %arg2, %c8_i32 : i32
    %12 = arith.extui %11 : i1 to i32
    %c0_i32_10 = arith.constant 0 : i32
    %13 = arith.cmpi ne, %12, %c0_i32_10 : i32
    scf.if %13 {
      %c0_11 = arith.constant 0 : index
      %c0_12 = arith.constant 0 : index
      %14 = vector.load %arg7[%c0_11, %c0_12] : memref<8x256xf32, #tpu.memory_space<vmem>>, vector<8x256xf32>
      %c0_13 = arith.constant 0 : index
      %c0_14 = arith.constant 0 : index
      %15 = vector.load %arg5[%c0_13, %c0_14] : memref<1x256xf32, #tpu.memory_space<vmem>>, vector<1x256xf32>
      %16 = vector.broadcast %15 : vector<1x256xf32> to vector<8x256xf32>
      %17 = arith.addf %14, %16 : vector<8x256xf32>
      %cst_15 = arith.constant 0.000000e+00 : f32
      %18 = vector.broadcast %cst_15 : f32 to vector<8x256xf32>
      %19 = arith.maximumf %17, %18 : vector<8x256xf32>
      %20 = arith.truncf %19 : vector<8x256xf32> to vector<8x256xbf16>
      %c0_16 = arith.constant 0 : index
      %c0_17 = arith.constant 0 : index
      %21 = vector.load %arg6[%c0_16, %c0_17] : memref<8x256xbf16, #tpu.memory_space<vmem>>, vector<8x256xbf16>
      tpu.vector_store %arg6[%c0_16, %c0_17], %20 {strides = array<i32>} : memref<8x256xbf16, #tpu.memory_space<vmem>>, vector<8x256xbf16>,
    } else {
    }
    return
  }
  func.func @transform_0(%arg0: i32, %arg1: i32, %arg2: i32) -> (i32, i32, i32) {
    %c0_i32 = arith.constant 0 : i32
    %c0_i32_0 = arith.constant 0 : i32
    return %arg2, %arg0, %c0_i32 : i32, i32, i32
  }
  func.func @transform_1(%arg0: i32, %arg1: i32, %arg2: i32) -> (i32, i32, i32) {
    %c0_i32 = arith.constant 0 : i32
    %c0_i32_0 = arith.constant 0 : i32
    return %arg2, %c0_i32, %arg1 : i32, i32, i32
  }
  func.func @transform_2(%arg0: i32, %arg1: i32, %arg2: i32) -> (i32, i32) {
    %c0_i32 = arith.constant 0 : i32
    %c0_i32_0 = arith.constant 0 : i32
    return %c0_i32, %arg1 : i32, i32
  }
  func.func @transform_3(%arg0: i32, %arg1: i32, %arg2: i32) -> (i32, i32) {
    %c0_i32 = arith.constant 0 : i32
    return %arg0, %arg1 : i32, i32
  }
}

module attributes {stable_mosaic.version = 11 : i64} {
  func.func @_avgpool_kernel(%arg0: memref<2x1x512xbf16, #tpu.memory_space<vmem>>, %arg1: memref<2x512xf32, #tpu.memory_space<vmem>>) attributes {dimension_semantics = [], scalar_prefetch = 0 : i64, scratch_operands = 0 : i64, tpu.core_type = #tpu.core_type<tc>} {
    %c0 = arith.constant 0 : index
    %c0_0 = arith.constant 0 : index
    %c0_1 = arith.constant 0 : index
    %0 = vector.load %arg0[%c0, %c0_0, %c0_1] : memref<2x1x512xbf16, #tpu.memory_space<vmem>>, vector<2x1x512xbf16>
    %1 = arith.extf %0 : vector<2x1x512xbf16> to vector<2x1x512xf32>
    %cst = arith.constant dense<0.000000e+00> : vector<2x512xf32>
    %2 = vector.multi_reduction <add>, %1, %cst [1] : vector<2x1x512xf32> to vector<2x512xf32>
    %cst_2 = arith.constant 1.000000e+00 : f32
    %3 = vector.broadcast %cst_2 : f32 to vector<2x512xf32>
    %4 = arith.divf %2, %3 : vector<2x512xf32>
    %c0_3 = arith.constant 0 : index
    %c0_4 = arith.constant 0 : index
    %5 = vector.load %arg1[%c0_3, %c0_4] : memref<2x512xf32, #tpu.memory_space<vmem>>, vector<2x512xf32>
    tpu.vector_store %arg1[%c0_3, %c0_4], %4 {strides = array<i32>} : memref<2x512xf32, #tpu.memory_space<vmem>>, vector<2x512xf32>,
    return
  }
}

module attributes {stable_mosaic.version = 11 : i64} {
  func.func @_conv_kernel(%arg0: i32, %arg1: i32, %arg2: i32, %arg3: memref<1x8x512xbf16, #tpu.memory_space<vmem>>, %arg4: memref<1x512x128xbf16, #tpu.memory_space<vmem>>, %arg5: memref<1x128xf32, #tpu.memory_space<vmem>>, %arg6: memref<8x128xf32, #tpu.memory_space<vmem>>, %arg7: memref<8x128xf32, #tpu.memory_space<vmem>>) attributes {dimension_semantics = [#tpu.dimension_semantics<parallel>, #tpu.dimension_semantics<parallel>, #tpu.dimension_semantics<arbitrary>], iteration_bounds = array<i64: 1, 1, 1>, scalar_prefetch = 0 : i64, scratch_operands = 1 : i64, tpu.core_type = #tpu.core_type<tc>, window_params = [{transform_indices = @transform_0, window_bounds = array<i64: 1, 8, 512>}, {transform_indices = @transform_1, window_bounds = array<i64: 1, 512, 128>}, {transform_indices = @transform_2, window_bounds = array<i64: 1, 128>}, {transform_indices = @transform_3, window_bounds = array<i64: 8, 128>}]} {
    %c0_i32 = arith.constant 0 : i32
    %0 = arith.cmpi eq, %arg2, %c0_i32 : i32
    %1 = arith.extui %0 : i1 to i32
    %c0_i32_0 = arith.constant 0 : i32
    %2 = arith.cmpi ne, %1, %c0_i32_0 : i32
    scf.if %2 {
      %cst_12 = arith.constant 0.000000e+00 : f32
      %14 = vector.broadcast %cst_12 : f32 to vector<8x128xf32>
      %c0_13 = arith.constant 0 : index
      %c0_14 = arith.constant 0 : index
      %15 = vector.load %arg7[%c0_13, %c0_14] : memref<8x128xf32, #tpu.memory_space<vmem>>, vector<8x128xf32>
      tpu.vector_store %arg7[%c0_13, %c0_14], %14 {strides = array<i32>} : memref<8x128xf32, #tpu.memory_space<vmem>>, vector<8x128xf32>,
    } else {
    }
    %c0 = arith.constant 0 : index
    %c0_1 = arith.constant 0 : index
    %3 = vector.load %arg7[%c0, %c0_1] : memref<8x128xf32, #tpu.memory_space<vmem>>, vector<8x128xf32>
    %c0_2 = arith.constant 0 : index
    %c0_3 = arith.constant 0 : index
    %c0_4 = arith.constant 0 : index
    %4 = vector.load %arg3[%c0_2, %c0_3, %c0_4] : memref<1x8x512xbf16, #tpu.memory_space<vmem>>, vector<1x8x512xbf16>
    %5 = vector.shape_cast %4 : vector<1x8x512xbf16> to vector<8x512xbf16>
    %c0_5 = arith.constant 0 : index
    %c0_6 = arith.constant 0 : index
    %c0_7 = arith.constant 0 : index
    %6 = vector.load %arg4[%c0_5, %c0_6, %c0_7] : memref<1x512x128xbf16, #tpu.memory_space<vmem>>, vector<1x512x128xbf16>
    %7 = vector.shape_cast %6 : vector<1x512x128xbf16> to vector<512x128xbf16>
    %cst = arith.constant dense<0.000000e+00> : vector<8x128xf32>
    %8 = tpu.matmul %5, %7, %cst {dimension_numbers = #tpu.dot_dimension_numbers<[1], [0], [0], [1], [0, 0, 1, 1], [], []>} : vector<8x512xbf16>, vector<512x128xbf16>, vector<8x128xf32> -> vector<8x128xf32>
    %9 = arith.addf %3, %8 : vector<8x128xf32>
    %c0_8 = arith.constant 0 : index
    %c0_9 = arith.constant 0 : index
    %10 = vector.load %arg7[%c0_8, %c0_9] : memref<8x128xf32, #tpu.memory_space<vmem>>, vector<8x128xf32>
    tpu.vector_store %arg7[%c0_8, %c0_9], %9 {strides = array<i32>} : memref<8x128xf32, #tpu.memory_space<vmem>>, vector<8x128xf32>,
    %c0_i32_10 = arith.constant 0 : i32
    %11 = arith.cmpi eq, %arg2, %c0_i32_10 : i32
    %12 = arith.extui %11 : i1 to i32
    %c0_i32_11 = arith.constant 0 : i32
    %13 = arith.cmpi ne, %12, %c0_i32_11 : i32
    scf.if %13 {
      %c0_12 = arith.constant 0 : index
      %c0_13 = arith.constant 0 : index
      %14 = vector.load %arg7[%c0_12, %c0_13] : memref<8x128xf32, #tpu.memory_space<vmem>>, vector<8x128xf32>
      %c0_14 = arith.constant 0 : index
      %c0_15 = arith.constant 0 : index
      %15 = vector.load %arg5[%c0_14, %c0_15] : memref<1x128xf32, #tpu.memory_space<vmem>>, vector<1x128xf32>
      %16 = vector.broadcast %15 : vector<1x128xf32> to vector<8x128xf32>
      %17 = arith.addf %14, %16 : vector<8x128xf32>
      %c0_16 = arith.constant 0 : index
      %c0_17 = arith.constant 0 : index
      %18 = vector.load %arg6[%c0_16, %c0_17] : memref<8x128xf32, #tpu.memory_space<vmem>>, vector<8x128xf32>
      tpu.vector_store %arg6[%c0_16, %c0_17], %17 {strides = array<i32>} : memref<8x128xf32, #tpu.memory_space<vmem>>, vector<8x128xf32>,
    } else {
    }
    return
  }
  func.func @transform_0(%arg0: i32, %arg1: i32, %arg2: i32) -> (i32, i32, i32) {
    %c0_i32 = arith.constant 0 : i32
    %c0_i32_0 = arith.constant 0 : i32
    return %arg2, %arg0, %c0_i32 : i32, i32, i32
  }
  func.func @transform_1(%arg0: i32, %arg1: i32, %arg2: i32) -> (i32, i32, i32) {
    %c0_i32 = arith.constant 0 : i32
    %c0_i32_0 = arith.constant 0 : i32
    return %arg2, %c0_i32, %arg1 : i32, i32, i32
  }
  func.func @transform_2(%arg0: i32, %arg1: i32, %arg2: i32) -> (i32, i32) {
    %c0_i32 = arith.constant 0 : i32
    %c0_i32_0 = arith.constant 0 : i32
    return %c0_i32, %arg1 : i32, i32
  }
  func.func @transform_3(%arg0: i32, %arg1: i32, %arg2: i32) -> (i32, i32) {
    %c0_i32 = arith.constant 0 : i32
    return %arg0, %arg1 : i32, i32
  }
}

</mosaic_0001>

<bundles_post_ra>
// kernel: resnet34_forward.39
= control target key start
LH: loop header
LB: loop body
LE: loop exit
PB: predicated region body
PF: predicated region fallthrough
CT: control target
= control target key end

     0   :  { %s1390_s12 = smov 0   ;;  %s1392_s13 = smov 0   ;;  %s1654_s0 = inlined_call_operand.vmem [shape: bf16[49,512,3], index: 0, kind: input, shape index: {}]   ;;  %s1655_s1 = inlined_call_operand.vmem [shape: bf16[49,3,64], index: 1, kind: input, shape index: {}]   ;;  %s1656_s2 = inlined_call_operand.vmem [shape: f32[1,64], index: 2, kind: input, shape index: {}]   ;;  %s1657_s3 = inlined_call_operand.vmem [shape: bf16[512,64], index: 3, kind: output, shape index: {}]  }
   0x1   :  { %s1394_s14 = smov 0   ;;  %s1396_s15 = smov 0  }
   0x2   :  { %s1398_s16 = smov 0  }
   0x3 LB: > { %s25_s17 = sadd.s32 1, %s1358_s14  ;;  %s32_s18 = sadd.s32 1, %s1362_s15  ;;  %s1366_s16 = sphi %s1398_s16, %s13_s16   ;;  %s1362_s15 = sphi %s1396_s15, %s1661_s15   ;;  %s1358_s14 = sphi %s1394_s14, %s1660_s14   ;;  %s1354_s13 = sphi %s1392_s13, %s1659_s13   ;;  %s1350_s12 = sphi %s1390_s12, %s1658_s12  }
   0x4   : > { %p26_p0 = scmp.ge.s32.totalorder %s25_s17, 49  ;;  %p1109_p1 = scmp.ge.s32.totalorder %s1366_s16, 1 }
   0x5   : > { %p187_p2 = scmp.lt.s32.totalorder %s1366_s16, 99 }
   0x6   : > { %s1663_s17 = smov (%p26_p0, %s25_s17), 0  ;;  %s1665_s18 = smov (!%p26_p0, %s32_s18), %s1362_s15 }
   0x7   : > { %p188_p3 = pnand %p1109_p1, %p187_p2  ;;  %p34_p4 = scmp.ge.s32.totalorder %s1665_s18, 2 }
   0x8   : > { %s1110_s19 = sshll.u32 (!%p188_p3), %s1354_s13, 5  ;;  %p229_p5 = scmp.lt.s32.totalorder (!%p188_p3), %s1350_s12, 48 }
   0x9   : > { %s1667_s18 = smov (%p34_p4, %s1665_s18), 0  ;;  %191 = sbr.rel (%p188_p3) target bundleno = 304 (0x130), region = 32 }
   0xa   : > { %p231_p6 = scmp.lt.s32.totalorder (!%p188_p3), %s1110_s19, 63  ;;  %p1116_p7 = scmp.ne.s32.totalorder (!%p188_p3), %s1350_s12, 0 }
  0x10   : > { %s230_s20 = scalar_select %p229_p5, %s1350_s12, 48 }
  0x11   : > { %s1669_s19 = smov (!%p231_p6, %s1110_s19), 63  ;;  %261 = sbr.rel (%p1116_p7) target bundleno = 35 (0x23), region = 36 }
  0x12   : > { %s1111_s21 = sshll.u32 %s230_s20, 6  ;;  %s1113_s22 = sshll.u32 %s230_s20, 1  ;;  %vm262_vm0 = vcmask (!%p1116_p7), 523264   ;;  %v1368_v0 = vmov (!%p1116_p7), 0.0  }
  0x13   : > { %s234_s23 = sadd.s32 %s1111_s21, %s1669_s19  ;;  %s1427_s26 = scalar_lea.vmem %s1655_s1, %s1113_s22  ;;  %263 = vst.msk [vmem:[#allocation2] sm:$0xff] (!%p1116_p7), %vm262_vm0, %v1368_v0  ;;  %264 = vst.msk [vmem:[#allocation2 + $0x8] sm:$0xff] (!%p1116_p7), %vm262_vm0, %v1368_v0 }
  0x14   : > { %s1112_s27 = sshll.u32 %s234_s23, 2  ;;  %s1115_s28 = sshll.u32 %s1669_s19, 2  ;;  %265 = vst.msk [vmem:[#allocation2 + $0x10] sm:$0xff] (!%p1116_p7), %vm262_vm0, %v1368_v0  ;;  %266 = vst.msk [vmem:[#allocation2 + $0x18] sm:$0xff] (!%p1116_p7), %vm262_vm0, %v1368_v0 }
  0x15   : > { %s1432_s4 = scalar_lea.vmem %s1654_s0, %s1112_s27  ;;  %s1437_s7 = scalar_lea.vmem %s1657_s3, %s1115_s28  ;;  %267 = vst.msk [vmem:[#allocation2 + $0x20] sm:$0xff] (!%p1116_p7), %vm262_vm0, %v1368_v0  ;;  %268 = vst.msk [vmem:[#allocation2 + $0x28] sm:$0xff] (!%p1116_p7), %vm262_vm0, %v1368_v0 }
  0x16   : > { %269 = vst.msk [vmem:[#allocation2 + $0x30] sm:$0xff] (!%p1116_p7), %vm262_vm0, %v1368_v0  ;;  %270 = vst.msk [vmem:[#allocation2 + $0x38] sm:$0xff] (!%p1116_p7), %vm262_vm0, %v1368_v0 }
  0x17   : > { %271 = vst.msk [vmem:[#allocation2 + $0x40] sm:$0xff] (!%p1116_p7), %vm262_vm0, %v1368_v0  ;;  %272 = vst.msk [vmem:[#allocation2 + $0x48] sm:$0xff] (!%p1116_p7), %vm262_vm0, %v1368_v0 }
  0x18   : > { %273 = vst.msk [vmem:[#allocation2 + $0x50] sm:$0xff] %vm262_vm0, %v1368_v0  ;;  %274 = vst.msk [vmem:[#allocation2 + $0x58] sm:$0xff] %vm262_vm0, %v1368_v0 }
  0x19   : > { %275 = vst.msk [vmem:[#allocation2 + $0x60] sm:$0xff] %vm262_vm0, %v1368_v0  ;;  %276 = vst.msk [vmem:[#allocation2 + $0x68] sm:$0xff] %vm262_vm0, %v1368_v0 }
  0x1a   : > { %277 = vst.msk [vmem:[#allocation2 + $0x70] sm:$0xff] %vm262_vm0, %v1368_v0  ;;  %278 = vst.msk [vmem:[#allocation2 + $0x78] sm:$0xff] %vm262_vm0, %v1368_v0 }
  0x1b   : > { %279 = vst.msk [vmem:[#allocation2 + $0x80] sm:$0xff] %vm262_vm0, %v1368_v0  ;;  %280 = vst.msk [vmem:[#allocation2 + $0x88] sm:$0xff] %vm262_vm0, %v1368_v0 }
  0x1c   : > { %281 = vst.msk [vmem:[#allocation2 + $0x90] sm:$0xff] %vm262_vm0, %v1368_v0  ;;  %282 = vst.msk [vmem:[#allocation2 + $0x98] sm:$0xff] %vm262_vm0, %v1368_v0 }
  0x1d   : > { %283 = vst.msk [vmem:[#allocation2 + $0xa0] sm:$0xff] %vm262_vm0, %v1368_v0  ;;  %284 = vst.msk [vmem:[#allocation2 + $0xa8] sm:$0xff] %vm262_vm0, %v1368_v0 }
  0x1e   : > { %285 = vst.msk [vmem:[#allocation2 + $0xb0] sm:$0xff] %vm262_vm0, %v1368_v0  ;;  %286 = vst.msk [vmem:[#allocation2 + $0xb8] sm:$0xff] %vm262_vm0, %v1368_v0 }
  0x1f   : > { %287 = vst.msk [vmem:[#allocation2 + $0xc0] sm:$0xff] %vm262_vm0, %v1368_v0  ;;  %288 = vst.msk [vmem:[#allocation2 + $0xc8] sm:$0xff] %vm262_vm0, %v1368_v0 }
  0x20   : > { %289 = vst.msk [vmem:[#allocation2 + $0xd0] sm:$0xff] %vm262_vm0, %v1368_v0  ;;  %290 = vst.msk [vmem:[#allocation2 + $0xd8] sm:$0xff] %vm262_vm0, %v1368_v0 }
  0x21   : > { %291 = vst.msk [vmem:[#allocation2 + $0xe0] sm:$0xff] %vm262_vm0, %v1368_v0  ;;  %292 = vst.msk [vmem:[#allocation2 + $0xe8] sm:$0xff] %vm262_vm0, %v1368_v0 }
  0x22   : > { %293 = vst.msk [vmem:[#allocation2 + $0xf0] sm:$0xff] %vm262_vm0, %v1368_v0  ;;  %294 = vst.msk [vmem:[#allocation2 + $0xf8] sm:$0xff] %vm262_vm0, %v1368_v0 }
  0x23 PF: > { %v359_v1 = vld [vmem:[%s1427_s26] sm:$0x3]  ;;  %vm489_vm1 = vcmask 1040384   ;;  %vm490_vm2 = vcmask 1041408   ;;  %v1369_v3 = vmov 65535   ;;  %vm440_vm3 = vcmask 23552  }
  0x24   : > { %v1312_v2 = vld [vmem:[%s1432_s4] sm:$0xff]   ;;  %v491_v4 = vsel %vm489_vm1, 4294967295, %v1369_v3  ;;  %v1314_v8 = vld [vmem:[%s1432_s4 + $0x8] sm:$0xff]   ;;  %v1316_v10 = vld [vmem:[%s1432_s4 + $0x10] sm:$0xff]   ;;  %vm689_vm4 = vcmask 523264   ;;  %p1149_p8 = scmp.ne.s32.totalorder %s1350_s12, 48 }
  0x25   : > { %v492_v5 = vsel %vm490_vm2, %v491_v4, 0  ;;  %1236 = vmatprep.mubr.msk.bf16.mxu0 %vm440_vm3, %v1312_v2  ;;  %v1313_v6 = vld [vmem:[%s1432_s4 + $0x40] sm:$0xff]   ;;  %v1315_v9 = vld [vmem:[%s1432_s4 + $0x48] sm:$0xff]   ;;  %v1317_v11 = vld [vmem:[%s1432_s4 + $0x50] sm:$0xff]   ;;  %vm957_vm5 = vcmask (!%p1149_p8), 519168  }
  0x26   : > { %v494_v7 = vand.u32 %v492_v5, %v359_v1  ;;  %1252 = vmatprep.mubr.msk.bf16.mxu1 %vm440_vm3, %v1313_v6  ;;  %v1318_v12 = vld [vmem:[%s1432_s4 + $0x18] sm:$0xff]   ;;  %v1320_v14 = vld [vmem:[%s1432_s4 + $0x20] sm:$0xff]   ;;  %v1322_v16 = vld [vmem:[%s1432_s4 + $0x28] sm:$0xff]  }
  0x27   : > { %v1319_v13 = vld [vmem:[%s1432_s4 + $0x58] sm:$0xff]   ;;  %v1321_v15 = vld [vmem:[%s1432_s4 + $0x60] sm:$0xff]   ;;  %v1323_v17 = vld [vmem:[%s1432_s4 + $0x68] sm:$0xff]  }
  0x28   : > { %1234 = vmatprep.subr.bf16.mxu0 %v494_v7  ;;  %1268 = vmatprep.subr.bf16.mxu1 %v494_v7  ;;  %v1324_v18 = vld [vmem:[%s1432_s4 + $0x30] sm:$0xff]   ;;  %v1326_v20 = vld [vmem:[%s1432_s4 + $0x38] sm:$0xff]   ;;  %v295_v24 = vld [vmem:[#allocation2] sm:$0xff] }
  0x29   : > { %1235 = vmatpush3.bf16.msra.mxu0 %v494_v7  ;;  %1269 = vmatpush3.bf16.msra.mxu1 %v494_v7  ;;  %v1325_v19 = vld [vmem:[%s1432_s4 + $0x70] sm:$0xff]   ;;  %v1327_v21 = vld [vmem:[%s1432_s4 + $0x78] sm:$0xff]   ;;  %v311_v25 = vld [vmem:[#allocation2 + $0x80] sm:$0xff] }
  0x2a   : > { %v297_v22 = vld [vmem:[#allocation2 + $0x10] sm:$0xff]  ;;  %v298_v28 = vld [vmem:[#allocation2 + $0x18] sm:$0xff]  ;;  %v296_v34 = vld [vmem:[#allocation2 + $0x8] sm:$0xff] }
  0x2b   : > { %v313_v23 = vld [vmem:[#allocation2 + $0x90] sm:$0xff]  ;;  %v314_v29 = vld [vmem:[#allocation2 + $0x98] sm:$0xff]  ;;  %v312_v35 = vld [vmem:[#allocation2 + $0x88] sm:$0xff] }
  0x2c   : > { %1237 = vmatmul.mubr.msk.bf16.vlgmr.msra.gmra.mrb[0].mxu0 %vm440_vm3, %v1314_v8  ;;  %1253 = vmatmul.mubr.msk.bf16.vlgmr.msra.gmra.mrb[0].mxu1 %vm440_vm3, %v1315_v9  ;;  %v301_v46 = vld [vmem:[#allocation2 + $0x30] sm:$0xff]  ;;  %v299_v48 = vld [vmem:[#allocation2 + $0x20] sm:$0xff]  ;;  %v302_v52 = vld [vmem:[#allocation2 + $0x38] sm:$0xff] }
  0x2d   : > { %1240 = vmatprep.mubr.msk.bf16.mxu0 %vm440_vm3, %v1316_v10  ;;  %1256 = vmatprep.mubr.msk.bf16.mxu1 %vm440_vm3, %v1317_v11  ;;  %v317_v47 = vld [vmem:[#allocation2 + $0xb0] sm:$0xff]  ;;  %v315_v49 = vld [vmem:[#allocation2 + $0xa0] sm:$0xff]  ;;  %v318_v53 = vld [vmem:[#allocation2 + $0xb8] sm:$0xff] }
  0x2e   : > { %v300_v58 = vld [vmem:[#allocation2 + $0x28] sm:$0xff]  ;;  %v305_v6 = vld [vmem:[#allocation2 + $0x50] sm:$0xff]  ;;  %v303_v8 = vld [vmem:[#allocation2 + $0x40] sm:$0xff] }
  0x2f   : > { %v316_v59 = vld [vmem:[#allocation2 + $0xa8] sm:$0xff]  ;;  %v321_v7 = vld [vmem:[#allocation2 + $0xd0] sm:$0xff]  ;;  %v319_v9 = vld [vmem:[#allocation2 + $0xc0] sm:$0xff] }
  0x34   : > { %1241 = vmatmul.mubr.msk.bf16.gmra.mrb[4].mxu0 %vm440_vm3, %v1318_v12  ;;  %1257 = vmatmul.mubr.msk.bf16.gmra.mrb[4].mxu1 %vm440_vm3, %v1319_v13  ;;  %v306_v12 = vld [vmem:[#allocation2 + $0x58] sm:$0xff] }
  0x35   : > { %1244 = vmatprep.mubr.msk.bf16.mxu0 %vm440_vm3, %v1320_v14  ;;  %1260 = vmatprep.mubr.msk.bf16.mxu1 %vm440_vm3, %v1321_v15  ;;  %v322_v13 = vld [vmem:[#allocation2 + $0xd8] sm:$0xff] }
  0x3c   : > { %1245 = vmatmul.mubr.msk.bf16.gmra.mrb[8].mxu0 %vm440_vm3, %v1322_v16  ;;  %1261 = vmatmul.mubr.msk.bf16.gmra.mrb[8].mxu1 %vm440_vm3, %v1323_v17 }
  0x3d   : > { %1248 = vmatprep.mubr.msk.bf16.mxu0 %vm440_vm3, %v1324_v18  ;;  %1264 = vmatprep.mubr.msk.bf16.mxu1 %vm440_vm3, %v1325_v19  ;;  %v304_v18 = vld [vmem:[#allocation2 + $0x48] sm:$0xff] }
  0x3e   : > { %v320_v19 = vld [vmem:[#allocation2 + $0xc8] sm:$0xff] }
  0x44   : > { %1249 = vmatmul.mubr.msk.bf16.gmra.mrb[12].mxu0 %vm440_vm3, %v1326_v20  ;;  %1265 = vmatmul.mubr.msk.bf16.gmra.mrb[12].mxu1 %vm440_vm3, %v1327_v21 }
  0xff   : > { %v1238_v26 = vpop.f32.mrb[0].mxu0  ;;  %v1254_v27 = vpop.f32.mrb[0].mxu1 }
 0x100   : > { %v659_v30 = vadd.f32 %v1238_v26, %v297_v22  ;;  %v675_v31 = vadd.f32 %v1254_v27, %v313_v23  ;;  %v530_v32 = vpop.f32.mrb[1].mxu0  ;;  %v594_v33 = vpop.f32.mrb[1].mxu1 }
 0x101   : > { %v657_v36 = vadd.f32 %v530_v32, %v295_v24  ;;  %v673_v37 = vadd.f32 %v594_v33, %v311_v25  ;;  %v1239_v38 = vpop.f32.mrb[2].mxu0  ;;  %v1255_v39 = vpop.f32.mrb[2].mxu1  ;;  %v307_v32 = vld [vmem:[#allocation2 + $0x60] sm:$0xff] }
 0x102   : > { %692 = vst.msk [vmem:[#allocation2 + $0x10] sm:$0xff] %vm689_vm4, %v659_v30  ;;  %708 = vst.msk [vmem:[#allocation2 + $0x90] sm:$0xff] %vm689_vm4, %v675_v31  ;;  %v660_v40 = vadd.f32 %v1239_v38, %v298_v28  ;;  %v676_v41 = vadd.f32 %v1255_v39, %v314_v29  ;;  %v533_v42 = vpop.f32.mrb[3].mxu0  ;;  %v597_v43 = vpop.f32.mrb[3].mxu1  ;;  %v309_v30 = vld [vmem:[#allocation2 + $0x70] sm:$0xff]  ;;  %v323_v33 = vld [vmem:[#allocation2 + $0xe0] sm:$0xff] }
 0x103   : > { %690 = vst.msk [vmem:[#allocation2] sm:$0xff] %vm689_vm4, %v657_v36  ;;  %706 = vst.msk [vmem:[#allocation2 + $0x80] sm:$0xff] %vm689_vm4, %v673_v37  ;;  %v658_v44 = vadd.f32 %v533_v42, %v296_v34  ;;  %v674_v45 = vadd.f32 %v597_v43, %v312_v35  ;;  %v325_v31 = vld [vmem:[#allocation2 + $0xf0] sm:$0xff]  ;;  %v310_v36 = vld [vmem:[#allocation2 + $0x78] sm:$0xff] }
 0x104   : > { %693 = vst.msk [vmem:[#allocation2 + $0x18] sm:$0xff] %vm689_vm4, %v660_v40  ;;  %709 = vst.msk [vmem:[#allocation2 + $0x98] sm:$0xff] %vm689_vm4, %v676_v41  ;;  %v326_v37 = vld [vmem:[#allocation2 + $0xf8] sm:$0xff]  ;;  %v308_v42 = vld [vmem:[#allocation2 + $0x68] sm:$0xff] }
 0x105   : > { %691 = vst.msk [vmem:[#allocation2 + $0x8] sm:$0xff] %vm689_vm4, %v658_v44  ;;  %707 = vst.msk [vmem:[#allocation2 + $0x88] sm:$0xff] %vm689_vm4, %v674_v45  ;;  %v324_v43 = vld [vmem:[#allocation2 + $0xe8] sm:$0xff] }
 0x107   : > { %v1242_v50 = vpop.f32.mrb[4].mxu0  ;;  %v1258_v51 = vpop.f32.mrb[4].mxu1 }
 0x108   : > { %v663_v54 = vadd.f32 %v1242_v50, %v301_v46  ;;  %v679_v55 = vadd.f32 %v1258_v51, %v317_v47  ;;  %v546_v56 = vpop.f32.mrb[5].mxu0  ;;  %v610_v57 = vpop.f32.mrb[5].mxu1 }
 0x109   : > { %v661_v60 = vadd.f32 %v546_v56, %v299_v48  ;;  %v677_v61 = vadd.f32 %v610_v57, %v315_v49  ;;  %v1243_v62 = vpop.f32.mrb[6].mxu0  ;;  %v1259_v63 = vpop.f32.mrb[6].mxu1 }
 0x10a   : > { %696 = vst.msk [vmem:[#allocation2 + $0x30] sm:$0xff] %vm689_vm4, %v663_v54  ;;  %712 = vst.msk [vmem:[#allocation2 + $0xb0] sm:$0xff] %vm689_vm4, %v679_v55  ;;  %v664_v0 = vadd.f32 %v1243_v62, %v302_v52  ;;  %v680_v1 = vadd.f32 %v1259_v63, %v318_v53  ;;  %v549_v2 = vpop.f32.mrb[7].mxu0  ;;  %v613_v3 = vpop.f32.mrb[7].mxu1  ;;  %v726_v54 = vld [vmem:[#allocation2] sm:$0xff] (!%p1149_p8) }
 0x10b   : > { %694 = vst.msk [vmem:[#allocation2 + $0x20] sm:$0xff] %vm689_vm4, %v661_v60  ;;  %710 = vst.msk [vmem:[#allocation2 + $0xa0] sm:$0xff] %vm689_vm4, %v677_v61  ;;  %v662_v4 = vadd.f32 %v549_v2, %v300_v58  ;;  %v678_v5 = vadd.f32 %v613_v3, %v316_v59  ;;  %v1541_v55 = vld [vmem:[%s1656_s2] ss:$0 sm:$0xff] (!%p1149_p8)  ;;  %v728_v59 = vld [vmem:[#allocation2 + $0x10] sm:$0xff] (!%p1149_p8) }
 0x10c   : > { %697 = vst.msk [vmem:[#allocation2 + $0x38] sm:$0xff] %vm689_vm4, %v664_v0  ;;  %713 = vst.msk [vmem:[#allocation2 + $0xb8] sm:$0xff] %vm689_vm4, %v680_v1  ;;  %v727_v56 = vld [vmem:[#allocation2 + $0x8] sm:$0xff] (!%p1149_p8)  ;;  %v765_v57 = vadd.f32 (!%p1149_p8), %v1541_v55, %v726_v54  ;;  %v729_v60 = vld [vmem:[#allocation2 + $0x18] sm:$0xff] (!%p1149_p8)  ;;  %v767_v62 = vadd.f32 (!%p1149_p8), %v1541_v55, %v728_v59 }
 0x10d   : > { %695 = vst.msk [vmem:[#allocation2 + $0x28] sm:$0xff] %vm689_vm4, %v662_v4  ;;  %711 = vst.msk [vmem:[#allocation2 + $0xa8] sm:$0xff] %vm689_vm4, %v678_v5  ;;  %v766_v58 = vadd.f32 (!%p1149_p8), %v1541_v55, %v727_v56  ;;  %v768_v63 = vadd.f32 (!%p1149_p8), %v1541_v55, %v729_v60 }
 0x10e   : > { %v797_v4 = vmax.f32 (!%p1149_p8), %v765_v57, 0.0 }
 0x10f   : > { %v1246_v10 = vpop.f32.mrb[8].mxu0  ;;  %v1262_v11 = vpop.f32.mrb[8].mxu1  ;;  %v798_v5 = vmax.f32 (!%p1149_p8), %v766_v58, 0.0 }
 0x110   : > { %v667_v14 = vadd.f32 %v1246_v10, %v305_v6  ;;  %v683_v15 = vadd.f32 %v1262_v11, %v321_v7  ;;  %v562_v16 = vpop.f32.mrb[9].mxu0  ;;  %v626_v17 = vpop.f32.mrb[9].mxu1 }
 0x111   : > { %v665_v20 = vadd.f32 %v562_v16, %v303_v8  ;;  %v681_v21 = vadd.f32 %v626_v17, %v319_v9  ;;  %v1247_v22 = vpop.f32.mrb[10].mxu0  ;;  %v1263_v23 = vpop.f32.mrb[10].mxu1  ;;  %v732_v2 = vld [vmem:[#allocation2 + $0x30] sm:$0xff] (!%p1149_p8)  ;;  %v799_v8 = vmax.f32 (!%p1149_p8), %v767_v62, 0.0  ;;  %v800_v9 = vmax.f32 (!%p1149_p8), %v768_v63, 0.0 }
 0x112   : > { %700 = vst.msk [vmem:[#allocation2 + $0x50] sm:$0xff] %vm689_vm4, %v667_v14  ;;  %716 = vst.msk [vmem:[#allocation2 + $0xd0] sm:$0xff] %vm689_vm4, %v683_v15  ;;  %v668_v24 = vadd.f32 %v1247_v22, %v306_v12  ;;  %v684_v25 = vadd.f32 %v1263_v23, %v322_v13  ;;  %v565_v26 = vpop.f32.mrb[11].mxu0  ;;  %v629_v27 = vpop.f32.mrb[11].mxu1  ;;  %v730_v61 = vld [vmem:[#allocation2 + $0x20] sm:$0xff] (!%p1149_p8)  ;;  %v771_v7 = vadd.f32 (!%p1149_p8), %v1541_v55, %v732_v2  ;;  %v748_v59 = vld [vmem:[#allocation2 + $0xb0] sm:$0xff] (!%p1149_p8) }
 0x113   : > { %698 = vst.msk [vmem:[#allocation2 + $0x40] sm:$0xff] %vm689_vm4, %v665_v20  ;;  %714 = vst.msk [vmem:[#allocation2 + $0xc0] sm:$0xff] %vm689_vm4, %v681_v21  ;;  %v666_v28 = vadd.f32 %v565_v26, %v304_v18  ;;  %v682_v29 = vadd.f32 %v629_v27, %v320_v19  ;;  %v769_v0 = vadd.f32 (!%p1149_p8), %v1541_v55, %v730_v61  ;;  %v733_v3 = vld [vmem:[#allocation2 + $0x38] sm:$0xff] (!%p1149_p8) }
 0x114   : > { %701 = vst.msk [vmem:[#allocation2 + $0x58] sm:$0xff] %vm689_vm4, %v668_v24  ;;  %717 = vst.msk [vmem:[#allocation2 + $0xd8] sm:$0xff] %vm689_vm4, %v684_v25  ;;  %v731_v1 = vld [vmem:[#allocation2 + $0x28] sm:$0xff] (!%p1149_p8)  ;;  %v772_v11 = vadd.f32 (!%p1149_p8), %v1541_v55, %v733_v3  ;;  %v1185_v14 = vpack.c.bf16 (!%p1149_p8), %v797_v4, %v797_v4  ;;  %v1186_v15 = vpack.c.bf16 (!%p1149_p8), %v798_v5, %v798_v5  ;;  %v803_v17 = vmax.f32 (!%p1149_p8), %v771_v7, 0.0 }
 0x115   : > { %699 = vst.msk [vmem:[#allocation2 + $0x48] sm:$0xff] %vm689_vm4, %v666_v28  ;;  %715 = vst.msk [vmem:[#allocation2 + $0xc8] sm:$0xff] %vm689_vm4, %v682_v29  ;;  %v770_v6 = vadd.f32 (!%p1149_p8), %v1541_v55, %v731_v1  ;;  %v801_v10 = vmax.f32 (!%p1149_p8), %v769_v0, 0.0  ;;  %v1187_v21 = vpack.c.bf16 (!%p1149_p8), %v799_v8, %v799_v8  ;;  %v1188_v22 = vpack.c.bf16 (!%p1149_p8), %v800_v9, %v800_v9  ;;  %v747_v58 = vld [vmem:[#allocation2 + $0xa8] sm:$0xff] (!%p1149_p8)  ;;  %v749_v0 = vld [vmem:[#allocation2 + $0xb8] sm:$0xff] (!%p1149_p8) }
 0x116   : > { %v804_v24 = vmax.f32 (!%p1149_p8), %v772_v11, 0.0  ;;  %958 = vst.msk [vmem:[%s1437_s7] sm:$0xf] (!%p1149_p8), %vm957_vm5, %v1185_v14  ;;  %959 = vst.msk [vmem:[%s1437_s7 + $0x4] sm:$0xf] (!%p1149_p8), %vm957_vm5, %v1186_v15  ;;  %v1191_v28 = vpack.c.bf16 (!%p1149_p8), %v803_v17, %v803_v17  ;;  %v786_v7 = vadd.f32 (!%p1149_p8), %v1541_v55, %v747_v58  ;;  %v787_v8 = vadd.f32 (!%p1149_p8), %v1541_v55, %v748_v59 }
 0x117   : > { %v1250_v34 = vpop.f32.mrb[12].mxu0  ;;  %v1266_v35 = vpop.f32.mrb[12].mxu1  ;;  %725 = sbr.rel (%p1149_p8) target bundleno = 304 (0x130), region = 40  ;;  %v802_v16 = vmax.f32 (!%p1149_p8), %v770_v6, 0.0  ;;  %v1189_v23 = vpack.c.bf16 (!%p1149_p8), %v801_v10, %v801_v10  ;;  %960 = vst.msk [vmem:[%s1437_s7 + $0x8] sm:$0xf] (!%p1149_p8), %vm957_vm5, %v1187_v21 }
 0x118   : > { %v671_v38 = vadd.f32 %v1250_v34, %v309_v30  ;;  %v687_v39 = vadd.f32 %v1266_v35, %v325_v31  ;;  %v578_v40 = vpop.f32.mrb[13].mxu0  ;;  %v642_v41 = vpop.f32.mrb[13].mxu1  ;;  %961 = vst.msk [vmem:[%s1437_s7 + $0xc] sm:$0xf] (!%p1149_p8), %vm957_vm5, %v1188_v22  ;;  %964 = vst.msk [vmem:[%s1437_s7 + $0x18] sm:$0xf] (!%p1149_p8), %vm957_vm5, %v1191_v28 }
 0x119   : > { %v669_v44 = vadd.f32 %v578_v40, %v307_v32  ;;  %v685_v45 = vadd.f32 %v642_v41, %v323_v33  ;;  %v1251_v46 = vpop.f32.mrb[14].mxu0  ;;  %v1267_v47 = vpop.f32.mrb[14].mxu1  ;;  %v736_v18 = vld [vmem:[#allocation2 + $0x50] sm:$0xff] (!%p1149_p8)  ;;  %v1190_v27 = vpack.c.bf16 (!%p1149_p8), %v802_v16, %v802_v16  ;;  %962 = vst.msk [vmem:[%s1437_s7 + $0x10] sm:$0xf] (!%p1149_p8), %vm957_vm5, %v1189_v23  ;;  %v1192_v32 = vpack.c.bf16 (!%p1149_p8), %v804_v24, %v804_v24 }
 0x11a   : > { %704 = vst.msk [vmem:[#allocation2 + $0x70] sm:$0xff] %vm689_vm4, %v671_v38  ;;  %720 = vst.msk [vmem:[#allocation2 + $0xf0] sm:$0xff] %vm689_vm4, %v687_v39  ;;  %v672_v48 = vadd.f32 %v1251_v46, %v310_v36  ;;  %v688_v49 = vadd.f32 %v1267_v47, %v326_v37  ;;  %v581_v50 = vpop.f32.mrb[15].mxu0  ;;  %v645_v51 = vpop.f32.mrb[15].mxu1  ;;  %v734_v12 = vld [vmem:[#allocation2 + $0x40] sm:$0xff] (!%p1149_p8)  ;;  %v775_v33 = vadd.f32 (!%p1149_p8), %v1541_v55, %v736_v18  ;;  %v818_v17 = vmax.f32 (!%p1149_p8), %v786_v7, 0.0 }
 0x11b   : > { %702 = vst.msk [vmem:[#allocation2 + $0x60] sm:$0xff] %vm689_vm4, %v669_v44  ;;  %718 = vst.msk [vmem:[#allocation2 + $0xe0] sm:$0xff] %vm689_vm4, %v685_v45  ;;  %v670_v52 = vadd.f32 %v581_v50, %v308_v42  ;;  %v686_v53 = vadd.f32 %v645_v51, %v324_v43  ;;  %v737_v19 = vld [vmem:[#allocation2 + $0x58] sm:$0xff] (!%p1149_p8)  ;;  %v773_v29 = vadd.f32 (!%p1149_p8), %v1541_v55, %v734_v12  ;;  %v742_v44 = vld [vmem:[#allocation2 + $0x80] sm:$0xff] (!%p1149_p8)  ;;  %v819_v18 = vmax.f32 (!%p1149_p8), %v787_v8, 0.0 }
 0x11c   : > { %705 = vst.msk [vmem:[#allocation2 + $0x78] sm:$0xff] %vm689_vm4, %v672_v48  ;;  %721 = vst.msk [vmem:[#allocation2 + $0xf8] sm:$0xff] %vm689_vm4, %v688_v49  ;;  %v735_v13 = vld [vmem:[#allocation2 + $0x48] sm:$0xff] (!%p1149_p8)  ;;  %v776_v34 = vadd.f32 (!%p1149_p8), %v1541_v55, %v737_v19  ;;  %v807_v40 = vmax.f32 (!%p1149_p8), %v775_v33, 0.0  ;;  %v744_v50 = vld [vmem:[#allocation2 + $0x90] sm:$0xff] (!%p1149_p8)  ;;  %v781_v62 = vadd.f32 (!%p1149_p8), %v1541_v55, %v742_v44  ;;  %v788_v12 = vadd.f32 (!%p1149_p8), %v1541_v55, %v749_v0 }
 0x11d   : > { %703 = vst.msk [vmem:[#allocation2 + $0x68] sm:$0xff] %vm689_vm4, %v670_v52  ;;  %719 = vst.msk [vmem:[#allocation2 + $0xe8] sm:$0xff] %vm689_vm4, %v686_v53  ;;  %v774_v30 = vadd.f32 (!%p1149_p8), %v1541_v55, %v735_v13  ;;  %v805_v36 = vmax.f32 (!%p1149_p8), %v773_v29, 0.0  ;;  %v743_v45 = vld [vmem:[#allocation2 + $0x88] sm:$0xff] (!%p1149_p8)  ;;  %v745_v51 = vld [vmem:[#allocation2 + $0x98] sm:$0xff] (!%p1149_p8)  ;;  %v783_v2 = vadd.f32 (!%p1149_p8), %v1541_v55, %v744_v50  ;;  %v1206_v28 = vpack.c.bf16 (!%p1149_p8), %v818_v17, %v818_v17 }
 0x11e   : > { %963 = vst.msk [vmem:[%s1437_s7 + $0x14] sm:$0xf] %vm957_vm5, %v1190_v27  ;;  %965 = vst.msk [vmem:[%s1437_s7 + $0x1c] sm:$0xf] %vm957_vm5, %v1192_v32  ;;  %v808_v41 = vmax.f32 %v776_v34, 0.0  ;;  %v746_v52 = vld [vmem:[#allocation2 + $0xa0] sm:$0xff]  ;;  %v1195_v53 = vpack.c.bf16 %v807_v40, %v807_v40  ;;  %v782_v63 = vadd.f32 %v1541_v55, %v743_v45  ;;  %v784_v3 = vadd.f32 %v1541_v55, %v745_v51 }
 0x11f   : > { %v806_v37 = vmax.f32 %v774_v30, 0.0  ;;  %v1193_v46 = vpack.c.bf16 %v805_v36, %v805_v36  ;;  %v785_v4 = vadd.f32 %v1541_v55, %v746_v52  ;;  %v813_v5 = vmax.f32 %v781_v62, 0.0  ;;  %v750_v13 = vld [vmem:[#allocation2 + $0xc0] sm:$0xff]  ;;  %v751_v14 = vld [vmem:[#allocation2 + $0xc8] sm:$0xff]  ;;  %v752_v19 = vld [vmem:[#allocation2 + $0xd0] sm:$0xff] }
 0x120   : > { %v1196_v54 = vpack.c.bf16 %v808_v41, %v808_v41  ;;  %968 = vst.msk [vmem:[%s1437_s7 + $0x28] sm:$0xf] %vm957_vm5, %v1195_v53  ;;  %v814_v6 = vmax.f32 %v782_v63, 0.0  ;;  %v815_v9 = vmax.f32 %v783_v2, 0.0  ;;  %v816_v10 = vmax.f32 %v784_v3, 0.0 }
 0x121   : > { %v740_v26 = vld [vmem:[#allocation2 + $0x70] sm:$0xff]  ;;  %v1194_v47 = vpack.c.bf16 %v806_v37, %v806_v37  ;;  %966 = vst.msk [vmem:[%s1437_s7 + $0x20] sm:$0xf] %vm957_vm5, %v1193_v46  ;;  %v817_v11 = vmax.f32 %v785_v4, 0.0  ;;  %v1201_v15 = vpack.c.bf16 %v813_v5, %v813_v5  ;;  %v1207_v29 = vpack.c.bf16 %v819_v18, %v819_v18  ;;  %979 = vst.msk [vmem:[%s1437_s7 + $0x54] sm:$0xf] %vm957_vm5, %v1206_v28 }
 0x122   : > { %v738_v20 = vld [vmem:[#allocation2 + $0x60] sm:$0xff]  ;;  %v779_v39 = vadd.f32 %v1541_v55, %v740_v26  ;;  %969 = vst.msk [vmem:[%s1437_s7 + $0x2c] sm:$0xf] %vm957_vm5, %v1196_v54  ;;  %v1202_v16 = vpack.c.bf16 %v814_v6, %v814_v6  ;;  %v1203_v22 = vpack.c.bf16 %v815_v9, %v815_v9  ;;  %v1204_v23 = vpack.c.bf16 %v816_v10, %v816_v10  ;;  %v756_v27 = vld [vmem:[#allocation2 + $0xf0] sm:$0xff] }
 0x123   : > { %v741_v31 = vld [vmem:[#allocation2 + $0x78] sm:$0xff]  ;;  %v777_v35 = vadd.f32 %v1541_v55, %v738_v20  ;;  %967 = vst.msk [vmem:[%s1437_s7 + $0x24] sm:$0xf] %vm957_vm5, %v1194_v47  ;;  %v754_v21 = vld [vmem:[#allocation2 + $0xe0] sm:$0xff]  ;;  %v1205_v24 = vpack.c.bf16 %v817_v11, %v817_v11  ;;  %974 = vst.msk [vmem:[%s1437_s7 + $0x40] sm:$0xf] %vm957_vm5, %v1201_v15  ;;  %v789_v30 = vadd.f32 %v1541_v55, %v750_v13 }
 0x124   : > { %v739_v25 = vld [vmem:[#allocation2 + $0x68] sm:$0xff]  ;;  %v780_v43 = vadd.f32 %v1541_v55, %v741_v31  ;;  %v811_v49 = vmax.f32 %v779_v39, 0.0  ;;  %v753_v20 = vld [vmem:[#allocation2 + $0xd8] sm:$0xff]  ;;  %975 = vst.msk [vmem:[%s1437_s7 + $0x44] sm:$0xf] %vm957_vm5, %v1202_v16  ;;  %v790_v31 = vadd.f32 %v1541_v55, %v751_v14  ;;  %v791_v34 = vadd.f32 %v1541_v55, %v752_v19 }
 0x125   : > { %v778_v38 = vadd.f32 %v1541_v55, %v739_v25  ;;  %v809_v42 = vmax.f32 %v777_v35, 0.0  ;;  %v820_v25 = vmax.f32 %v788_v12, 0.0  ;;  %v755_v26 = vld [vmem:[#allocation2 + $0xe8] sm:$0xff]  ;;  %v757_v32 = vld [vmem:[#allocation2 + $0xf8] sm:$0xff]  ;;  %976 = vst.msk [vmem:[%s1437_s7 + $0x48] sm:$0xf] %vm957_vm5, %v1203_v22  ;;  %v792_v35 = vadd.f32 %v1541_v55, %v753_v20 }
 0x126   : > { %v812_v57 = vmax.f32 %v780_v43, 0.0  ;;  %v1199_v61 = vpack.c.bf16 %v811_v49, %v811_v49  ;;  %977 = vst.msk [vmem:[%s1437_s7 + $0x4c] sm:$0xf] %vm957_vm5, %v1204_v23  ;;  %978 = vst.msk [vmem:[%s1437_s7 + $0x50] sm:$0xf] %vm957_vm5, %v1205_v24  ;;  %v793_v36 = vadd.f32 %v1541_v55, %v754_v21  ;;  %v821_v37 = vmax.f32 %v789_v30, 0.0 }
 0x127   : > { %v810_v48 = vmax.f32 %v778_v38, 0.0  ;;  %v1197_v56 = vpack.c.bf16 %v809_v42, %v809_v42  ;;  %v1208_v33 = vpack.c.bf16 %v820_v25, %v820_v25  ;;  %980 = vst.msk [vmem:[%s1437_s7 + $0x58] sm:$0xf] %vm957_vm5, %v1207_v29  ;;  %v822_v38 = vmax.f32 %v790_v31, 0.0 }
 0x128   : > { %v1200_v1 = vpack.c.bf16 %v812_v57, %v812_v57  ;;  %972 = vst.msk [vmem:[%s1437_s7 + $0x38] sm:$0xf] %vm957_vm5, %v1199_v61  ;;  %v794_v39 = vadd.f32 %v1541_v55, %v755_v26  ;;  %v795_v40 = vadd.f32 %v1541_v55, %v756_v27  ;;  %v823_v41 = vmax.f32 %v791_v34, 0.0 }
 0x129   : > { %v1198_v60 = vpack.c.bf16 %v810_v48, %v810_v48  ;;  %970 = vst.msk [vmem:[%s1437_s7 + $0x30] sm:$0xf] %vm957_vm5, %v1197_v56  ;;  %981 = vst.msk [vmem:[%s1437_s7 + $0x5c] sm:$0xf] %vm957_vm5, %v1208_v33  ;;  %v824_v42 = vmax.f32 %v792_v35, 0.0  ;;  %v825_v43 = vmax.f32 %v793_v36, 0.0  ;;  %v796_v44 = vadd.f32 %v1541_v55, %v757_v32 }
 0x12a   : > { %973 = vst.msk [vmem:[%s1437_s7 + $0x3c] sm:$0xf] %vm957_vm5, %v1200_v1  ;;  %v1209_v45 = vpack.c.bf16 %v821_v37, %v821_v37  ;;  %v1210_v46 = vpack.c.bf16 %v822_v38, %v822_v38  ;;  %v826_v47 = vmax.f32 %v794_v39, 0.0  ;;  %v827_v48 = vmax.f32 %v795_v40, 0.0 }
 0x12b   : > { %971 = vst.msk [vmem:[%s1437_s7 + $0x34] sm:$0xf] %vm957_vm5, %v1198_v60  ;;  %v1211_v49 = vpack.c.bf16 %v823_v41, %v823_v41  ;;  %v1212_v50 = vpack.c.bf16 %v824_v42, %v824_v42  ;;  %v1213_v51 = vpack.c.bf16 %v825_v43, %v825_v43  ;;  %v828_v52 = vmax.f32 %v796_v44, 0.0 }
 0x12c   : > { %982 = vst.msk [vmem:[%s1437_s7 + $0x60] sm:$0xf] %vm957_vm5, %v1209_v45  ;;  %983 = vst.msk [vmem:[%s1437_s7 + $0x64] sm:$0xf] %vm957_vm5, %v1210_v46  ;;  %v1214_v53 = vpack.c.bf16 %v826_v47, %v826_v47  ;;  %v1215_v54 = vpack.c.bf16 %v827_v48, %v827_v48 }
 0x12d   : > { %984 = vst.msk [vmem:[%s1437_s7 + $0x68] sm:$0xf] %vm957_vm5, %v1211_v49  ;;  %985 = vst.msk [vmem:[%s1437_s7 + $0x6c] sm:$0xf] %vm957_vm5, %v1212_v50  ;;  %v1216_v55 = vpack.c.bf16 %v828_v52, %v828_v52 }
 0x12e   : > { %986 = vst.msk [vmem:[%s1437_s7 + $0x70] sm:$0xf] %vm957_vm5, %v1213_v51  ;;  %987 = vst.msk [vmem:[%s1437_s7 + $0x74] sm:$0xf] %vm957_vm5, %v1214_v53 }
 0x12f   : > { %988 = vst.msk [vmem:[%s1437_s7 + $0x78] sm:$0xf] %vm957_vm5, %v1215_v54  ;;  %989 = vst.msk [vmem:[%s1437_s7 + $0x7c] sm:$0xf] %vm957_vm5, %v1216_v55 }
 0x130 PF: > { %s13_s16 = sadd.s32 1, %s1366_s16   ;;  %s1658_s12 = smov %s1358_s14 }
 0x131   : > { %p10_p9 = scmp.ge.s32.totalorder %s13_s16, 100   ;;  %s1659_s13 = smov %s1362_s15 }
 0x132   : > { %s1660_s14 = smov %s1663_s17  ;;  %s1661_s15 = smov %s1667_s18 }
 0x133   :  { %12 = sbr.rel (!%p10_p9) target bundleno = 3 (0x3), region = 76 }

// kernel: resnet34_forward.40
= control target key start
LH: loop header
LB: loop body
LE: loop exit
PB: predicated region body
PF: predicated region fallthrough
CT: control target
= control target key end

     0   :  { %vm153_vm0 = vcmask 519168   ;;  %s1385_s0 = inlined_call_operand.vmem [shape: bf16[9,128,64], index: 0, kind: input, shape index: {}]   ;;  %s1386_s1 = inlined_call_operand.vmem [shape: bf16[128,64], index: 1, kind: output, shape index: {}]  }
   0x1   :  { %v9_v0 = vld [vmem:[%s1385_s0] sm:$0xf]  ;;  %v10_v12 = vld [vmem:[%s1385_s0 + $0x4] sm:$0xf]  ;;  %v11_v33 = vld [vmem:[%s1385_s0 + $0x8] sm:$0xf] }
   0x2   :  { %v25_v1 = vld [vmem:[%s1385_s0 + $0x40] sm:$0xf]  ;;  %v156_v4 = vsel %vm153_vm0, %v9_v0, 4286644096  ;;  %v26_v13 = vld [vmem:[%s1385_s0 + $0x44] sm:$0xf] }
   0x3   :  { %v41_v2 = vld [vmem:[%s1385_s0 + $0x80] sm:$0xf]  ;;  %v159_v5 = vsel %vm153_vm0, %v25_v1, 4286644096  ;;  %v42_v14 = vld [vmem:[%s1385_s0 + $0x84] sm:$0xf] }
   0x4   :  { %v57_v3 = vld [vmem:[%s1385_s0 + $0xc0] sm:$0xf]  ;;  %v163_v6 = vsel %vm153_vm0, %v41_v2, 4286644096  ;;  %v161_v8 = vmax.bf16 %v159_v5, %v156_v4  ;;  %v58_v19 = vld [vmem:[%s1385_s0 + $0xc4] sm:$0xf] }
   0x5   :  { %v73_v7 = vld [vmem:[%s1385_s0 + $0x100] sm:$0xf]  ;;  %v167_v10 = vsel %vm153_vm0, %v57_v3, 4286644096  ;;  %v191_v20 = vsel %vm153_vm0, %v10_v12, 4286644096 }
   0x6   :  { %v89_v9 = vld [vmem:[%s1385_s0 + $0x140] sm:$0xf]  ;;  %v165_v11 = vmax.bf16 %v163_v6, %v161_v8  ;;  %v171_v15 = vsel %vm153_vm0, %v73_v7, 4286644096  ;;  %v194_v21 = vsel %vm153_vm0, %v26_v13, 4286644096 }
   0x7   :  { %v105_v16 = vld [vmem:[%s1385_s0 + $0x180] sm:$0xf]  ;;  %v175_v18 = vsel %vm153_vm0, %v89_v9, 4286644096  ;;  %v198_v22 = vsel %vm153_vm0, %v42_v14, 4286644096  ;;  %v196_v27 = vmax.bf16 %v194_v21, %v191_v20 }
   0x8   :  { %v169_v17 = vmax.bf16 %v167_v10, %v165_v11  ;;  %v121_v23 = vld [vmem:[%s1385_s0 + $0x1c0] sm:$0xf]  ;;  %v74_v26 = vld [vmem:[%s1385_s0 + $0x104] sm:$0xf]  ;;  %v179_v28 = vsel %vm153_vm0, %v105_v16, 4286644096 }
   0x9   :  { %v137_v24 = vld [vmem:[%s1385_s0 + $0x200] sm:$0xf]  ;;  %v90_v29 = vld [vmem:[%s1385_s0 + $0x144] sm:$0xf]  ;;  %v202_v30 = vsel %vm153_vm0, %v58_v19, 4286644096  ;;  %v200_v32 = vmax.bf16 %v198_v22, %v196_v27 }
   0xa   :  { %v173_v25 = vmax.bf16 %v171_v15, %v169_v17  ;;  %v27_v34 = vld [vmem:[%s1385_s0 + $0x48] sm:$0xf]  ;;  %v183_v36 = vsel %vm153_vm0, %v121_v23, 4286644096  ;;  %v187_v37 = vsel %vm153_vm0, %v137_v24, 4286644096 }
   0xb   :  { %v43_v35 = vld [vmem:[%s1385_s0 + $0x88] sm:$0xf]  ;;  %v206_v38 = vsel %vm153_vm0, %v74_v26, 4286644096  ;;  %v106_v40 = vld [vmem:[%s1385_s0 + $0x184] sm:$0xf]  ;;  %v204_v41 = vmax.bf16 %v202_v30, %v200_v32 }
   0xc   :  { %v177_v31 = vmax.bf16 %v175_v18, %v173_v25  ;;  %v210_v42 = vsel %vm153_vm0, %v90_v29, 4286644096  ;;  %v59_v43 = vld [vmem:[%s1385_s0 + $0xc8] sm:$0xf]  ;;  %v226_v44 = vsel %vm153_vm0, %v11_v33, 4286644096 }
   0xd   :  { %v229_v45 = vsel %vm153_vm0, %v27_v34, 4286644096  ;;  %v233_v46 = vsel %vm153_vm0, %v43_v35, 4286644096  ;;  %v122_v48 = vld [vmem:[%s1385_s0 + $0x1c4] sm:$0xf]  ;;  %v208_v50 = vmax.bf16 %v206_v38, %v204_v41 }
   0xe   :  { %v181_v39 = vmax.bf16 %v179_v28, %v177_v31  ;;  %v138_v49 = vld [vmem:[%s1385_s0 + $0x204] sm:$0xf]  ;;  %v75_v51 = vld [vmem:[%s1385_s0 + $0x108] sm:$0xf]  ;;  %v231_v52 = vmax.bf16 %v229_v45, %v226_v44  ;;  %v214_v53 = vsel %vm153_vm0, %v106_v40, 4286644096 }
   0xf   :  { %v91_v54 = vld [vmem:[%s1385_s0 + $0x148] sm:$0xf]  ;;  %v237_v55 = vsel %vm153_vm0, %v59_v43, 4286644096  ;;  %v212_v57 = vmax.bf16 %v210_v42, %v208_v50  ;;  %v12_v59 = vld [vmem:[%s1385_s0 + $0xc] sm:$0xf] }
  0x10   :  { %v185_v47 = vmax.bf16 %v183_v36, %v181_v39  ;;  %v235_v58 = vmax.bf16 %v233_v46, %v231_v52  ;;  %v28_v60 = vld [vmem:[%s1385_s0 + $0x4c] sm:$0xf]  ;;  %v218_v62 = vsel %vm153_vm0, %v122_v48, 4286644096  ;;  %v222_v63 = vsel %vm153_vm0, %v138_v49, 4286644096 }
  0x11   :  { %v44_v61 = vld [vmem:[%s1385_s0 + $0x8c] sm:$0xf]  ;;  %v241_v0 = vsel %vm153_vm0, %v75_v51, 4286644096  ;;  %v216_v1 = vmax.bf16 %v214_v53, %v212_v57  ;;  %v107_v2 = vld [vmem:[%s1385_s0 + $0x188] sm:$0xf] }
  0x12   :  { %v189_v56 = vmax.bf16 %v187_v37, %v185_v47  ;;  %v239_v3 = vmax.bf16 %v237_v55, %v235_v58  ;;  %v245_v4 = vsel %vm153_vm0, %v91_v54, 4286644096  ;;  %v60_v5 = vld [vmem:[%s1385_s0 + $0xcc] sm:$0xf]  ;;  %v261_v6 = vsel %vm153_vm0, %v12_v59, 4286644096 }
  0x13   :  { %v264_v7 = vsel %vm153_vm0, %v28_v60, 4286644096  ;;  %v268_v8 = vsel %vm153_vm0, %v44_v61, 4286644096  ;;  %v220_v9 = vmax.bf16 %v218_v62, %v216_v1  ;;  %v123_v10 = vld [vmem:[%s1385_s0 + $0x1c8] sm:$0xf] }
  0x14   :  { %715 = vst.msk [vmem:[%s1386_s1] sm:$0xf] %vm153_vm0, %v189_v56  ;;  %v139_v11 = vld [vmem:[%s1385_s0 + $0x208] sm:$0xf]  ;;  %v243_v12 = vmax.bf16 %v241_v0, %v239_v3  ;;  %v76_v13 = vld [vmem:[%s1385_s0 + $0x10c] sm:$0xf]  ;;  %v266_v14 = vmax.bf16 %v264_v7, %v261_v6 }
  0x15   :  { %v249_v15 = vsel %vm153_vm0, %v107_v2, 4286644096  ;;  %v92_v16 = vld [vmem:[%s1385_s0 + $0x14c] sm:$0xf]  ;;  %v272_v17 = vsel %vm153_vm0, %v60_v5, 4286644096  ;;  %v224_v18 = vmax.bf16 %v222_v63, %v220_v9 }
  0x16   :  { %v247_v19 = vmax.bf16 %v245_v4, %v243_v12  ;;  %v270_v20 = vmax.bf16 %v268_v8, %v266_v14  ;;  %v13_v21 = vld [vmem:[%s1385_s0 + $0x10] sm:$0xf]  ;;  %v253_v24 = vsel %vm153_vm0, %v123_v10, 4286644096  ;;  %v257_v25 = vsel %vm153_vm0, %v139_v11, 4286644096 }
  0x17   :  { %v29_v22 = vld [vmem:[%s1385_s0 + $0x50] sm:$0xf]  ;;  %v276_v26 = vsel %vm153_vm0, %v76_v13, 4286644096  ;;  %716 = vst.msk [vmem:[%s1386_s1 + $0x4] sm:$0xf] %vm153_vm0, %v224_v18 }
  0x18   :  { %v45_v23 = vld [vmem:[%s1385_s0 + $0x90] sm:$0xf]  ;;  %v251_v27 = vmax.bf16 %v249_v15, %v247_v19  ;;  %v108_v28 = vld [vmem:[%s1385_s0 + $0x18c] sm:$0xf]  ;;  %v274_v29 = vmax.bf16 %v272_v17, %v270_v20  ;;  %v280_v30 = vsel %vm153_vm0, %v92_v16, 4286644096 }
  0x19   :  { %v61_v31 = vld [vmem:[%s1385_s0 + $0xd0] sm:$0xf]  ;;  %v296_v32 = vsel %vm153_vm0, %v13_v21, 4286644096  ;;  %v299_v33 = vsel %vm153_vm0, %v29_v22, 4286644096 }
  0x1a   :  { %v303_v34 = vsel %vm153_vm0, %v45_v23, 4286644096  ;;  %v255_v35 = vmax.bf16 %v253_v24, %v251_v27  ;;  %v124_v36 = vld [vmem:[%s1385_s0 + $0x1cc] sm:$0xf]  ;;  %v278_v38 = vmax.bf16 %v276_v26, %v274_v29  ;;  %v77_v39 = vld [vmem:[%s1385_s0 + $0x110] sm:$0xf]  ;;  %v301_v40 = vmax.bf16 %v299_v33, %v296_v32 }
  0x1b   :  { %v140_v37 = vld [vmem:[%s1385_s0 + $0x20c] sm:$0xf]  ;;  %v284_v41 = vsel %vm153_vm0, %v108_v28, 4286644096  ;;  %v93_v42 = vld [vmem:[%s1385_s0 + $0x150] sm:$0xf] }
  0x1c   :  { %v307_v43 = vsel %vm153_vm0, %v61_v31, 4286644096  ;;  %v259_v44 = vmax.bf16 %v257_v25, %v255_v35  ;;  %v282_v45 = vmax.bf16 %v280_v30, %v278_v38  ;;  %v305_v46 = vmax.bf16 %v303_v34, %v301_v40  ;;  %v14_v47 = vld [vmem:[%s1385_s0 + $0x14] sm:$0xf]  ;;  %v109_v54 = vld [vmem:[%s1385_s0 + $0x190] sm:$0xf] }
  0x1d   :  { %v30_v48 = vld [vmem:[%s1385_s0 + $0x54] sm:$0xf]  ;;  %v288_v50 = vsel %vm153_vm0, %v124_v36, 4286644096  ;;  %v292_v51 = vsel %vm153_vm0, %v140_v37, 4286644096 }
  0x1e   :  { %v46_v49 = vld [vmem:[%s1385_s0 + $0x94] sm:$0xf]  ;;  %v311_v52 = vsel %vm153_vm0, %v77_v39, 4286644096  ;;  %717 = vst.msk [vmem:[%s1386_s1 + $0x8] sm:$0xf] %vm153_vm0, %v259_v44  ;;  %v286_v53 = vmax.bf16 %v284_v41, %v282_v45  ;;  %v309_v55 = vmax.bf16 %v307_v43, %v305_v46 }
  0x1f   :  { %v315_v56 = vsel %vm153_vm0, %v93_v42, 4286644096  ;;  %v62_v57 = vld [vmem:[%s1385_s0 + $0xd4] sm:$0xf]  ;;  %v331_v58 = vsel %vm153_vm0, %v14_v47, 4286644096 }
  0x20   :  { %v334_v59 = vsel %vm153_vm0, %v30_v48, 4286644096  ;;  %v338_v60 = vsel %vm153_vm0, %v46_v49, 4286644096  ;;  %v290_v61 = vmax.bf16 %v288_v50, %v286_v53  ;;  %v125_v62 = vld [vmem:[%s1385_s0 + $0x1d0] sm:$0xf]  ;;  %v313_v0 = vmax.bf16 %v311_v52, %v309_v55 }
  0x21   :  { %v141_v63 = vld [vmem:[%s1385_s0 + $0x210] sm:$0xf]  ;;  %v78_v1 = vld [vmem:[%s1385_s0 + $0x114] sm:$0xf]  ;;  %v336_v2 = vmax.bf16 %v334_v59, %v331_v58  ;;  %v319_v3 = vsel %vm153_vm0, %v109_v54, 4286644096 }
  0x22   :  { %v94_v4 = vld [vmem:[%s1385_s0 + $0x154] sm:$0xf]  ;;  %v342_v5 = vsel %vm153_vm0, %v62_v57, 4286644096  ;;  %v294_v6 = vmax.bf16 %v292_v51, %v290_v61  ;;  %v317_v7 = vmax.bf16 %v315_v56, %v313_v0  ;;  %v15_v9 = vld [vmem:[%s1385_s0 + $0x18] sm:$0xf] }
  0x23   :  { %v340_v8 = vmax.bf16 %v338_v60, %v336_v2  ;;  %v31_v10 = vld [vmem:[%s1385_s0 + $0x58] sm:$0xf]  ;;  %v323_v12 = vsel %vm153_vm0, %v125_v62, 4286644096  ;;  %v327_v13 = vsel %vm153_vm0, %v141_v63, 4286644096 }
  0x24   :  { %v47_v11 = vld [vmem:[%s1385_s0 + $0x98] sm:$0xf]  ;;  %v346_v14 = vsel %vm153_vm0, %v78_v1, 4286644096  ;;  %718 = vst.msk [vmem:[%s1386_s1 + $0xc] sm:$0xf] %vm153_vm0, %v294_v6  ;;  %v321_v15 = vmax.bf16 %v319_v3, %v317_v7 }
  0x25   :  { %v110_v16 = vld [vmem:[%s1385_s0 + $0x194] sm:$0xf]  ;;  %v344_v17 = vmax.bf16 %v342_v5, %v340_v8  ;;  %v350_v18 = vsel %vm153_vm0, %v94_v4, 4286644096  ;;  %v63_v19 = vld [vmem:[%s1385_s0 + $0xd8] sm:$0xf] }
  0x26   :  { %v366_v20 = vsel %vm153_vm0, %v15_v9, 4286644096  ;;  %v369_v21 = vsel %vm153_vm0, %v31_v10, 4286644096  ;;  %v373_v22 = vsel %vm153_vm0, %v47_v11, 4286644096  ;;  %v325_v23 = vmax.bf16 %v323_v12, %v321_v15 }
  0x27   :  { %v126_v24 = vld [vmem:[%s1385_s0 + $0x1d4] sm:$0xf]  ;;  %v348_v26 = vmax.bf16 %v346_v14, %v344_v17  ;;  %v79_v27 = vld [vmem:[%s1385_s0 + $0x118] sm:$0xf]  ;;  %v371_v28 = vmax.bf16 %v369_v21, %v366_v20  ;;  %v354_v29 = vsel %vm153_vm0, %v110_v16, 4286644096 }
  0x28   :  { %v142_v25 = vld [vmem:[%s1385_s0 + $0x214] sm:$0xf]  ;;  %v95_v30 = vld [vmem:[%s1385_s0 + $0x158] sm:$0xf]  ;;  %v377_v31 = vsel %vm153_vm0, %v63_v19, 4286644096  ;;  %v329_v32 = vmax.bf16 %v327_v13, %v325_v23 }
  0x29   :  { %v352_v33 = vmax.bf16 %v350_v18, %v348_v26  ;;  %v375_v34 = vmax.bf16 %v373_v22, %v371_v28  ;;  %v16_v35 = vld [vmem:[%s1385_s0 + $0x1c] sm:$0xf]  ;;  %v358_v38 = vsel %vm153_vm0, %v126_v24, 4286644096  ;;  %v362_v39 = vsel %vm153_vm0, %v142_v25, 4286644096 }
  0x2a   :  { %v32_v36 = vld [vmem:[%s1385_s0 + $0x5c] sm:$0xf]  ;;  %v381_v40 = vsel %vm153_vm0, %v79_v27, 4286644096  ;;  %719 = vst.msk [vmem:[%s1386_s1 + $0x10] sm:$0xf] %vm153_vm0, %v329_v32 }
  0x2b   :  { %v48_v37 = vld [vmem:[%s1385_s0 + $0x9c] sm:$0xf]  ;;  %v356_v41 = vmax.bf16 %v354_v29, %v352_v33  ;;  %v111_v42 = vld [vmem:[%s1385_s0 + $0x198] sm:$0xf]  ;;  %v379_v43 = vmax.bf16 %v377_v31, %v375_v34  ;;  %v385_v44 = vsel %vm153_vm0, %v95_v30, 4286644096 }
  0x2c   :  { %v64_v45 = vld [vmem:[%s1385_s0 + $0xdc] sm:$0xf]  ;;  %v401_v46 = vsel %vm153_vm0, %v16_v35, 4286644096  ;;  %v404_v47 = vsel %vm153_vm0, %v32_v36, 4286644096 }
  0x2d   :  { %v408_v48 = vsel %vm153_vm0, %v48_v37, 4286644096  ;;  %v360_v49 = vmax.bf16 %v358_v38, %v356_v41  ;;  %v127_v50 = vld [vmem:[%s1385_s0 + $0x1d8] sm:$0xf]  ;;  %v383_v52 = vmax.bf16 %v381_v40, %v379_v43  ;;  %v80_v53 = vld [vmem:[%s1385_s0 + $0x11c] sm:$0xf]  ;;  %v406_v54 = vmax.bf16 %v404_v47, %v401_v46 }
  0x2e   :  { %v143_v51 = vld [vmem:[%s1385_s0 + $0x218] sm:$0xf]  ;;  %v389_v55 = vsel %vm153_vm0, %v111_v42, 4286644096  ;;  %v96_v56 = vld [vmem:[%s1385_s0 + $0x15c] sm:$0xf] }
  0x2f   :  { %v412_v57 = vsel %vm153_vm0, %v64_v45, 4286644096  ;;  %v364_v58 = vmax.bf16 %v362_v39, %v360_v49  ;;  %v387_v59 = vmax.bf16 %v385_v44, %v383_v52  ;;  %v410_v60 = vmax.bf16 %v408_v48, %v406_v54  ;;  %v17_v61 = vld [vmem:[%s1385_s0 + $0x20] sm:$0xf]  ;;  %v112_v4 = vld [vmem:[%s1385_s0 + $0x19c] sm:$0xf] }
  0x30   :  { %v33_v62 = vld [vmem:[%s1385_s0 + $0x60] sm:$0xf]  ;;  %v393_v0 = vsel %vm153_vm0, %v127_v50, 4286644096  ;;  %v397_v1 = vsel %vm153_vm0, %v143_v51, 4286644096 }
  0x31   :  { %v49_v63 = vld [vmem:[%s1385_s0 + $0xa0] sm:$0xf]  ;;  %v416_v2 = vsel %vm153_vm0, %v80_v53, 4286644096  ;;  %720 = vst.msk [vmem:[%s1386_s1 + $0x14] sm:$0xf] %vm153_vm0, %v364_v58  ;;  %v391_v3 = vmax.bf16 %v389_v55, %v387_v59  ;;  %v414_v5 = vmax.bf16 %v412_v57, %v410_v60 }
  0x32   :  { %v420_v6 = vsel %vm153_vm0, %v96_v56, 4286644096  ;;  %v65_v7 = vld [vmem:[%s1385_s0 + $0xe0] sm:$0xf]  ;;  %v436_v8 = vsel %vm153_vm0, %v17_v61, 4286644096 }
  0x33   :  { %v439_v9 = vsel %vm153_vm0, %v33_v62, 4286644096  ;;  %v443_v10 = vsel %vm153_vm0, %v49_v63, 4286644096  ;;  %v395_v11 = vmax.bf16 %v393_v0, %v391_v3  ;;  %v128_v12 = vld [vmem:[%s1385_s0 + $0x1dc] sm:$0xf]  ;;  %v418_v14 = vmax.bf16 %v416_v2, %v414_v5 }
  0x34   :  { %v144_v13 = vld [vmem:[%s1385_s0 + $0x21c] sm:$0xf]  ;;  %v81_v15 = vld [vmem:[%s1385_s0 + $0x120] sm:$0xf]  ;;  %v441_v16 = vmax.bf16 %v439_v9, %v436_v8  ;;  %v424_v17 = vsel %vm153_vm0, %v112_v4, 4286644096 }
  0x35   :  { %v97_v18 = vld [vmem:[%s1385_s0 + $0x160] sm:$0xf]  ;;  %v447_v19 = vsel %vm153_vm0, %v65_v7, 4286644096  ;;  %v399_v20 = vmax.bf16 %v397_v1, %v395_v11  ;;  %v422_v21 = vmax.bf16 %v420_v6, %v418_v14  ;;  %v18_v23 = vld [vmem:[%s1385_s0 + $0x24] sm:$0xf] }
  0x36   :  { %v445_v22 = vmax.bf16 %v443_v10, %v441_v16  ;;  %v34_v24 = vld [vmem:[%s1385_s0 + $0x64] sm:$0xf]  ;;  %v428_v26 = vsel %vm153_vm0, %v128_v12, 4286644096  ;;  %v432_v27 = vsel %vm153_vm0, %v144_v13, 4286644096 }
  0x37   :  { %v50_v25 = vld [vmem:[%s1385_s0 + $0xa4] sm:$0xf]  ;;  %v451_v28 = vsel %vm153_vm0, %v81_v15, 4286644096  ;;  %721 = vst.msk [vmem:[%s1386_s1 + $0x18] sm:$0xf] %vm153_vm0, %v399_v20  ;;  %v426_v29 = vmax.bf16 %v424_v17, %v422_v21 }
  0x38   :  { %v113_v30 = vld [vmem:[%s1385_s0 + $0x1a0] sm:$0xf]  ;;  %v449_v31 = vmax.bf16 %v447_v19, %v445_v22  ;;  %v455_v32 = vsel %vm153_vm0, %v97_v18, 4286644096  ;;  %v66_v33 = vld [vmem:[%s1385_s0 + $0xe4] sm:$0xf] }
  0x39   :  { %v471_v34 = vsel %vm153_vm0, %v18_v23, 4286644096  ;;  %v474_v35 = vsel %vm153_vm0, %v34_v24, 4286644096  ;;  %v478_v36 = vsel %vm153_vm0, %v50_v25, 4286644096  ;;  %v430_v37 = vmax.bf16 %v428_v26, %v426_v29 }
  0x3a   :  { %v129_v38 = vld [vmem:[%s1385_s0 + $0x1e0] sm:$0xf]  ;;  %v453_v40 = vmax.bf16 %v451_v28, %v449_v31  ;;  %v82_v41 = vld [vmem:[%s1385_s0 + $0x124] sm:$0xf]  ;;  %v476_v42 = vmax.bf16 %v474_v35, %v471_v34  ;;  %v459_v43 = vsel %vm153_vm0, %v113_v30, 4286644096 }
  0x3b   :  { %v145_v39 = vld [vmem:[%s1385_s0 + $0x220] sm:$0xf]  ;;  %v98_v44 = vld [vmem:[%s1385_s0 + $0x164] sm:$0xf]  ;;  %v482_v45 = vsel %vm153_vm0, %v66_v33, 4286644096  ;;  %v434_v46 = vmax.bf16 %v432_v27, %v430_v37 }
  0x3c   :  { %v457_v47 = vmax.bf16 %v455_v32, %v453_v40  ;;  %v480_v48 = vmax.bf16 %v478_v36, %v476_v42  ;;  %v19_v49 = vld [vmem:[%s1385_s0 + $0x28] sm:$0xf]  ;;  %v463_v52 = vsel %vm153_vm0, %v129_v38, 4286644096  ;;  %v467_v53 = vsel %vm153_vm0, %v145_v39, 4286644096 }
  0x3d   :  { %v35_v50 = vld [vmem:[%s1385_s0 + $0x68] sm:$0xf]  ;;  %v486_v54 = vsel %vm153_vm0, %v82_v41, 4286644096  ;;  %722 = vst.msk [vmem:[%s1386_s1 + $0x1c] sm:$0xf] %vm153_vm0, %v434_v46 }
  0x3e   :  { %v51_v51 = vld [vmem:[%s1385_s0 + $0xa8] sm:$0xf]  ;;  %v461_v55 = vmax.bf16 %v459_v43, %v457_v47  ;;  %v114_v56 = vld [vmem:[%s1385_s0 + $0x1a4] sm:$0xf]  ;;  %v484_v57 = vmax.bf16 %v482_v45, %v480_v48  ;;  %v490_v58 = vsel %vm153_vm0, %v98_v44, 4286644096 }
  0x3f   :  { %v67_v59 = vld [vmem:[%s1385_s0 + $0xe8] sm:$0xf]  ;;  %v506_v60 = vsel %vm153_vm0, %v19_v49, 4286644096  ;;  %v509_v61 = vsel %vm153_vm0, %v35_v50, 4286644096 }
  0x40   :  { %v513_v62 = vsel %vm153_vm0, %v51_v51, 4286644096  ;;  %v465_v63 = vmax.bf16 %v463_v52, %v461_v55  ;;  %v130_v0 = vld [vmem:[%s1385_s0 + $0x1e4] sm:$0xf]  ;;  %v488_v2 = vmax.bf16 %v486_v54, %v484_v57  ;;  %v83_v3 = vld [vmem:[%s1385_s0 + $0x128] sm:$0xf]  ;;  %v511_v4 = vmax.bf16 %v509_v61, %v506_v60 }
  0x41   :  { %v146_v1 = vld [vmem:[%s1385_s0 + $0x224] sm:$0xf]  ;;  %v494_v5 = vsel %vm153_vm0, %v114_v56, 4286644096  ;;  %v99_v6 = vld [vmem:[%s1385_s0 + $0x168] sm:$0xf] }
  0x42   :  { %v517_v7 = vsel %vm153_vm0, %v67_v59, 4286644096  ;;  %v469_v8 = vmax.bf16 %v467_v53, %v465_v63  ;;  %v492_v9 = vmax.bf16 %v490_v58, %v488_v2  ;;  %v515_v10 = vmax.bf16 %v513_v62, %v511_v4  ;;  %v20_v11 = vld [vmem:[%s1385_s0 + $0x2c] sm:$0xf]  ;;  %v115_v18 = vld [vmem:[%s1385_s0 + $0x1a8] sm:$0xf] }
  0x43   :  { %v36_v12 = vld [vmem:[%s1385_s0 + $0x6c] sm:$0xf]  ;;  %v498_v14 = vsel %vm153_vm0, %v130_v0, 4286644096  ;;  %v502_v15 = vsel %vm153_vm0, %v146_v1, 4286644096 }
  0x44   :  { %v52_v13 = vld [vmem:[%s1385_s0 + $0xac] sm:$0xf]  ;;  %v521_v16 = vsel %vm153_vm0, %v83_v3, 4286644096  ;;  %723 = vst.msk [vmem:[%s1386_s1 + $0x20] sm:$0xf] %vm153_vm0, %v469_v8  ;;  %v496_v17 = vmax.bf16 %v494_v5, %v492_v9  ;;  %v519_v19 = vmax.bf16 %v517_v7, %v515_v10 }
  0x45   :  { %v525_v20 = vsel %vm153_vm0, %v99_v6, 4286644096  ;;  %v68_v21 = vld [vmem:[%s1385_s0 + $0xec] sm:$0xf]  ;;  %v541_v22 = vsel %vm153_vm0, %v20_v11, 4286644096 }
  0x46   :  { %v544_v23 = vsel %vm153_vm0, %v36_v12, 4286644096  ;;  %v548_v24 = vsel %vm153_vm0, %v52_v13, 4286644096  ;;  %v500_v25 = vmax.bf16 %v498_v14, %v496_v17  ;;  %v131_v26 = vld [vmem:[%s1385_s0 + $0x1e8] sm:$0xf]  ;;  %v523_v28 = vmax.bf16 %v521_v16, %v519_v19 }
  0x47   :  { %v147_v27 = vld [vmem:[%s1385_s0 + $0x228] sm:$0xf]  ;;  %v84_v29 = vld [vmem:[%s1385_s0 + $0x12c] sm:$0xf]  ;;  %v546_v30 = vmax.bf16 %v544_v23, %v541_v22  ;;  %v529_v31 = vsel %vm153_vm0, %v115_v18, 4286644096 }
  0x48   :  { %v100_v32 = vld [vmem:[%s1385_s0 + $0x16c] sm:$0xf]  ;;  %v552_v33 = vsel %vm153_vm0, %v68_v21, 4286644096  ;;  %v504_v34 = vmax.bf16 %v502_v15, %v500_v25  ;;  %v527_v35 = vmax.bf16 %v525_v20, %v523_v28  ;;  %v21_v37 = vld [vmem:[%s1385_s0 + $0x30] sm:$0xf] }
  0x49   :  { %v550_v36 = vmax.bf16 %v548_v24, %v546_v30  ;;  %v37_v38 = vld [vmem:[%s1385_s0 + $0x70] sm:$0xf]  ;;  %v533_v40 = vsel %vm153_vm0, %v131_v26, 4286644096  ;;  %v537_v41 = vsel %vm153_vm0, %v147_v27, 4286644096 }
  0x4a   :  { %v53_v39 = vld [vmem:[%s1385_s0 + $0xb0] sm:$0xf]  ;;  %v556_v42 = vsel %vm153_vm0, %v84_v29, 4286644096  ;;  %724 = vst.msk [vmem:[%s1386_s1 + $0x24] sm:$0xf] %vm153_vm0, %v504_v34  ;;  %v531_v43 = vmax.bf16 %v529_v31, %v527_v35 }
  0x4b   :  { %v116_v44 = vld [vmem:[%s1385_s0 + $0x1ac] sm:$0xf]  ;;  %v554_v45 = vmax.bf16 %v552_v33, %v550_v36  ;;  %v560_v46 = vsel %vm153_vm0, %v100_v32, 4286644096  ;;  %v69_v47 = vld [vmem:[%s1385_s0 + $0xf0] sm:$0xf] }
  0x4c   :  { %v576_v48 = vsel %vm153_vm0, %v21_v37, 4286644096  ;;  %v579_v49 = vsel %vm153_vm0, %v37_v38, 4286644096  ;;  %v583_v50 = vsel %vm153_vm0, %v53_v39, 4286644096  ;;  %v535_v51 = vmax.bf16 %v533_v40, %v531_v43 }
  0x4d   :  { %v132_v52 = vld [vmem:[%s1385_s0 + $0x1ec] sm:$0xf]  ;;  %v558_v54 = vmax.bf16 %v556_v42, %v554_v45  ;;  %v85_v55 = vld [vmem:[%s1385_s0 + $0x130] sm:$0xf]  ;;  %v581_v56 = vmax.bf16 %v579_v49, %v576_v48  ;;  %v564_v57 = vsel %vm153_vm0, %v116_v44, 4286644096 }
  0x4e   :  { %v148_v53 = vld [vmem:[%s1385_s0 + $0x22c] sm:$0xf]  ;;  %v101_v58 = vld [vmem:[%s1385_s0 + $0x170] sm:$0xf]  ;;  %v587_v59 = vsel %vm153_vm0, %v69_v47, 4286644096  ;;  %v539_v60 = vmax.bf16 %v537_v41, %v535_v51 }
  0x4f   :  { %v562_v61 = vmax.bf16 %v560_v46, %v558_v54  ;;  %v585_v62 = vmax.bf16 %v583_v50, %v581_v56  ;;  %v22_v63 = vld [vmem:[%s1385_s0 + $0x34] sm:$0xf]  ;;  %v568_v2 = vsel %vm153_vm0, %v132_v52, 4286644096  ;;  %v572_v3 = vsel %vm153_vm0, %v148_v53, 4286644096 }
  0x50   :  { %v38_v0 = vld [vmem:[%s1385_s0 + $0x74] sm:$0xf]  ;;  %v591_v4 = vsel %vm153_vm0, %v85_v55, 4286644096  ;;  %725 = vst.msk [vmem:[%s1386_s1 + $0x28] sm:$0xf] %vm153_vm0, %v539_v60 }
  0x51   :  { %v54_v1 = vld [vmem:[%s1385_s0 + $0xb4] sm:$0xf]  ;;  %v566_v5 = vmax.bf16 %v564_v57, %v562_v61  ;;  %v117_v6 = vld [vmem:[%s1385_s0 + $0x1b0] sm:$0xf]  ;;  %v589_v7 = vmax.bf16 %v587_v59, %v585_v62  ;;  %v595_v8 = vsel %vm153_vm0, %v101_v58, 4286644096 }
  0x52   :  { %v70_v9 = vld [vmem:[%s1385_s0 + $0xf4] sm:$0xf]  ;;  %v611_v10 = vsel %vm153_vm0, %v22_v63, 4286644096  ;;  %v614_v11 = vsel %vm153_vm0, %v38_v0, 4286644096 }
  0x53   :  { %v618_v12 = vsel %vm153_vm0, %v54_v1, 4286644096  ;;  %v570_v13 = vmax.bf16 %v568_v2, %v566_v5  ;;  %v133_v14 = vld [vmem:[%s1385_s0 + $0x1f0] sm:$0xf]  ;;  %v593_v16 = vmax.bf16 %v591_v4, %v589_v7  ;;  %v86_v17 = vld [vmem:[%s1385_s0 + $0x134] sm:$0xf]  ;;  %v616_v18 = vmax.bf16 %v614_v11, %v611_v10 }
  0x54   :  { %v149_v15 = vld [vmem:[%s1385_s0 + $0x230] sm:$0xf]  ;;  %v599_v19 = vsel %vm153_vm0, %v117_v6, 4286644096  ;;  %v102_v20 = vld [vmem:[%s1385_s0 + $0x174] sm:$0xf] }
  0x55   :  { %v622_v21 = vsel %vm153_vm0, %v70_v9, 4286644096  ;;  %v574_v22 = vmax.bf16 %v572_v3, %v570_v13  ;;  %v597_v23 = vmax.bf16 %v595_v8, %v593_v16  ;;  %v620_v24 = vmax.bf16 %v618_v12, %v616_v18  ;;  %v23_v25 = vld [vmem:[%s1385_s0 + $0x38] sm:$0xf]  ;;  %v118_v32 = vld [vmem:[%s1385_s0 + $0x1b4] sm:$0xf] }
  0x56   :  { %v39_v26 = vld [vmem:[%s1385_s0 + $0x78] sm:$0xf]  ;;  %v603_v28 = vsel %vm153_vm0, %v133_v14, 4286644096  ;;  %v607_v29 = vsel %vm153_vm0, %v149_v15, 4286644096 }
  0x57   :  { %v55_v27 = vld [vmem:[%s1385_s0 + $0xb8] sm:$0xf]  ;;  %v626_v30 = vsel %vm153_vm0, %v86_v17, 4286644096  ;;  %726 = vst.msk [vmem:[%s1386_s1 + $0x2c] sm:$0xf] %vm153_vm0, %v574_v22  ;;  %v601_v31 = vmax.bf16 %v599_v19, %v597_v23  ;;  %v624_v33 = vmax.bf16 %v622_v21, %v620_v24 }
  0x58   :  { %v630_v34 = vsel %vm153_vm0, %v102_v20, 4286644096  ;;  %v71_v35 = vld [vmem:[%s1385_s0 + $0xf8] sm:$0xf]  ;;  %v646_v36 = vsel %vm153_vm0, %v23_v25, 4286644096 }
  0x59   :  { %v649_v37 = vsel %vm153_vm0, %v39_v26, 4286644096  ;;  %v653_v38 = vsel %vm153_vm0, %v55_v27, 4286644096  ;;  %v605_v39 = vmax.bf16 %v603_v28, %v601_v31  ;;  %v134_v40 = vld [vmem:[%s1385_s0 + $0x1f4] sm:$0xf]  ;;  %v628_v42 = vmax.bf16 %v626_v30, %v624_v33 }
  0x5a   :  { %v150_v41 = vld [vmem:[%s1385_s0 + $0x234] sm:$0xf]  ;;  %v87_v43 = vld [vmem:[%s1385_s0 + $0x138] sm:$0xf]  ;;  %v651_v44 = vmax.bf16 %v649_v37, %v646_v36  ;;  %v634_v45 = vsel %vm153_vm0, %v118_v32, 4286644096 }
  0x5b   :  { %v103_v46 = vld [vmem:[%s1385_s0 + $0x178] sm:$0xf]  ;;  %v657_v47 = vsel %vm153_vm0, %v71_v35, 4286644096  ;;  %v609_v48 = vmax.bf16 %v607_v29, %v605_v39  ;;  %v632_v49 = vmax.bf16 %v630_v34, %v628_v42  ;;  %v24_v51 = vld [vmem:[%s1385_s0 + $0x3c] sm:$0xf] }
  0x5c   :  { %v655_v50 = vmax.bf16 %v653_v38, %v651_v44  ;;  %v40_v52 = vld [vmem:[%s1385_s0 + $0x7c] sm:$0xf]  ;;  %v638_v54 = vsel %vm153_vm0, %v134_v40, 4286644096  ;;  %v642_v55 = vsel %vm153_vm0, %v150_v41, 4286644096 }
  0x5d   :  { %v56_v53 = vld [vmem:[%s1385_s0 + $0xbc] sm:$0xf]  ;;  %v661_v56 = vsel %vm153_vm0, %v87_v43, 4286644096  ;;  %727 = vst.msk [vmem:[%s1386_s1 + $0x30] sm:$0xf] %vm153_vm0, %v609_v48  ;;  %v636_v57 = vmax.bf16 %v634_v45, %v632_v49 }
  0x5e   :  { %v119_v58 = vld [vmem:[%s1385_s0 + $0x1b8] sm:$0xf]  ;;  %v659_v59 = vmax.bf16 %v657_v47, %v655_v50  ;;  %v665_v60 = vsel %vm153_vm0, %v103_v46, 4286644096  ;;  %v72_v61 = vld [vmem:[%s1385_s0 + $0xfc] sm:$0xf] }
  0x5f   :  { %v681_v62 = vsel %vm153_vm0, %v24_v51, 4286644096  ;;  %v684_v63 = vsel %vm153_vm0, %v40_v52, 4286644096  ;;  %v688_v0 = vsel %vm153_vm0, %v56_v53, 4286644096  ;;  %v640_v1 = vmax.bf16 %v638_v54, %v636_v57 }
  0x60   :  { %v135_v2 = vld [vmem:[%s1385_s0 + $0x1f8] sm:$0xf]  ;;  %v663_v3 = vmax.bf16 %v661_v56, %v659_v59  ;;  %v88_v4 = vld [vmem:[%s1385_s0 + $0x13c] sm:$0xf]  ;;  %v686_v5 = vmax.bf16 %v684_v63, %v681_v62  ;;  %v669_v6 = vsel %vm153_vm0, %v119_v58, 4286644096 }
  0x61   :  { %v692_v7 = vsel %vm153_vm0, %v72_v61, 4286644096  ;;  %v644_v8 = vmax.bf16 %v642_v55, %v640_v1  ;;  %v151_v9 = vld [vmem:[%s1385_s0 + $0x238] sm:$0xf]  ;;  %v104_v11 = vld [vmem:[%s1385_s0 + $0x17c] sm:$0xf] }
  0x62   :  { %v667_v10 = vmax.bf16 %v665_v60, %v663_v3  ;;  %v690_v12 = vmax.bf16 %v688_v0, %v686_v5  ;;  %v673_v13 = vsel %vm153_vm0, %v135_v2, 4286644096  ;;  %v696_v14 = vsel %vm153_vm0, %v88_v4, 4286644096  ;;  %v120_v16 = vld [vmem:[%s1385_s0 + $0x1bc] sm:$0xf] }
  0x63   :  { %728 = vst.msk [vmem:[%s1386_s1 + $0x34] sm:$0xf] %vm153_vm0, %v644_v8  ;;  %v677_v18 = vsel %vm153_vm0, %v151_v9, 4286644096  ;;  %v700_v19 = vsel %vm153_vm0, %v104_v11, 4286644096 }
  0x64   :  { %v671_v15 = vmax.bf16 %v669_v6, %v667_v10  ;;  %v694_v17 = vmax.bf16 %v692_v7, %v690_v12  ;;  %v136_v21 = vld [vmem:[%s1385_s0 + $0x1fc] sm:$0xf]  ;;  %v704_v23 = vsel %vm153_vm0, %v120_v16, 4286644096 }
  0x65   :  { %v152_v25 = vld [vmem:[%s1385_s0 + $0x23c] sm:$0xf]  ;;  %v708_v27 = vsel %vm153_vm0, %v136_v21, 4286644096 }
  0x66   :  { %v675_v20 = vmax.bf16 %v673_v13, %v671_v15  ;;  %v698_v22 = vmax.bf16 %v696_v14, %v694_v17  ;;  %v712_v29 = vsel %vm153_vm0, %v152_v25, 4286644096 }
  0x68   :  { %v679_v24 = vmax.bf16 %v677_v18, %v675_v20  ;;  %v702_v26 = vmax.bf16 %v700_v19, %v698_v22 }
  0x6a   :  { %729 = vst.msk [vmem:[%s1386_s1 + $0x38] sm:$0xf] %vm153_vm0, %v679_v24  ;;  %v706_v28 = vmax.bf16 %v704_v23, %v702_v26 }
  0x6c   :  { %v710_v30 = vmax.bf16 %v708_v27, %v706_v28 }
  0x6e   :  { %v714_v31 = vmax.bf16 %v712_v29, %v710_v30 }
  0x70   :  { %730 = vst.msk [vmem:[%s1386_s1 + $0x3c] sm:$0xf] %vm153_vm0, %v714_v31 }

// kernel: resnet34_forward.41
= control target key start
LH: loop header
LB: loop body
LE: loop exit
PB: predicated region body
PF: predicated region fallthrough
CT: control target
= control target key end

     0   :  { %s987_s12 = smov 0   ;;  %s989_s13 = smov 0   ;;  %s1149_s0 = inlined_call_operand.vmem [shape: bf16[9,128,64], index: 0, kind: input, shape index: {}]   ;;  %s1150_s1 = inlined_call_operand.vmem [shape: bf16[9,64,64], index: 1, kind: input, shape index: {}]   ;;  %s1151_s2 = inlined_call_operand.vmem [shape: f32[1,64], index: 2, kind: input, shape index: {}]   ;;  %s1152_s3 = inlined_call_operand.vmem [shape: bf16[128,64], index: 3, kind: output, shape index: {}]  }
   0x1   :  { %s991_s14 = smov 0  }
   0x2 LB: > { %s25_s15 = sadd.s32 1, %s960_s13  ;;  %p795_p0 = scmp.ge.s32.totalorder %s964_s14, 1  ;;  %s964_s14 = sphi %s991_s14, %s13_s14   ;;  %s960_s13 = sphi %s989_s13, %s1154_s13   ;;  %s956_s12 = sphi %s987_s12, %s1153_s12  }
   0x3   : > { %p26_p1 = scmp.ge.s32.totalorder %s25_s15, 9  ;;  %p188_p2 = scmp.lt.s32.totalorder %s964_s14, 10 }
   0x5   : > { %s1156_s15 = smov (%p26_p1, %s25_s15), 0  ;;  %p189_p3 = pnand %p795_p0, %p188_p2 }
   0x6   : > { %p231_p4 = scmp.lt.s32.totalorder (!%p189_p3), %s956_s12, 8  ;;  %p800_p5 = scmp.ne.s32.totalorder (!%p189_p3), %s956_s12, 0 }
   0x7   : > { %192 = sbr.rel (%p189_p3) target bundleno = 282 (0x11a), region = 32 }
   0xe   : > { %s232_s16 = scalar_select %p231_p4, %s956_s12, 8 }
   0xf   : > { %264 = sbr.rel (%p800_p5) target bundleno = 24 (0x18), region = 36  ;;  %vm265_vm0 = vcmask (!%p800_p5), 523264   ;;  %v966_v0 = vmov (!%p800_p5), 0.0  }
  0x10   : > { %s843_s17 = sshll.u32 %s232_s16, 6  ;;  %s844_s18 = sshll.u32 %s232_s16, 5  ;;  %266 = vst.msk [vmem:[#allocation2] sm:$0xff] (!%p800_p5), %vm265_vm0, %v966_v0  ;;  %267 = vst.msk [vmem:[#allocation2 + $0x8] sm:$0xff] (!%p800_p5), %vm265_vm0, %v966_v0 }
  0x11   : > { %s1012_s21 = scalar_lea.vmem %s1149_s0, %s843_s17  ;;  %s1017_s24 = scalar_lea.vmem %s1150_s1, %s844_s18  ;;  %268 = vst.msk [vmem:[#allocation2 + $0x10] sm:$0xff] (!%p800_p5), %vm265_vm0, %v966_v0  ;;  %269 = vst.msk [vmem:[#allocation2 + $0x18] sm:$0xff] (!%p800_p5), %vm265_vm0, %v966_v0 }
  0x12   : > { %270 = vst.msk [vmem:[#allocation2 + $0x20] sm:$0xff] (!%p800_p5), %vm265_vm0, %v966_v0  ;;  %271 = vst.msk [vmem:[#allocation2 + $0x28] sm:$0xff] (!%p800_p5), %vm265_vm0, %v966_v0 }
  0x13   : > { %272 = vst.msk [vmem:[#allocation2 + $0x30] sm:$0xff] (!%p800_p5), %vm265_vm0, %v966_v0  ;;  %273 = vst.msk [vmem:[#allocation2 + $0x38] sm:$0xff] (!%p800_p5), %vm265_vm0, %v966_v0 }
  0x14   : > { %274 = vst.msk [vmem:[#allocation2 + $0x40] sm:$0xff] (!%p800_p5), %vm265_vm0, %v966_v0  ;;  %275 = vst.msk [vmem:[#allocation2 + $0x48] sm:$0xff] (!%p800_p5), %vm265_vm0, %v966_v0 }
  0x15   : > { %276 = vst.msk [vmem:[#allocation2 + $0x50] sm:$0xff] (!%p800_p5), %vm265_vm0, %v966_v0  ;;  %277 = vst.msk [vmem:[#allocation2 + $0x58] sm:$0xff] (!%p800_p5), %vm265_vm0, %v966_v0 }
  0x16   : > { %278 = vst.msk [vmem:[#allocation2 + $0x60] sm:$0xff] %vm265_vm0, %v966_v0  ;;  %279 = vst.msk [vmem:[#allocation2 + $0x68] sm:$0xff] %vm265_vm0, %v966_v0 }
  0x17   : > { %280 = vst.msk [vmem:[#allocation2 + $0x70] sm:$0xff] %vm265_vm0, %v966_v0  ;;  %281 = vst.msk [vmem:[#allocation2 + $0x78] sm:$0xff] %vm265_vm0, %v966_v0 }
  0x18 PF: > { %v930_v1 = vld [vmem:[%s1017_s24] sm:$0xff]   ;;  %v931_v2 = vld [vmem:[%s1017_s24 + $0x8] sm:$0xff]   ;;  %v932_v3 = vld [vmem:[%s1017_s24 + $0x10] sm:$0xff]   ;;  %vm386_vm1 = vcmask 523264   ;;  %p821_p6 = scmp.ne.s32.totalorder %s956_s12, 8 }
  0x19   : > { %873 = vmatprep.subr.bf16.mxu0 %v930_v1  ;;  %897 = vmatprep.subr.bf16.mxu1 %v930_v1  ;;  %v934_v4 = vld [vmem:[%s1012_s21] sm:$0xff]   ;;  %v933_v6 = vld [vmem:[%s1017_s24 + $0x18] sm:$0xff]   ;;  %v936_v7 = vld [vmem:[%s1012_s21 + $0x8] sm:$0xff]   ;;  %vm663_vm2 = vcmask (!%p821_p6), 519168  }
  0x1a   : > { %874 = vmatpush3.bf16.msra.mxu0 %v930_v1  ;;  %901 = vmatpush3.bf16.msra.mxu1 %v930_v1  ;;  %v935_v5 = vld [vmem:[%s1012_s21 + $0x20] sm:$0xff]   ;;  %v937_v8 = vld [vmem:[%s1012_s21 + $0x28] sm:$0xff]   ;;  %v938_v9 = vld [vmem:[%s1012_s21 + $0x10] sm:$0xff]  }
  0x1b   : > { %875 = vmatprep.subr.bf16.mxu0 %v931_v2  ;;  %898 = vmatprep.subr.bf16.mxu1 %v931_v2  ;;  %v939_v10 = vld [vmem:[%s1012_s21 + $0x30] sm:$0xff]   ;;  %v940_v11 = vld [vmem:[%s1012_s21 + $0x18] sm:$0xff]   ;;  %v282_v15 = vld [vmem:[#allocation2] sm:$0xff] }
  0x1c   : > { %881 = vmatprep.mubr.msk.bf16.mxu0 %vm386_vm1, %v934_v4  ;;  %889 = vmatprep.mubr.msk.bf16.mxu1 %vm386_vm1, %v935_v5  ;;  %v941_v12 = vld [vmem:[%s1012_s21 + $0x38] sm:$0xff]   ;;  %v284_v13 = vld [vmem:[#allocation2 + $0x10] sm:$0xff]  ;;  %v283_v25 = vld [vmem:[#allocation2 + $0x8] sm:$0xff] }
  0x1d   : > { %v290_v16 = vld [vmem:[#allocation2 + $0x40] sm:$0xff]  ;;  %v285_v19 = vld [vmem:[#allocation2 + $0x18] sm:$0xff]  ;;  %v291_v26 = vld [vmem:[#allocation2 + $0x48] sm:$0xff] }
  0x1e   : > { %876 = vmatpush3.bf16.msra.mxu0 %v931_v2  ;;  %902 = vmatpush3.bf16.msra.mxu1 %v931_v2  ;;  %v292_v14 = vld [vmem:[#allocation2 + $0x50] sm:$0xff]  ;;  %v293_v20 = vld [vmem:[#allocation2 + $0x58] sm:$0xff]  ;;  %v286_v39 = vld [vmem:[#allocation2 + $0x20] sm:$0xff] }
  0x1f   : > { %877 = vmatprep.subr.bf16.mxu0 %v932_v3  ;;  %899 = vmatprep.subr.bf16.mxu1 %v932_v3  ;;  %v288_v37 = vld [vmem:[#allocation2 + $0x30] sm:$0xff]  ;;  %v294_v40 = vld [vmem:[#allocation2 + $0x60] sm:$0xff]  ;;  %v289_v43 = vld [vmem:[#allocation2 + $0x38] sm:$0xff] }
  0x20   : > { %v296_v38 = vld [vmem:[#allocation2 + $0x70] sm:$0xff]  ;;  %v297_v44 = vld [vmem:[#allocation2 + $0x78] sm:$0xff]  ;;  %v287_v49 = vld [vmem:[#allocation2 + $0x28] sm:$0xff] }
  0x21   : > { %v295_v50 = vld [vmem:[#allocation2 + $0x68] sm:$0xff]  ;;  %v822_v62 = vld [vmem:[%s1151_s2] ss:$0 sm:$0xff] (!%p821_p6) }
  0x22   : > { %878 = vmatpush3.bf16.msra.mxu0 %v932_v3  ;;  %903 = vmatpush3.bf16.msra.mxu1 %v932_v3 }
  0x23   : > { %879 = vmatprep.subr.bf16.mxu0 %v933_v6  ;;  %900 = vmatprep.subr.bf16.mxu1 %v933_v6 }
  0x26   : > { %880 = vmatpush3.bf16.msra.mxu0 %v933_v6  ;;  %904 = vmatpush3.bf16.msra.mxu1 %v933_v6 }
  0x29   : > { %882 = vmatmul.mubr.msk.bf16.vlgmr.msra.gmra.mrb[0].mxu0 %vm386_vm1, %v936_v7  ;;  %890 = vmatmul.mubr.msk.bf16.vlgmr.msra.gmra.mrb[0].mxu1 %vm386_vm1, %v937_v8 }
  0x2a   : > { %885 = vmatprep.mubr.msk.bf16.mxu0 %vm386_vm1, %v938_v9  ;;  %893 = vmatprep.mubr.msk.bf16.mxu1 %vm386_vm1, %v939_v10 }
  0x31   : > { %886 = vmatmul.mubr.msk.bf16.gmra.mrb[4].mxu0 %vm386_vm1, %v940_v11  ;;  %894 = vmatmul.mubr.msk.bf16.gmra.mrb[4].mxu1 %vm386_vm1, %v941_v12 }
  0xfc   : > { %v883_v17 = vpop.f32.mrb[0].mxu0  ;;  %v891_v18 = vpop.f32.mrb[0].mxu1 }
  0xfd   : > { %v510_v21 = vadd.f32 %v883_v17, %v284_v13  ;;  %v518_v22 = vadd.f32 %v891_v18, %v292_v14  ;;  %v445_v23 = vpop.f32.mrb[1].mxu0  ;;  %v477_v24 = vpop.f32.mrb[1].mxu1 }
  0xfe   : > { %v508_v27 = vadd.f32 %v445_v23, %v282_v15  ;;  %v516_v28 = vadd.f32 %v477_v24, %v290_v16  ;;  %v884_v29 = vpop.f32.mrb[2].mxu0  ;;  %v892_v30 = vpop.f32.mrb[2].mxu1 }
  0xff   : > { %526 = vst.msk [vmem:[#allocation2 + $0x10] sm:$0xff] %vm386_vm1, %v510_v21  ;;  %534 = vst.msk [vmem:[#allocation2 + $0x50] sm:$0xff] %vm386_vm1, %v518_v22  ;;  %v511_v31 = vadd.f32 %v884_v29, %v285_v19  ;;  %v519_v32 = vadd.f32 %v892_v30, %v293_v20  ;;  %v448_v33 = vpop.f32.mrb[3].mxu0  ;;  %v480_v34 = vpop.f32.mrb[3].mxu1 }
 0x100   : > { %524 = vst.msk [vmem:[#allocation2] sm:$0xff] %vm386_vm1, %v508_v27  ;;  %532 = vst.msk [vmem:[#allocation2 + $0x40] sm:$0xff] %vm386_vm1, %v516_v28  ;;  %v509_v35 = vadd.f32 %v448_v33, %v283_v25  ;;  %v517_v36 = vadd.f32 %v480_v34, %v291_v26 }
 0x101   : > { %527 = vst.msk [vmem:[#allocation2 + $0x18] sm:$0xff] %vm386_vm1, %v511_v31  ;;  %535 = vst.msk [vmem:[#allocation2 + $0x58] sm:$0xff] %vm386_vm1, %v519_v32 }
 0x102   : > { %525 = vst.msk [vmem:[#allocation2 + $0x8] sm:$0xff] %vm386_vm1, %v509_v35  ;;  %533 = vst.msk [vmem:[#allocation2 + $0x48] sm:$0xff] %vm386_vm1, %v517_v36 }
 0x104   : > { %v887_v41 = vpop.f32.mrb[4].mxu0  ;;  %v895_v42 = vpop.f32.mrb[4].mxu1  ;;  %543 = sbr.rel (%p821_p6) target bundleno = 282 (0x11a), region = 40 }
 0x105   : > { %v514_v45 = vadd.f32 %v887_v41, %v288_v37  ;;  %v522_v46 = vadd.f32 %v895_v42, %v296_v38  ;;  %v461_v47 = vpop.f32.mrb[5].mxu0  ;;  %v493_v48 = vpop.f32.mrb[5].mxu1 }
 0x106   : > { %v512_v51 = vadd.f32 %v461_v47, %v286_v39  ;;  %v520_v52 = vadd.f32 %v493_v48, %v294_v40  ;;  %v888_v53 = vpop.f32.mrb[6].mxu0  ;;  %v896_v54 = vpop.f32.mrb[6].mxu1  ;;  %v546_v2 = vld [vmem:[#allocation2 + $0x10] sm:$0xff] (!%p821_p6) }
 0x107   : > { %530 = vst.msk [vmem:[#allocation2 + $0x30] sm:$0xff] %vm386_vm1, %v514_v45  ;;  %538 = vst.msk [vmem:[#allocation2 + $0x70] sm:$0xff] %vm386_vm1, %v522_v46  ;;  %v515_v55 = vadd.f32 %v888_v53, %v289_v43  ;;  %v523_v56 = vadd.f32 %v896_v54, %v297_v44  ;;  %v464_v57 = vpop.f32.mrb[7].mxu0  ;;  %v496_v58 = vpop.f32.mrb[7].mxu1  ;;  %v544_v61 = vld [vmem:[#allocation2] sm:$0xff] (!%p821_p6)  ;;  %v569_v5 = vadd.f32 (!%p821_p6), %v822_v62, %v546_v2  ;;  %v554_v25 = vld [vmem:[#allocation2 + $0x50] sm:$0xff] (!%p821_p6) }
 0x108   : > { %528 = vst.msk [vmem:[#allocation2 + $0x20] sm:$0xff] %vm386_vm1, %v512_v51  ;;  %536 = vst.msk [vmem:[#allocation2 + $0x60] sm:$0xff] %vm386_vm1, %v520_v52  ;;  %v513_v59 = vadd.f32 %v464_v57, %v287_v49  ;;  %v521_v60 = vadd.f32 %v496_v58, %v295_v50  ;;  %v567_v0 = vadd.f32 (!%p821_p6), %v822_v62, %v544_v61  ;;  %v547_v3 = vld [vmem:[#allocation2 + $0x18] sm:$0xff] (!%p821_p6)  ;;  %v552_v19 = vld [vmem:[#allocation2 + $0x40] sm:$0xff] (!%p821_p6) }
 0x109   : > { %531 = vst.msk [vmem:[#allocation2 + $0x38] sm:$0xff] %vm386_vm1, %v515_v55  ;;  %539 = vst.msk [vmem:[#allocation2 + $0x78] sm:$0xff] %vm386_vm1, %v523_v56  ;;  %v545_v63 = vld [vmem:[#allocation2 + $0x8] sm:$0xff] (!%p821_p6)  ;;  %v570_v6 = vadd.f32 (!%p821_p6), %v822_v62, %v547_v3  ;;  %v585_v15 = vmax.f32 (!%p821_p6), %v569_v5, 0.0  ;;  %v555_v26 = vld [vmem:[#allocation2 + $0x58] sm:$0xff] (!%p821_p6)  ;;  %v575_v36 = vadd.f32 (!%p821_p6), %v822_v62, %v552_v19  ;;  %v577_v40 = vadd.f32 (!%p821_p6), %v822_v62, %v554_v25 }
 0x10a   : > { %529 = vst.msk [vmem:[#allocation2 + $0x28] sm:$0xff] %vm386_vm1, %v513_v59  ;;  %537 = vst.msk [vmem:[#allocation2 + $0x68] sm:$0xff] %vm386_vm1, %v521_v60  ;;  %v568_v1 = vadd.f32 (!%p821_p6), %v822_v62, %v545_v63  ;;  %v583_v11 = vmax.f32 (!%p821_p6), %v567_v0, 0.0  ;;  %v553_v20 = vld [vmem:[#allocation2 + $0x48] sm:$0xff] (!%p821_p6)  ;;  %v578_v41 = vadd.f32 (!%p821_p6), %v822_v62, %v555_v26 }
 0x10b   : > { %v586_v16 = vmax.f32 %v570_v6, 0.0  ;;  %v847_v28 = vpack.c.bf16 %v585_v15, %v585_v15  ;;  %v576_v37 = vadd.f32 %v822_v62, %v553_v20  ;;  %v591_v43 = vmax.f32 %v575_v36, 0.0 }
 0x10c   : > { %v584_v12 = vmax.f32 %v568_v1, 0.0  ;;  %v845_v21 = vpack.c.bf16 %v583_v11, %v583_v11  ;;  %v593_v47 = vmax.f32 %v577_v40, 0.0  ;;  %v594_v48 = vmax.f32 %v578_v41, 0.0 }
 0x10d   : > { %v848_v29 = vpack.c.bf16 %v586_v16, %v586_v16  ;;  %666 = vst.msk [vmem:[%s1152_s3 + $0x8] sm:$0xf] %vm663_vm2, %v847_v28  ;;  %v592_v44 = vmax.f32 %v576_v37, 0.0  ;;  %v853_v51 = vpack.c.bf16 %v591_v43, %v591_v43 }
 0x10e   : > { %v550_v9 = vld [vmem:[#allocation2 + $0x30] sm:$0xff]  ;;  %v846_v22 = vpack.c.bf16 %v584_v12, %v584_v12  ;;  %664 = vst.msk [vmem:[%s1152_s3] sm:$0xf] %vm663_vm2, %v845_v21  ;;  %v855_v55 = vpack.c.bf16 %v593_v47, %v593_v47  ;;  %v856_v56 = vpack.c.bf16 %v594_v48, %v594_v48 }
 0x10f   : > { %v548_v4 = vld [vmem:[#allocation2 + $0x20] sm:$0xff]  ;;  %v573_v14 = vadd.f32 %v822_v62, %v550_v9  ;;  %v558_v33 = vld [vmem:[#allocation2 + $0x70] sm:$0xff]  ;;  %667 = vst.msk [vmem:[%s1152_s3 + $0xc] sm:$0xf] %vm663_vm2, %v848_v29  ;;  %v854_v52 = vpack.c.bf16 %v592_v44, %v592_v44  ;;  %672 = vst.msk [vmem:[%s1152_s3 + $0x20] sm:$0xf] %vm663_vm2, %v853_v51 }
 0x110   : > { %v571_v7 = vadd.f32 %v822_v62, %v548_v4  ;;  %v551_v10 = vld [vmem:[#allocation2 + $0x38] sm:$0xff]  ;;  %v556_v27 = vld [vmem:[#allocation2 + $0x60] sm:$0xff]  ;;  %665 = vst.msk [vmem:[%s1152_s3 + $0x4] sm:$0xf] %vm663_vm2, %v846_v22  ;;  %v581_v46 = vadd.f32 %v822_v62, %v558_v33  ;;  %674 = vst.msk [vmem:[%s1152_s3 + $0x28] sm:$0xf] %vm663_vm2, %v855_v55 }
 0x111   : > { %v549_v8 = vld [vmem:[#allocation2 + $0x28] sm:$0xff]  ;;  %v574_v18 = vadd.f32 %v822_v62, %v551_v10  ;;  %v589_v24 = vmax.f32 %v573_v14, 0.0  ;;  %v559_v38 = vld [vmem:[#allocation2 + $0x78] sm:$0xff]  ;;  %v579_v42 = vadd.f32 %v822_v62, %v556_v27  ;;  %673 = vst.msk [vmem:[%s1152_s3 + $0x24] sm:$0xf] %vm663_vm2, %v854_v52 }
 0x112   : > { %v572_v13 = vadd.f32 %v822_v62, %v549_v8  ;;  %v587_v17 = vmax.f32 %v571_v7, 0.0  ;;  %v557_v32 = vld [vmem:[#allocation2 + $0x68] sm:$0xff]  ;;  %v582_v50 = vadd.f32 %v822_v62, %v559_v38  ;;  %v597_v54 = vmax.f32 %v581_v46, 0.0  ;;  %675 = vst.msk [vmem:[%s1152_s3 + $0x2c] sm:$0xf] %vm663_vm2, %v856_v56 }
 0x113   : > { %v590_v31 = vmax.f32 %v574_v18, 0.0  ;;  %v851_v35 = vpack.c.bf16 %v589_v24, %v589_v24  ;;  %v580_v45 = vadd.f32 %v822_v62, %v557_v32  ;;  %v595_v49 = vmax.f32 %v579_v42, 0.0 }
 0x114   : > { %v588_v23 = vmax.f32 %v572_v13, 0.0  ;;  %v849_v30 = vpack.c.bf16 %v587_v17, %v587_v17  ;;  %v598_v58 = vmax.f32 %v582_v50, 0.0  ;;  %v859_v60 = vpack.c.bf16 %v597_v54, %v597_v54 }
 0x115   : > { %v852_v39 = vpack.c.bf16 %v590_v31, %v590_v31  ;;  %670 = vst.msk [vmem:[%s1152_s3 + $0x18] sm:$0xf] %vm663_vm2, %v851_v35  ;;  %v596_v53 = vmax.f32 %v580_v45, 0.0  ;;  %v857_v57 = vpack.c.bf16 %v595_v49, %v595_v49 }
 0x116   : > { %v850_v34 = vpack.c.bf16 %v588_v23, %v588_v23  ;;  %668 = vst.msk [vmem:[%s1152_s3 + $0x10] sm:$0xf] %vm663_vm2, %v849_v30  ;;  %v860_v61 = vpack.c.bf16 %v598_v58, %v598_v58  ;;  %678 = vst.msk [vmem:[%s1152_s3 + $0x38] sm:$0xf] %vm663_vm2, %v859_v60 }
 0x117   : > { %671 = vst.msk [vmem:[%s1152_s3 + $0x1c] sm:$0xf] %vm663_vm2, %v852_v39  ;;  %v858_v59 = vpack.c.bf16 %v596_v53, %v596_v53  ;;  %676 = vst.msk [vmem:[%s1152_s3 + $0x30] sm:$0xf] %vm663_vm2, %v857_v57 }
 0x118   : > { %669 = vst.msk [vmem:[%s1152_s3 + $0x14] sm:$0xf] %vm663_vm2, %v850_v34  ;;  %679 = vst.msk [vmem:[%s1152_s3 + $0x3c] sm:$0xf] %vm663_vm2, %v860_v61 }
 0x119   : > { %677 = vst.msk [vmem:[%s1152_s3 + $0x34] sm:$0xf] %vm663_vm2, %v858_v59 }
 0x11a PF: > { %s13_s14 = sadd.s32 1, %s964_s14   ;;  %s1153_s12 = smov %s960_s13 }
 0x11b   : > { %p10_p7 = scmp.ge.s32.totalorder %s13_s14, 11   ;;  %s1154_s13 = smov %s1156_s15 }
 0x11d   :  { %12 = sbr.rel (!%p10_p7) target bundleno = 2 (0x2), region = 76 }

// kernel: resnet34_forward.42
= control target key start
LH: loop header
LB: loop body
LE: loop exit
PB: predicated region body
PF: predicated region fallthrough
CT: control target
= control target key end

     0   :  { %s1158_s15 = smov 0   ;;  %s1160_s16 = smov 0   ;;  %s1362_s0 = inlined_call_operand.vmem [shape: bf16[9,128,64], index: 0, kind: input, shape index: {}]   ;;  %s1363_s1 = inlined_call_operand.vmem [shape: bf16[9,64,64], index: 1, kind: input, shape index: {}]   ;;  %s1364_s2 = inlined_call_operand.vmem [shape: f32[1,64], index: 2, kind: input, shape index: {}]   ;;  %s1365_s3 = inlined_call_operand.vmem [shape: bf16[128,64], index: 3, kind: input, shape index: {}]   ;;  %s1366_s4 = inlined_call_operand.vmem [shape: bf16[128,64], index: 4, kind: output, shape index: {}]  }
   0x1   :  { %s1162_s17 = smov 0  }
   0x2 LB: > { %s26_s18 = sadd.s32 1, %s1126_s16  ;;  %p922_p0 = scmp.ge.s32.totalorder %s1130_s17, 1  ;;  %s1130_s17 = sphi %s1162_s17, %s14_s17   ;;  %s1126_s16 = sphi %s1160_s16, %s1368_s16   ;;  %s1122_s15 = sphi %s1158_s15, %s1367_s15  }
   0x3   : > { %p27_p1 = scmp.ge.s32.totalorder %s26_s18, 9  ;;  %p229_p2 = scmp.lt.s32.totalorder %s1130_s17, 10 }
   0x5   : > { %s1370_s18 = smov (%p27_p1, %s26_s18), 0  ;;  %p230_p3 = pnand %p922_p0, %p229_p2 }
   0x6   : > { %p282_p4 = scmp.lt.s32.totalorder (!%p230_p3), %s1122_s15, 8  ;;  %p927_p5 = scmp.ne.s32.totalorder (!%p230_p3), %s1122_s15, 0 }
   0x7   : > { %233 = sbr.rel (%p230_p3) target bundleno = 288 (0x120), region = 36 }
   0xe   : > { %s283_s19 = scalar_select %p282_p4, %s1122_s15, 8 }
   0xf   : > { %324 = sbr.rel (%p927_p5) target bundleno = 24 (0x18), region = 40  ;;  %vm325_vm0 = vcmask (!%p927_p5), 523264   ;;  %v1132_v0 = vmov (!%p927_p5), 0.0  }
  0x10   : > { %s970_s20 = sshll.u32 %s283_s19, 6  ;;  %s971_s21 = sshll.u32 %s283_s19, 5  ;;  %326 = vst.msk [vmem:[#allocation2] sm:$0xff] (!%p927_p5), %vm325_vm0, %v1132_v0  ;;  %327 = vst.msk [vmem:[#allocation2 + $0x8] sm:$0xff] (!%p927_p5), %vm325_vm0, %v1132_v0 }
  0x11   : > { %s1183_s24 = scalar_lea.vmem %s1362_s0, %s970_s20  ;;  %s1188_s27 = scalar_lea.vmem %s1363_s1, %s971_s21  ;;  %328 = vst.msk [vmem:[#allocation2 + $0x10] sm:$0xff] (!%p927_p5), %vm325_vm0, %v1132_v0  ;;  %329 = vst.msk [vmem:[#allocation2 + $0x18] sm:$0xff] (!%p927_p5), %vm325_vm0, %v1132_v0 }
  0x12   : > { %330 = vst.msk [vmem:[#allocation2 + $0x20] sm:$0xff] (!%p927_p5), %vm325_vm0, %v1132_v0  ;;  %331 = vst.msk [vmem:[#allocation2 + $0x28] sm:$0xff] (!%p927_p5), %vm325_vm0, %v1132_v0 }
  0x13   : > { %332 = vst.msk [vmem:[#allocation2 + $0x30] sm:$0xff] (!%p927_p5), %vm325_vm0, %v1132_v0  ;;  %333 = vst.msk [vmem:[#allocation2 + $0x38] sm:$0xff] (!%p927_p5), %vm325_vm0, %v1132_v0 }
  0x14   : > { %334 = vst.msk [vmem:[#allocation2 + $0x40] sm:$0xff] (!%p927_p5), %vm325_vm0, %v1132_v0  ;;  %335 = vst.msk [vmem:[#allocation2 + $0x48] sm:$0xff] (!%p927_p5), %vm325_vm0, %v1132_v0 }
  0x15   : > { %336 = vst.msk [vmem:[#allocation2 + $0x50] sm:$0xff] (!%p927_p5), %vm325_vm0, %v1132_v0  ;;  %337 = vst.msk [vmem:[#allocation2 + $0x58] sm:$0xff] (!%p927_p5), %vm325_vm0, %v1132_v0 }
  0x16   : > { %338 = vst.msk [vmem:[#allocation2 + $0x60] sm:$0xff] %vm325_vm0, %v1132_v0  ;;  %339 = vst.msk [vmem:[#allocation2 + $0x68] sm:$0xff] %vm325_vm0, %v1132_v0 }
  0x17   : > { %340 = vst.msk [vmem:[#allocation2 + $0x70] sm:$0xff] %vm325_vm0, %v1132_v0  ;;  %341 = vst.msk [vmem:[#allocation2 + $0x78] sm:$0xff] %vm325_vm0, %v1132_v0 }
  0x18 PF: > { %v1096_v1 = vld [vmem:[%s1188_s27] sm:$0xff]   ;;  %v1097_v2 = vld [vmem:[%s1188_s27 + $0x8] sm:$0xff]   ;;  %v1098_v3 = vld [vmem:[%s1188_s27 + $0x10] sm:$0xff]   ;;  %vm446_vm1 = vcmask 523264   ;;  %p948_p6 = scmp.ne.s32.totalorder %s1122_s15, 8 }
  0x19   : > { %1039 = vmatprep.subr.bf16.mxu0 %v1096_v1  ;;  %1063 = vmatprep.subr.bf16.mxu1 %v1096_v1  ;;  %v1100_v4 = vld [vmem:[%s1183_s24] sm:$0xff]   ;;  %v1099_v6 = vld [vmem:[%s1188_s27 + $0x18] sm:$0xff]   ;;  %v1102_v7 = vld [vmem:[%s1183_s24 + $0x8] sm:$0xff]   ;;  %vm771_vm2 = vcmask (!%p948_p6), 519168  }
  0x1a   : > { %1040 = vmatpush3.bf16.msra.mxu0 %v1096_v1  ;;  %1067 = vmatpush3.bf16.msra.mxu1 %v1096_v1  ;;  %v1101_v5 = vld [vmem:[%s1183_s24 + $0x20] sm:$0xff]   ;;  %v1103_v8 = vld [vmem:[%s1183_s24 + $0x28] sm:$0xff]   ;;  %v1104_v9 = vld [vmem:[%s1183_s24 + $0x10] sm:$0xff]  }
  0x1b   : > { %1041 = vmatprep.subr.bf16.mxu0 %v1097_v2  ;;  %1064 = vmatprep.subr.bf16.mxu1 %v1097_v2  ;;  %v1105_v10 = vld [vmem:[%s1183_s24 + $0x30] sm:$0xff]   ;;  %v1106_v11 = vld [vmem:[%s1183_s24 + $0x18] sm:$0xff]   ;;  %v342_v15 = vld [vmem:[#allocation2] sm:$0xff] }
  0x1c   : > { %1047 = vmatprep.mubr.msk.bf16.mxu0 %vm446_vm1, %v1100_v4  ;;  %1055 = vmatprep.mubr.msk.bf16.mxu1 %vm446_vm1, %v1101_v5  ;;  %v1107_v12 = vld [vmem:[%s1183_s24 + $0x38] sm:$0xff]   ;;  %v344_v13 = vld [vmem:[#allocation2 + $0x10] sm:$0xff]  ;;  %v343_v25 = vld [vmem:[#allocation2 + $0x8] sm:$0xff] }
  0x1d   : > { %v350_v16 = vld [vmem:[#allocation2 + $0x40] sm:$0xff]  ;;  %v345_v19 = vld [vmem:[#allocation2 + $0x18] sm:$0xff]  ;;  %v351_v26 = vld [vmem:[#allocation2 + $0x48] sm:$0xff] }
  0x1e   : > { %1042 = vmatpush3.bf16.msra.mxu0 %v1097_v2  ;;  %1068 = vmatpush3.bf16.msra.mxu1 %v1097_v2  ;;  %v352_v14 = vld [vmem:[#allocation2 + $0x50] sm:$0xff]  ;;  %v353_v20 = vld [vmem:[#allocation2 + $0x58] sm:$0xff]  ;;  %v346_v39 = vld [vmem:[#allocation2 + $0x20] sm:$0xff] }
  0x1f   : > { %1043 = vmatprep.subr.bf16.mxu0 %v1098_v3  ;;  %1065 = vmatprep.subr.bf16.mxu1 %v1098_v3  ;;  %v348_v37 = vld [vmem:[#allocation2 + $0x30] sm:$0xff]  ;;  %v354_v40 = vld [vmem:[#allocation2 + $0x60] sm:$0xff]  ;;  %v349_v43 = vld [vmem:[#allocation2 + $0x38] sm:$0xff] }
  0x20   : > { %v356_v38 = vld [vmem:[#allocation2 + $0x70] sm:$0xff]  ;;  %v357_v44 = vld [vmem:[#allocation2 + $0x78] sm:$0xff]  ;;  %v347_v49 = vld [vmem:[#allocation2 + $0x28] sm:$0xff] }
  0x21   : > { %v355_v50 = vld [vmem:[#allocation2 + $0x68] sm:$0xff]  ;;  %v1247_v62 = vld [vmem:[%s1364_s2] ss:$0 sm:$0xff] (!%p948_p6) }
  0x22   : > { %1044 = vmatpush3.bf16.msra.mxu0 %v1098_v3  ;;  %1069 = vmatpush3.bf16.msra.mxu1 %v1098_v3  ;;  %v989_v63 = vld [vmem:[%s1365_s3] sm:$0xff] (!%p948_p6)   ;;  %v1020_v5 = vld [vmem:[%s1365_s3 + $0x8] sm:$0xff] (!%p948_p6)  }
  0x23   : > { %1045 = vmatprep.subr.bf16.mxu0 %v1099_v6  ;;  %1066 = vmatprep.subr.bf16.mxu1 %v1099_v6  ;;  %v990_v1 = vunpack.c.l.bf16 (!%p948_p6), %v989_v63  ;;  %v991_v3 = vunpack.c.h.bf16 (!%p948_p6), %v989_v63 }
  0x26   : > { %1046 = vmatpush3.bf16.msra.mxu0 %v1099_v6  ;;  %1070 = vmatpush3.bf16.msra.mxu1 %v1099_v6 }
  0x29   : > { %1048 = vmatmul.mubr.msk.bf16.vlgmr.msra.gmra.mrb[0].mxu0 %vm446_vm1, %v1102_v7  ;;  %1056 = vmatmul.mubr.msk.bf16.vlgmr.msra.gmra.mrb[0].mxu1 %vm446_vm1, %v1103_v8  ;;  %v994_v8 = vunpack.c.l.bf16 (!%p948_p6), %v1020_v5 }
  0x2a   : > { %1051 = vmatprep.mubr.msk.bf16.mxu0 %vm446_vm1, %v1104_v9  ;;  %1059 = vmatprep.mubr.msk.bf16.mxu1 %vm446_vm1, %v1105_v10  ;;  %v995_v10 = vunpack.c.h.bf16 (!%p948_p6), %v1020_v5 }
  0x31   : > { %1052 = vmatmul.mubr.msk.bf16.gmra.mrb[4].mxu0 %vm446_vm1, %v1106_v11  ;;  %1060 = vmatmul.mubr.msk.bf16.gmra.mrb[4].mxu1 %vm446_vm1, %v1107_v12  ;;  %v1021_v12 = vld [vmem:[%s1365_s3 + $0x10] sm:$0xff] (!%p948_p6)  }
  0xfc   : > { %v1049_v17 = vpop.f32.mrb[0].mxu0  ;;  %v1057_v18 = vpop.f32.mrb[0].mxu1 }
  0xfd   : > { %v570_v21 = vadd.f32 %v1049_v17, %v344_v13  ;;  %v578_v22 = vadd.f32 %v1057_v18, %v352_v14  ;;  %v505_v23 = vpop.f32.mrb[1].mxu0  ;;  %v537_v24 = vpop.f32.mrb[1].mxu1 }
  0xfe   : > { %v568_v27 = vadd.f32 %v505_v23, %v342_v15  ;;  %v576_v28 = vadd.f32 %v537_v24, %v350_v16  ;;  %v1050_v29 = vpop.f32.mrb[2].mxu0  ;;  %v1058_v30 = vpop.f32.mrb[2].mxu1  ;;  %v998_v16 = vunpack.c.l.bf16 (!%p948_p6), %v1021_v12  ;;  %v999_v23 = vunpack.c.h.bf16 (!%p948_p6), %v1021_v12  ;;  %v1026_v12 = vld [vmem:[%s1365_s3 + $0x38] sm:$0xff] (!%p948_p6)  }
  0xff   : > { %586 = vst.msk [vmem:[#allocation2 + $0x10] sm:$0xff] %vm446_vm1, %v570_v21  ;;  %594 = vst.msk [vmem:[#allocation2 + $0x50] sm:$0xff] %vm446_vm1, %v578_v22  ;;  %v571_v31 = vadd.f32 %v1050_v29, %v345_v19  ;;  %v579_v32 = vadd.f32 %v1058_v30, %v353_v20  ;;  %v508_v33 = vpop.f32.mrb[3].mxu0  ;;  %v540_v34 = vpop.f32.mrb[3].mxu1  ;;  %v1022_v19 = vld [vmem:[%s1365_s3 + $0x18] sm:$0xff] (!%p948_p6)  }
 0x100   : > { %584 = vst.msk [vmem:[#allocation2] sm:$0xff] %vm446_vm1, %v568_v27  ;;  %592 = vst.msk [vmem:[#allocation2 + $0x40] sm:$0xff] %vm446_vm1, %v576_v28  ;;  %v569_v35 = vadd.f32 %v508_v33, %v343_v25  ;;  %v577_v36 = vadd.f32 %v540_v34, %v351_v26 }
 0x101   : > { %587 = vst.msk [vmem:[#allocation2 + $0x18] sm:$0xff] %vm446_vm1, %v571_v31  ;;  %595 = vst.msk [vmem:[#allocation2 + $0x58] sm:$0xff] %vm446_vm1, %v579_v32  ;;  %v1002_v32 = vunpack.c.l.bf16 (!%p948_p6), %v1022_v19 }
 0x102   : > { %585 = vst.msk [vmem:[#allocation2 + $0x8] sm:$0xff] %vm446_vm1, %v569_v35  ;;  %593 = vst.msk [vmem:[#allocation2 + $0x48] sm:$0xff] %vm446_vm1, %v577_v36 }
 0x104   : > { %v1053_v41 = vpop.f32.mrb[4].mxu0  ;;  %v1061_v42 = vpop.f32.mrb[4].mxu1  ;;  %603 = sbr.rel (%p948_p6) target bundleno = 288 (0x120), region = 44 }
 0x105   : > { %v574_v45 = vadd.f32 %v1053_v41, %v348_v37  ;;  %v582_v46 = vadd.f32 %v1061_v42, %v356_v38  ;;  %v521_v47 = vpop.f32.mrb[5].mxu0  ;;  %v553_v48 = vpop.f32.mrb[5].mxu1  ;;  %v1023_v38 = vld [vmem:[%s1365_s3 + $0x20] sm:$0xff] (!%p948_p6)  }
 0x106   : > { %v572_v51 = vadd.f32 %v521_v47, %v346_v39  ;;  %v580_v52 = vadd.f32 %v553_v48, %v354_v40  ;;  %v1054_v53 = vpop.f32.mrb[6].mxu0  ;;  %v1062_v54 = vpop.f32.mrb[6].mxu1  ;;  %v606_v4 = vld [vmem:[#allocation2 + $0x10] sm:$0xff] (!%p948_p6)  ;;  %v1003_v48 = vunpack.c.h.bf16 (!%p948_p6), %v1022_v19 }
 0x107   : > { %590 = vst.msk [vmem:[#allocation2 + $0x30] sm:$0xff] %vm446_vm1, %v574_v45  ;;  %598 = vst.msk [vmem:[#allocation2 + $0x70] sm:$0xff] %vm446_vm1, %v582_v46  ;;  %v575_v55 = vadd.f32 %v1054_v53, %v349_v43  ;;  %v583_v56 = vadd.f32 %v1062_v54, %v357_v44  ;;  %v524_v57 = vpop.f32.mrb[7].mxu0  ;;  %v556_v58 = vpop.f32.mrb[7].mxu1  ;;  %v604_v61 = vld [vmem:[#allocation2] sm:$0xff] (!%p948_p6)  ;;  %v629_v7 = vadd.f32 (!%p948_p6), %v1247_v62, %v606_v4  ;;  %v614_v44 = vld [vmem:[#allocation2 + $0x50] sm:$0xff] (!%p948_p6)  ;;  %v1006_v53 = vunpack.c.l.bf16 (!%p948_p6), %v1023_v38 }
 0x108   : > { %588 = vst.msk [vmem:[#allocation2 + $0x20] sm:$0xff] %vm446_vm1, %v572_v51  ;;  %596 = vst.msk [vmem:[#allocation2 + $0x60] sm:$0xff] %vm446_vm1, %v580_v52  ;;  %v573_v59 = vadd.f32 %v524_v57, %v347_v49  ;;  %v581_v60 = vadd.f32 %v556_v58, %v355_v50  ;;  %v627_v0 = vadd.f32 (!%p948_p6), %v1247_v62, %v604_v61  ;;  %v607_v9 = vld [vmem:[#allocation2 + $0x18] sm:$0xff] (!%p948_p6)  ;;  %v612_v33 = vld [vmem:[#allocation2 + $0x40] sm:$0xff] (!%p948_p6)  ;;  %v1007_v57 = vunpack.c.h.bf16 (!%p948_p6), %v1023_v38 }
 0x109   : > { %591 = vst.msk [vmem:[#allocation2 + $0x38] sm:$0xff] %vm446_vm1, %v575_v55  ;;  %599 = vst.msk [vmem:[#allocation2 + $0x78] sm:$0xff] %vm446_vm1, %v583_v56  ;;  %v605_v2 = vld [vmem:[#allocation2 + $0x8] sm:$0xff] (!%p948_p6)  ;;  %v630_v14 = vadd.f32 (!%p948_p6), %v1247_v62, %v607_v9  ;;  %v677_v21 = vadd.f32 (!%p948_p6), %v994_v8, %v629_v7  ;;  %v635_v49 = vadd.f32 (!%p948_p6), %v1247_v62, %v612_v33  ;;  %v615_v50 = vld [vmem:[#allocation2 + $0x58] sm:$0xff] (!%p948_p6) }
 0x10a   : > { %589 = vst.msk [vmem:[#allocation2 + $0x28] sm:$0xff] %vm446_vm1, %v573_v59  ;;  %597 = vst.msk [vmem:[#allocation2 + $0x68] sm:$0xff] %vm446_vm1, %v581_v60  ;;  %v628_v6 = vadd.f32 (!%p948_p6), %v1247_v62, %v605_v2  ;;  %v675_v13 = vadd.f32 (!%p948_p6), %v990_v1, %v627_v0  ;;  %v613_v39 = vld [vmem:[#allocation2 + $0x48] sm:$0xff] (!%p948_p6)  ;;  %v637_v58 = vadd.f32 (!%p948_p6), %v1247_v62, %v614_v44  ;;  %v1025_v60 = vld [vmem:[%s1365_s3 + $0x30] sm:$0xff] (!%p948_p6)  }
 0x10b   : > { %v678_v26 = vadd.f32 %v995_v10, %v630_v14  ;;  %v693_v30 = vmax.f32 %v677_v21, 0.0  ;;  %v1024_v45 = vld [vmem:[%s1365_s3 + $0x28] sm:$0xff]   ;;  %v636_v54 = vadd.f32 %v1247_v62, %v613_v39  ;;  %v683_v0 = vadd.f32 %v1006_v53, %v635_v49 }
 0x10c   : > { %v676_v20 = vadd.f32 %v991_v3, %v628_v6  ;;  %v691_v25 = vmax.f32 %v675_v13, 0.0  ;;  %v1010_v59 = vunpack.c.l.bf16 %v1024_v45  ;;  %v638_v1 = vadd.f32 %v1247_v62, %v615_v50 }
 0x10d   : > { %v694_v35 = vmax.f32 %v678_v26, 0.0  ;;  %v974_v41 = vpack.c.bf16 %v693_v30, %v693_v30  ;;  %v1011_v2 = vunpack.c.h.bf16 %v1024_v45  ;;  %v684_v4 = vadd.f32 %v1007_v57, %v636_v54 }
 0x10e   : > { %v610_v18 = vld [vmem:[#allocation2 + $0x30] sm:$0xff]  ;;  %v692_v29 = vmax.f32 %v676_v20, 0.0  ;;  %v972_v34 = vpack.c.bf16 %v691_v25, %v691_v25  ;;  %v685_v5 = vadd.f32 %v1010_v59, %v637_v58  ;;  %v699_v8 = vmax.f32 %v683_v0, 0.0 }
 0x10f   : > { %v608_v11 = vld [vmem:[#allocation2 + $0x20] sm:$0xff]  ;;  %v633_v28 = vadd.f32 %v1247_v62, %v610_v18  ;;  %v975_v46 = vpack.c.bf16 %v694_v35, %v694_v35  ;;  %774 = vst.msk [vmem:[%s1366_s4 + $0x8] sm:$0xf] %vm771_vm2, %v974_v41  ;;  %v618_v7 = vld [vmem:[#allocation2 + $0x70] sm:$0xff]  ;;  %v686_v9 = vadd.f32 %v1011_v2, %v638_v1  ;;  %v1014_v10 = vunpack.c.l.bf16 %v1025_v60 }
 0x110   : > { %v631_v15 = vadd.f32 %v1247_v62, %v608_v11  ;;  %v611_v24 = vld [vmem:[#allocation2 + $0x38] sm:$0xff]  ;;  %v973_v40 = vpack.c.bf16 %v692_v29, %v692_v29  ;;  %772 = vst.msk [vmem:[%s1366_s4] sm:$0xf] %vm771_vm2, %v972_v34  ;;  %v616_v55 = vld [vmem:[#allocation2 + $0x60] sm:$0xff]  ;;  %v700_v14 = vmax.f32 %v684_v4, 0.0  ;;  %v980_v18 = vpack.c.bf16 %v699_v8, %v699_v8 }
 0x111   : > { %v609_v17 = vld [vmem:[#allocation2 + $0x28] sm:$0xff]  ;;  %v634_v37 = vadd.f32 %v1247_v62, %v611_v24  ;;  %v681_v43 = vadd.f32 %v1002_v32, %v633_v28  ;;  %775 = vst.msk [vmem:[%s1366_s4 + $0xc] sm:$0xf] %vm771_vm2, %v975_v46  ;;  %v639_v6 = vadd.f32 %v1247_v62, %v616_v55  ;;  %v702_v19 = vmax.f32 %v686_v9, 0.0 }
 0x112   : > { %v632_v22 = vadd.f32 %v1247_v62, %v609_v17  ;;  %v679_v27 = vadd.f32 %v998_v16, %v631_v15  ;;  %773 = vst.msk [vmem:[%s1366_s4 + $0x4] sm:$0xf] %vm771_vm2, %v973_v40  ;;  %v617_v61 = vld [vmem:[#allocation2 + $0x68] sm:$0xff]  ;;  %v701_v15 = vmax.f32 %v685_v5, 0.0  ;;  %v1015_v16 = vunpack.c.h.bf16 %v1025_v60  ;;  %v619_v17 = vld [vmem:[#allocation2 + $0x78] sm:$0xff] }
 0x113   : > { %v697_v52 = vmax.f32 %v681_v43, 0.0  ;;  %v682_v56 = vadd.f32 %v1003_v48, %v634_v37  ;;  %v640_v11 = vadd.f32 %v1247_v62, %v617_v61  ;;  %v687_v20 = vadd.f32 %v1014_v10, %v639_v6  ;;  %780 = vst.msk [vmem:[%s1366_s4 + $0x20] sm:$0xf] %vm771_vm2, %v980_v18 }
 0x114   : > { %v680_v31 = vadd.f32 %v999_v23, %v632_v22  ;;  %v695_v36 = vmax.f32 %v679_v27, 0.0  ;;  %v641_v21 = vadd.f32 %v1247_v62, %v618_v7  ;;  %v981_v22 = vpack.c.bf16 %v700_v14, %v700_v14 }
 0x115   : > { %v978_v63 = vpack.c.bf16 %v697_v52, %v697_v52  ;;  %v698_v3 = vmax.f32 %v682_v56, 0.0  ;;  %v982_v23 = vpack.c.bf16 %v701_v15, %v701_v15  ;;  %v688_v24 = vadd.f32 %v1015_v16, %v640_v11 }
 0x116   : > { %v696_v42 = vmax.f32 %v680_v31, 0.0  ;;  %v976_v47 = vpack.c.bf16 %v695_v36, %v695_v36  ;;  %v1018_v25 = vunpack.c.l.bf16 %v1026_v12  ;;  %v983_v26 = vpack.c.bf16 %v702_v19, %v702_v19  ;;  %781 = vst.msk [vmem:[%s1366_s4 + $0x24] sm:$0xf] %vm771_vm2, %v981_v22 }
 0x117   : > { %778 = vst.msk [vmem:[%s1366_s4 + $0x18] sm:$0xf] %vm771_vm2, %v978_v63  ;;  %v979_v13 = vpack.c.bf16 %v698_v3, %v698_v3  ;;  %v703_v27 = vmax.f32 %v687_v20, 0.0  ;;  %v642_v28 = vadd.f32 %v1247_v62, %v619_v17  ;;  %v1019_v29 = vunpack.c.h.bf16 %v1026_v12  ;;  %782 = vst.msk [vmem:[%s1366_s4 + $0x28] sm:$0xf] %vm771_vm2, %v982_v23 }
 0x118   : > { %v977_v51 = vpack.c.bf16 %v696_v42, %v696_v42  ;;  %776 = vst.msk [vmem:[%s1366_s4 + $0x10] sm:$0xf] %vm771_vm2, %v976_v47  ;;  %v704_v30 = vmax.f32 %v688_v24, 0.0  ;;  %v689_v31 = vadd.f32 %v1018_v25, %v641_v21  ;;  %783 = vst.msk [vmem:[%s1366_s4 + $0x2c] sm:$0xf] %vm771_vm2, %v983_v26 }
 0x119   : > { %779 = vst.msk [vmem:[%s1366_s4 + $0x1c] sm:$0xf] %vm771_vm2, %v979_v13  ;;  %v984_v32 = vpack.c.bf16 %v703_v27, %v703_v27  ;;  %v690_v62 = vadd.f32 %v1019_v29, %v642_v28 }
 0x11a   : > { %777 = vst.msk [vmem:[%s1366_s4 + $0x14] sm:$0xf] %vm771_vm2, %v977_v51  ;;  %v985_v33 = vpack.c.bf16 %v704_v30, %v704_v30  ;;  %v705_v34 = vmax.f32 %v689_v31, 0.0 }
 0x11b   : > { %784 = vst.msk [vmem:[%s1366_s4 + $0x30] sm:$0xf] %vm771_vm2, %v984_v32  ;;  %v706_v35 = vmax.f32 %v690_v62, 0.0 }
 0x11c   : > { %785 = vst.msk [vmem:[%s1366_s4 + $0x34] sm:$0xf] %vm771_vm2, %v985_v33  ;;  %v986_v36 = vpack.c.bf16 %v705_v34, %v705_v34 }
 0x11d   : > { %v987_v37 = vpack.c.bf16 %v706_v35, %v706_v35 }
 0x11e   : > { %786 = vst.msk [vmem:[%s1366_s4 + $0x38] sm:$0xf] %vm771_vm2, %v986_v36 }
 0x11f   : > { %787 = vst.msk [vmem:[%s1366_s4 + $0x3c] sm:$0xf] %vm771_vm2, %v987_v37 }
 0x120 PF: > { %s14_s17 = sadd.s32 1, %s1130_s17   ;;  %s1367_s15 = smov %s1126_s16 }
 0x121   : > { %p11_p7 = scmp.ge.s32.totalorder %s14_s17, 11   ;;  %s1368_s16 = smov %s1370_s18 }
 0x123   :  { %13 = sbr.rel (!%p11_p7) target bundleno = 2 (0x2), region = 83 }

// kernel: resnet34_forward.48
= control target key start
LH: loop header
LB: loop body
LE: loop exit
PB: predicated region body
PF: predicated region fallthrough
CT: control target
= control target key end

     0   :  { %s676_s12 = smov 0   ;;  %s678_s13 = smov 0   ;;  %s724_s0 = inlined_call_operand.vmem [shape: bf16[9,32,64], index: 0, kind: input, shape index: {}]   ;;  %s725_s1 = inlined_call_operand.vmem [shape: bf16[9,64,128], index: 1, kind: input, shape index: {}]   ;;  %s726_s2 = inlined_call_operand.vmem [shape: f32[1,128], index: 2, kind: input, shape index: {}]   ;;  %s727_s3 = inlined_call_operand.vmem [shape: bf16[32,128], index: 3, kind: output, shape index: {}]  }
   0x1   :  { %s680_s14 = smov 0  }
   0x2 LB: > { %s25_s15 = sadd.s32 1, %s649_s13  ;;  %p541_p0 = scmp.ge.s32.totalorder %s653_s14, 1  ;;  %s653_s14 = sphi %s680_s14, %s13_s14   ;;  %s649_s13 = sphi %s678_s13, %s729_s13   ;;  %s645_s12 = sphi %s676_s12, %s728_s12  }
   0x3   : > { %p26_p1 = scmp.ge.s32.totalorder %s25_s15, 9  ;;  %p188_p2 = scmp.lt.s32.totalorder %s653_s14, 10 }
   0x5   : > { %s731_s15 = smov (%p26_p1, %s25_s15), 0  ;;  %p189_p3 = pnand %p541_p0, %p188_p2 }
   0x6   : > { %p231_p4 = scmp.lt.s32.totalorder (!%p189_p3), %s645_s12, 8  ;;  %p546_p5 = scmp.ne.s32.totalorder (!%p189_p3), %s645_s12, 0 }
   0x7   : > { %192 = sbr.rel (%p189_p3) target bundleno = 271 (0x10f), region = 32 }
   0xe   : > { %s232_s16 = scalar_select %p231_p4, %s645_s12, 8 }
   0xf   : > { %264 = sbr.rel (%p546_p5) target bundleno = 22 (0x16), region = 36  ;;  %v655_v0 = vmov (!%p546_p5), 0.0  }
  0x10   : > { %s565_s17 = sshll.u32 %s232_s16, 4  ;;  %s566_s18 = sshll.u32 %s232_s16, 5  ;;  %265 = vst [vmem:[#allocation2] sm:$0xff] (!%p546_p5), %v655_v0  ;;  %266 = vst [vmem:[#allocation2 + $0x8] sm:$0xff] (!%p546_p5), %v655_v0 }
  0x11   : > { %s238_s21 = scalar_lea.vmem %s724_s0, %s565_s17  ;;  %s247_s24 = scalar_lea.vmem %s725_s1, %s566_s18  ;;  %267 = vst [vmem:[#allocation2 + $0x10] sm:$0xff] (!%p546_p5), %v655_v0  ;;  %268 = vst [vmem:[#allocation2 + $0x18] sm:$0xff] (!%p546_p5), %v655_v0 }
  0x16 PF: > { %v625_v1 = vld [vmem:[%s247_s24] sm:$0xff]   ;;  %v626_v2 = vld [vmem:[%s247_s24 + $0x8] sm:$0xff]   ;;  %v627_v3 = vld [vmem:[%s247_s24 + $0x10] sm:$0xff]   ;;  %vm319_vm0 = vcmask 523264   ;;  %p555_p6 = scmp.ne.s32.totalorder %s645_s12, 8 }
  0x17   : > { %588 = vmatprep.subr.bf16.mxu0 %v625_v1  ;;  %v629_v4 = vld [vmem:[%s238_s21] sm:$0xff]   ;;  %v628_v5 = vld [vmem:[%s247_s24 + $0x18] sm:$0xff]   ;;  %v630_v6 = vld [vmem:[%s238_s21 + $0x8] sm:$0xff]  }
  0x18   : > { %589 = vmatpush3.bf16.msra.mxu0 %v625_v1  ;;  %596 = vmatprep.mubr.msk.bf16.mxu0 %vm319_vm0, %v629_v4  ;;  %v271_v7 = vld [vmem:[#allocation2 + $0x10] sm:$0xff]  ;;  %v269_v8 = vld [vmem:[#allocation2] sm:$0xff]  ;;  %v272_v10 = vld [vmem:[#allocation2 + $0x18] sm:$0xff] }
  0x19   : > { %590 = vmatprep.subr.bf16.mxu0 %v626_v2  ;;  %v270_v13 = vld [vmem:[#allocation2 + $0x8] sm:$0xff]  ;;  %v556_v21 = vld [vmem:[%s726_s2] ss:$0 sm:$0xff] (!%p555_p6) }
  0x1c   : > { %591 = vmatpush3.bf16.msra.mxu0 %v626_v2 }
  0x1d   : > { %592 = vmatprep.subr.bf16.mxu0 %v627_v3 }
  0x20   : > { %593 = vmatpush3.bf16.msra.mxu0 %v627_v3 }
  0x21   : > { %594 = vmatprep.subr.bf16.mxu0 %v628_v5 }
  0x24   : > { %595 = vmatpush3.bf16.msra.mxu0 %v628_v5 }
  0x27   : > { %597 = vmatmul.mubr.msk.bf16.vlgmr.msra.gmra.mrb[0].mxu0 %vm319_vm0, %v630_v6 }
  0xfa   : > { %v598_v9 = vpop.f32.mrb[0].mxu0  ;;  %386 = sbr.rel (%p555_p6) target bundleno = 271 (0x10f), region = 40 }
  0xfb   : > { %v377_v11 = vadd.f32 %v598_v9, %v271_v7  ;;  %v360_v12 = vpop.f32.mrb[1].mxu0 }
  0xfc   : > { %v375_v14 = vadd.f32 %v360_v12, %v269_v8  ;;  %v599_v15 = vpop.f32.mrb[2].mxu0 }
  0xfd   : > { %381 = vst [vmem:[#allocation2 + $0x10] sm:$0xff] %v377_v11  ;;  %v378_v16 = vadd.f32 %v599_v15, %v272_v10  ;;  %v363_v17 = vpop.f32.mrb[3].mxu0 }
  0xfe   : > { %379 = vst [vmem:[#allocation2] sm:$0xff] %v375_v14  ;;  %v376_v18 = vadd.f32 %v363_v17, %v270_v13 }
  0xff   : > { %382 = vst [vmem:[#allocation2 + $0x18] sm:$0xff] %v378_v16 }
 0x100   : > { %380 = vst [vmem:[#allocation2 + $0x8] sm:$0xff] %v376_v18 }
 0x104   : > { %v389_v24 = vld [vmem:[#allocation2 + $0x10] sm:$0xff] }
 0x105   : > { %v387_v19 = vld [vmem:[#allocation2] sm:$0xff]  ;;  %v400_v26 = vadd.f32 %v556_v21, %v389_v24 }
 0x106   : > { %v398_v22 = vadd.f32 %v556_v21, %v387_v19  ;;  %v390_v25 = vld [vmem:[#allocation2 + $0x18] sm:$0xff] }
 0x107   : > { %v388_v20 = vld [vmem:[#allocation2 + $0x8] sm:$0xff]  ;;  %v401_v27 = vadd.f32 %v556_v21, %v390_v25  ;;  %v404_v30 = vmax.f32 %v400_v26, 0.0 }
 0x108   : > { %v399_v23 = vadd.f32 %v556_v21, %v388_v20  ;;  %v402_v28 = vmax.f32 %v398_v22, 0.0 }
 0x109   : > { %v405_v31 = vmax.f32 %v401_v27, 0.0 }
 0x10a   : > { %v403_v29 = vmax.f32 %v399_v23, 0.0 }
 0x10b   : > { %v579_v33 = vpack.c.bf16 %v405_v31, %v404_v30 }
 0x10c   : > { %v574_v32 = vpack.c.bf16 %v403_v29, %v402_v28 }
 0x10d   : > { %581 = vst [vmem:[%s727_s3 + $0x8] sm:$0xff] %v579_v33  }
 0x10e   : > { %575 = vst [vmem:[%s727_s3] sm:$0xff] %v574_v32  }
 0x10f PF: > { %s13_s14 = sadd.s32 1, %s653_s14   ;;  %s728_s12 = smov %s649_s13 }
 0x110   : > { %p10_p7 = scmp.ge.s32.totalorder %s13_s14, 11   ;;  %s729_s13 = smov %s731_s15 }
 0x112   :  { %12 = sbr.rel (!%p10_p7) target bundleno = 2 (0x2), region = 76 }

// kernel: resnet34_forward.47
= control target key start
LH: loop header
LB: loop body
LE: loop exit
PB: predicated region body
PF: predicated region fallthrough
CT: control target
= control target key end

     0   :  { %vm73_vm0 = vcmask 523264   ;;  %s278_s1 = inlined_call_operand.vmem [shape: bf16[1,64,128], index: 1, kind: input, shape index: {}]   ;;  %s279_s0 = inlined_call_operand.vmem [shape: bf16[1,32,64], index: 0, kind: input, shape index: {}]   ;;  %s280_s2 = inlined_call_operand.vmem [shape: f32[1,128], index: 2, kind: input, shape index: {}]   ;;  %s281_s3 = inlined_call_operand.vmem [shape: bf16[32,128], index: 3, kind: output, shape index: {}]  }
   0x1   :  { %v225_v0 = vld [vmem:[%s278_s1] sm:$0xff]   ;;  %v226_v1 = vld [vmem:[%s278_s1 + $0x8] sm:$0xff]   ;;  %v227_v2 = vld [vmem:[%s278_s1 + $0x10] sm:$0xff]  }
   0x2   :  { %213 = vmatprep.subr.bf16.mxu0 %v225_v0  ;;  %v229_v3 = vld [vmem:[%s279_s0] sm:$0xff]   ;;  %v228_v4 = vld [vmem:[%s278_s1 + $0x18] sm:$0xff]   ;;  %v230_v5 = vld [vmem:[%s279_s0 + $0x8] sm:$0xff]  }
   0x3   :  { %214 = vmatpush3.bf16.msra.mxu0 %v225_v0  ;;  %221 = vmatprep.mubr.msk.bf16.mxu0 %vm73_vm0, %v229_v3  ;;  %v187_v7 = vld [vmem:[%s280_s2] ss:$0 sm:$0xff] }
   0x4   :  { %215 = vmatprep.subr.bf16.mxu0 %v226_v1 }
   0x7   :  { %216 = vmatpush3.bf16.msra.mxu0 %v226_v1 }
   0x8   :  { %217 = vmatprep.subr.bf16.mxu0 %v227_v2 }
   0xb   :  { %218 = vmatpush3.bf16.msra.mxu0 %v227_v2 }
   0xc   :  { %219 = vmatprep.subr.bf16.mxu0 %v228_v4 }
   0xf   :  { %220 = vmatpush3.bf16.msra.mxu0 %v228_v4 }
  0x12   :  { %222 = vmatmul.mubr.msk.bf16.vlgmr.msra.gmra.mrb[0].mxu0 %vm73_vm0, %v230_v5 }
  0xe5   :  { %v223_v6 = vpop.f32.mrb[0].mxu0 }
  0xe6   :  { %v114_v8 = vpop.f32.mrb[1].mxu0  ;;  %v153_v10 = vadd.f32 %v223_v6, %v187_v7 }
  0xe7   :  { %v224_v9 = vpop.f32.mrb[2].mxu0  ;;  %v151_v13 = vadd.f32 %v187_v7, %v114_v8 }
  0xe8   :  { %v154_v11 = vadd.f32 %v224_v9, %v187_v7  ;;  %v117_v12 = vpop.f32.mrb[3].mxu0 }
  0xe9   :  { %v152_v14 = vadd.f32 %v187_v7, %v117_v12 }
  0xea   :  { %v204_v15 = vpack.c.bf16 %v154_v11, %v153_v10 }
  0xeb   :  { %v199_v16 = vpack.c.bf16 %v152_v14, %v151_v13 }
  0xec   :  { %206 = vst [vmem:[%s281_s3 + $0x8] sm:$0xff] %v204_v15  }
  0xed   :  { %200 = vst [vmem:[%s281_s3] sm:$0xff] %v199_v16  }

// kernel: resnet34_forward.49
= control target key start
LH: loop header
LB: loop body
LE: loop exit
PB: predicated region body
PF: predicated region fallthrough
CT: control target
= control target key end

     0   :  { %s826_s15 = smov 0   ;;  %s828_s16 = smov 0   ;;  %s894_s0 = inlined_call_operand.vmem [shape: bf16[9,32,128], index: 0, kind: input, shape index: {}]   ;;  %s895_s1 = inlined_call_operand.vmem [shape: bf16[9,128,128], index: 1, kind: input, shape index: {}]   ;;  %s896_s2 = inlined_call_operand.vmem [shape: f32[1,128], index: 2, kind: input, shape index: {}]   ;;  %s897_s3 = inlined_call_operand.vmem [shape: bf16[32,128], index: 3, kind: input, shape index: {}]   ;;  %s898_s4 = inlined_call_operand.vmem [shape: bf16[32,128], index: 4, kind: output, shape index: {}]  }
   0x1   :  { %s830_s17 = smov 0  }
   0x2 LB: > { %s26_s18 = sadd.s32 1, %s794_s16  ;;  %p659_p0 = scmp.ge.s32.totalorder %s798_s17, 1  ;;  %s798_s17 = sphi %s830_s17, %s14_s17   ;;  %s794_s16 = sphi %s828_s16, %s900_s16   ;;  %s790_s15 = sphi %s826_s15, %s899_s15  }
   0x3   : > { %p27_p1 = scmp.ge.s32.totalorder %s26_s18, 9  ;;  %p229_p2 = scmp.lt.s32.totalorder %s798_s17, 10 }
   0x5   : > { %s902_s18 = smov (%p27_p1, %s26_s18), 0  ;;  %p230_p3 = pnand %p659_p0, %p229_p2 }
   0x6   : > { %p282_p4 = scmp.lt.s32.totalorder (!%p230_p3), %s790_s15, 8  ;;  %p664_p5 = scmp.ne.s32.totalorder (!%p230_p3), %s790_s15, 0 }
   0x7   : > { %233 = sbr.rel (%p230_p3) target bundleno = 289 (0x121), region = 36 }
   0xe   : > { %s283_s19 = scalar_select %p282_p4, %s790_s15, 8 }
   0xf   : > { %324 = sbr.rel (%p664_p5) target bundleno = 22 (0x16), region = 40  ;;  %v800_v0 = vmov (!%p664_p5), 0.0  }
  0x10   : > { %s685_s20 = sshll.u32 %s283_s19, 4  ;;  %s686_s21 = sshll.u32 %s283_s19, 6  ;;  %325 = vst [vmem:[#allocation2] sm:$0xff] (!%p664_p5), %v800_v0  ;;  %326 = vst [vmem:[#allocation2 + $0x8] sm:$0xff] (!%p664_p5), %v800_v0 }
  0x11   : > { %s851_s24 = scalar_lea.vmem %s894_s0, %s685_s20  ;;  %s856_s27 = scalar_lea.vmem %s895_s1, %s686_s21  ;;  %327 = vst [vmem:[#allocation2 + $0x10] sm:$0xff] (!%p664_p5), %v800_v0  ;;  %328 = vst [vmem:[#allocation2 + $0x18] sm:$0xff] (!%p664_p5), %v800_v0 }
  0x16 PF: > { %v766_v1 = vld [vmem:[%s856_s27] sm:$0xff]   ;;  %v767_v2 = vld [vmem:[%s856_s27 + $0x8] sm:$0xff]   ;;  %v768_v3 = vld [vmem:[%s856_s27 + $0x10] sm:$0xff]   ;;  %p675_p6 = scmp.ne.s32.totalorder %s790_s15, 8 }
  0x17   : > { %721 = vmatprep.subr.bf16.mxu0 %v766_v1  ;;  %v769_v4 = vld [vmem:[%s856_s27 + $0x18] sm:$0xff]   ;;  %v774_v5 = vld [vmem:[%s851_s24] sm:$0xff]   ;;  %v771_v7 = vld [vmem:[%s856_s27 + $0x28] sm:$0xff]  }
  0x18   : > { %722 = vmatpush3.bf16.msra.mxu0 %v766_v1  ;;  %737 = vmatprep.mubr.bf16.mxu0 %v774_v5  ;;  %v770_v6 = vld [vmem:[%s856_s27 + $0x20] sm:$0xff]   ;;  %v772_v8 = vld [vmem:[%s856_s27 + $0x30] sm:$0xff]   ;;  %v773_v9 = vld [vmem:[%s856_s27 + $0x38] sm:$0xff]  }
  0x19   : > { %723 = vmatprep.subr.bf16.mxu0 %v767_v2  ;;  %v775_v10 = vld [vmem:[%s851_s24 + $0x8] sm:$0xff]   ;;  %v331_v11 = vld [vmem:[#allocation2 + $0x10] sm:$0xff]  ;;  %v329_v12 = vld [vmem:[#allocation2] sm:$0xff] }
  0x1a   : > { %v332_v14 = vld [vmem:[#allocation2 + $0x18] sm:$0xff]  ;;  %v330_v17 = vld [vmem:[#allocation2 + $0x8] sm:$0xff]  ;;  %v676_v25 = vld [vmem:[%s896_s2] ss:$0 sm:$0xff] (!%p675_p6) }
  0x1b   : > { %v692_v28 = vld [vmem:[%s897_s3] sm:$0xff] (!%p675_p6)   ;;  %v709_v35 = vld [vmem:[%s897_s3 + $0x8] sm:$0xff] (!%p675_p6)  }
  0x1c   : > { %724 = vmatpush3.bf16.msra.mxu0 %v767_v2  ;;  %v693_v31 = vunpack.c.l.bf16 (!%p675_p6), %v692_v28  ;;  %v694_v32 = vunpack.c.h.bf16 (!%p675_p6), %v692_v28  ;;  %v697_v36 = vunpack.c.l.bf16 (!%p675_p6), %v709_v35  ;;  %v698_v37 = vunpack.c.h.bf16 (!%p675_p6), %v709_v35 }
  0x1d   : > { %725 = vmatprep.subr.bf16.mxu0 %v768_v3 }
  0x20   : > { %726 = vmatpush3.bf16.msra.mxu0 %v768_v3 }
  0x21   : > { %727 = vmatprep.subr.bf16.mxu0 %v769_v4 }
  0x24   : > { %728 = vmatpush3.bf16.msra.mxu0 %v769_v4 }
  0x25   : > { %729 = vmatprep.subr.bf16.mxu0 %v770_v6 }
  0x28   : > { %730 = vmatpush3.bf16.msra.mxu0 %v770_v6 }
  0x29   : > { %731 = vmatprep.subr.bf16.mxu0 %v771_v7 }
  0x2c   : > { %732 = vmatpush3.bf16.msra.mxu0 %v771_v7 }
  0x2d   : > { %733 = vmatprep.subr.bf16.mxu0 %v772_v8 }
  0x30   : > { %734 = vmatpush3.bf16.msra.mxu0 %v772_v8 }
  0x31   : > { %735 = vmatprep.subr.bf16.mxu0 %v773_v9 }
  0x34   : > { %736 = vmatpush3.bf16.msra.mxu0 %v773_v9 }
  0x37   : > { %738 = vmatmul.mubr.bf16.vlgmr.msra.gmra.mrb[0].mxu0 %v775_v10 }
 0x10a   : > { %v739_v13 = vpop.f32.mrb[0].mxu0  ;;  %473 = sbr.rel (%p675_p6) target bundleno = 289 (0x121), region = 44 }
 0x10b   : > { %v464_v15 = vadd.f32 %v739_v13, %v331_v11  ;;  %v447_v16 = vpop.f32.mrb[1].mxu0 }
 0x10c   : > { %v462_v18 = vadd.f32 %v447_v16, %v329_v12  ;;  %v740_v19 = vpop.f32.mrb[2].mxu0 }
 0x10d   : > { %468 = vst [vmem:[#allocation2 + $0x10] sm:$0xff] %v464_v15  ;;  %v465_v20 = vadd.f32 %v740_v19, %v332_v14  ;;  %v450_v21 = vpop.f32.mrb[3].mxu0 }
 0x10e   : > { %466 = vst [vmem:[#allocation2] sm:$0xff] %v462_v18  ;;  %v463_v22 = vadd.f32 %v450_v21, %v330_v17 }
 0x10f   : > { %469 = vst [vmem:[#allocation2 + $0x18] sm:$0xff] %v465_v20 }
 0x110   : > { %467 = vst [vmem:[#allocation2 + $0x8] sm:$0xff] %v463_v22 }
 0x114   : > { %v476_v29 = vld [vmem:[#allocation2 + $0x10] sm:$0xff] }
 0x115   : > { %v474_v23 = vld [vmem:[#allocation2] sm:$0xff]  ;;  %v487_v33 = vadd.f32 %v676_v25, %v476_v29 }
 0x116   : > { %v485_v26 = vadd.f32 %v676_v25, %v474_v23  ;;  %v477_v30 = vld [vmem:[#allocation2 + $0x18] sm:$0xff] }
 0x117   : > { %v475_v24 = vld [vmem:[#allocation2 + $0x8] sm:$0xff]  ;;  %v488_v34 = vadd.f32 %v676_v25, %v477_v30  ;;  %v499_v40 = vadd.f32 %v697_v36, %v487_v33 }
 0x118   : > { %v486_v27 = vadd.f32 %v676_v25, %v475_v24  ;;  %v497_v38 = vadd.f32 %v693_v31, %v485_v26 }
 0x119   : > { %v500_v41 = vadd.f32 %v698_v37, %v488_v34  ;;  %v503_v44 = vmax.f32 %v499_v40, 0.0 }
 0x11a   : > { %v498_v39 = vadd.f32 %v694_v32, %v486_v27  ;;  %v501_v42 = vmax.f32 %v497_v38, 0.0 }
 0x11b   : > { %v504_v45 = vmax.f32 %v500_v41, 0.0 }
 0x11c   : > { %v502_v43 = vmax.f32 %v498_v39, 0.0 }
 0x11d   : > { %v707_v47 = vpack.c.bf16 %v504_v45, %v503_v44 }
 0x11e   : > { %v702_v46 = vpack.c.bf16 %v502_v43, %v501_v42 }
 0x11f   : > { %710 = vst [vmem:[%s898_s4 + $0x8] sm:$0xff] %v707_v47  }
 0x120   : > { %703 = vst [vmem:[%s898_s4] sm:$0xff] %v702_v46  }
 0x121 PF: > { %s14_s17 = sadd.s32 1, %s798_s17   ;;  %s899_s15 = smov %s794_s16 }
 0x122   : > { %p11_p7 = scmp.ge.s32.totalorder %s14_s17, 11   ;;  %s900_s16 = smov %s902_s18 }
 0x124   :  { %13 = sbr.rel (!%p11_p7) target bundleno = 2 (0x2), region = 83 }

// kernel: resnet34_forward.50
= control target key start
LH: loop header
LB: loop body
LE: loop exit
PB: predicated region body
PF: predicated region fallthrough
CT: control target
= control target key end

     0   :  { %s721_s12 = smov 0   ;;  %s723_s13 = smov 0   ;;  %s783_s0 = inlined_call_operand.vmem [shape: bf16[9,32,128], index: 0, kind: input, shape index: {}]   ;;  %s784_s1 = inlined_call_operand.vmem [shape: bf16[9,128,128], index: 1, kind: input, shape index: {}]   ;;  %s785_s2 = inlined_call_operand.vmem [shape: f32[1,128], index: 2, kind: input, shape index: {}]   ;;  %s786_s3 = inlined_call_operand.vmem [shape: bf16[32,128], index: 3, kind: output, shape index: {}]  }
   0x1   :  { %s725_s14 = smov 0  }
   0x2 LB: > { %s25_s15 = sadd.s32 1, %s694_s13  ;;  %p568_p0 = scmp.ge.s32.totalorder %s698_s14, 1  ;;  %s698_s14 = sphi %s725_s14, %s13_s14   ;;  %s694_s13 = sphi %s723_s13, %s788_s13   ;;  %s690_s12 = sphi %s721_s12, %s787_s12  }
   0x3   : > { %p26_p1 = scmp.ge.s32.totalorder %s25_s15, 9  ;;  %p188_p2 = scmp.lt.s32.totalorder %s698_s14, 10 }
   0x5   : > { %s790_s15 = smov (%p26_p1, %s25_s15), 0  ;;  %p189_p3 = pnand %p568_p0, %p188_p2 }
   0x6   : > { %p231_p4 = scmp.lt.s32.totalorder (!%p189_p3), %s690_s12, 8  ;;  %p573_p5 = scmp.ne.s32.totalorder (!%p189_p3), %s690_s12, 0 }
   0x7   : > { %192 = sbr.rel (%p189_p3) target bundleno = 287 (0x11f), region = 32 }
   0xe   : > { %s232_s16 = scalar_select %p231_p4, %s690_s12, 8 }
   0xf   : > { %264 = sbr.rel (%p573_p5) target bundleno = 22 (0x16), region = 36  ;;  %v700_v0 = vmov (!%p573_p5), 0.0  }
  0x10   : > { %s594_s17 = sshll.u32 %s232_s16, 4  ;;  %s595_s18 = sshll.u32 %s232_s16, 6  ;;  %265 = vst [vmem:[#allocation2] sm:$0xff] (!%p573_p5), %v700_v0  ;;  %266 = vst [vmem:[#allocation2 + $0x8] sm:$0xff] (!%p573_p5), %v700_v0 }
  0x11   : > { %s746_s21 = scalar_lea.vmem %s783_s0, %s594_s17  ;;  %s751_s24 = scalar_lea.vmem %s784_s1, %s595_s18  ;;  %267 = vst [vmem:[#allocation2 + $0x10] sm:$0xff] (!%p573_p5), %v700_v0  ;;  %268 = vst [vmem:[#allocation2 + $0x18] sm:$0xff] (!%p573_p5), %v700_v0 }
  0x16 PF: > { %v666_v1 = vld [vmem:[%s751_s24] sm:$0xff]   ;;  %v667_v2 = vld [vmem:[%s751_s24 + $0x8] sm:$0xff]   ;;  %v668_v3 = vld [vmem:[%s751_s24 + $0x10] sm:$0xff]   ;;  %p584_p6 = scmp.ne.s32.totalorder %s690_s12, 8 }
  0x17   : > { %621 = vmatprep.subr.bf16.mxu0 %v666_v1  ;;  %v669_v4 = vld [vmem:[%s751_s24 + $0x18] sm:$0xff]   ;;  %v674_v5 = vld [vmem:[%s746_s21] sm:$0xff]   ;;  %v671_v7 = vld [vmem:[%s751_s24 + $0x28] sm:$0xff]  }
  0x18   : > { %622 = vmatpush3.bf16.msra.mxu0 %v666_v1  ;;  %637 = vmatprep.mubr.bf16.mxu0 %v674_v5  ;;  %v670_v6 = vld [vmem:[%s751_s24 + $0x20] sm:$0xff]   ;;  %v672_v8 = vld [vmem:[%s751_s24 + $0x30] sm:$0xff]   ;;  %v673_v9 = vld [vmem:[%s751_s24 + $0x38] sm:$0xff]  }
  0x19   : > { %623 = vmatprep.subr.bf16.mxu0 %v667_v2  ;;  %v675_v10 = vld [vmem:[%s746_s21 + $0x8] sm:$0xff]   ;;  %v271_v11 = vld [vmem:[#allocation2 + $0x10] sm:$0xff]  ;;  %v269_v12 = vld [vmem:[#allocation2] sm:$0xff] }
  0x1a   : > { %v272_v14 = vld [vmem:[#allocation2 + $0x18] sm:$0xff]  ;;  %v270_v17 = vld [vmem:[#allocation2 + $0x8] sm:$0xff]  ;;  %v585_v25 = vld [vmem:[%s785_s2] ss:$0 sm:$0xff] (!%p584_p6) }
  0x1c   : > { %624 = vmatpush3.bf16.msra.mxu0 %v667_v2 }
  0x1d   : > { %625 = vmatprep.subr.bf16.mxu0 %v668_v3 }
  0x20   : > { %626 = vmatpush3.bf16.msra.mxu0 %v668_v3 }
  0x21   : > { %627 = vmatprep.subr.bf16.mxu0 %v669_v4 }
  0x24   : > { %628 = vmatpush3.bf16.msra.mxu0 %v669_v4 }
  0x25   : > { %629 = vmatprep.subr.bf16.mxu0 %v670_v6 }
  0x28   : > { %630 = vmatpush3.bf16.msra.mxu0 %v670_v6 }
  0x29   : > { %631 = vmatprep.subr.bf16.mxu0 %v671_v7 }
  0x2c   : > { %632 = vmatpush3.bf16.msra.mxu0 %v671_v7 }
  0x2d   : > { %633 = vmatprep.subr.bf16.mxu0 %v672_v8 }
  0x30   : > { %634 = vmatpush3.bf16.msra.mxu0 %v672_v8 }
  0x31   : > { %635 = vmatprep.subr.bf16.mxu0 %v673_v9 }
  0x34   : > { %636 = vmatpush3.bf16.msra.mxu0 %v673_v9 }
  0x37   : > { %638 = vmatmul.mubr.bf16.vlgmr.msra.gmra.mrb[0].mxu0 %v675_v10 }
 0x10a   : > { %v639_v13 = vpop.f32.mrb[0].mxu0  ;;  %413 = sbr.rel (%p584_p6) target bundleno = 287 (0x11f), region = 40 }
 0x10b   : > { %v404_v15 = vadd.f32 %v639_v13, %v271_v11  ;;  %v387_v16 = vpop.f32.mrb[1].mxu0 }
 0x10c   : > { %v402_v18 = vadd.f32 %v387_v16, %v269_v12  ;;  %v640_v19 = vpop.f32.mrb[2].mxu0 }
 0x10d   : > { %408 = vst [vmem:[#allocation2 + $0x10] sm:$0xff] %v404_v15  ;;  %v405_v20 = vadd.f32 %v640_v19, %v272_v14  ;;  %v390_v21 = vpop.f32.mrb[3].mxu0 }
 0x10e   : > { %406 = vst [vmem:[#allocation2] sm:$0xff] %v402_v18  ;;  %v403_v22 = vadd.f32 %v390_v21, %v270_v17 }
 0x10f   : > { %409 = vst [vmem:[#allocation2 + $0x18] sm:$0xff] %v405_v20 }
 0x110   : > { %407 = vst [vmem:[#allocation2 + $0x8] sm:$0xff] %v403_v22 }
 0x114   : > { %v416_v28 = vld [vmem:[#allocation2 + $0x10] sm:$0xff] }
 0x115   : > { %v414_v23 = vld [vmem:[#allocation2] sm:$0xff]  ;;  %v427_v30 = vadd.f32 %v585_v25, %v416_v28 }
 0x116   : > { %v425_v26 = vadd.f32 %v585_v25, %v414_v23  ;;  %v417_v29 = vld [vmem:[#allocation2 + $0x18] sm:$0xff] }
 0x117   : > { %v415_v24 = vld [vmem:[#allocation2 + $0x8] sm:$0xff]  ;;  %v428_v31 = vadd.f32 %v585_v25, %v417_v29  ;;  %v431_v34 = vmax.f32 %v427_v30, 0.0 }
 0x118   : > { %v426_v27 = vadd.f32 %v585_v25, %v415_v24  ;;  %v429_v32 = vmax.f32 %v425_v26, 0.0 }
 0x119   : > { %v432_v35 = vmax.f32 %v428_v31, 0.0 }
 0x11a   : > { %v430_v33 = vmax.f32 %v426_v27, 0.0 }
 0x11b   : > { %v608_v37 = vpack.c.bf16 %v432_v35, %v431_v34 }
 0x11c   : > { %v603_v36 = vpack.c.bf16 %v430_v33, %v429_v32 }
 0x11d   : > { %610 = vst [vmem:[%s786_s3 + $0x8] sm:$0xff] %v608_v37  }
 0x11e   : > { %604 = vst [vmem:[%s786_s3] sm:$0xff] %v603_v36  }
 0x11f PF: > { %s13_s14 = sadd.s32 1, %s698_s14   ;;  %s787_s12 = smov %s694_s13 }
 0x120   : > { %p10_p7 = scmp.ge.s32.totalorder %s13_s14, 11   ;;  %s788_s13 = smov %s790_s15 }
 0x122   :  { %12 = sbr.rel (!%p10_p7) target bundleno = 2 (0x2), region = 76 }

// kernel: resnet34_forward.57
= control target key start
LH: loop header
LB: loop body
LE: loop exit
PB: predicated region body
PF: predicated region fallthrough
CT: control target
= control target key end

     0   :  { %s689_s12 = smov 0   ;;  %s691_s13 = smov 0   ;;  %s755_s0 = inlined_call_operand.vmem [shape: bf16[9,8,128], index: 0, kind: input, shape index: {}]   ;;  %s756_s1 = inlined_call_operand.vmem [shape: bf16[9,128,256], index: 1, kind: input, shape index: {}]   ;;  %s757_s2 = inlined_call_operand.vmem [shape: f32[1,256], index: 2, kind: input, shape index: {}]   ;;  %s758_s3 = inlined_call_operand.vmem [shape: bf16[8,256], index: 3, kind: output, shape index: {}]  }
   0x1   :  { %s693_s14 = smov 0  }
   0x2 LB: > { %s25_s15 = sadd.s32 1, %s661_s13  ;;  %p564_p0 = scmp.ge.s32.totalorder %s665_s14, 1  ;;  %s665_s14 = sphi %s693_s14, %s13_s14   ;;  %s661_s13 = sphi %s691_s13, %s760_s13   ;;  %s657_s12 = sphi %s689_s12, %s759_s12  }
   0x3   : > { %p26_p1 = scmp.ge.s32.totalorder %s25_s15, 9  ;;  %p189_p2 = scmp.lt.s32.totalorder %s665_s14, 10 }
   0x5   : > { %s762_s15 = smov (%p26_p1, %s25_s15), 0  ;;  %p190_p3 = pnand %p564_p0, %p189_p2 }
   0x6   : > { %p232_p4 = scmp.lt.s32.totalorder (!%p190_p3), %s657_s12, 8  ;;  %p568_p5 = scmp.ne.s32.totalorder (!%p190_p3), %s657_s12, 0 }
   0x7   : > { %193 = sbr.rel (%p190_p3) target bundleno = 285 (0x11d), region = 32 }
   0xe   : > { %s233_s16 = scalar_select %p232_p4, %s657_s12, 8 }
   0xf   : > { %268 = sbr.rel (%p568_p5) target bundleno = 22 (0x16), region = 36  ;;  %v667_v0 = vmov (!%p568_p5), 0.0  }
  0x10   : > { %s565_s17 = sshll.u32 %s233_s16, 2  ;;  %s591_s18 = sshll.u32 %s233_s16, 7  ;;  %269 = vst [vmem:[#allocation2] sm:$0xff] (!%p568_p5), %v667_v0  ;;  %270 = vst [vmem:[#allocation2 + $0x8] sm:$0xff] (!%p568_p5), %v667_v0 }
  0x11   : > { %s714_s21 = scalar_lea.vmem %s755_s0, %s565_s17  ;;  %s719_s24 = scalar_lea.vmem %s756_s1, %s591_s18 }
  0x16 PF: > { %v619_v1 = vld [vmem:[%s719_s24 + $0x4] ss:$8 sps:$4 sm:$0xff]   ;;  %v621_v2 = vld [vmem:[%s719_s24] ss:$8 sps:$4 sm:$0xff]   ;;  %v668_v3 = vmov 0   ;;  %p585_p6 = scmp.ne.s32.totalorder %s657_s12, 8 }
  0x17   : > { %402 = vmatprep.mubr.bf16.mxu0 %v668_v3  ;;  %370 = vmatprep.subr.bf16.mxu0 %v619_v1  ;;  %v622_v4 = vld [vmem:[%s719_s24 + $0x14] ss:$8 sps:$4 sm:$0xff]   ;;  %v624_v5 = vld [vmem:[%s719_s24 + $0x10] ss:$8 sps:$4 sm:$0xff]   ;;  %v625_v6 = vld [vmem:[%s719_s24 + $0x24] ss:$8 sps:$4 sm:$0xff]   ;;  %v423_v27 = vlaneseq (!%p585_p6) }
  0x18   : > { %371 = vmatpush1.bf16.msra.mxu0 %v621_v2  ;;  %v627_v7 = vld [vmem:[%s719_s24 + $0x20] ss:$8 sps:$4 sm:$0xff]   ;;  %v628_v8 = vld [vmem:[%s719_s24 + $0x34] ss:$8 sps:$4 sm:$0xff]   ;;  %v630_v9 = vld [vmem:[%s719_s24 + $0x30] ss:$8 sps:$4 sm:$0xff]  }
  0x19   : > { %372 = vmatprep.subr.bf16.mxu0 %v622_v4  ;;  %v631_v10 = vld [vmem:[%s719_s24 + $0x44] ss:$8 sps:$4 sm:$0xff]   ;;  %v633_v11 = vld [vmem:[%s719_s24 + $0x40] ss:$8 sps:$4 sm:$0xff]   ;;  %v634_v12 = vld [vmem:[%s719_s24 + $0x54] ss:$8 sps:$4 sm:$0xff]  }
  0x1a   : > { %v636_v13 = vld [vmem:[%s719_s24 + $0x50] ss:$8 sps:$4 sm:$0xff]   ;;  %v637_v14 = vld [vmem:[%s719_s24 + $0x64] ss:$8 sps:$4 sm:$0xff]   ;;  %v639_v15 = vld [vmem:[%s719_s24 + $0x60] ss:$8 sps:$4 sm:$0xff]  }
  0x1b   : > { %v640_v16 = vld [vmem:[%s719_s24 + $0x74] ss:$8 sps:$4 sm:$0xff]   ;;  %v642_v17 = vld [vmem:[%s719_s24 + $0x70] ss:$8 sps:$4 sm:$0xff]   ;;  %v273_v18 = vld [vmem:[%s714_s21] sm:$0xf] }
  0x1c   : > { %373 = vmatpush1.bf16.msra.mxu0 %v624_v5  ;;  %v271_v19 = vld [vmem:[#allocation2] sm:$0xff]  ;;  %v272_v20 = vld [vmem:[#allocation2 + $0x8] sm:$0xff]  ;;  %v424_v28 = vshrl.u32 (!%p585_p6), %v423_v27, 7 }
  0x1d   : > { %374 = vmatprep.subr.bf16.mxu0 %v625_v6  ;;  %v421_v29 = vld [vmem:[%s757_s2] sm:$0x3] (!%p585_p6) }
  0x1e   : > { %v425_v30 = vsub.s32 (!%p585_p6), 0, %v424_v28  ;;  %v429_v31 = vsub.s32 (!%p585_p6), 1, %v424_v28 }
  0x20   : > { %375 = vmatpush1.bf16.msra.mxu0 %v627_v7  ;;  %v426_v34 = vrot.slane (!%p585_p6), %v421_v29, %v425_v30  ;;  %v430_v35 = vrot.slane (!%p585_p6), %v421_v29, %v429_v31 }
  0x21   : > { %376 = vmatprep.subr.bf16.mxu0 %v628_v8 }
  0x24   : > { %377 = vmatpush1.bf16.msra.mxu0 %v630_v9 }
  0x25   : > { %378 = vmatprep.subr.bf16.mxu0 %v631_v10 }
  0x28   : > { %379 = vmatpush1.bf16.msra.mxu0 %v633_v11 }
  0x29   : > { %380 = vmatprep.subr.bf16.mxu0 %v634_v12 }
  0x2c   : > { %381 = vmatpush1.bf16.msra.mxu0 %v636_v13 }
  0x2d   : > { %382 = vmatprep.subr.bf16.mxu0 %v637_v14 }
  0x30   : > { %383 = vmatpush1.bf16.msra.mxu0 %v639_v15 }
  0x31   : > { %384 = vmatprep.subr.bf16.mxu0 %v640_v16 }
  0x34   : > { %385 = vmatpush1.bf16.msra.mxu0 %v642_v17 }
  0x37   : > { %403 = vmatmul.mubr.bf16.vlgmr.msra.gmra.mrb[0].mxu0 %v273_v18 }
 0x108   : > { %418 = sbr.rel (%p585_p6) target bundleno = 285 (0x11d), region = 40 }
 0x10a   : > { %v404_v21 = vpop.f32.mrb[0].mxu0 }
 0x10b   : > { %v411_v22 = vadd.f32 %v404_v21, %v271_v19  ;;  %v406_v23 = vpop.f32.mrb[1].mxu0 }
 0x10c   : > { %v412_v24 = vadd.f32 %v406_v23, %v272_v20  ;;  %v408_v25 = vpop.f32.mrb[2].mxu0 }
 0x10d   : > { %413 = vst [vmem:[#allocation2] sm:$0xff] %v411_v22  ;;  %v409_v26 = vpop.f32.mrb[3].mxu0 }
 0x10e   : > { %414 = vst [vmem:[#allocation2 + $0x8] sm:$0xff] %v412_v24 }
 0x114   : > { %v419_v32 = vld [vmem:[#allocation2] sm:$0xff] }
 0x115   : > { %v420_v33 = vld [vmem:[#allocation2 + $0x8] sm:$0xff]  ;;  %v433_v36 = vadd.f32 %v426_v34, %v419_v32 }
 0x116   : > { %v434_v37 = vadd.f32 %v430_v35, %v420_v33 }
 0x117   : > { %v435_v38 = vmax.f32 %v433_v36, 0.0 }
 0x118   : > { %v436_v39 = vmax.f32 %v434_v37, 0.0 }
 0x11a   : > { %v592_v40 = vpack.c.bf16 %v436_v39, %v435_v38 }
 0x11c   : > { %445 = vst [vmem:[%s758_s3] sm:$0xff] %v592_v40 }
 0x11d PF: > { %s13_s14 = sadd.s32 1, %s665_s14   ;;  %s759_s12 = smov %s661_s13 }
 0x11e   : > { %p10_p7 = scmp.ge.s32.totalorder %s13_s14, 11   ;;  %s760_s13 = smov %s762_s15 }
 0x120   :  { %12 = sbr.rel (!%p10_p7) target bundleno = 2 (0x2), region = 76 }

// kernel: resnet34_forward.56
= control target key start
LH: loop header
LB: loop body
LE: loop exit
PB: predicated region body
PF: predicated region fallthrough
CT: control target
= control target key end

     0   :  { %v240_v1 = vmov 0   ;;  %v172_v18 = vlaneseq  ;;  %s318_s1 = inlined_call_operand.vmem [shape: bf16[1,128,256], index: 1, kind: input, shape index: {}]   ;;  %s319_s0 = inlined_call_operand.vmem [shape: bf16[1,8,128], index: 0, kind: input, shape index: {}]   ;;  %s320_s2 = inlined_call_operand.vmem [shape: f32[1,256], index: 2, kind: input, shape index: {}]   ;;  %s321_s3 = inlined_call_operand.vmem [shape: bf16[8,256], index: 3, kind: output, shape index: {}]  }
   0x1   :  { %v216_v0 = vld [vmem:[%s318_s1 + $0x4] ss:$8 sps:$4 sm:$0xff]   ;;  %152 = vmatprep.mubr.bf16.mxu0 %v240_v1  ;;  %v218_v2 = vld [vmem:[%s318_s1] ss:$8 sps:$4 sm:$0xff]   ;;  %v219_v3 = vld [vmem:[%s318_s1 + $0x14] ss:$8 sps:$4 sm:$0xff]  }
   0x2   :  { %120 = vmatprep.subr.bf16.mxu0 %v216_v0  ;;  %v221_v4 = vld [vmem:[%s318_s1 + $0x10] ss:$8 sps:$4 sm:$0xff]   ;;  %v222_v5 = vld [vmem:[%s318_s1 + $0x24] ss:$8 sps:$4 sm:$0xff]   ;;  %v224_v6 = vld [vmem:[%s318_s1 + $0x20] ss:$8 sps:$4 sm:$0xff]  }
   0x3   :  { %121 = vmatpush1.bf16.msra.mxu0 %v218_v2  ;;  %v225_v7 = vld [vmem:[%s318_s1 + $0x34] ss:$8 sps:$4 sm:$0xff]   ;;  %v227_v8 = vld [vmem:[%s318_s1 + $0x30] ss:$8 sps:$4 sm:$0xff]   ;;  %v228_v9 = vld [vmem:[%s318_s1 + $0x44] ss:$8 sps:$4 sm:$0xff]  }
   0x4   :  { %122 = vmatprep.subr.bf16.mxu0 %v219_v3  ;;  %v230_v10 = vld [vmem:[%s318_s1 + $0x40] ss:$8 sps:$4 sm:$0xff]   ;;  %v231_v11 = vld [vmem:[%s318_s1 + $0x54] ss:$8 sps:$4 sm:$0xff]   ;;  %v233_v12 = vld [vmem:[%s318_s1 + $0x50] ss:$8 sps:$4 sm:$0xff]  }
   0x5   :  { %v234_v13 = vld [vmem:[%s318_s1 + $0x64] ss:$8 sps:$4 sm:$0xff]   ;;  %v236_v14 = vld [vmem:[%s318_s1 + $0x60] ss:$8 sps:$4 sm:$0xff]   ;;  %v237_v15 = vld [vmem:[%s318_s1 + $0x74] ss:$8 sps:$4 sm:$0xff]  }
   0x6   :  { %v239_v16 = vld [vmem:[%s318_s1 + $0x70] ss:$8 sps:$4 sm:$0xff]   ;;  %v23_v17 = vld [vmem:[%s319_s0] sm:$0xf]  ;;  %v173_v19 = vshrl.u32 %v172_v18, 7 }
   0x7   :  { %123 = vmatpush1.bf16.msra.mxu0 %v221_v4  ;;  %v170_v21 = vld [vmem:[%s320_s2] sm:$0x3] }
   0x8   :  { %124 = vmatprep.subr.bf16.mxu0 %v222_v5  ;;  %v174_v20 = vsub.s32 0, %v173_v19  ;;  %v178_v22 = vsub.s32 1, %v173_v19 }
   0xa   :  { %v175_v23 = vrot.slane %v170_v21, %v174_v20  ;;  %v179_v24 = vrot.slane %v170_v21, %v178_v22 }
   0xb   :  { %125 = vmatpush1.bf16.msra.mxu0 %v224_v6 }
   0xc   :  { %126 = vmatprep.subr.bf16.mxu0 %v225_v7 }
   0xf   :  { %127 = vmatpush1.bf16.msra.mxu0 %v227_v8 }
  0x10   :  { %128 = vmatprep.subr.bf16.mxu0 %v228_v9 }
  0x13   :  { %129 = vmatpush1.bf16.msra.mxu0 %v230_v10 }
  0x14   :  { %130 = vmatprep.subr.bf16.mxu0 %v231_v11 }
  0x17   :  { %131 = vmatpush1.bf16.msra.mxu0 %v233_v12 }
  0x18   :  { %132 = vmatprep.subr.bf16.mxu0 %v234_v13 }
  0x1b   :  { %133 = vmatpush1.bf16.msra.mxu0 %v236_v14 }
  0x1c   :  { %134 = vmatprep.subr.bf16.mxu0 %v237_v15 }
  0x1f   :  { %135 = vmatpush1.bf16.msra.mxu0 %v239_v16 }
  0x22   :  { %153 = vmatmul.mubr.bf16.vlgmr.msra.gmra.mrb[0].mxu0 %v23_v17 }
  0xf5   :  { %v154_v25 = vpop.f32.mrb[0].mxu0 }
  0xf6   :  { %v182_v26 = vadd.f32 %v175_v23, %v154_v25  ;;  %v156_v27 = vpop.f32.mrb[1].mxu0 }
  0xf7   :  { %v183_v28 = vadd.f32 %v179_v24, %v156_v27  ;;  %v158_v29 = vpop.f32.mrb[2].mxu0 }
  0xf8   :  { %v159_v30 = vpop.f32.mrb[3].mxu0 }
  0xf9   :  { %v214_v31 = vpack.c.bf16 %v183_v28, %v182_v26 }
  0xfb   :  { %192 = vst [vmem:[%s321_s3] sm:$0xff] %v214_v31 }

// kernel: resnet34_forward.58
= control target key start
LH: loop header
LB: loop body
LE: loop exit
PB: predicated region body
PF: predicated region fallthrough
CT: control target
= control target key end

     0   :  { %s942_s15 = smov 0   ;;  %s944_s16 = smov 0   ;;  %s1027_s0 = inlined_call_operand.vmem [shape: bf16[9,8,256], index: 0, kind: input, shape index: {}]   ;;  %s1028_s1 = inlined_call_operand.vmem [shape: bf16[9,256,256], index: 1, kind: input, shape index: {}]   ;;  %s1029_s2 = inlined_call_operand.vmem [shape: f32[1,256], index: 2, kind: input, shape index: {}]   ;;  %s1030_s3 = inlined_call_operand.vmem [shape: bf16[8,256], index: 3, kind: input, shape index: {}]   ;;  %s1031_s4 = inlined_call_operand.vmem [shape: bf16[8,256], index: 4, kind: output, shape index: {}]  }
   0x1   :  { %s946_s17 = smov 0  }
   0x2 LB: > { %s26_s18 = sadd.s32 1, %s910_s16  ;;  %p768_p0 = scmp.ge.s32.totalorder %s914_s17, 1  ;;  %s914_s17 = sphi %s946_s17, %s14_s17   ;;  %s910_s16 = sphi %s944_s16, %s1033_s16   ;;  %s906_s15 = sphi %s942_s15, %s1032_s15  }
   0x3   : > { %p27_p1 = scmp.ge.s32.totalorder %s26_s18, 9  ;;  %p233_p2 = scmp.lt.s32.totalorder %s914_s17, 10 }
   0x5   : > { %s1035_s18 = smov (%p27_p1, %s26_s18), 0  ;;  %p234_p3 = pnand %p768_p0, %p233_p2 }
   0x6   : > { %p289_p4 = scmp.lt.s32.totalorder (!%p234_p3), %s906_s15, 8  ;;  %p773_p5 = scmp.ne.s32.totalorder (!%p234_p3), %s906_s15, 0 }
   0x7   : > { %237 = sbr.rel (%p234_p3) target bundleno = 319 (0x13f), region = 36 }
   0xe   : > { %s290_s19 = scalar_select %p289_p4, %s906_s15, 8 }
   0xf   : > { %336 = sbr.rel (%p773_p5) target bundleno = 22 (0x16), region = 40  ;;  %v916_v0 = vmov (!%p773_p5), 0.0  }
  0x10   : > { %s814_s20 = sshll.u32 %s290_s19, 3  ;;  %s815_s21 = sshll.u32 %s290_s19, 8  ;;  %337 = vst [vmem:[#allocation2] sm:$0xff] (!%p773_p5), %v916_v0  ;;  %338 = vst [vmem:[#allocation2 + $0x8] sm:$0xff] (!%p773_p5), %v916_v0 }
  0x11   : > { %s967_s24 = scalar_lea.vmem %s1027_s0, %s814_s20  ;;  %s972_s27 = scalar_lea.vmem %s1028_s1, %s815_s21 }
  0x16 PF: > { %v842_v1 = vld [vmem:[%s972_s27 + $0x4] ss:$8 sps:$4 sm:$0xff]   ;;  %v844_v2 = vld [vmem:[%s972_s27] ss:$8 sps:$4 sm:$0xff]   ;;  %v845_v3 = vld [vmem:[%s972_s27 + $0x14] ss:$8 sps:$4 sm:$0xff]  }
  0x17   : > { %541 = vmatprep.subr.bf16.mxu0 %v842_v1  ;;  %v847_v4 = vld [vmem:[%s972_s27 + $0x10] ss:$8 sps:$4 sm:$0xff]   ;;  %v848_v5 = vld [vmem:[%s972_s27 + $0x24] ss:$8 sps:$4 sm:$0xff]   ;;  %v850_v6 = vld [vmem:[%s972_s27 + $0x20] ss:$8 sps:$4 sm:$0xff]  }
  0x18   : > { %542 = vmatpush1.bf16.msra.mxu0 %v844_v2  ;;  %v851_v7 = vld [vmem:[%s972_s27 + $0x34] ss:$8 sps:$4 sm:$0xff]   ;;  %v853_v8 = vld [vmem:[%s972_s27 + $0x30] ss:$8 sps:$4 sm:$0xff]   ;;  %v854_v9 = vld [vmem:[%s972_s27 + $0x44] ss:$8 sps:$4 sm:$0xff]  }
  0x19   : > { %543 = vmatprep.subr.bf16.mxu0 %v845_v3  ;;  %v856_v10 = vld [vmem:[%s972_s27 + $0x40] ss:$8 sps:$4 sm:$0xff]   ;;  %v857_v11 = vld [vmem:[%s972_s27 + $0x54] ss:$8 sps:$4 sm:$0xff]   ;;  %v859_v12 = vld [vmem:[%s972_s27 + $0x50] ss:$8 sps:$4 sm:$0xff]  }
  0x1a   : > { %v860_v13 = vld [vmem:[%s972_s27 + $0x64] ss:$8 sps:$4 sm:$0xff]   ;;  %v862_v16 = vld [vmem:[%s972_s27 + $0x60] ss:$8 sps:$4 sm:$0xff]   ;;  %v863_v17 = vld [vmem:[%s972_s27 + $0x74] ss:$8 sps:$4 sm:$0xff]  }
  0x1b   : > { %v341_v14 = vld [vmem:[%s967_s24] sm:$0xff]  ;;  %v865_v18 = vld [vmem:[%s972_s27 + $0x70] ss:$8 sps:$4 sm:$0xff]   ;;  %v869_v21 = vld [vmem:[%s972_s27 + $0x94] ss:$8 sps:$4 sm:$0xff]   ;;  %p808_p6 = scmp.ne.s32.totalorder %s906_s15, 8 }
  0x1c   : > { %544 = vmatpush1.bf16.msra.mxu0 %v847_v4  ;;  %v775_v15 = vcombine.high %v341_v14, %v341_v14  ;;  %v866_v19 = vld [vmem:[%s972_s27 + $0x84] ss:$8 sps:$4 sm:$0xff]   ;;  %v868_v20 = vld [vmem:[%s972_s27 + $0x80] ss:$8 sps:$4 sm:$0xff]   ;;  %v871_v22 = vld [vmem:[%s972_s27 + $0x90] ss:$8 sps:$4 sm:$0xff]   ;;  %v774_v35 = vcombine.low %v341_v14, %v341_v14  ;;  %v594_v44 = vlaneseq (!%p808_p6) }
  0x1d   : > { %545 = vmatprep.subr.bf16.mxu0 %v848_v5  ;;  %v872_v23 = vld [vmem:[%s972_s27 + $0xa4] ss:$8 sps:$4 sm:$0xff]   ;;  %v874_v24 = vld [vmem:[%s972_s27 + $0xa0] ss:$8 sps:$4 sm:$0xff]   ;;  %v875_v25 = vld [vmem:[%s972_s27 + $0xb4] ss:$8 sps:$4 sm:$0xff]  }
  0x1e   : > { %573 = vmatprep.mubr.bf16.mxu0 %v775_v15  ;;  %v877_v26 = vld [vmem:[%s972_s27 + $0xb0] ss:$8 sps:$4 sm:$0xff]   ;;  %v878_v27 = vld [vmem:[%s972_s27 + $0xc4] ss:$8 sps:$4 sm:$0xff]   ;;  %v880_v28 = vld [vmem:[%s972_s27 + $0xc0] ss:$8 sps:$4 sm:$0xff]  }
  0x1f   : > { %v881_v29 = vld [vmem:[%s972_s27 + $0xd4] ss:$8 sps:$4 sm:$0xff]   ;;  %v883_v30 = vld [vmem:[%s972_s27 + $0xd0] ss:$8 sps:$4 sm:$0xff]   ;;  %v884_v31 = vld [vmem:[%s972_s27 + $0xe4] ss:$8 sps:$4 sm:$0xff]  }
  0x20   : > { %546 = vmatpush1.bf16.msra.mxu0 %v850_v6  ;;  %v886_v32 = vld [vmem:[%s972_s27 + $0xe0] ss:$8 sps:$4 sm:$0xff]   ;;  %v887_v33 = vld [vmem:[%s972_s27 + $0xf4] ss:$8 sps:$4 sm:$0xff]   ;;  %v889_v34 = vld [vmem:[%s972_s27 + $0xf0] ss:$8 sps:$4 sm:$0xff]  }
  0x21   : > { %547 = vmatprep.subr.bf16.mxu0 %v851_v7  ;;  %v339_v36 = vld [vmem:[#allocation2] sm:$0xff]  ;;  %v340_v37 = vld [vmem:[#allocation2 + $0x8] sm:$0xff]  ;;  %v595_v45 = vshrl.u32 (!%p808_p6), %v594_v44, 7 }
  0x22   : > { %v592_v46 = vld [vmem:[%s1029_s2] sm:$0x3] (!%p808_p6) }
  0x23   : > { %v606_v47 = vld [vmem:[%s1030_s3] sm:$0xff] (!%p808_p6)  ;;  %v596_v48 = vsub.s32 (!%p808_p6), 0, %v595_v45  ;;  %v600_v49 = vsub.s32 (!%p808_p6), 1, %v595_v45 }
  0x24   : > { %548 = vmatpush1.bf16.msra.mxu0 %v853_v8  ;;  %v607_v54 = vunpack.c.l.bf16 (!%p808_p6), %v606_v47  ;;  %v608_v55 = vunpack.c.h.bf16 (!%p808_p6), %v606_v47 }
  0x25   : > { %549 = vmatprep.subr.bf16.mxu0 %v854_v9  ;;  %v597_v52 = vrot.slane (!%p808_p6), %v592_v46, %v596_v48  ;;  %v601_v53 = vrot.slane (!%p808_p6), %v592_v46, %v600_v49 }
  0x28   : > { %550 = vmatpush1.bf16.msra.mxu0 %v856_v10 }
  0x29   : > { %551 = vmatprep.subr.bf16.mxu0 %v857_v11 }
  0x2c   : > { %552 = vmatpush1.bf16.msra.mxu0 %v859_v12 }
  0x2d   : > { %553 = vmatprep.subr.bf16.mxu0 %v860_v13 }
  0x30   : > { %554 = vmatpush1.bf16.msra.mxu0 %v862_v16 }
  0x31   : > { %555 = vmatprep.subr.bf16.mxu0 %v863_v17 }
  0x34   : > { %556 = vmatpush1.bf16.msra.mxu0 %v865_v18 }
  0x35   : > { %557 = vmatprep.subr.bf16.mxu0 %v866_v19 }
  0x38   : > { %558 = vmatpush1.bf16.msra.mxu0 %v868_v20 }
  0x39   : > { %559 = vmatprep.subr.bf16.mxu0 %v869_v21 }
  0x3c   : > { %560 = vmatpush1.bf16.msra.mxu0 %v871_v22 }
  0x3d   : > { %561 = vmatprep.subr.bf16.mxu0 %v872_v23 }
  0x40   : > { %562 = vmatpush1.bf16.msra.mxu0 %v874_v24 }
  0x41   : > { %563 = vmatprep.subr.bf16.mxu0 %v875_v25 }
  0x44   : > { %564 = vmatpush1.bf16.msra.mxu0 %v877_v26 }
  0x45   : > { %565 = vmatprep.subr.bf16.mxu0 %v878_v27 }
  0x48   : > { %566 = vmatpush1.bf16.msra.mxu0 %v880_v28 }
  0x49   : > { %567 = vmatprep.subr.bf16.mxu0 %v881_v29 }
  0x4c   : > { %568 = vmatpush1.bf16.msra.mxu0 %v883_v30 }
  0x4d   : > { %569 = vmatprep.subr.bf16.mxu0 %v884_v31 }
  0x50   : > { %570 = vmatpush1.bf16.msra.mxu0 %v886_v32 }
  0x51   : > { %571 = vmatprep.subr.bf16.mxu0 %v887_v33 }
  0x54   : > { %572 = vmatpush1.bf16.msra.mxu0 %v889_v34 }
  0x57   : > { %574 = vmatmul.mubr.bf16.vlgmr.msra.gmra.mrb[0].mxu0 %v774_v35 }
 0x128   : > { %589 = sbr.rel (%p808_p6) target bundleno = 319 (0x13f), region = 44 }
 0x12a   : > { %v575_v38 = vpop.f32.mrb[0].mxu0 }
 0x12b   : > { %v582_v39 = vadd.f32 %v575_v38, %v339_v36  ;;  %v577_v40 = vpop.f32.mrb[1].mxu0 }
 0x12c   : > { %v583_v41 = vadd.f32 %v577_v40, %v340_v37  ;;  %v579_v42 = vpop.f32.mrb[2].mxu0 }
 0x12d   : > { %584 = vst [vmem:[#allocation2] sm:$0xff] %v582_v39  ;;  %v580_v43 = vpop.f32.mrb[3].mxu0 }
 0x12e   : > { %585 = vst [vmem:[#allocation2 + $0x8] sm:$0xff] %v583_v41 }
 0x134   : > { %v590_v50 = vld [vmem:[#allocation2] sm:$0xff] }
 0x135   : > { %v591_v51 = vld [vmem:[#allocation2 + $0x8] sm:$0xff]  ;;  %v604_v56 = vadd.f32 %v597_v52, %v590_v50 }
 0x136   : > { %v605_v57 = vadd.f32 %v601_v53, %v591_v51 }
 0x137   : > { %v609_v58 = vadd.f32 %v607_v54, %v604_v56 }
 0x138   : > { %v610_v59 = vadd.f32 %v608_v55, %v605_v57 }
 0x139   : > { %v611_v60 = vmax.f32 %v609_v58, 0.0 }
 0x13a   : > { %v612_v61 = vmax.f32 %v610_v59, 0.0 }
 0x13c   : > { %v816_v62 = vpack.c.bf16 %v612_v61, %v611_v60 }
 0x13e   : > { %621 = vst [vmem:[%s1031_s4] sm:$0xff] %v816_v62 }
 0x13f PF: > { %s14_s17 = sadd.s32 1, %s914_s17   ;;  %s1032_s15 = smov %s910_s16 }
 0x140   : > { %p11_p7 = scmp.ge.s32.totalorder %s14_s17, 11   ;;  %s1033_s16 = smov %s1035_s18 }
 0x142   :  { %13 = sbr.rel (!%p11_p7) target bundleno = 2 (0x2), region = 83 }

// kernel: resnet34_forward.59
= control target key start
LH: loop header
LB: loop body
LE: loop exit
PB: predicated region body
PF: predicated region fallthrough
CT: control target
= control target key end

     0   :  { %s847_s12 = smov 0   ;;  %s849_s13 = smov 0   ;;  %s929_s0 = inlined_call_operand.vmem [shape: bf16[9,8,256], index: 0, kind: input, shape index: {}]   ;;  %s930_s1 = inlined_call_operand.vmem [shape: bf16[9,256,256], index: 1, kind: input, shape index: {}]   ;;  %s931_s2 = inlined_call_operand.vmem [shape: f32[1,256], index: 2, kind: input, shape index: {}]   ;;  %s932_s3 = inlined_call_operand.vmem [shape: bf16[8,256], index: 3, kind: output, shape index: {}]  }
   0x1   :  { %s851_s14 = smov 0  }
   0x2 LB: > { %s25_s15 = sadd.s32 1, %s820_s13  ;;  %p678_p0 = scmp.ge.s32.totalorder %s824_s14, 1  ;;  %s824_s14 = sphi %s851_s14, %s13_s14   ;;  %s820_s13 = sphi %s849_s13, %s934_s13   ;;  %s816_s12 = sphi %s847_s12, %s933_s12  }
   0x3   : > { %p26_p1 = scmp.ge.s32.totalorder %s25_s15, 9  ;;  %p191_p2 = scmp.lt.s32.totalorder %s824_s14, 10 }
   0x5   : > { %s936_s15 = smov (%p26_p1, %s25_s15), 0  ;;  %p192_p3 = pnand %p678_p0, %p191_p2 }
   0x6   : > { %p236_p4 = scmp.lt.s32.totalorder (!%p192_p3), %s816_s12, 8  ;;  %p683_p5 = scmp.ne.s32.totalorder (!%p192_p3), %s816_s12, 0 }
   0x7   : > { %195 = sbr.rel (%p192_p3) target bundleno = 317 (0x13d), region = 32 }
   0xe   : > { %s237_s16 = scalar_select %p236_p4, %s816_s12, 8 }
   0xf   : > { %273 = sbr.rel (%p683_p5) target bundleno = 22 (0x16), region = 36  ;;  %v826_v0 = vmov (!%p683_p5), 0.0  }
  0x10   : > { %s724_s17 = sshll.u32 %s237_s16, 3  ;;  %s725_s18 = sshll.u32 %s237_s16, 8  ;;  %274 = vst [vmem:[#allocation2] sm:$0xff] (!%p683_p5), %v826_v0  ;;  %275 = vst [vmem:[#allocation2 + $0x8] sm:$0xff] (!%p683_p5), %v826_v0 }
  0x11   : > { %s872_s21 = scalar_lea.vmem %s929_s0, %s724_s17  ;;  %s877_s24 = scalar_lea.vmem %s930_s1, %s725_s18 }
  0x16 PF: > { %v752_v1 = vld [vmem:[%s877_s24 + $0x4] ss:$8 sps:$4 sm:$0xff]   ;;  %v754_v2 = vld [vmem:[%s877_s24] ss:$8 sps:$4 sm:$0xff]   ;;  %v755_v3 = vld [vmem:[%s877_s24 + $0x14] ss:$8 sps:$4 sm:$0xff]  }
  0x17   : > { %478 = vmatprep.subr.bf16.mxu0 %v752_v1  ;;  %v757_v4 = vld [vmem:[%s877_s24 + $0x10] ss:$8 sps:$4 sm:$0xff]   ;;  %v758_v5 = vld [vmem:[%s877_s24 + $0x24] ss:$8 sps:$4 sm:$0xff]   ;;  %v760_v6 = vld [vmem:[%s877_s24 + $0x20] ss:$8 sps:$4 sm:$0xff]  }
  0x18   : > { %479 = vmatpush1.bf16.msra.mxu0 %v754_v2  ;;  %v761_v7 = vld [vmem:[%s877_s24 + $0x34] ss:$8 sps:$4 sm:$0xff]   ;;  %v763_v8 = vld [vmem:[%s877_s24 + $0x30] ss:$8 sps:$4 sm:$0xff]   ;;  %v764_v9 = vld [vmem:[%s877_s24 + $0x44] ss:$8 sps:$4 sm:$0xff]  }
  0x19   : > { %480 = vmatprep.subr.bf16.mxu0 %v755_v3  ;;  %v766_v10 = vld [vmem:[%s877_s24 + $0x40] ss:$8 sps:$4 sm:$0xff]   ;;  %v767_v11 = vld [vmem:[%s877_s24 + $0x54] ss:$8 sps:$4 sm:$0xff]   ;;  %v769_v12 = vld [vmem:[%s877_s24 + $0x50] ss:$8 sps:$4 sm:$0xff]  }
  0x1a   : > { %v770_v13 = vld [vmem:[%s877_s24 + $0x64] ss:$8 sps:$4 sm:$0xff]   ;;  %v772_v16 = vld [vmem:[%s877_s24 + $0x60] ss:$8 sps:$4 sm:$0xff]   ;;  %v773_v17 = vld [vmem:[%s877_s24 + $0x74] ss:$8 sps:$4 sm:$0xff]  }
  0x1b   : > { %v278_v14 = vld [vmem:[%s872_s21] sm:$0xff]  ;;  %v775_v18 = vld [vmem:[%s877_s24 + $0x70] ss:$8 sps:$4 sm:$0xff]   ;;  %v779_v21 = vld [vmem:[%s877_s24 + $0x94] ss:$8 sps:$4 sm:$0xff]   ;;  %p718_p6 = scmp.ne.s32.totalorder %s816_s12, 8 }
  0x1c   : > { %481 = vmatpush1.bf16.msra.mxu0 %v757_v4  ;;  %v685_v15 = vcombine.high %v278_v14, %v278_v14  ;;  %v776_v19 = vld [vmem:[%s877_s24 + $0x84] ss:$8 sps:$4 sm:$0xff]   ;;  %v778_v20 = vld [vmem:[%s877_s24 + $0x80] ss:$8 sps:$4 sm:$0xff]   ;;  %v781_v22 = vld [vmem:[%s877_s24 + $0x90] ss:$8 sps:$4 sm:$0xff]   ;;  %v684_v35 = vcombine.low %v278_v14, %v278_v14  ;;  %v531_v44 = vlaneseq (!%p718_p6) }
  0x1d   : > { %482 = vmatprep.subr.bf16.mxu0 %v758_v5  ;;  %v782_v23 = vld [vmem:[%s877_s24 + $0xa4] ss:$8 sps:$4 sm:$0xff]   ;;  %v784_v24 = vld [vmem:[%s877_s24 + $0xa0] ss:$8 sps:$4 sm:$0xff]   ;;  %v785_v25 = vld [vmem:[%s877_s24 + $0xb4] ss:$8 sps:$4 sm:$0xff]  }
  0x1e   : > { %510 = vmatprep.mubr.bf16.mxu0 %v685_v15  ;;  %v787_v26 = vld [vmem:[%s877_s24 + $0xb0] ss:$8 sps:$4 sm:$0xff]   ;;  %v788_v27 = vld [vmem:[%s877_s24 + $0xc4] ss:$8 sps:$4 sm:$0xff]   ;;  %v790_v28 = vld [vmem:[%s877_s24 + $0xc0] ss:$8 sps:$4 sm:$0xff]  }
  0x1f   : > { %v791_v29 = vld [vmem:[%s877_s24 + $0xd4] ss:$8 sps:$4 sm:$0xff]   ;;  %v793_v30 = vld [vmem:[%s877_s24 + $0xd0] ss:$8 sps:$4 sm:$0xff]   ;;  %v794_v31 = vld [vmem:[%s877_s24 + $0xe4] ss:$8 sps:$4 sm:$0xff]  }
  0x20   : > { %483 = vmatpush1.bf16.msra.mxu0 %v760_v6  ;;  %v796_v32 = vld [vmem:[%s877_s24 + $0xe0] ss:$8 sps:$4 sm:$0xff]   ;;  %v797_v33 = vld [vmem:[%s877_s24 + $0xf4] ss:$8 sps:$4 sm:$0xff]   ;;  %v799_v34 = vld [vmem:[%s877_s24 + $0xf0] ss:$8 sps:$4 sm:$0xff]  }
  0x21   : > { %484 = vmatprep.subr.bf16.mxu0 %v761_v7  ;;  %v276_v36 = vld [vmem:[#allocation2] sm:$0xff]  ;;  %v277_v37 = vld [vmem:[#allocation2 + $0x8] sm:$0xff]  ;;  %v532_v45 = vshrl.u32 (!%p718_p6), %v531_v44, 7 }
  0x22   : > { %v529_v46 = vld [vmem:[%s931_s2] sm:$0x3] (!%p718_p6) }
  0x23   : > { %v533_v47 = vsub.s32 (!%p718_p6), 0, %v532_v45  ;;  %v537_v48 = vsub.s32 (!%p718_p6), 1, %v532_v45 }
  0x24   : > { %485 = vmatpush1.bf16.msra.mxu0 %v763_v8 }
  0x25   : > { %486 = vmatprep.subr.bf16.mxu0 %v764_v9  ;;  %v534_v51 = vrot.slane (!%p718_p6), %v529_v46, %v533_v47  ;;  %v538_v52 = vrot.slane (!%p718_p6), %v529_v46, %v537_v48 }
  0x28   : > { %487 = vmatpush1.bf16.msra.mxu0 %v766_v10 }
  0x29   : > { %488 = vmatprep.subr.bf16.mxu0 %v767_v11 }
  0x2c   : > { %489 = vmatpush1.bf16.msra.mxu0 %v769_v12 }
  0x2d   : > { %490 = vmatprep.subr.bf16.mxu0 %v770_v13 }
  0x30   : > { %491 = vmatpush1.bf16.msra.mxu0 %v772_v16 }
  0x31   : > { %492 = vmatprep.subr.bf16.mxu0 %v773_v17 }
  0x34   : > { %493 = vmatpush1.bf16.msra.mxu0 %v775_v18 }
  0x35   : > { %494 = vmatprep.subr.bf16.mxu0 %v776_v19 }
  0x38   : > { %495 = vmatpush1.bf16.msra.mxu0 %v778_v20 }
  0x39   : > { %496 = vmatprep.subr.bf16.mxu0 %v779_v21 }
  0x3c   : > { %497 = vmatpush1.bf16.msra.mxu0 %v781_v22 }
  0x3d   : > { %498 = vmatprep.subr.bf16.mxu0 %v782_v23 }
  0x40   : > { %499 = vmatpush1.bf16.msra.mxu0 %v784_v24 }
  0x41   : > { %500 = vmatprep.subr.bf16.mxu0 %v785_v25 }
  0x44   : > { %501 = vmatpush1.bf16.msra.mxu0 %v787_v26 }
  0x45   : > { %502 = vmatprep.subr.bf16.mxu0 %v788_v27 }
  0x48   : > { %503 = vmatpush1.bf16.msra.mxu0 %v790_v28 }
  0x49   : > { %504 = vmatprep.subr.bf16.mxu0 %v791_v29 }
  0x4c   : > { %505 = vmatpush1.bf16.msra.mxu0 %v793_v30 }
  0x4d   : > { %506 = vmatprep.subr.bf16.mxu0 %v794_v31 }
  0x50   : > { %507 = vmatpush1.bf16.msra.mxu0 %v796_v32 }
  0x51   : > { %508 = vmatprep.subr.bf16.mxu0 %v797_v33 }
  0x54   : > { %509 = vmatpush1.bf16.msra.mxu0 %v799_v34 }
  0x57   : > { %511 = vmatmul.mubr.bf16.vlgmr.msra.gmra.mrb[0].mxu0 %v684_v35 }
 0x128   : > { %526 = sbr.rel (%p718_p6) target bundleno = 317 (0x13d), region = 40 }
 0x12a   : > { %v512_v38 = vpop.f32.mrb[0].mxu0 }
 0x12b   : > { %v519_v39 = vadd.f32 %v512_v38, %v276_v36  ;;  %v514_v40 = vpop.f32.mrb[1].mxu0 }
 0x12c   : > { %v520_v41 = vadd.f32 %v514_v40, %v277_v37  ;;  %v516_v42 = vpop.f32.mrb[2].mxu0 }
 0x12d   : > { %521 = vst [vmem:[#allocation2] sm:$0xff] %v519_v39  ;;  %v517_v43 = vpop.f32.mrb[3].mxu0 }
 0x12e   : > { %522 = vst [vmem:[#allocation2 + $0x8] sm:$0xff] %v520_v41 }
 0x134   : > { %v527_v49 = vld [vmem:[#allocation2] sm:$0xff] }
 0x135   : > { %v528_v50 = vld [vmem:[#allocation2 + $0x8] sm:$0xff]  ;;  %v541_v53 = vadd.f32 %v534_v51, %v527_v49 }
 0x136   : > { %v542_v54 = vadd.f32 %v538_v52, %v528_v50 }
 0x137   : > { %v543_v55 = vmax.f32 %v541_v53, 0.0 }
 0x138   : > { %v544_v56 = vmax.f32 %v542_v54, 0.0 }
 0x13a   : > { %v726_v57 = vpack.c.bf16 %v544_v56, %v543_v55 }
 0x13c   : > { %553 = vst [vmem:[%s932_s3] sm:$0xff] %v726_v57 }
 0x13d PF: > { %s13_s14 = sadd.s32 1, %s824_s14   ;;  %s933_s12 = smov %s820_s13 }
 0x13e   : > { %p10_p7 = scmp.ge.s32.totalorder %s13_s14, 11   ;;  %s934_s13 = smov %s936_s15 }
 0x140   :  { %12 = sbr.rel (!%p10_p7) target bundleno = 2 (0x2), region = 76 }

// kernel: resnet34_forward.70
= control target key start
LH: loop header
LB: loop body
LE: loop exit
PB: predicated region body
PF: predicated region fallthrough
CT: control target
= control target key end

     0   :  { %s1068_s12 = smov 0   ;;  %s1070_s13 = smov 0   ;;  %s1283_s0 = inlined_call_operand.vmem [shape: bf16[9,8,256], index: 0, kind: input, shape index: {}]   ;;  %s1284_s1 = inlined_call_operand.vmem [shape: bf16[9,256,512], index: 1, kind: input, shape index: {}]   ;;  %s1285_s2 = inlined_call_operand.vmem [shape: f32[1,512], index: 2, kind: input, shape index: {}]   ;;  %s1286_s3 = inlined_call_operand.vmem [shape: bf16[8,512], index: 3, kind: output, shape index: {}]  }
   0x1   :  { %s1072_s14 = smov 0   ;;  %s1074_s15 = smov 0  }
   0x2   :  { %s1076_s16 = smov 0   ;;  %s1078_s17 = smov 0  }
   0x3   :  { %s1080_s18 = smov 0  }
   0x4 LB: > { %s25_s19 = sadd.s32 1, %s1037_s16  ;;  %s28_s20 = sadd.s32 1, %s1041_s17  ;;  %s1045_s18 = sphi %s1080_s18, %s13_s18   ;;  %s1041_s17 = sphi %s1078_s17, %s1292_s17   ;;  %s1037_s16 = sphi %s1076_s16, %s1291_s16   ;;  %s1033_s15 = sphi %s1074_s15, %s1290_s15   ;;  %s1029_s14 = sphi %s1072_s14, %s1289_s14   ;;  %s1025_s13 = sphi %s1070_s13, %s1288_s13   ;;  %s1021_s12 = sphi %s1068_s12, %s1287_s12  }
   0x5   : > { %p26_p0 = scmp.ge.s32.totalorder %s25_s19, 9  ;;  %p76_p1 = scmp.ne.s32.totalorder %s1025_s13, %s1021_s12 }
   0x6   : > { %p77_p2 = scmp.eq.s32.totalorder %s1045_s18, 0  ;;  %s69_s24 = sadd.s32 1, %s1025_s13 }
   0x7   : > { %s1294_s19 = smov (%p26_p0, %s25_s19), 0  ;;  %s1296_s20 = smov (!%p26_p0, %s28_s20), %s1041_s17 }
   0x8   : > { %p78_p3 = por %p77_p2, %p76_p1  ;;  %p30_p4 = scmp.ge.s32.totalorder %s1296_s20, 2 }
   0x9   : > { %s64_s21 = ssub.s32 %s1037_s16, %s1294_s19  ;;  %p831_p6 = scmp.ge.s32.totalorder %s1045_s18, 18 }
   0xa   : > { %s1298_s20 = smov (%p30_p4, %s1296_s20), 0 }
   0xb   : > { %s65_s22 = ssub.s32 %s1041_s17, %s1298_s20  ;;  %156 = sbr.rel (%p831_p6) target bundleno = 41 (0x29), region = 16 }
   0xc   : > { %s66_s23 = sor.u32 %s65_s22, %s64_s21 }
   0xd   : > { %p67_p5 = scmp.eq.s32.totalorder %s66_s23, 0 }
   0xf   : > { %s1119_s25 = scalar_select %p67_p5, %s1025_s13, %s69_s24  }
  0x12   : > { %171 = sbr.rel (!%p78_p3) target bundleno = 41 (0x29), region = 24  ;;  %s173_s26 = sand.u32 (%p78_p3), 1, %s1025_s13  }
  0x13   : > { %s833_s27 = sshll.u32 (%p78_p3), %s1041_s17, 1  ;;  %s832_s28 = sshll.u32 (%p78_p3), %s173_s26, 8 }
  0x14   : > { %s834_s29 = sshll.u32 (%p78_p3), %s1037_s16, 7  ;;  %s1133_s8 = scalar_lea.vmem (%p78_p3), [#allocation3], %s832_s28 }
  0x15   : > { %s178_s30 = sadd.s32 (%p78_p3), %s834_s29, %s833_s27 }
  0x16   : > { %s835_s4 = sshll.u32 (%p78_p3), %s178_s30, 2 }
  0x17   : > { %s1128_s7 = scalar_lea.vmem (%p78_p3), %s1284_s1, %s835_s4 }
  0x18   : > { %v270_v0 = vld [vmem:[%s1128_s7] sm:$0xff] (%p78_p3)  ;;  %v272_v1 = vld [vmem:[%s1128_s7 + $0x10] sm:$0xff] (%p78_p3) }
  0x19   : > { %v274_v2 = vld [vmem:[%s1128_s7 + $0x20] sm:$0xff]  ;;  %271 = vst [vmem:[%s1133_s8] sm:$0xff] %v270_v0  ;;  %273 = vst [vmem:[%s1133_s8 + $0x8] sm:$0xff] %v272_v1  ;;  %v276_v3 = vld [vmem:[%s1128_s7 + $0x30] sm:$0xff] }
  0x1a   : > { %275 = vst [vmem:[%s1133_s8 + $0x10] sm:$0xff] %v274_v2  ;;  %v278_v4 = vld [vmem:[%s1128_s7 + $0x40] sm:$0xff]  ;;  %v280_v5 = vld [vmem:[%s1128_s7 + $0x50] sm:$0xff]  ;;  %277 = vst [vmem:[%s1133_s8 + $0x18] sm:$0xff] %v276_v3 }
  0x1b   : > { %279 = vst [vmem:[%s1133_s8 + $0x20] sm:$0xff] %v278_v4  ;;  %281 = vst [vmem:[%s1133_s8 + $0x28] sm:$0xff] %v280_v5  ;;  %v282_v6 = vld [vmem:[%s1128_s7 + $0x60] sm:$0xff]  ;;  %v284_v7 = vld [vmem:[%s1128_s7 + $0x70] sm:$0xff] }
  0x1c   : > { %v286_v8 = vld [vmem:[%s1128_s7 + $0x80] sm:$0xff]  ;;  %283 = vst [vmem:[%s1133_s8 + $0x30] sm:$0xff] %v282_v6  ;;  %285 = vst [vmem:[%s1133_s8 + $0x38] sm:$0xff] %v284_v7  ;;  %v288_v9 = vld [vmem:[%s1128_s7 + $0x90] sm:$0xff] }
  0x1d   : > { %287 = vst [vmem:[%s1133_s8 + $0x40] sm:$0xff] %v286_v8  ;;  %v290_v10 = vld [vmem:[%s1128_s7 + $0xa0] sm:$0xff]  ;;  %v292_v11 = vld [vmem:[%s1128_s7 + $0xb0] sm:$0xff]  ;;  %289 = vst [vmem:[%s1133_s8 + $0x48] sm:$0xff] %v288_v9 }
  0x1e   : > { %291 = vst [vmem:[%s1133_s8 + $0x50] sm:$0xff] %v290_v10  ;;  %293 = vst [vmem:[%s1133_s8 + $0x58] sm:$0xff] %v292_v11  ;;  %v294_v12 = vld [vmem:[%s1128_s7 + $0xc0] sm:$0xff]  ;;  %v296_v13 = vld [vmem:[%s1128_s7 + $0xd0] sm:$0xff] }
  0x1f   : > { %v298_v14 = vld [vmem:[%s1128_s7 + $0xe0] sm:$0xff]  ;;  %295 = vst [vmem:[%s1133_s8 + $0x60] sm:$0xff] %v294_v12  ;;  %297 = vst [vmem:[%s1133_s8 + $0x68] sm:$0xff] %v296_v13  ;;  %v300_v15 = vld [vmem:[%s1128_s7 + $0xf0] sm:$0xff] }
  0x20   : > { %299 = vst [vmem:[%s1133_s8 + $0x70] sm:$0xff] %v298_v14  ;;  %v302_v16 = vld [vmem:[%s1128_s7 + $0x100] sm:$0xff]  ;;  %v304_v17 = vld [vmem:[%s1128_s7 + $0x110] sm:$0xff]  ;;  %301 = vst [vmem:[%s1133_s8 + $0x78] sm:$0xff] %v300_v15 }
  0x21   : > { %303 = vst [vmem:[%s1133_s8 + $0x80] sm:$0xff] %v302_v16  ;;  %305 = vst [vmem:[%s1133_s8 + $0x88] sm:$0xff] %v304_v17  ;;  %v306_v18 = vld [vmem:[%s1128_s7 + $0x120] sm:$0xff]  ;;  %v308_v19 = vld [vmem:[%s1128_s7 + $0x130] sm:$0xff] }
  0x22   : > { %v310_v20 = vld [vmem:[%s1128_s7 + $0x140] sm:$0xff]  ;;  %307 = vst [vmem:[%s1133_s8 + $0x90] sm:$0xff] %v306_v18  ;;  %309 = vst [vmem:[%s1133_s8 + $0x98] sm:$0xff] %v308_v19  ;;  %v312_v21 = vld [vmem:[%s1128_s7 + $0x150] sm:$0xff] }
  0x23   : > { %311 = vst [vmem:[%s1133_s8 + $0xa0] sm:$0xff] %v310_v20  ;;  %v314_v22 = vld [vmem:[%s1128_s7 + $0x160] sm:$0xff]  ;;  %v316_v23 = vld [vmem:[%s1128_s7 + $0x170] sm:$0xff]  ;;  %313 = vst [vmem:[%s1133_s8 + $0xa8] sm:$0xff] %v312_v21 }
  0x24   : > { %315 = vst [vmem:[%s1133_s8 + $0xb0] sm:$0xff] %v314_v22  ;;  %317 = vst [vmem:[%s1133_s8 + $0xb8] sm:$0xff] %v316_v23  ;;  %v318_v24 = vld [vmem:[%s1128_s7 + $0x180] sm:$0xff]  ;;  %v320_v25 = vld [vmem:[%s1128_s7 + $0x190] sm:$0xff] }
  0x25   : > { %v322_v26 = vld [vmem:[%s1128_s7 + $0x1a0] sm:$0xff]  ;;  %319 = vst [vmem:[%s1133_s8 + $0xc0] sm:$0xff] %v318_v24  ;;  %321 = vst [vmem:[%s1133_s8 + $0xc8] sm:$0xff] %v320_v25  ;;  %v324_v27 = vld [vmem:[%s1128_s7 + $0x1b0] sm:$0xff] }
  0x26   : > { %323 = vst [vmem:[%s1133_s8 + $0xd0] sm:$0xff] %v322_v26  ;;  %v326_v28 = vld [vmem:[%s1128_s7 + $0x1c0] sm:$0xff]  ;;  %v328_v29 = vld [vmem:[%s1128_s7 + $0x1d0] sm:$0xff]  ;;  %325 = vst [vmem:[%s1133_s8 + $0xd8] sm:$0xff] %v324_v27 }
  0x27   : > { %327 = vst [vmem:[%s1133_s8 + $0xe0] sm:$0xff] %v326_v28  ;;  %329 = vst [vmem:[%s1133_s8 + $0xe8] sm:$0xff] %v328_v29  ;;  %v330_v30 = vld [vmem:[%s1128_s7 + $0x1e0] sm:$0xff]  ;;  %v332_v31 = vld [vmem:[%s1128_s7 + $0x1f0] sm:$0xff] }
  0x28   : > { %331 = vst [vmem:[%s1133_s8 + $0xf0] sm:$0xff] %v330_v30  ;;  %333 = vst [vmem:[%s1133_s8 + $0xf8] sm:$0xff] %v332_v31 }
  0x29 PF: > { %p836_p7 = scmp.ge.s32.totalorder %s1045_s18, 1  ;;  %p346_p8 = scmp.lt.s32.totalorder %s1045_s18, 19 }
  0x2b   : > { %p347_p9 = pnand %p836_p7, %p346_p8 }
  0x2c   : > { %s353_s9 = sand.u32 (!%p347_p9), 1, %s1021_s12   ;;  %p393_p10 = scmp.lt.s32.totalorder (!%p347_p9), %s1029_s14, 8 }
  0x2d   : > { %350 = sbr.rel (%p347_p9) target bundleno = 355 (0x163), region = 66  ;;  %s837_s10 = sshll.u32 (!%p347_p9), %s353_s9, 8 }
  0x2e   : > { %s840_s11 = sshll.u32 (!%p347_p9), %s1033_s15, 1  ;;  %s1219_s5 = scalar_lea.vmem (!%p347_p9), [#allocation3], %s837_s10 }
  0x2f   : > { %p404_p11 = scmp.lt.s32.totalorder (!%p347_p9), %s840_s11, 3  ;;  %p843_p12 = scmp.ne.s32.totalorder (!%p347_p9), %s1029_s14, 0 }
  0x34   : > { %s394_s21 = scalar_select %p393_p10, %s1029_s14, 8 }
  0x35   : > { %s1300_s11 = smov (!%p404_p11, %s840_s11), 3  ;;  %421 = sbr.rel (%p843_p12) target bundleno = 60 (0x3c), region = 74 }
  0x36   : > { %s882_s22 = sshll.u32 %s394_s21, 3  ;;  %s406_s29 = scalar_lea.vmem %s1285_s2, %s1300_s11  ;;  %v1047_v32 = vmov (!%p843_p12), 0.0  }
  0x37   : > { %s1207_s26 = scalar_lea.vmem %s1283_s0, %s882_s22  ;;  %s842_s12 = sshll.u32 %s1300_s11, 2  ;;  %422 = vst [vmem:[#allocation2] sm:$0xff] (!%p843_p12), %v1047_v32  ;;  %423 = vst [vmem:[#allocation2 + $0x8] sm:$0xff] (!%p843_p12), %v1047_v32 }
  0x38   : > { %s1217_s15 = scalar_lea.vmem %s1286_s3, %s842_s12 }
  0x3c PF: > { %v941_v33 = vld [vmem:[%s1219_s5 + $0x4] ss:$8 sps:$4 sm:$0xff]   ;;  %v943_v34 = vld [vmem:[%s1219_s5] ss:$8 sps:$4 sm:$0xff]   ;;  %v944_v35 = vld [vmem:[%s1219_s5 + $0x14] ss:$8 sps:$4 sm:$0xff]  }
  0x3d   : > { %626 = vmatprep.subr.bf16.mxu0 %v941_v33  ;;  %v946_v36 = vld [vmem:[%s1219_s5 + $0x10] ss:$8 sps:$4 sm:$0xff]   ;;  %v947_v37 = vld [vmem:[%s1219_s5 + $0x24] ss:$8 sps:$4 sm:$0xff]   ;;  %v949_v38 = vld [vmem:[%s1219_s5 + $0x20] ss:$8 sps:$4 sm:$0xff]  }
  0x3e   : > { %627 = vmatpush1.bf16.msra.mxu0 %v943_v34  ;;  %v950_v39 = vld [vmem:[%s1219_s5 + $0x34] ss:$8 sps:$4 sm:$0xff]   ;;  %v952_v40 = vld [vmem:[%s1219_s5 + $0x30] ss:$8 sps:$4 sm:$0xff]   ;;  %v953_v41 = vld [vmem:[%s1219_s5 + $0x44] ss:$8 sps:$4 sm:$0xff]  }
  0x3f   : > { %628 = vmatprep.subr.bf16.mxu0 %v944_v35  ;;  %v955_v42 = vld [vmem:[%s1219_s5 + $0x40] ss:$8 sps:$4 sm:$0xff]   ;;  %v956_v43 = vld [vmem:[%s1219_s5 + $0x54] ss:$8 sps:$4 sm:$0xff]   ;;  %v958_v44 = vld [vmem:[%s1219_s5 + $0x50] ss:$8 sps:$4 sm:$0xff]  }
  0x40   : > { %v959_v45 = vld [vmem:[%s1219_s5 + $0x64] ss:$8 sps:$4 sm:$0xff]   ;;  %v426_v46 = vld [vmem:[%s1207_s26] sm:$0xff]  ;;  %v961_v48 = vld [vmem:[%s1219_s5 + $0x60] ss:$8 sps:$4 sm:$0xff]   ;;  %p878_p13 = scmp.ne.s32.totalorder %s1029_s14, 8 }
  0x41   : > { %v845_v47 = vcombine.high %v426_v46, %v426_v46  ;;  %v962_v49 = vld [vmem:[%s1219_s5 + $0x74] ss:$8 sps:$4 sm:$0xff]   ;;  %v964_v50 = vld [vmem:[%s1219_s5 + $0x70] ss:$8 sps:$4 sm:$0xff]   ;;  %v965_v51 = vld [vmem:[%s1219_s5 + $0x84] ss:$8 sps:$4 sm:$0xff]   ;;  %v844_v3 = vcombine.low %v426_v46, %v426_v46  ;;  %v679_v12 = vlaneseq (!%p878_p13) }
  0x42   : > { %629 = vmatpush1.bf16.msra.mxu0 %v946_v36  ;;  %v967_v52 = vld [vmem:[%s1219_s5 + $0x80] ss:$8 sps:$4 sm:$0xff]   ;;  %v968_v53 = vld [vmem:[%s1219_s5 + $0x94] ss:$8 sps:$4 sm:$0xff]   ;;  %v970_v54 = vld [vmem:[%s1219_s5 + $0x90] ss:$8 sps:$4 sm:$0xff]  }
  0x43   : > { %630 = vmatprep.subr.bf16.mxu0 %v947_v37  ;;  %658 = vmatprep.mubr.bf16.mxu0 %v845_v47  ;;  %v971_v55 = vld [vmem:[%s1219_s5 + $0xa4] ss:$8 sps:$4 sm:$0xff]   ;;  %v973_v56 = vld [vmem:[%s1219_s5 + $0xa0] ss:$8 sps:$4 sm:$0xff]   ;;  %v974_v57 = vld [vmem:[%s1219_s5 + $0xb4] ss:$8 sps:$4 sm:$0xff]  }
  0x44   : > { %v976_v58 = vld [vmem:[%s1219_s5 + $0xb0] ss:$8 sps:$4 sm:$0xff]   ;;  %v977_v59 = vld [vmem:[%s1219_s5 + $0xc4] ss:$8 sps:$4 sm:$0xff]   ;;  %v979_v60 = vld [vmem:[%s1219_s5 + $0xc0] ss:$8 sps:$4 sm:$0xff]  }
  0x45   : > { %v980_v61 = vld [vmem:[%s1219_s5 + $0xd4] ss:$8 sps:$4 sm:$0xff]   ;;  %v982_v62 = vld [vmem:[%s1219_s5 + $0xd0] ss:$8 sps:$4 sm:$0xff]   ;;  %v983_v63 = vld [vmem:[%s1219_s5 + $0xe4] ss:$8 sps:$4 sm:$0xff]  }
  0x46   : > { %631 = vmatpush1.bf16.msra.mxu0 %v949_v38  ;;  %v985_v0 = vld [vmem:[%s1219_s5 + $0xe0] ss:$8 sps:$4 sm:$0xff]   ;;  %v986_v1 = vld [vmem:[%s1219_s5 + $0xf4] ss:$8 sps:$4 sm:$0xff]   ;;  %v988_v2 = vld [vmem:[%s1219_s5 + $0xf0] ss:$8 sps:$4 sm:$0xff]  }
  0x47   : > { %632 = vmatprep.subr.bf16.mxu0 %v950_v39  ;;  %v424_v4 = vld [vmem:[#allocation2] sm:$0xff]  ;;  %v425_v5 = vld [vmem:[#allocation2 + $0x8] sm:$0xff]  ;;  %v680_v13 = vshrl.u32 (!%p878_p13), %v679_v12, 7 }
  0x48   : > { %v677_v14 = vld [vmem:[%s406_s29] sm:$0x3] (!%p878_p13) }
  0x49   : > { %v681_v15 = vsub.s32 (!%p878_p13), 0, %v680_v13  ;;  %v685_v16 = vsub.s32 (!%p878_p13), 1, %v680_v13 }
  0x4a   : > { %633 = vmatpush1.bf16.msra.mxu0 %v952_v40 }
  0x4b   : > { %634 = vmatprep.subr.bf16.mxu0 %v953_v41  ;;  %v682_v19 = vrot.slane (!%p878_p13), %v677_v14, %v681_v15  ;;  %v686_v20 = vrot.slane (!%p878_p13), %v677_v14, %v685_v16 }
  0x4e   : > { %635 = vmatpush1.bf16.msra.mxu0 %v955_v42 }
  0x4f   : > { %636 = vmatprep.subr.bf16.mxu0 %v956_v43 }
  0x52   : > { %637 = vmatpush1.bf16.msra.mxu0 %v958_v44 }
  0x53   : > { %638 = vmatprep.subr.bf16.mxu0 %v959_v45 }
  0x56   : > { %639 = vmatpush1.bf16.msra.mxu0 %v961_v48 }
  0x57   : > { %640 = vmatprep.subr.bf16.mxu0 %v962_v49 }
  0x5a   : > { %641 = vmatpush1.bf16.msra.mxu0 %v964_v50 }
  0x5b   : > { %642 = vmatprep.subr.bf16.mxu0 %v965_v51 }
  0x5e   : > { %643 = vmatpush1.bf16.msra.mxu0 %v967_v52 }
  0x5f   : > { %644 = vmatprep.subr.bf16.mxu0 %v968_v53 }
  0x62   : > { %645 = vmatpush1.bf16.msra.mxu0 %v970_v54 }
  0x63   : > { %646 = vmatprep.subr.bf16.mxu0 %v971_v55 }
  0x66   : > { %647 = vmatpush1.bf16.msra.mxu0 %v973_v56 }
  0x67   : > { %648 = vmatprep.subr.bf16.mxu0 %v974_v57 }
  0x6a   : > { %649 = vmatpush1.bf16.msra.mxu0 %v976_v58 }
  0x6b   : > { %650 = vmatprep.subr.bf16.mxu0 %v977_v59 }
  0x6e   : > { %651 = vmatpush1.bf16.msra.mxu0 %v979_v60 }
  0x6f   : > { %652 = vmatprep.subr.bf16.mxu0 %v980_v61 }
  0x72   : > { %653 = vmatpush1.bf16.msra.mxu0 %v982_v62 }
  0x73   : > { %654 = vmatprep.subr.bf16.mxu0 %v983_v63 }
  0x76   : > { %655 = vmatpush1.bf16.msra.mxu0 %v985_v0 }
  0x77   : > { %656 = vmatprep.subr.bf16.mxu0 %v986_v1 }
  0x7a   : > { %657 = vmatpush1.bf16.msra.mxu0 %v988_v2 }
  0x7d   : > { %659 = vmatmul.mubr.bf16.vlgmr.msra.gmra.mrb[0].mxu0 %v844_v3 }
 0x14e   : > { %674 = sbr.rel (%p878_p13) target bundleno = 355 (0x163), region = 78 }
 0x150   : > { %v660_v6 = vpop.f32.mrb[0].mxu0 }
 0x151   : > { %v667_v7 = vadd.f32 %v660_v6, %v424_v4  ;;  %v662_v8 = vpop.f32.mrb[1].mxu0 }
 0x152   : > { %v668_v9 = vadd.f32 %v662_v8, %v425_v5  ;;  %v664_v10 = vpop.f32.mrb[2].mxu0 }
 0x153   : > { %669 = vst [vmem:[#allocation2] sm:$0xff] %v667_v7  ;;  %v665_v11 = vpop.f32.mrb[3].mxu0 }
 0x154   : > { %670 = vst [vmem:[#allocation2 + $0x8] sm:$0xff] %v668_v9 }
 0x15a   : > { %v675_v17 = vld [vmem:[#allocation2] sm:$0xff] }
 0x15b   : > { %v676_v18 = vld [vmem:[#allocation2 + $0x8] sm:$0xff]  ;;  %v689_v21 = vadd.f32 %v682_v19, %v675_v17 }
 0x15c   : > { %v690_v22 = vadd.f32 %v686_v20, %v676_v18 }
 0x15d   : > { %v691_v23 = vmax.f32 %v689_v21, 0.0 }
 0x15e   : > { %v692_v24 = vmax.f32 %v690_v22, 0.0 }
 0x160   : > { %v883_v25 = vpack.c.bf16 %v692_v24, %v691_v23 }
 0x162   : > { %701 = vst [vmem:[%s1217_s15] sm:$0xff] %v883_v25 }
 0x163 PF: > { %s13_s18 = sadd.s32 1, %s1045_s18   ;;  %s1287_s12 = smov %s1025_s13 }
 0x164   : > { %p10_p0 = scmp.ge.s32.totalorder %s13_s18, 20   ;;  %s1288_s13 = smov %s1119_s25 }
 0x165   : > { %s1289_s14 = smov %s1037_s16  ;;  %s1290_s15 = smov %s1041_s17 }
 0x166   : > { %s1291_s16 = smov %s1294_s19  ;;  %s1292_s17 = smov %s1298_s20 }
 0x167   :  { %12 = sbr.rel (!%p10_p0) target bundleno = 4 (0x4), region = 119 }

// kernel: resnet34_forward.69
= control target key start
LH: loop header
LB: loop body
LE: loop exit
PB: predicated region body
PF: predicated region fallthrough
CT: control target
= control target key end

     0   :  { %s1027_s12 = smov 0   ;;  %s1029_s13 = smov 0   ;;  %s1206_s0 = inlined_call_operand.vmem [shape: bf16[1,8,256], index: 0, kind: input, shape index: {}]   ;;  %s1207_s1 = inlined_call_operand.vmem [shape: bf16[1,256,512], index: 1, kind: input, shape index: {}]   ;;  %s1208_s2 = inlined_call_operand.vmem [shape: f32[1,512], index: 2, kind: input, shape index: {}]   ;;  %s1209_s3 = inlined_call_operand.vmem [shape: bf16[8,512], index: 3, kind: output, shape index: {}]  }
   0x1   :  { %s1031_s14 = smov 0   ;;  %s1033_s15 = smov 0  }
   0x2   :  { %s1035_s16 = smov 0  }
   0x3 LB: > { %s28_s17 = sadd.s32 1, %s1001_s15  ;;  %p76_p1 = scmp.ne.s32.totalorder %s993_s13, %s989_s12  ;;  %s1005_s16 = sphi %s1035_s16, %s13_s16   ;;  %s1001_s15 = sphi %s1033_s15, %s1213_s15   ;;  %s997_s14 = sphi %s1031_s14, %s1212_s14   ;;  %s993_s13 = sphi %s1029_s13, %s1211_s13   ;;  %s989_s12 = sphi %s1027_s12, %s1210_s12  }
   0x4   : > { %p30_p0 = scmp.ge.s32.totalorder %s28_s17, 2  ;;  %p77_p2 = scmp.eq.s32.totalorder %s1005_s16, 0 }
   0x5   : > { %s69_s19 = sadd.s32 1, %s993_s13  ;;  %p829_p5 = scmp.ge.s32.totalorder %s1005_s16, 2 }
   0x6   : > { %s1215_s17 = smov (%p30_p0, %s28_s17), 0  ;;  %p78_p3 = por %p77_p2, %p76_p1 }
   0x7   : > { %s65_s18 = ssub.s32 %s1001_s15, %s1215_s17  ;;  %168 = sbr.rel (%p829_p5) target bundleno = 34 (0x22), region = 20 }
   0x8   : > { %p67_p4 = scmp.eq.s32.totalorder %s65_s18, 0 }
   0xa   : > { %s1062_s20 = scalar_select %p67_p4, %s993_s13, %s69_s19  }
   0xe   : > { %171 = sbr.rel (!%p78_p3) target bundleno = 34 (0x22), region = 24  ;;  %s173_s21 = sand.u32 (%p78_p3), 1, %s993_s13  }
   0xf   : > { %s875_s22 = sshll.u32 (%p78_p3), %s1001_s15, 3  ;;  %s830_s23 = sshll.u32 (%p78_p3), %s173_s21, 8 }
  0x10   : > { %s1070_s26 = scalar_lea.vmem (%p78_p3), %s1207_s1, %s875_s22  ;;  %s1075_s27 = scalar_lea.vmem (%p78_p3), [#allocation3], %s830_s23 }
  0x11   : > { %v270_v0 = vld [vmem:[%s1070_s26] sm:$0xff] (%p78_p3)  ;;  %v272_v1 = vld [vmem:[%s1070_s26 + $0x10] sm:$0xff] (%p78_p3) }
  0x12   : > { %v274_v2 = vld [vmem:[%s1070_s26 + $0x20] sm:$0xff] (%p78_p3)  ;;  %271 = vst [vmem:[%s1075_s27] sm:$0xff] (%p78_p3), %v270_v0  ;;  %273 = vst [vmem:[%s1075_s27 + $0x8] sm:$0xff] (%p78_p3), %v272_v1  ;;  %v276_v3 = vld [vmem:[%s1070_s26 + $0x30] sm:$0xff] (%p78_p3) }
  0x13   : > { %275 = vst [vmem:[%s1075_s27 + $0x10] sm:$0xff] (%p78_p3), %v274_v2  ;;  %v278_v4 = vld [vmem:[%s1070_s26 + $0x40] sm:$0xff] (%p78_p3)  ;;  %v280_v5 = vld [vmem:[%s1070_s26 + $0x50] sm:$0xff] (%p78_p3)  ;;  %277 = vst [vmem:[%s1075_s27 + $0x18] sm:$0xff] (%p78_p3), %v276_v3 }
  0x14   : > { %279 = vst [vmem:[%s1075_s27 + $0x20] sm:$0xff] (%p78_p3), %v278_v4  ;;  %281 = vst [vmem:[%s1075_s27 + $0x28] sm:$0xff] (%p78_p3), %v280_v5  ;;  %v282_v6 = vld [vmem:[%s1070_s26 + $0x60] sm:$0xff] (%p78_p3)  ;;  %v284_v7 = vld [vmem:[%s1070_s26 + $0x70] sm:$0xff] (%p78_p3) }
  0x15   : > { %v286_v8 = vld [vmem:[%s1070_s26 + $0x80] sm:$0xff]  ;;  %283 = vst [vmem:[%s1075_s27 + $0x30] sm:$0xff] %v282_v6  ;;  %285 = vst [vmem:[%s1075_s27 + $0x38] sm:$0xff] %v284_v7  ;;  %v288_v9 = vld [vmem:[%s1070_s26 + $0x90] sm:$0xff] }
  0x16   : > { %287 = vst [vmem:[%s1075_s27 + $0x40] sm:$0xff] %v286_v8  ;;  %v290_v10 = vld [vmem:[%s1070_s26 + $0xa0] sm:$0xff]  ;;  %v292_v11 = vld [vmem:[%s1070_s26 + $0xb0] sm:$0xff]  ;;  %289 = vst [vmem:[%s1075_s27 + $0x48] sm:$0xff] %v288_v9 }
  0x17   : > { %291 = vst [vmem:[%s1075_s27 + $0x50] sm:$0xff] %v290_v10  ;;  %293 = vst [vmem:[%s1075_s27 + $0x58] sm:$0xff] %v292_v11  ;;  %v294_v12 = vld [vmem:[%s1070_s26 + $0xc0] sm:$0xff]  ;;  %v296_v13 = vld [vmem:[%s1070_s26 + $0xd0] sm:$0xff] }
  0x18   : > { %v298_v14 = vld [vmem:[%s1070_s26 + $0xe0] sm:$0xff]  ;;  %295 = vst [vmem:[%s1075_s27 + $0x60] sm:$0xff] %v294_v12  ;;  %297 = vst [vmem:[%s1075_s27 + $0x68] sm:$0xff] %v296_v13  ;;  %v300_v15 = vld [vmem:[%s1070_s26 + $0xf0] sm:$0xff] }
  0x19   : > { %299 = vst [vmem:[%s1075_s27 + $0x70] sm:$0xff] %v298_v14  ;;  %v302_v16 = vld [vmem:[%s1070_s26 + $0x100] sm:$0xff]  ;;  %v304_v17 = vld [vmem:[%s1070_s26 + $0x110] sm:$0xff]  ;;  %301 = vst [vmem:[%s1075_s27 + $0x78] sm:$0xff] %v300_v15 }
  0x1a   : > { %303 = vst [vmem:[%s1075_s27 + $0x80] sm:$0xff] %v302_v16  ;;  %305 = vst [vmem:[%s1075_s27 + $0x88] sm:$0xff] %v304_v17  ;;  %v306_v18 = vld [vmem:[%s1070_s26 + $0x120] sm:$0xff]  ;;  %v308_v19 = vld [vmem:[%s1070_s26 + $0x130] sm:$0xff] }
  0x1b   : > { %v310_v20 = vld [vmem:[%s1070_s26 + $0x140] sm:$0xff]  ;;  %307 = vst [vmem:[%s1075_s27 + $0x90] sm:$0xff] %v306_v18  ;;  %309 = vst [vmem:[%s1075_s27 + $0x98] sm:$0xff] %v308_v19  ;;  %v312_v21 = vld [vmem:[%s1070_s26 + $0x150] sm:$0xff] }
  0x1c   : > { %311 = vst [vmem:[%s1075_s27 + $0xa0] sm:$0xff] %v310_v20  ;;  %v314_v22 = vld [vmem:[%s1070_s26 + $0x160] sm:$0xff]  ;;  %v316_v23 = vld [vmem:[%s1070_s26 + $0x170] sm:$0xff]  ;;  %313 = vst [vmem:[%s1075_s27 + $0xa8] sm:$0xff] %v312_v21 }
  0x1d   : > { %315 = vst [vmem:[%s1075_s27 + $0xb0] sm:$0xff] %v314_v22  ;;  %317 = vst [vmem:[%s1075_s27 + $0xb8] sm:$0xff] %v316_v23  ;;  %v318_v24 = vld [vmem:[%s1070_s26 + $0x180] sm:$0xff]  ;;  %v320_v25 = vld [vmem:[%s1070_s26 + $0x190] sm:$0xff] }
  0x1e   : > { %v322_v26 = vld [vmem:[%s1070_s26 + $0x1a0] sm:$0xff]  ;;  %319 = vst [vmem:[%s1075_s27 + $0xc0] sm:$0xff] %v318_v24  ;;  %321 = vst [vmem:[%s1075_s27 + $0xc8] sm:$0xff] %v320_v25  ;;  %v324_v27 = vld [vmem:[%s1070_s26 + $0x1b0] sm:$0xff] }
  0x1f   : > { %323 = vst [vmem:[%s1075_s27 + $0xd0] sm:$0xff] %v322_v26  ;;  %v326_v28 = vld [vmem:[%s1070_s26 + $0x1c0] sm:$0xff]  ;;  %v328_v29 = vld [vmem:[%s1070_s26 + $0x1d0] sm:$0xff]  ;;  %325 = vst [vmem:[%s1075_s27 + $0xd8] sm:$0xff] %v324_v27 }
  0x20   : > { %327 = vst [vmem:[%s1075_s27 + $0xe0] sm:$0xff] %v326_v28  ;;  %329 = vst [vmem:[%s1075_s27 + $0xe8] sm:$0xff] %v328_v29  ;;  %v330_v30 = vld [vmem:[%s1070_s26 + $0x1e0] sm:$0xff]  ;;  %v332_v31 = vld [vmem:[%s1070_s26 + $0x1f0] sm:$0xff] }
  0x21   : > { %331 = vst [vmem:[%s1075_s27 + $0xf0] sm:$0xff] %v330_v30  ;;  %333 = vst [vmem:[%s1075_s27 + $0xf8] sm:$0xff] %v332_v31 }
  0x22 PF: > { %p833_p6 = scmp.ge.s32.totalorder %s1005_s16, 1  ;;  %p346_p7 = scmp.lt.s32.totalorder %s1005_s16, 3 }
  0x24   : > { %p347_p8 = pnand %p833_p6, %p346_p7 }
  0x25   : > { %s353_s28 = sand.u32 (!%p347_p8), 1, %s989_s12   ;;  %v1144_v32 = vld [vmem:[%s1206_s0] sm:$0xff] (!%p347_p8)  ;;  %s835_s6 = sshll.u32 (!%p347_p8), %s997_s14, 1  ;;  %v678_v3 = vlaneseq (!%p347_p8) }
  0x26   : > { %350 = sbr.rel (%p347_p8) target bundleno = 323 (0x143), region = 66  ;;  %s834_s4 = sshll.u32 (!%p347_p8), %s353_s28, 8  ;;  %v839_v33 = vcombine.high (!%p347_p8), %v1144_v32, %v1144_v32  ;;  %v838_v2 = vcombine.low (!%p347_p8), %v1144_v32, %v1144_v32 }
  0x27   : > { %s1148_s5 = scalar_lea.vmem (!%p347_p8), [#allocation3], %s834_s4  ;;  %p404_p9 = scmp.lt.s32.totalorder (!%p347_p8), %s835_s6, 3  ;;  %v679_v4 = vshrl.u32 (!%p347_p8), %v678_v3, 7 }
  0x28   : > { %v917_v34 = vld [vmem:[%s1148_s5 + $0x4] ss:$8 sps:$4 sm:$0xff] (!%p347_p8)   ;;  %658 = vmatprep.mubr.bf16.mxu0 (!%p347_p8), %v839_v33  ;;  %v919_v35 = vld [vmem:[%s1148_s5] ss:$8 sps:$4 sm:$0xff] (!%p347_p8)   ;;  %v920_v36 = vld [vmem:[%s1148_s5 + $0x14] ss:$8 sps:$4 sm:$0xff] (!%p347_p8)  }
  0x29   : > { %626 = vmatprep.subr.bf16.mxu0 (!%p347_p8), %v917_v34  ;;  %v922_v37 = vld [vmem:[%s1148_s5 + $0x10] ss:$8 sps:$4 sm:$0xff] (!%p347_p8)   ;;  %v923_v38 = vld [vmem:[%s1148_s5 + $0x24] ss:$8 sps:$4 sm:$0xff] (!%p347_p8)   ;;  %v925_v39 = vld [vmem:[%s1148_s5 + $0x20] ss:$8 sps:$4 sm:$0xff] (!%p347_p8)  }
  0x2a   : > { %627 = vmatpush1.bf16.msra.mxu0 (!%p347_p8), %v919_v35  ;;  %v926_v40 = vld [vmem:[%s1148_s5 + $0x34] ss:$8 sps:$4 sm:$0xff] (!%p347_p8)   ;;  %v928_v41 = vld [vmem:[%s1148_s5 + $0x30] ss:$8 sps:$4 sm:$0xff] (!%p347_p8)   ;;  %v929_v42 = vld [vmem:[%s1148_s5 + $0x44] ss:$8 sps:$4 sm:$0xff] (!%p347_p8)  }
  0x2b   : > { %628 = vmatprep.subr.bf16.mxu0 (!%p347_p8), %v920_v36  ;;  %v931_v43 = vld [vmem:[%s1148_s5 + $0x40] ss:$8 sps:$4 sm:$0xff] (!%p347_p8)   ;;  %v932_v44 = vld [vmem:[%s1148_s5 + $0x54] ss:$8 sps:$4 sm:$0xff] (!%p347_p8)   ;;  %v934_v45 = vld [vmem:[%s1148_s5 + $0x50] ss:$8 sps:$4 sm:$0xff] (!%p347_p8)  }
  0x2c   : > { %v935_v46 = vld [vmem:[%s1148_s5 + $0x64] ss:$8 sps:$4 sm:$0xff] (!%p347_p8)   ;;  %v937_v47 = vld [vmem:[%s1148_s5 + $0x60] ss:$8 sps:$4 sm:$0xff] (!%p347_p8)   ;;  %v938_v48 = vld [vmem:[%s1148_s5 + $0x74] ss:$8 sps:$4 sm:$0xff] (!%p347_p8)  }
  0x2d   : > { %v940_v49 = vld [vmem:[%s1148_s5 + $0x70] ss:$8 sps:$4 sm:$0xff]   ;;  %v941_v50 = vld [vmem:[%s1148_s5 + $0x84] ss:$8 sps:$4 sm:$0xff]   ;;  %v943_v51 = vld [vmem:[%s1148_s5 + $0x80] ss:$8 sps:$4 sm:$0xff]  }
  0x2e   : > { %629 = vmatpush1.bf16.msra.mxu0 %v922_v37  ;;  %v944_v52 = vld [vmem:[%s1148_s5 + $0x94] ss:$8 sps:$4 sm:$0xff]   ;;  %v946_v53 = vld [vmem:[%s1148_s5 + $0x90] ss:$8 sps:$4 sm:$0xff]   ;;  %v947_v54 = vld [vmem:[%s1148_s5 + $0xa4] ss:$8 sps:$4 sm:$0xff]  }
  0x2f   : > { %630 = vmatprep.subr.bf16.mxu0 %v923_v38  ;;  %v949_v55 = vld [vmem:[%s1148_s5 + $0xa0] ss:$8 sps:$4 sm:$0xff]   ;;  %v950_v56 = vld [vmem:[%s1148_s5 + $0xb4] ss:$8 sps:$4 sm:$0xff]   ;;  %v952_v57 = vld [vmem:[%s1148_s5 + $0xb0] ss:$8 sps:$4 sm:$0xff]  }
  0x30   : > { %v953_v58 = vld [vmem:[%s1148_s5 + $0xc4] ss:$8 sps:$4 sm:$0xff]   ;;  %v955_v59 = vld [vmem:[%s1148_s5 + $0xc0] ss:$8 sps:$4 sm:$0xff]   ;;  %v956_v60 = vld [vmem:[%s1148_s5 + $0xd4] ss:$8 sps:$4 sm:$0xff]  }
  0x31   : > { %v958_v61 = vld [vmem:[%s1148_s5 + $0xd0] ss:$8 sps:$4 sm:$0xff]   ;;  %v959_v62 = vld [vmem:[%s1148_s5 + $0xe4] ss:$8 sps:$4 sm:$0xff]   ;;  %v961_v63 = vld [vmem:[%s1148_s5 + $0xe0] ss:$8 sps:$4 sm:$0xff]  }
  0x32   : > { %631 = vmatpush1.bf16.msra.mxu0 %v925_v39  ;;  %v962_v0 = vld [vmem:[%s1148_s5 + $0xf4] ss:$8 sps:$4 sm:$0xff]   ;;  %v964_v1 = vld [vmem:[%s1148_s5 + $0xf0] ss:$8 sps:$4 sm:$0xff]   ;;  %s1217_s6 = smov (!%p404_p9, %s835_s6), 3  ;;  %v680_v5 = vsub.s32 0, %v679_v4 }
  0x33   : > { %632 = vmatprep.subr.bf16.mxu0 %v926_v40  ;;  %s406_s9 = scalar_lea.vmem %s1208_s2, %s1217_s6  ;;  %v684_v7 = vsub.s32 1, %v679_v4  ;;  %s837_s10 = sshll.u32 %s1217_s6, 2 }
  0x34   : > { %v676_v6 = vld [vmem:[%s406_s9] sm:$0x3]  ;;  %s416_s14 = scalar_lea.vmem %s1209_s3, %s837_s10 }
  0x35   : > { %v681_v8 = vrot.slane %v676_v6, %v680_v5  ;;  %v685_v9 = vrot.slane %v676_v6, %v684_v7 }
  0x36   : > { %633 = vmatpush1.bf16.msra.mxu0 %v928_v41 }
  0x37   : > { %634 = vmatprep.subr.bf16.mxu0 %v929_v42 }
  0x3a   : > { %635 = vmatpush1.bf16.msra.mxu0 %v931_v43 }
  0x3b   : > { %636 = vmatprep.subr.bf16.mxu0 %v932_v44 }
  0x3e   : > { %637 = vmatpush1.bf16.msra.mxu0 %v934_v45 }
  0x3f   : > { %638 = vmatprep.subr.bf16.mxu0 %v935_v46 }
  0x42   : > { %639 = vmatpush1.bf16.msra.mxu0 %v937_v47 }
  0x43   : > { %640 = vmatprep.subr.bf16.mxu0 %v938_v48 }
  0x46   : > { %641 = vmatpush1.bf16.msra.mxu0 %v940_v49 }
  0x47   : > { %642 = vmatprep.subr.bf16.mxu0 %v941_v50 }
  0x4a   : > { %643 = vmatpush1.bf16.msra.mxu0 %v943_v51 }
  0x4b   : > { %644 = vmatprep.subr.bf16.mxu0 %v944_v52 }
  0x4e   : > { %645 = vmatpush1.bf16.msra.mxu0 %v946_v53 }
  0x4f   : > { %646 = vmatprep.subr.bf16.mxu0 %v947_v54 }
  0x52   : > { %647 = vmatpush1.bf16.msra.mxu0 %v949_v55 }
  0x53   : > { %648 = vmatprep.subr.bf16.mxu0 %v950_v56 }
  0x56   : > { %649 = vmatpush1.bf16.msra.mxu0 %v952_v57 }
  0x57   : > { %650 = vmatprep.subr.bf16.mxu0 %v953_v58 }
  0x5a   : > { %651 = vmatpush1.bf16.msra.mxu0 %v955_v59 }
  0x5b   : > { %652 = vmatprep.subr.bf16.mxu0 %v956_v60 }
  0x5e   : > { %653 = vmatpush1.bf16.msra.mxu0 %v958_v61 }
  0x5f   : > { %654 = vmatprep.subr.bf16.mxu0 %v959_v62 }
  0x62   : > { %655 = vmatpush1.bf16.msra.mxu0 %v961_v63 }
  0x63   : > { %656 = vmatprep.subr.bf16.mxu0 %v962_v0 }
  0x66   : > { %657 = vmatpush1.bf16.msra.mxu0 %v964_v1 }
  0x69   : > { %659 = vmatmul.mubr.bf16.vlgmr.msra.gmra.mrb[0].mxu0 %v838_v2 }
 0x13c   : > { %v660_v10 = vpop.f32.mrb[0].mxu0 }
 0x13d   : > { %v688_v11 = vadd.f32 %v681_v8, %v660_v10  ;;  %v662_v12 = vpop.f32.mrb[1].mxu0 }
 0x13e   : > { %v689_v13 = vadd.f32 %v685_v9, %v662_v12  ;;  %v664_v14 = vpop.f32.mrb[2].mxu0 }
 0x13f   : > { %v665_v15 = vpop.f32.mrb[3].mxu0 }
 0x140   : > { %v876_v16 = vpack.c.bf16 %v689_v13, %v688_v11 }
 0x142   : > { %698 = vst [vmem:[%s416_s14] sm:$0xff] %v876_v16 }
 0x143 PF: > { %s13_s16 = sadd.s32 1, %s1005_s16   ;;  %s1210_s12 = smov %s993_s13 }
 0x144   : > { %p10_p10 = scmp.ge.s32.totalorder %s13_s16, 4   ;;  %s1211_s13 = smov %s1062_s20 }
 0x145   : > { %s1212_s14 = smov %s1001_s15  ;;  %s1213_s15 = smov %s1215_s17 }
 0x146   :  { %12 = sbr.rel (!%p10_p10) target bundleno = 3 (0x3), region = 119 }

// kernel: resnet34_forward.71
= control target key start
LH: loop header
LB: loop body
LE: loop exit
PB: predicated region body
PF: predicated region fallthrough
CT: control target
= control target key end

     0   :  { %s1614_s15 = smov 0   ;;  %s1616_s16 = smov 0   ;;  %s1932_s0 = inlined_call_operand.vmem [shape: bf16[9,8,512], index: 0, kind: input, shape index: {}]   ;;  %s1933_s1 = inlined_call_operand.vmem [shape: bf16[9,512,512], index: 1, kind: input, shape index: {}]   ;;  %s1934_s2 = inlined_call_operand.vmem [shape: f32[1,512], index: 2, kind: input, shape index: {}]   ;;  %s1935_s3 = inlined_call_operand.vmem [shape: bf16[8,512], index: 3, kind: input, shape index: {}]   ;;  %s1936_s4 = inlined_call_operand.vmem [shape: bf16[8,512], index: 4, kind: output, shape index: {}]  }
   0x1   :  { %s1618_s17 = smov 0   ;;  %s1620_s18 = smov 0  }
   0x2   :  { %s1622_s19 = smov 0   ;;  %s1624_s20 = smov 0  }
   0x3   :  { %s1626_s21 = smov 0  }
   0x4 LB: > { %s26_s22 = sadd.s32 1, %s1578_s19  ;;  %s29_s23 = sadd.s32 1, %s1582_s20  ;;  %s1586_s21 = sphi %s1626_s21, %s14_s21   ;;  %s1582_s20 = sphi %s1624_s20, %s1942_s20   ;;  %s1578_s19 = sphi %s1622_s19, %s1941_s19   ;;  %s1574_s18 = sphi %s1620_s18, %s1940_s18   ;;  %s1570_s17 = sphi %s1618_s17, %s1939_s17   ;;  %s1566_s16 = sphi %s1616_s16, %s1938_s16   ;;  %s1562_s15 = sphi %s1614_s15, %s1937_s15  }
   0x5   : > { %p27_p0 = scmp.ge.s32.totalorder %s26_s22, 9  ;;  %p77_p1 = scmp.ne.s32.totalorder %s1566_s16, %s1562_s15 }
   0x6   : > { %p78_p2 = scmp.eq.s32.totalorder %s1586_s21, 0  ;;  %s70_s27 = sadd.s32 1, %s1566_s16 }
   0x7   : > { %s1944_s22 = smov (%p27_p0, %s26_s22), 0  ;;  %s1946_s23 = smov (!%p27_p0, %s29_s23), %s1582_s20 }
   0x8   : > { %p79_p3 = por %p78_p2, %p77_p1  ;;  %p31_p4 = scmp.ge.s32.totalorder %s1946_s23, 2 }
   0x9   : > { %s65_s24 = ssub.s32 %s1578_s19, %s1944_s22  ;;  %p1286_p6 = scmp.ge.s32.totalorder %s1586_s21, 18 }
   0xa   : > { %s1948_s23 = smov (%p31_p4, %s1946_s23), 0 }
   0xb   : > { %s66_s25 = ssub.s32 %s1582_s20, %s1948_s23  ;;  %185 = sbr.rel (%p1286_p6) target bundleno = 57 (0x39), region = 16 }
   0xc   : > { %s67_s26 = sor.u32 %s66_s25, %s65_s24 }
   0xd   : > { %p68_p5 = scmp.eq.s32.totalorder %s67_s26, 0 }
   0xf   : > { %s1665_s28 = scalar_select %p68_p5, %s1566_s16, %s70_s27  }
  0x12   : > { %200 = sbr.rel (!%p79_p3) target bundleno = 57 (0x39), region = 24  ;;  %s202_s29 = sand.u32 (%p79_p3), 1, %s1566_s16  }
  0x13   : > { %s1288_s30 = sshll.u32 (%p79_p3), %s1582_s20, 1  ;;  %s1287_s5 = sshll.u32 (%p79_p3), %s202_s29, 9 }
  0x14   : > { %s1289_s6 = sshll.u32 (%p79_p3), %s1578_s19, 8  ;;  %s1679_s12 = scalar_lea.vmem (%p79_p3), [#allocation3], %s1287_s5 }
  0x15   : > { %s207_s7 = sadd.s32 (%p79_p3), %s1289_s6, %s1288_s30 }
  0x16   : > { %s1290_s8 = sshll.u32 (%p79_p3), %s207_s7, 2 }
  0x17   : > { %s1674_s11 = scalar_lea.vmem (%p79_p3), %s1933_s1, %s1290_s8 }
  0x18   : > { %v363_v0 = vld [vmem:[%s1674_s11] sm:$0xff] (%p79_p3)  ;;  %v365_v1 = vld [vmem:[%s1674_s11 + $0x10] sm:$0xff] (%p79_p3) }
  0x19   : > { %v367_v2 = vld [vmem:[%s1674_s11 + $0x20] sm:$0xff]  ;;  %364 = vst [vmem:[%s1679_s12] sm:$0xff] %v363_v0  ;;  %366 = vst [vmem:[%s1679_s12 + $0x8] sm:$0xff] %v365_v1  ;;  %v369_v3 = vld [vmem:[%s1674_s11 + $0x30] sm:$0xff] }
  0x1a   : > { %368 = vst [vmem:[%s1679_s12 + $0x10] sm:$0xff] %v367_v2  ;;  %v371_v4 = vld [vmem:[%s1674_s11 + $0x40] sm:$0xff]  ;;  %v373_v5 = vld [vmem:[%s1674_s11 + $0x50] sm:$0xff]  ;;  %370 = vst [vmem:[%s1679_s12 + $0x18] sm:$0xff] %v369_v3 }
  0x1b   : > { %372 = vst [vmem:[%s1679_s12 + $0x20] sm:$0xff] %v371_v4  ;;  %374 = vst [vmem:[%s1679_s12 + $0x28] sm:$0xff] %v373_v5  ;;  %v375_v6 = vld [vmem:[%s1674_s11 + $0x60] sm:$0xff]  ;;  %v377_v7 = vld [vmem:[%s1674_s11 + $0x70] sm:$0xff] }
  0x1c   : > { %v379_v8 = vld [vmem:[%s1674_s11 + $0x80] sm:$0xff]  ;;  %376 = vst [vmem:[%s1679_s12 + $0x30] sm:$0xff] %v375_v6  ;;  %378 = vst [vmem:[%s1679_s12 + $0x38] sm:$0xff] %v377_v7  ;;  %v381_v9 = vld [vmem:[%s1674_s11 + $0x90] sm:$0xff] }
  0x1d   : > { %380 = vst [vmem:[%s1679_s12 + $0x40] sm:$0xff] %v379_v8  ;;  %v383_v10 = vld [vmem:[%s1674_s11 + $0xa0] sm:$0xff]  ;;  %v385_v11 = vld [vmem:[%s1674_s11 + $0xb0] sm:$0xff]  ;;  %382 = vst [vmem:[%s1679_s12 + $0x48] sm:$0xff] %v381_v9 }
  0x1e   : > { %384 = vst [vmem:[%s1679_s12 + $0x50] sm:$0xff] %v383_v10  ;;  %386 = vst [vmem:[%s1679_s12 + $0x58] sm:$0xff] %v385_v11  ;;  %v387_v12 = vld [vmem:[%s1674_s11 + $0xc0] sm:$0xff]  ;;  %v389_v13 = vld [vmem:[%s1674_s11 + $0xd0] sm:$0xff] }
  0x1f   : > { %v391_v14 = vld [vmem:[%s1674_s11 + $0xe0] sm:$0xff]  ;;  %388 = vst [vmem:[%s1679_s12 + $0x60] sm:$0xff] %v387_v12  ;;  %390 = vst [vmem:[%s1679_s12 + $0x68] sm:$0xff] %v389_v13  ;;  %v393_v15 = vld [vmem:[%s1674_s11 + $0xf0] sm:$0xff] }
  0x20   : > { %392 = vst [vmem:[%s1679_s12 + $0x70] sm:$0xff] %v391_v14  ;;  %v395_v16 = vld [vmem:[%s1674_s11 + $0x100] sm:$0xff]  ;;  %v397_v17 = vld [vmem:[%s1674_s11 + $0x110] sm:$0xff]  ;;  %394 = vst [vmem:[%s1679_s12 + $0x78] sm:$0xff] %v393_v15 }
  0x21   : > { %396 = vst [vmem:[%s1679_s12 + $0x80] sm:$0xff] %v395_v16  ;;  %398 = vst [vmem:[%s1679_s12 + $0x88] sm:$0xff] %v397_v17  ;;  %v399_v18 = vld [vmem:[%s1674_s11 + $0x120] sm:$0xff]  ;;  %v401_v19 = vld [vmem:[%s1674_s11 + $0x130] sm:$0xff] }
  0x22   : > { %v403_v20 = vld [vmem:[%s1674_s11 + $0x140] sm:$0xff]  ;;  %400 = vst [vmem:[%s1679_s12 + $0x90] sm:$0xff] %v399_v18  ;;  %402 = vst [vmem:[%s1679_s12 + $0x98] sm:$0xff] %v401_v19  ;;  %v405_v21 = vld [vmem:[%s1674_s11 + $0x150] sm:$0xff] }
  0x23   : > { %404 = vst [vmem:[%s1679_s12 + $0xa0] sm:$0xff] %v403_v20  ;;  %v407_v22 = vld [vmem:[%s1674_s11 + $0x160] sm:$0xff]  ;;  %v409_v23 = vld [vmem:[%s1674_s11 + $0x170] sm:$0xff]  ;;  %406 = vst [vmem:[%s1679_s12 + $0xa8] sm:$0xff] %v405_v21 }
  0x24   : > { %408 = vst [vmem:[%s1679_s12 + $0xb0] sm:$0xff] %v407_v22  ;;  %410 = vst [vmem:[%s1679_s12 + $0xb8] sm:$0xff] %v409_v23  ;;  %v411_v24 = vld [vmem:[%s1674_s11 + $0x180] sm:$0xff]  ;;  %v413_v25 = vld [vmem:[%s1674_s11 + $0x190] sm:$0xff] }
  0x25   : > { %v415_v26 = vld [vmem:[%s1674_s11 + $0x1a0] sm:$0xff]  ;;  %412 = vst [vmem:[%s1679_s12 + $0xc0] sm:$0xff] %v411_v24  ;;  %414 = vst [vmem:[%s1679_s12 + $0xc8] sm:$0xff] %v413_v25  ;;  %v417_v27 = vld [vmem:[%s1674_s11 + $0x1b0] sm:$0xff] }
  0x26   : > { %416 = vst [vmem:[%s1679_s12 + $0xd0] sm:$0xff] %v415_v26  ;;  %v419_v28 = vld [vmem:[%s1674_s11 + $0x1c0] sm:$0xff]  ;;  %v421_v29 = vld [vmem:[%s1674_s11 + $0x1d0] sm:$0xff]  ;;  %418 = vst [vmem:[%s1679_s12 + $0xd8] sm:$0xff] %v417_v27 }
  0x27   : > { %420 = vst [vmem:[%s1679_s12 + $0xe0] sm:$0xff] %v419_v28  ;;  %422 = vst [vmem:[%s1679_s12 + $0xe8] sm:$0xff] %v421_v29  ;;  %v423_v30 = vld [vmem:[%s1674_s11 + $0x1e0] sm:$0xff]  ;;  %v425_v31 = vld [vmem:[%s1674_s11 + $0x1f0] sm:$0xff] }
  0x28   : > { %v427_v32 = vld [vmem:[%s1674_s11 + $0x200] sm:$0xff]  ;;  %424 = vst [vmem:[%s1679_s12 + $0xf0] sm:$0xff] %v423_v30  ;;  %426 = vst [vmem:[%s1679_s12 + $0xf8] sm:$0xff] %v425_v31  ;;  %v429_v33 = vld [vmem:[%s1674_s11 + $0x210] sm:$0xff] }
  0x29   : > { %428 = vst [vmem:[%s1679_s12 + $0x100] sm:$0xff] %v427_v32  ;;  %v431_v34 = vld [vmem:[%s1674_s11 + $0x220] sm:$0xff]  ;;  %v433_v35 = vld [vmem:[%s1674_s11 + $0x230] sm:$0xff]  ;;  %430 = vst [vmem:[%s1679_s12 + $0x108] sm:$0xff] %v429_v33 }
  0x2a   : > { %432 = vst [vmem:[%s1679_s12 + $0x110] sm:$0xff] %v431_v34  ;;  %434 = vst [vmem:[%s1679_s12 + $0x118] sm:$0xff] %v433_v35  ;;  %v435_v36 = vld [vmem:[%s1674_s11 + $0x240] sm:$0xff]  ;;  %v437_v37 = vld [vmem:[%s1674_s11 + $0x250] sm:$0xff] }
  0x2b   : > { %v439_v38 = vld [vmem:[%s1674_s11 + $0x260] sm:$0xff]  ;;  %436 = vst [vmem:[%s1679_s12 + $0x120] sm:$0xff] %v435_v36  ;;  %438 = vst [vmem:[%s1679_s12 + $0x128] sm:$0xff] %v437_v37  ;;  %v441_v39 = vld [vmem:[%s1674_s11 + $0x270] sm:$0xff] }
  0x2c   : > { %440 = vst [vmem:[%s1679_s12 + $0x130] sm:$0xff] %v439_v38  ;;  %v443_v40 = vld [vmem:[%s1674_s11 + $0x280] sm:$0xff]  ;;  %v445_v41 = vld [vmem:[%s1674_s11 + $0x290] sm:$0xff]  ;;  %442 = vst [vmem:[%s1679_s12 + $0x138] sm:$0xff] %v441_v39 }
  0x2d   : > { %444 = vst [vmem:[%s1679_s12 + $0x140] sm:$0xff] %v443_v40  ;;  %446 = vst [vmem:[%s1679_s12 + $0x148] sm:$0xff] %v445_v41  ;;  %v447_v42 = vld [vmem:[%s1674_s11 + $0x2a0] sm:$0xff]  ;;  %v449_v43 = vld [vmem:[%s1674_s11 + $0x2b0] sm:$0xff] }
  0x2e   : > { %v451_v44 = vld [vmem:[%s1674_s11 + $0x2c0] sm:$0xff]  ;;  %448 = vst [vmem:[%s1679_s12 + $0x150] sm:$0xff] %v447_v42  ;;  %450 = vst [vmem:[%s1679_s12 + $0x158] sm:$0xff] %v449_v43  ;;  %v453_v45 = vld [vmem:[%s1674_s11 + $0x2d0] sm:$0xff] }
  0x2f   : > { %452 = vst [vmem:[%s1679_s12 + $0x160] sm:$0xff] %v451_v44  ;;  %v455_v46 = vld [vmem:[%s1674_s11 + $0x2e0] sm:$0xff]  ;;  %v457_v47 = vld [vmem:[%s1674_s11 + $0x2f0] sm:$0xff]  ;;  %454 = vst [vmem:[%s1679_s12 + $0x168] sm:$0xff] %v453_v45 }
  0x30   : > { %456 = vst [vmem:[%s1679_s12 + $0x170] sm:$0xff] %v455_v46  ;;  %458 = vst [vmem:[%s1679_s12 + $0x178] sm:$0xff] %v457_v47  ;;  %v459_v48 = vld [vmem:[%s1674_s11 + $0x300] sm:$0xff]  ;;  %v461_v49 = vld [vmem:[%s1674_s11 + $0x310] sm:$0xff] }
  0x31   : > { %v463_v50 = vld [vmem:[%s1674_s11 + $0x320] sm:$0xff]  ;;  %460 = vst [vmem:[%s1679_s12 + $0x180] sm:$0xff] %v459_v48  ;;  %462 = vst [vmem:[%s1679_s12 + $0x188] sm:$0xff] %v461_v49  ;;  %v465_v51 = vld [vmem:[%s1674_s11 + $0x330] sm:$0xff] }
  0x32   : > { %464 = vst [vmem:[%s1679_s12 + $0x190] sm:$0xff] %v463_v50  ;;  %v467_v52 = vld [vmem:[%s1674_s11 + $0x340] sm:$0xff]  ;;  %v469_v53 = vld [vmem:[%s1674_s11 + $0x350] sm:$0xff]  ;;  %466 = vst [vmem:[%s1679_s12 + $0x198] sm:$0xff] %v465_v51 }
  0x33   : > { %468 = vst [vmem:[%s1679_s12 + $0x1a0] sm:$0xff] %v467_v52  ;;  %470 = vst [vmem:[%s1679_s12 + $0x1a8] sm:$0xff] %v469_v53  ;;  %v471_v54 = vld [vmem:[%s1674_s11 + $0x360] sm:$0xff]  ;;  %v473_v55 = vld [vmem:[%s1674_s11 + $0x370] sm:$0xff] }
  0x34   : > { %v475_v56 = vld [vmem:[%s1674_s11 + $0x380] sm:$0xff]  ;;  %472 = vst [vmem:[%s1679_s12 + $0x1b0] sm:$0xff] %v471_v54  ;;  %474 = vst [vmem:[%s1679_s12 + $0x1b8] sm:$0xff] %v473_v55  ;;  %v477_v57 = vld [vmem:[%s1674_s11 + $0x390] sm:$0xff] }
  0x35   : > { %476 = vst [vmem:[%s1679_s12 + $0x1c0] sm:$0xff] %v475_v56  ;;  %v479_v58 = vld [vmem:[%s1674_s11 + $0x3a0] sm:$0xff]  ;;  %v481_v59 = vld [vmem:[%s1674_s11 + $0x3b0] sm:$0xff]  ;;  %478 = vst [vmem:[%s1679_s12 + $0x1c8] sm:$0xff] %v477_v57 }
  0x36   : > { %480 = vst [vmem:[%s1679_s12 + $0x1d0] sm:$0xff] %v479_v58  ;;  %482 = vst [vmem:[%s1679_s12 + $0x1d8] sm:$0xff] %v481_v59  ;;  %v483_v60 = vld [vmem:[%s1674_s11 + $0x3c0] sm:$0xff]  ;;  %v485_v61 = vld [vmem:[%s1674_s11 + $0x3d0] sm:$0xff] }
  0x37   : > { %v487_v62 = vld [vmem:[%s1674_s11 + $0x3e0] sm:$0xff]  ;;  %484 = vst [vmem:[%s1679_s12 + $0x1e0] sm:$0xff] %v483_v60  ;;  %486 = vst [vmem:[%s1679_s12 + $0x1e8] sm:$0xff] %v485_v61  ;;  %v489_v63 = vld [vmem:[%s1674_s11 + $0x3f0] sm:$0xff] }
  0x38   : > { %488 = vst [vmem:[%s1679_s12 + $0x1f0] sm:$0xff] %v487_v62  ;;  %490 = vst [vmem:[%s1679_s12 + $0x1f8] sm:$0xff] %v489_v63 }
  0x39 PF: > { %p1291_p7 = scmp.ge.s32.totalorder %s1586_s21, 1  ;;  %p516_p8 = scmp.lt.s32.totalorder %s1586_s21, 19 }
  0x3b   : > { %p517_p9 = pnand %p1291_p7, %p516_p8 }
  0x3c   : > { %s523_s13 = sand.u32 (!%p517_p9), 1, %s1562_s15   ;;  %p574_p10 = scmp.lt.s32.totalorder (!%p517_p9), %s1570_s17, 8 }
  0x3d   : > { %520 = sbr.rel (%p517_p9) target bundleno = 376 (0x178), region = 70  ;;  %s1292_s14 = sshll.u32 (!%p517_p9), %s523_s13, 9 }
  0x3e   : > { %s1295_s24 = sshll.u32 (!%p517_p9), %s1574_s18, 1  ;;  %s1834_s13 = scalar_lea.vmem (!%p517_p9), [#allocation3], %s1292_s14 }
  0x3f   : > { %p585_p11 = scmp.lt.s32.totalorder (!%p517_p9), %s1295_s24, 3  ;;  %p1300_p12 = scmp.ne.s32.totalorder (!%p517_p9), %s1570_s17, 0 }
  0x44   : > { %s575_s25 = scalar_select %p574_p10, %s1570_s17, 8 }
  0x45   : > { %s1950_s24 = smov (!%p585_p11, %s1295_s24), 3  ;;  %612 = sbr.rel (%p1300_p12) target bundleno = 76 (0x4c), region = 78 }
  0x46   : > { %s1373_s26 = sshll.u32 %s575_s25, 4  ;;  %s587_s7 = scalar_lea.vmem %s1934_s2, %s1950_s24  ;;  %v1588_v0 = vmov (!%p1300_p12), 0.0  }
  0x47   : > { %s1817_s30 = scalar_lea.vmem %s1932_s0, %s1373_s26  ;;  %s1297_s15 = sshll.u32 %s1950_s24, 2  ;;  %613 = vst [vmem:[#allocation2] sm:$0xff] (!%p1300_p12), %v1588_v0  ;;  %614 = vst [vmem:[#allocation2 + $0x8] sm:$0xff] (!%p1300_p12), %v1588_v0 }
  0x48   : > { %s1827_s18 = scalar_lea.vmem %s1935_s3, %s1297_s15  ;;  %s1832_s12 = scalar_lea.vmem %s1936_s4, %s1297_s15 }
  0x4c PF: > { %v1432_v1 = vld [vmem:[%s1834_s13 + $0x4] ss:$8 sps:$4 sm:$0xff]   ;;  %v1436_v3 = vld [vmem:[%s1834_s13] ss:$8 sps:$4 sm:$0xff]   ;;  %v1438_v5 = vld [vmem:[%s1834_s13 + $0x14] ss:$8 sps:$4 sm:$0xff]  }
  0x4d   : > { %v1434_v2 = vld [vmem:[%s1834_s13 + $0x104] ss:$8 sps:$4 sm:$0xff]   ;;  %1017 = vmatprep.subr.bf16.mxu0 %v1432_v1  ;;  %v1437_v4 = vld [vmem:[%s1834_s13 + $0x100] ss:$8 sps:$4 sm:$0xff]   ;;  %v1440_v6 = vld [vmem:[%s1834_s13 + $0x114] ss:$8 sps:$4 sm:$0xff]  }
  0x4e   : > { %1058 = vmatprep.subr.bf16.mxu1 %v1434_v2  ;;  %1018 = vmatpush1.bf16.msra.mxu0 %v1436_v3  ;;  %v1442_v7 = vld [vmem:[%s1834_s13 + $0x10] ss:$8 sps:$4 sm:$0xff]   ;;  %v1444_v9 = vld [vmem:[%s1834_s13 + $0x24] ss:$8 sps:$4 sm:$0xff]   ;;  %v1448_v11 = vld [vmem:[%s1834_s13 + $0x20] ss:$8 sps:$4 sm:$0xff]  }
  0x4f   : > { %1059 = vmatpush1.bf16.msra.mxu1 %v1437_v4  ;;  %1019 = vmatprep.subr.bf16.mxu0 %v1438_v5  ;;  %v1443_v8 = vld [vmem:[%s1834_s13 + $0x110] ss:$8 sps:$4 sm:$0xff]   ;;  %v1446_v10 = vld [vmem:[%s1834_s13 + $0x124] ss:$8 sps:$4 sm:$0xff]   ;;  %v1449_v12 = vld [vmem:[%s1834_s13 + $0x120] ss:$8 sps:$4 sm:$0xff]  }
  0x50   : > { %1060 = vmatprep.subr.bf16.mxu1 %v1440_v6  ;;  %v1450_v13 = vld [vmem:[%s1834_s13 + $0x34] ss:$8 sps:$4 sm:$0xff]   ;;  %v1454_v15 = vld [vmem:[%s1834_s13 + $0x30] ss:$8 sps:$4 sm:$0xff]   ;;  %v1456_v17 = vld [vmem:[%s1834_s13 + $0x44] ss:$8 sps:$4 sm:$0xff]  }
  0x51   : > { %v1452_v14 = vld [vmem:[%s1834_s13 + $0x134] ss:$8 sps:$4 sm:$0xff]   ;;  %v1455_v16 = vld [vmem:[%s1834_s13 + $0x130] ss:$8 sps:$4 sm:$0xff]   ;;  %v1458_v18 = vld [vmem:[%s1834_s13 + $0x144] ss:$8 sps:$4 sm:$0xff]  }
  0x52   : > { %1020 = vmatpush1.bf16.msra.mxu0 %v1442_v7  ;;  %v1460_v19 = vld [vmem:[%s1834_s13 + $0x40] ss:$8 sps:$4 sm:$0xff]   ;;  %v1462_v21 = vld [vmem:[%s1834_s13 + $0x54] ss:$8 sps:$4 sm:$0xff]   ;;  %v1466_v23 = vld [vmem:[%s1834_s13 + $0x50] ss:$8 sps:$4 sm:$0xff]  }
  0x53   : > { %1061 = vmatpush1.bf16.msra.mxu1 %v1443_v8  ;;  %1021 = vmatprep.subr.bf16.mxu0 %v1444_v9  ;;  %v1461_v20 = vld [vmem:[%s1834_s13 + $0x140] ss:$8 sps:$4 sm:$0xff]   ;;  %v1464_v22 = vld [vmem:[%s1834_s13 + $0x154] ss:$8 sps:$4 sm:$0xff]   ;;  %v1467_v24 = vld [vmem:[%s1834_s13 + $0x150] ss:$8 sps:$4 sm:$0xff]  }
  0x54   : > { %1062 = vmatprep.subr.bf16.mxu1 %v1446_v10  ;;  %v1468_v25 = vld [vmem:[%s1834_s13 + $0x64] ss:$8 sps:$4 sm:$0xff]   ;;  %v1472_v27 = vld [vmem:[%s1834_s13 + $0x60] ss:$8 sps:$4 sm:$0xff]   ;;  %v1474_v29 = vld [vmem:[%s1834_s13 + $0x74] ss:$8 sps:$4 sm:$0xff]  }
  0x55   : > { %v1470_v26 = vld [vmem:[%s1834_s13 + $0x164] ss:$8 sps:$4 sm:$0xff]   ;;  %v1473_v28 = vld [vmem:[%s1834_s13 + $0x160] ss:$8 sps:$4 sm:$0xff]   ;;  %v1476_v30 = vld [vmem:[%s1834_s13 + $0x174] ss:$8 sps:$4 sm:$0xff]  }
  0x56   : > { %1022 = vmatpush1.bf16.msra.mxu0 %v1448_v11  ;;  %v1478_v31 = vld [vmem:[%s1834_s13 + $0x70] ss:$8 sps:$4 sm:$0xff]   ;;  %v1480_v33 = vld [vmem:[%s1834_s13 + $0x84] ss:$8 sps:$4 sm:$0xff]   ;;  %v1484_v35 = vld [vmem:[%s1834_s13 + $0x80] ss:$8 sps:$4 sm:$0xff]  }
  0x57   : > { %1063 = vmatpush1.bf16.msra.mxu1 %v1449_v12  ;;  %1023 = vmatprep.subr.bf16.mxu0 %v1450_v13  ;;  %v1479_v32 = vld [vmem:[%s1834_s13 + $0x170] ss:$8 sps:$4 sm:$0xff]   ;;  %v1482_v34 = vld [vmem:[%s1834_s13 + $0x184] ss:$8 sps:$4 sm:$0xff]   ;;  %v1485_v36 = vld [vmem:[%s1834_s13 + $0x180] ss:$8 sps:$4 sm:$0xff]  }
  0x58   : > { %1064 = vmatprep.subr.bf16.mxu1 %v1452_v14  ;;  %v1486_v37 = vld [vmem:[%s1834_s13 + $0x94] ss:$8 sps:$4 sm:$0xff]   ;;  %v1490_v39 = vld [vmem:[%s1834_s13 + $0x90] ss:$8 sps:$4 sm:$0xff]   ;;  %v1492_v41 = vld [vmem:[%s1834_s13 + $0xa4] ss:$8 sps:$4 sm:$0xff]  }
  0x59   : > { %v1488_v38 = vld [vmem:[%s1834_s13 + $0x194] ss:$8 sps:$4 sm:$0xff]   ;;  %v1491_v40 = vld [vmem:[%s1834_s13 + $0x190] ss:$8 sps:$4 sm:$0xff]   ;;  %v1494_v42 = vld [vmem:[%s1834_s13 + $0x1a4] ss:$8 sps:$4 sm:$0xff]  }
  0x5a   : > { %1024 = vmatpush1.bf16.msra.mxu0 %v1454_v15  ;;  %v1496_v43 = vld [vmem:[%s1834_s13 + $0xa0] ss:$8 sps:$4 sm:$0xff]   ;;  %v1498_v45 = vld [vmem:[%s1834_s13 + $0xb4] ss:$8 sps:$4 sm:$0xff]   ;;  %v1502_v50 = vld [vmem:[%s1834_s13 + $0xb0] ss:$8 sps:$4 sm:$0xff]  }
  0x5b   : > { %1065 = vmatpush1.bf16.msra.mxu1 %v1455_v16  ;;  %1025 = vmatprep.subr.bf16.mxu0 %v1456_v17  ;;  %v1497_v44 = vld [vmem:[%s1834_s13 + $0x1a0] ss:$8 sps:$4 sm:$0xff]   ;;  %v1500_v46 = vld [vmem:[%s1834_s13 + $0x1b4] ss:$8 sps:$4 sm:$0xff]   ;;  %v1503_v51 = vld [vmem:[%s1834_s13 + $0x1b0] ss:$8 sps:$4 sm:$0xff]  }
  0x5c   : > { %1066 = vmatprep.subr.bf16.mxu1 %v1458_v18  ;;  %v617_v47 = vld [vmem:[%s1817_s30] sm:$0xff]  ;;  %v618_v49 = vld [vmem:[%s1817_s30 + $0x8] sm:$0xff]  ;;  %v1504_v53 = vld [vmem:[%s1834_s13 + $0xc4] ss:$8 sps:$4 sm:$0xff]   ;;  %p1369_p13 = scmp.ne.s32.totalorder %s1570_s17, 8 }
  0x5d   : > { %v1302_v48 = vcombine.high %v617_v47, %v617_v47  ;;  %v1304_v52 = vcombine.high %v618_v49, %v618_v49  ;;  %v1506_v54 = vld [vmem:[%s1834_s13 + $0x1c4] ss:$8 sps:$4 sm:$0xff]   ;;  %v1508_v55 = vld [vmem:[%s1834_s13 + $0xc0] ss:$8 sps:$4 sm:$0xff]   ;;  %v1510_v57 = vld [vmem:[%s1834_s13 + $0xd4] ss:$8 sps:$4 sm:$0xff]   ;;  %v1301_v5 = vcombine.low %v617_v47, %v617_v47  ;;  %v1303_v6 = vcombine.low %v618_v49, %v618_v49 }
  0x5e   : > { %1026 = vmatpush1.bf16.msra.mxu0 %v1460_v19  ;;  %v1509_v56 = vld [vmem:[%s1834_s13 + $0x1c0] ss:$8 sps:$4 sm:$0xff]   ;;  %v1512_v58 = vld [vmem:[%s1834_s13 + $0x1d4] ss:$8 sps:$4 sm:$0xff]   ;;  %v1514_v59 = vld [vmem:[%s1834_s13 + $0xd0] ss:$8 sps:$4 sm:$0xff]  }
  0x5f   : > { %1067 = vmatpush1.bf16.msra.mxu1 %v1461_v20  ;;  %1027 = vmatprep.subr.bf16.mxu0 %v1462_v21  ;;  %v1515_v60 = vld [vmem:[%s1834_s13 + $0x1d0] ss:$8 sps:$4 sm:$0xff]   ;;  %v1516_v61 = vld [vmem:[%s1834_s13 + $0xe4] ss:$8 sps:$4 sm:$0xff]   ;;  %v1520_v63 = vld [vmem:[%s1834_s13 + $0xe0] ss:$8 sps:$4 sm:$0xff]   ;;  %v1111_v21 = vlaneseq (!%p1369_p13) }
  0x60   : > { %1068 = vmatprep.subr.bf16.mxu1 %v1464_v22  ;;  %1049 = vmatprep.mubr.bf16.mxu0 %v1302_v48  ;;  %v1518_v62 = vld [vmem:[%s1834_s13 + $0x1e4] ss:$8 sps:$4 sm:$0xff]   ;;  %v1521_v0 = vld [vmem:[%s1834_s13 + $0x1e0] ss:$8 sps:$4 sm:$0xff]   ;;  %v1522_v1 = vld [vmem:[%s1834_s13 + $0xf4] ss:$8 sps:$4 sm:$0xff]  }
  0x61   : > { %1090 = vmatprep.mubr.bf16.mxu1 %v1304_v52  ;;  %v1524_v2 = vld [vmem:[%s1834_s13 + $0x1f4] ss:$8 sps:$4 sm:$0xff]   ;;  %v1526_v3 = vld [vmem:[%s1834_s13 + $0xf0] ss:$8 sps:$4 sm:$0xff]   ;;  %v1112_v22 = vshrl.u32 (!%p1369_p13), %v1111_v21, 7 }
  0x62   : > { %1028 = vmatpush1.bf16.msra.mxu0 %v1466_v23  ;;  %v1527_v4 = vld [vmem:[%s1834_s13 + $0x1f0] ss:$8 sps:$4 sm:$0xff]  }
  0x63   : > { %1069 = vmatpush1.bf16.msra.mxu1 %v1467_v24  ;;  %1029 = vmatprep.subr.bf16.mxu0 %v1468_v25  ;;  %v615_v8 = vld [vmem:[#allocation2] sm:$0xff]  ;;  %v616_v12 = vld [vmem:[#allocation2 + $0x8] sm:$0xff]  ;;  %v1113_v25 = vsub.s32 (!%p1369_p13), 0, %v1112_v22 }
  0x64   : > { %1070 = vmatprep.subr.bf16.mxu1 %v1470_v26  ;;  %v1109_v23 = vld [vmem:[%s587_s7] sm:$0x3] (!%p1369_p13)  ;;  %v1117_v26 = vsub.s32 (!%p1369_p13), 1, %v1112_v22 }
  0x65   : > { %v1123_v24 = vld [vmem:[%s1827_s18] sm:$0xff] (!%p1369_p13) }
  0x66   : > { %1030 = vmatpush1.bf16.msra.mxu0 %v1472_v27 }
  0x67   : > { %1071 = vmatpush1.bf16.msra.mxu1 %v1473_v28  ;;  %1031 = vmatprep.subr.bf16.mxu0 %v1474_v29  ;;  %v1114_v29 = vrot.slane (!%p1369_p13), %v1109_v23, %v1113_v25 }
  0x68   : > { %1072 = vmatprep.subr.bf16.mxu1 %v1476_v30  ;;  %v1118_v30 = vrot.slane (!%p1369_p13), %v1109_v23, %v1117_v26 }
  0x6a   : > { %1032 = vmatpush1.bf16.msra.mxu0 %v1478_v31  ;;  %v1124_v31 = vunpack.c.l.bf16 (!%p1369_p13), %v1123_v24 }
  0x6b   : > { %1073 = vmatpush1.bf16.msra.mxu1 %v1479_v32  ;;  %1033 = vmatprep.subr.bf16.mxu0 %v1480_v33  ;;  %v1125_v32 = vunpack.c.h.bf16 (!%p1369_p13), %v1123_v24 }
  0x6c   : > { %1074 = vmatprep.subr.bf16.mxu1 %v1482_v34 }
  0x6e   : > { %1034 = vmatpush1.bf16.msra.mxu0 %v1484_v35 }
  0x6f   : > { %1075 = vmatpush1.bf16.msra.mxu1 %v1485_v36  ;;  %1035 = vmatprep.subr.bf16.mxu0 %v1486_v37 }
  0x70   : > { %1076 = vmatprep.subr.bf16.mxu1 %v1488_v38 }
  0x72   : > { %1036 = vmatpush1.bf16.msra.mxu0 %v1490_v39 }
  0x73   : > { %1077 = vmatpush1.bf16.msra.mxu1 %v1491_v40  ;;  %1037 = vmatprep.subr.bf16.mxu0 %v1492_v41 }
  0x74   : > { %1078 = vmatprep.subr.bf16.mxu1 %v1494_v42 }
  0x76   : > { %1038 = vmatpush1.bf16.msra.mxu0 %v1496_v43 }
  0x77   : > { %1079 = vmatpush1.bf16.msra.mxu1 %v1497_v44  ;;  %1039 = vmatprep.subr.bf16.mxu0 %v1498_v45 }
  0x78   : > { %1080 = vmatprep.subr.bf16.mxu1 %v1500_v46 }
  0x7a   : > { %1040 = vmatpush1.bf16.msra.mxu0 %v1502_v50 }
  0x7b   : > { %1081 = vmatpush1.bf16.msra.mxu1 %v1503_v51  ;;  %1041 = vmatprep.subr.bf16.mxu0 %v1504_v53 }
  0x7c   : > { %1082 = vmatprep.subr.bf16.mxu1 %v1506_v54 }
  0x7e   : > { %1042 = vmatpush1.bf16.msra.mxu0 %v1508_v55 }
  0x7f   : > { %1083 = vmatpush1.bf16.msra.mxu1 %v1509_v56  ;;  %1043 = vmatprep.subr.bf16.mxu0 %v1510_v57 }
  0x80   : > { %1084 = vmatprep.subr.bf16.mxu1 %v1512_v58 }
  0x82   : > { %1044 = vmatpush1.bf16.msra.mxu0 %v1514_v59 }
  0x83   : > { %1085 = vmatpush1.bf16.msra.mxu1 %v1515_v60  ;;  %1045 = vmatprep.subr.bf16.mxu0 %v1516_v61 }
  0x84   : > { %1086 = vmatprep.subr.bf16.mxu1 %v1518_v62 }
  0x86   : > { %1046 = vmatpush1.bf16.msra.mxu0 %v1520_v63 }
  0x87   : > { %1087 = vmatpush1.bf16.msra.mxu1 %v1521_v0  ;;  %1047 = vmatprep.subr.bf16.mxu0 %v1522_v1 }
  0x88   : > { %1088 = vmatprep.subr.bf16.mxu1 %v1524_v2 }
  0x8a   : > { %1048 = vmatpush1.bf16.msra.mxu0 %v1526_v3 }
  0x8b   : > { %1089 = vmatpush1.bf16.msra.mxu1 %v1527_v4 }
  0x8d   : > { %1050 = vmatmul.mubr.bf16.vlgmr.msra.gmra.mrb[0].mxu0 %v1301_v5 }
  0x8e   : > { %1091 = vmatmul.mubr.bf16.vlgmr.msra.gmra.mrb[0].mxu1 %v1303_v6 }
 0x160   : > { %v1051_v7 = vpop.f32.mrb[0].mxu0 }
 0x161   : > { %v1092_v9 = vpop.f32.mrb[0].mxu1  ;;  %v1053_v11 = vpop.f32.mrb[1].mxu0  ;;  %1106 = sbr.rel (%p1369_p13) target bundleno = 376 (0x178), region = 82 }
 0x162   : > { %v1093_v10 = vadd.f32 %v1092_v9, %v1051_v7  ;;  %v1094_v13 = vpop.f32.mrb[1].mxu1  ;;  %v1055_v15 = vpop.f32.mrb[2].mxu0 }
 0x163   : > { %v1095_v14 = vadd.f32 %v1094_v13, %v1053_v11  ;;  %v1096_v16 = vpop.f32.mrb[2].mxu1  ;;  %v1056_v18 = vpop.f32.mrb[3].mxu0 }
 0x164   : > { %v1099_v17 = vadd.f32 %v1093_v10, %v615_v8  ;;  %v1097_v19 = vpop.f32.mrb[3].mxu1 }
 0x165   : > { %v1100_v20 = vadd.f32 %v1095_v14, %v616_v12 }
 0x166   : > { %1101 = vst [vmem:[#allocation2] sm:$0xff] %v1099_v17 }
 0x167   : > { %1102 = vst [vmem:[#allocation2 + $0x8] sm:$0xff] %v1100_v20 }
 0x16d   : > { %v1107_v27 = vld [vmem:[#allocation2] sm:$0xff] }
 0x16e   : > { %v1108_v28 = vld [vmem:[#allocation2 + $0x8] sm:$0xff]  ;;  %v1121_v33 = vadd.f32 %v1114_v29, %v1107_v27 }
 0x16f   : > { %v1122_v34 = vadd.f32 %v1118_v30, %v1108_v28 }
 0x170   : > { %v1126_v35 = vadd.f32 %v1124_v31, %v1121_v33 }
 0x171   : > { %v1127_v36 = vadd.f32 %v1125_v32, %v1122_v34 }
 0x172   : > { %v1128_v37 = vmax.f32 %v1126_v35, 0.0 }
 0x173   : > { %v1129_v38 = vmax.f32 %v1127_v36, 0.0 }
 0x175   : > { %v1374_v39 = vpack.c.bf16 %v1129_v38, %v1128_v37 }
 0x177   : > { %1138 = vst [vmem:[%s1832_s12] sm:$0xff] %v1374_v39 }
 0x178 PF: > { %s14_s21 = sadd.s32 1, %s1586_s21   ;;  %s1937_s15 = smov %s1566_s16 }
 0x179   : > { %p11_p0 = scmp.ge.s32.totalorder %s14_s21, 20   ;;  %s1938_s16 = smov %s1665_s28 }
 0x17a   : > { %s1939_s17 = smov %s1578_s19  ;;  %s1940_s18 = smov %s1582_s20 }
 0x17b   : > { %s1941_s19 = smov %s1944_s22  ;;  %s1942_s20 = smov %s1948_s23 }
 0x17c   :  { %13 = sbr.rel (!%p11_p0) target bundleno = 4 (0x4), region = 126 }

// kernel: resnet34_forward.72
= control target key start
LH: loop header
LB: loop body
LE: loop exit
PB: predicated region body
PF: predicated region fallthrough
CT: control target
= control target key end

     0   :  { %s1521_s12 = smov 0   ;;  %s1523_s13 = smov 0   ;;  %s1833_s0 = inlined_call_operand.vmem [shape: bf16[9,8,512], index: 0, kind: input, shape index: {}]   ;;  %s1834_s1 = inlined_call_operand.vmem [shape: bf16[9,512,512], index: 1, kind: input, shape index: {}]   ;;  %s1835_s2 = inlined_call_operand.vmem [shape: f32[1,512], index: 2, kind: input, shape index: {}]   ;;  %s1836_s3 = inlined_call_operand.vmem [shape: bf16[8,512], index: 3, kind: output, shape index: {}]  }
   0x1   :  { %s1525_s14 = smov 0   ;;  %s1527_s15 = smov 0  }
   0x2   :  { %s1529_s16 = smov 0   ;;  %s1531_s17 = smov 0  }
   0x3   :  { %s1533_s18 = smov 0  }
   0x4 LB: > { %s25_s19 = sadd.s32 1, %s1490_s16  ;;  %s28_s20 = sadd.s32 1, %s1494_s17  ;;  %s1498_s18 = sphi %s1533_s18, %s13_s18   ;;  %s1494_s17 = sphi %s1531_s17, %s1842_s17   ;;  %s1490_s16 = sphi %s1529_s16, %s1841_s16   ;;  %s1486_s15 = sphi %s1527_s15, %s1840_s15   ;;  %s1482_s14 = sphi %s1525_s14, %s1839_s14   ;;  %s1478_s13 = sphi %s1523_s13, %s1838_s13   ;;  %s1474_s12 = sphi %s1521_s12, %s1837_s12  }
   0x5   : > { %p26_p0 = scmp.ge.s32.totalorder %s25_s19, 9  ;;  %p76_p1 = scmp.ne.s32.totalorder %s1478_s13, %s1474_s12 }
   0x6   : > { %p77_p2 = scmp.eq.s32.totalorder %s1498_s18, 0  ;;  %s69_s24 = sadd.s32 1, %s1478_s13 }
   0x7   : > { %s1844_s19 = smov (%p26_p0, %s25_s19), 0  ;;  %s1846_s20 = smov (!%p26_p0, %s28_s20), %s1494_s17 }
   0x8   : > { %p78_p3 = por %p77_p2, %p76_p1  ;;  %p30_p4 = scmp.ge.s32.totalorder %s1846_s20, 2 }
   0x9   : > { %s64_s21 = ssub.s32 %s1490_s16, %s1844_s19  ;;  %p1200_p6 = scmp.ge.s32.totalorder %s1498_s18, 18 }
   0xa   : > { %s1848_s20 = smov (%p30_p4, %s1846_s20), 0 }
   0xb   : > { %s65_s22 = ssub.s32 %s1494_s17, %s1848_s20  ;;  %156 = sbr.rel (%p1200_p6) target bundleno = 57 (0x39), region = 16 }
   0xc   : > { %s66_s23 = sor.u32 %s65_s22, %s64_s21 }
   0xd   : > { %p67_p5 = scmp.eq.s32.totalorder %s66_s23, 0 }
   0xf   : > { %s1572_s25 = scalar_select %p67_p5, %s1478_s13, %s69_s24  }
  0x12   : > { %171 = sbr.rel (!%p78_p3) target bundleno = 57 (0x39), region = 24  ;;  %s173_s26 = sand.u32 (%p78_p3), 1, %s1478_s13  }
  0x13   : > { %s1202_s27 = sshll.u32 (%p78_p3), %s1494_s17, 1  ;;  %s1201_s28 = sshll.u32 (%p78_p3), %s173_s26, 9 }
  0x14   : > { %s1203_s29 = sshll.u32 (%p78_p3), %s1490_s16, 8  ;;  %s1586_s8 = scalar_lea.vmem (%p78_p3), [#allocation3], %s1201_s28 }
  0x15   : > { %s178_s30 = sadd.s32 (%p78_p3), %s1203_s29, %s1202_s27 }
  0x16   : > { %s1204_s4 = sshll.u32 (%p78_p3), %s178_s30, 2 }
  0x17   : > { %s1581_s7 = scalar_lea.vmem (%p78_p3), %s1834_s1, %s1204_s4 }
  0x18   : > { %v334_v0 = vld [vmem:[%s1581_s7] sm:$0xff] (%p78_p3)  ;;  %v336_v1 = vld [vmem:[%s1581_s7 + $0x10] sm:$0xff] (%p78_p3) }
  0x19   : > { %v338_v2 = vld [vmem:[%s1581_s7 + $0x20] sm:$0xff]  ;;  %335 = vst [vmem:[%s1586_s8] sm:$0xff] %v334_v0  ;;  %337 = vst [vmem:[%s1586_s8 + $0x8] sm:$0xff] %v336_v1  ;;  %v340_v3 = vld [vmem:[%s1581_s7 + $0x30] sm:$0xff] }
  0x1a   : > { %339 = vst [vmem:[%s1586_s8 + $0x10] sm:$0xff] %v338_v2  ;;  %v342_v4 = vld [vmem:[%s1581_s7 + $0x40] sm:$0xff]  ;;  %v344_v5 = vld [vmem:[%s1581_s7 + $0x50] sm:$0xff]  ;;  %341 = vst [vmem:[%s1586_s8 + $0x18] sm:$0xff] %v340_v3 }
  0x1b   : > { %343 = vst [vmem:[%s1586_s8 + $0x20] sm:$0xff] %v342_v4  ;;  %345 = vst [vmem:[%s1586_s8 + $0x28] sm:$0xff] %v344_v5  ;;  %v346_v6 = vld [vmem:[%s1581_s7 + $0x60] sm:$0xff]  ;;  %v348_v7 = vld [vmem:[%s1581_s7 + $0x70] sm:$0xff] }
  0x1c   : > { %v350_v8 = vld [vmem:[%s1581_s7 + $0x80] sm:$0xff]  ;;  %347 = vst [vmem:[%s1586_s8 + $0x30] sm:$0xff] %v346_v6  ;;  %349 = vst [vmem:[%s1586_s8 + $0x38] sm:$0xff] %v348_v7  ;;  %v352_v9 = vld [vmem:[%s1581_s7 + $0x90] sm:$0xff] }
  0x1d   : > { %351 = vst [vmem:[%s1586_s8 + $0x40] sm:$0xff] %v350_v8  ;;  %v354_v10 = vld [vmem:[%s1581_s7 + $0xa0] sm:$0xff]  ;;  %v356_v11 = vld [vmem:[%s1581_s7 + $0xb0] sm:$0xff]  ;;  %353 = vst [vmem:[%s1586_s8 + $0x48] sm:$0xff] %v352_v9 }
  0x1e   : > { %355 = vst [vmem:[%s1586_s8 + $0x50] sm:$0xff] %v354_v10  ;;  %357 = vst [vmem:[%s1586_s8 + $0x58] sm:$0xff] %v356_v11  ;;  %v358_v12 = vld [vmem:[%s1581_s7 + $0xc0] sm:$0xff]  ;;  %v360_v13 = vld [vmem:[%s1581_s7 + $0xd0] sm:$0xff] }
  0x1f   : > { %v362_v14 = vld [vmem:[%s1581_s7 + $0xe0] sm:$0xff]  ;;  %359 = vst [vmem:[%s1586_s8 + $0x60] sm:$0xff] %v358_v12  ;;  %361 = vst [vmem:[%s1586_s8 + $0x68] sm:$0xff] %v360_v13  ;;  %v364_v15 = vld [vmem:[%s1581_s7 + $0xf0] sm:$0xff] }
  0x20   : > { %363 = vst [vmem:[%s1586_s8 + $0x70] sm:$0xff] %v362_v14  ;;  %v366_v16 = vld [vmem:[%s1581_s7 + $0x100] sm:$0xff]  ;;  %v368_v17 = vld [vmem:[%s1581_s7 + $0x110] sm:$0xff]  ;;  %365 = vst [vmem:[%s1586_s8 + $0x78] sm:$0xff] %v364_v15 }
  0x21   : > { %367 = vst [vmem:[%s1586_s8 + $0x80] sm:$0xff] %v366_v16  ;;  %369 = vst [vmem:[%s1586_s8 + $0x88] sm:$0xff] %v368_v17  ;;  %v370_v18 = vld [vmem:[%s1581_s7 + $0x120] sm:$0xff]  ;;  %v372_v19 = vld [vmem:[%s1581_s7 + $0x130] sm:$0xff] }
  0x22   : > { %v374_v20 = vld [vmem:[%s1581_s7 + $0x140] sm:$0xff]  ;;  %371 = vst [vmem:[%s1586_s8 + $0x90] sm:$0xff] %v370_v18  ;;  %373 = vst [vmem:[%s1586_s8 + $0x98] sm:$0xff] %v372_v19  ;;  %v376_v21 = vld [vmem:[%s1581_s7 + $0x150] sm:$0xff] }
  0x23   : > { %375 = vst [vmem:[%s1586_s8 + $0xa0] sm:$0xff] %v374_v20  ;;  %v378_v22 = vld [vmem:[%s1581_s7 + $0x160] sm:$0xff]  ;;  %v380_v23 = vld [vmem:[%s1581_s7 + $0x170] sm:$0xff]  ;;  %377 = vst [vmem:[%s1586_s8 + $0xa8] sm:$0xff] %v376_v21 }
  0x24   : > { %379 = vst [vmem:[%s1586_s8 + $0xb0] sm:$0xff] %v378_v22  ;;  %381 = vst [vmem:[%s1586_s8 + $0xb8] sm:$0xff] %v380_v23  ;;  %v382_v24 = vld [vmem:[%s1581_s7 + $0x180] sm:$0xff]  ;;  %v384_v25 = vld [vmem:[%s1581_s7 + $0x190] sm:$0xff] }
  0x25   : > { %v386_v26 = vld [vmem:[%s1581_s7 + $0x1a0] sm:$0xff]  ;;  %383 = vst [vmem:[%s1586_s8 + $0xc0] sm:$0xff] %v382_v24  ;;  %385 = vst [vmem:[%s1586_s8 + $0xc8] sm:$0xff] %v384_v25  ;;  %v388_v27 = vld [vmem:[%s1581_s7 + $0x1b0] sm:$0xff] }
  0x26   : > { %387 = vst [vmem:[%s1586_s8 + $0xd0] sm:$0xff] %v386_v26  ;;  %v390_v28 = vld [vmem:[%s1581_s7 + $0x1c0] sm:$0xff]  ;;  %v392_v29 = vld [vmem:[%s1581_s7 + $0x1d0] sm:$0xff]  ;;  %389 = vst [vmem:[%s1586_s8 + $0xd8] sm:$0xff] %v388_v27 }
  0x27   : > { %391 = vst [vmem:[%s1586_s8 + $0xe0] sm:$0xff] %v390_v28  ;;  %393 = vst [vmem:[%s1586_s8 + $0xe8] sm:$0xff] %v392_v29  ;;  %v394_v30 = vld [vmem:[%s1581_s7 + $0x1e0] sm:$0xff]  ;;  %v396_v31 = vld [vmem:[%s1581_s7 + $0x1f0] sm:$0xff] }
  0x28   : > { %v398_v32 = vld [vmem:[%s1581_s7 + $0x200] sm:$0xff]  ;;  %395 = vst [vmem:[%s1586_s8 + $0xf0] sm:$0xff] %v394_v30  ;;  %397 = vst [vmem:[%s1586_s8 + $0xf8] sm:$0xff] %v396_v31  ;;  %v400_v33 = vld [vmem:[%s1581_s7 + $0x210] sm:$0xff] }
  0x29   : > { %399 = vst [vmem:[%s1586_s8 + $0x100] sm:$0xff] %v398_v32  ;;  %v402_v34 = vld [vmem:[%s1581_s7 + $0x220] sm:$0xff]  ;;  %v404_v35 = vld [vmem:[%s1581_s7 + $0x230] sm:$0xff]  ;;  %401 = vst [vmem:[%s1586_s8 + $0x108] sm:$0xff] %v400_v33 }
  0x2a   : > { %403 = vst [vmem:[%s1586_s8 + $0x110] sm:$0xff] %v402_v34  ;;  %405 = vst [vmem:[%s1586_s8 + $0x118] sm:$0xff] %v404_v35  ;;  %v406_v36 = vld [vmem:[%s1581_s7 + $0x240] sm:$0xff]  ;;  %v408_v37 = vld [vmem:[%s1581_s7 + $0x250] sm:$0xff] }
  0x2b   : > { %v410_v38 = vld [vmem:[%s1581_s7 + $0x260] sm:$0xff]  ;;  %407 = vst [vmem:[%s1586_s8 + $0x120] sm:$0xff] %v406_v36  ;;  %409 = vst [vmem:[%s1586_s8 + $0x128] sm:$0xff] %v408_v37  ;;  %v412_v39 = vld [vmem:[%s1581_s7 + $0x270] sm:$0xff] }
  0x2c   : > { %411 = vst [vmem:[%s1586_s8 + $0x130] sm:$0xff] %v410_v38  ;;  %v414_v40 = vld [vmem:[%s1581_s7 + $0x280] sm:$0xff]  ;;  %v416_v41 = vld [vmem:[%s1581_s7 + $0x290] sm:$0xff]  ;;  %413 = vst [vmem:[%s1586_s8 + $0x138] sm:$0xff] %v412_v39 }
  0x2d   : > { %415 = vst [vmem:[%s1586_s8 + $0x140] sm:$0xff] %v414_v40  ;;  %417 = vst [vmem:[%s1586_s8 + $0x148] sm:$0xff] %v416_v41  ;;  %v418_v42 = vld [vmem:[%s1581_s7 + $0x2a0] sm:$0xff]  ;;  %v420_v43 = vld [vmem:[%s1581_s7 + $0x2b0] sm:$0xff] }
  0x2e   : > { %v422_v44 = vld [vmem:[%s1581_s7 + $0x2c0] sm:$0xff]  ;;  %419 = vst [vmem:[%s1586_s8 + $0x150] sm:$0xff] %v418_v42  ;;  %421 = vst [vmem:[%s1586_s8 + $0x158] sm:$0xff] %v420_v43  ;;  %v424_v45 = vld [vmem:[%s1581_s7 + $0x2d0] sm:$0xff] }
  0x2f   : > { %423 = vst [vmem:[%s1586_s8 + $0x160] sm:$0xff] %v422_v44  ;;  %v426_v46 = vld [vmem:[%s1581_s7 + $0x2e0] sm:$0xff]  ;;  %v428_v47 = vld [vmem:[%s1581_s7 + $0x2f0] sm:$0xff]  ;;  %425 = vst [vmem:[%s1586_s8 + $0x168] sm:$0xff] %v424_v45 }
  0x30   : > { %427 = vst [vmem:[%s1586_s8 + $0x170] sm:$0xff] %v426_v46  ;;  %429 = vst [vmem:[%s1586_s8 + $0x178] sm:$0xff] %v428_v47  ;;  %v430_v48 = vld [vmem:[%s1581_s7 + $0x300] sm:$0xff]  ;;  %v432_v49 = vld [vmem:[%s1581_s7 + $0x310] sm:$0xff] }
  0x31   : > { %v434_v50 = vld [vmem:[%s1581_s7 + $0x320] sm:$0xff]  ;;  %431 = vst [vmem:[%s1586_s8 + $0x180] sm:$0xff] %v430_v48  ;;  %433 = vst [vmem:[%s1586_s8 + $0x188] sm:$0xff] %v432_v49  ;;  %v436_v51 = vld [vmem:[%s1581_s7 + $0x330] sm:$0xff] }
  0x32   : > { %435 = vst [vmem:[%s1586_s8 + $0x190] sm:$0xff] %v434_v50  ;;  %v438_v52 = vld [vmem:[%s1581_s7 + $0x340] sm:$0xff]  ;;  %v440_v53 = vld [vmem:[%s1581_s7 + $0x350] sm:$0xff]  ;;  %437 = vst [vmem:[%s1586_s8 + $0x198] sm:$0xff] %v436_v51 }
  0x33   : > { %439 = vst [vmem:[%s1586_s8 + $0x1a0] sm:$0xff] %v438_v52  ;;  %441 = vst [vmem:[%s1586_s8 + $0x1a8] sm:$0xff] %v440_v53  ;;  %v442_v54 = vld [vmem:[%s1581_s7 + $0x360] sm:$0xff]  ;;  %v444_v55 = vld [vmem:[%s1581_s7 + $0x370] sm:$0xff] }
  0x34   : > { %v446_v56 = vld [vmem:[%s1581_s7 + $0x380] sm:$0xff]  ;;  %443 = vst [vmem:[%s1586_s8 + $0x1b0] sm:$0xff] %v442_v54  ;;  %445 = vst [vmem:[%s1586_s8 + $0x1b8] sm:$0xff] %v444_v55  ;;  %v448_v57 = vld [vmem:[%s1581_s7 + $0x390] sm:$0xff] }
  0x35   : > { %447 = vst [vmem:[%s1586_s8 + $0x1c0] sm:$0xff] %v446_v56  ;;  %v450_v58 = vld [vmem:[%s1581_s7 + $0x3a0] sm:$0xff]  ;;  %v452_v59 = vld [vmem:[%s1581_s7 + $0x3b0] sm:$0xff]  ;;  %449 = vst [vmem:[%s1586_s8 + $0x1c8] sm:$0xff] %v448_v57 }
  0x36   : > { %451 = vst [vmem:[%s1586_s8 + $0x1d0] sm:$0xff] %v450_v58  ;;  %453 = vst [vmem:[%s1586_s8 + $0x1d8] sm:$0xff] %v452_v59  ;;  %v454_v60 = vld [vmem:[%s1581_s7 + $0x3c0] sm:$0xff]  ;;  %v456_v61 = vld [vmem:[%s1581_s7 + $0x3d0] sm:$0xff] }
  0x37   : > { %v458_v62 = vld [vmem:[%s1581_s7 + $0x3e0] sm:$0xff]  ;;  %455 = vst [vmem:[%s1586_s8 + $0x1e0] sm:$0xff] %v454_v60  ;;  %457 = vst [vmem:[%s1586_s8 + $0x1e8] sm:$0xff] %v456_v61  ;;  %v460_v63 = vld [vmem:[%s1581_s7 + $0x3f0] sm:$0xff] }
  0x38   : > { %459 = vst [vmem:[%s1586_s8 + $0x1f0] sm:$0xff] %v458_v62  ;;  %461 = vst [vmem:[%s1586_s8 + $0x1f8] sm:$0xff] %v460_v63 }
  0x39 PF: > { %p1205_p7 = scmp.ge.s32.totalorder %s1498_s18, 1  ;;  %p474_p8 = scmp.lt.s32.totalorder %s1498_s18, 19 }
  0x3b   : > { %p475_p9 = pnand %p1205_p7, %p474_p8 }
  0x3c   : > { %s481_s9 = sand.u32 (!%p475_p9), 1, %s1474_s12   ;;  %p521_p10 = scmp.lt.s32.totalorder (!%p475_p9), %s1482_s14, 8 }
  0x3d   : > { %478 = sbr.rel (%p475_p9) target bundleno = 374 (0x176), region = 66  ;;  %s1206_s10 = sshll.u32 (!%p475_p9), %s481_s9, 9 }
  0x3e   : > { %s1209_s11 = sshll.u32 (!%p475_p9), %s1486_s15, 1  ;;  %s1736_s5 = scalar_lea.vmem (!%p475_p9), [#allocation3], %s1206_s10 }
  0x3f   : > { %p532_p11 = scmp.lt.s32.totalorder (!%p475_p9), %s1209_s11, 3  ;;  %p1212_p12 = scmp.ne.s32.totalorder (!%p475_p9), %s1482_s14, 0 }
  0x44   : > { %s522_s21 = scalar_select %p521_p10, %s1482_s14, 8 }
  0x45   : > { %s1850_s11 = smov (!%p532_p11, %s1209_s11), 3  ;;  %549 = sbr.rel (%p1212_p12) target bundleno = 76 (0x4c), region = 74 }
  0x46   : > { %s1285_s22 = sshll.u32 %s522_s21, 4  ;;  %s534_s29 = scalar_lea.vmem %s1835_s2, %s1850_s11  ;;  %v1500_v0 = vmov (!%p1212_p12), 0.0  }
  0x47   : > { %s1724_s26 = scalar_lea.vmem %s1833_s0, %s1285_s22  ;;  %s1211_s12 = sshll.u32 %s1850_s11, 2  ;;  %550 = vst [vmem:[#allocation2] sm:$0xff] (!%p1212_p12), %v1500_v0  ;;  %551 = vst [vmem:[#allocation2 + $0x8] sm:$0xff] (!%p1212_p12), %v1500_v0 }
  0x48   : > { %s1734_s15 = scalar_lea.vmem %s1836_s3, %s1211_s12 }
  0x4c PF: > { %v1344_v1 = vld [vmem:[%s1736_s5 + $0x4] ss:$8 sps:$4 sm:$0xff]   ;;  %v1348_v3 = vld [vmem:[%s1736_s5] ss:$8 sps:$4 sm:$0xff]   ;;  %v1350_v5 = vld [vmem:[%s1736_s5 + $0x14] ss:$8 sps:$4 sm:$0xff]  }
  0x4d   : > { %v1346_v2 = vld [vmem:[%s1736_s5 + $0x104] ss:$8 sps:$4 sm:$0xff]   ;;  %954 = vmatprep.subr.bf16.mxu0 %v1344_v1  ;;  %v1349_v4 = vld [vmem:[%s1736_s5 + $0x100] ss:$8 sps:$4 sm:$0xff]   ;;  %v1352_v6 = vld [vmem:[%s1736_s5 + $0x114] ss:$8 sps:$4 sm:$0xff]  }
  0x4e   : > { %995 = vmatprep.subr.bf16.mxu1 %v1346_v2  ;;  %955 = vmatpush1.bf16.msra.mxu0 %v1348_v3  ;;  %v1354_v7 = vld [vmem:[%s1736_s5 + $0x10] ss:$8 sps:$4 sm:$0xff]   ;;  %v1356_v9 = vld [vmem:[%s1736_s5 + $0x24] ss:$8 sps:$4 sm:$0xff]   ;;  %v1360_v11 = vld [vmem:[%s1736_s5 + $0x20] ss:$8 sps:$4 sm:$0xff]  }
  0x4f   : > { %996 = vmatpush1.bf16.msra.mxu1 %v1349_v4  ;;  %956 = vmatprep.subr.bf16.mxu0 %v1350_v5  ;;  %v1355_v8 = vld [vmem:[%s1736_s5 + $0x110] ss:$8 sps:$4 sm:$0xff]   ;;  %v1358_v10 = vld [vmem:[%s1736_s5 + $0x124] ss:$8 sps:$4 sm:$0xff]   ;;  %v1361_v12 = vld [vmem:[%s1736_s5 + $0x120] ss:$8 sps:$4 sm:$0xff]  }
  0x50   : > { %997 = vmatprep.subr.bf16.mxu1 %v1352_v6  ;;  %v1362_v13 = vld [vmem:[%s1736_s5 + $0x34] ss:$8 sps:$4 sm:$0xff]   ;;  %v1366_v15 = vld [vmem:[%s1736_s5 + $0x30] ss:$8 sps:$4 sm:$0xff]   ;;  %v1368_v17 = vld [vmem:[%s1736_s5 + $0x44] ss:$8 sps:$4 sm:$0xff]  }
  0x51   : > { %v1364_v14 = vld [vmem:[%s1736_s5 + $0x134] ss:$8 sps:$4 sm:$0xff]   ;;  %v1367_v16 = vld [vmem:[%s1736_s5 + $0x130] ss:$8 sps:$4 sm:$0xff]   ;;  %v1370_v18 = vld [vmem:[%s1736_s5 + $0x144] ss:$8 sps:$4 sm:$0xff]  }
  0x52   : > { %957 = vmatpush1.bf16.msra.mxu0 %v1354_v7  ;;  %v1372_v19 = vld [vmem:[%s1736_s5 + $0x40] ss:$8 sps:$4 sm:$0xff]   ;;  %v1374_v21 = vld [vmem:[%s1736_s5 + $0x54] ss:$8 sps:$4 sm:$0xff]   ;;  %v1378_v23 = vld [vmem:[%s1736_s5 + $0x50] ss:$8 sps:$4 sm:$0xff]  }
  0x53   : > { %998 = vmatpush1.bf16.msra.mxu1 %v1355_v8  ;;  %958 = vmatprep.subr.bf16.mxu0 %v1356_v9  ;;  %v1373_v20 = vld [vmem:[%s1736_s5 + $0x140] ss:$8 sps:$4 sm:$0xff]   ;;  %v1376_v22 = vld [vmem:[%s1736_s5 + $0x154] ss:$8 sps:$4 sm:$0xff]   ;;  %v1379_v24 = vld [vmem:[%s1736_s5 + $0x150] ss:$8 sps:$4 sm:$0xff]  }
  0x54   : > { %999 = vmatprep.subr.bf16.mxu1 %v1358_v10  ;;  %v1380_v25 = vld [vmem:[%s1736_s5 + $0x64] ss:$8 sps:$4 sm:$0xff]   ;;  %v1384_v27 = vld [vmem:[%s1736_s5 + $0x60] ss:$8 sps:$4 sm:$0xff]   ;;  %v1386_v29 = vld [vmem:[%s1736_s5 + $0x74] ss:$8 sps:$4 sm:$0xff]  }
  0x55   : > { %v1382_v26 = vld [vmem:[%s1736_s5 + $0x164] ss:$8 sps:$4 sm:$0xff]   ;;  %v1385_v28 = vld [vmem:[%s1736_s5 + $0x160] ss:$8 sps:$4 sm:$0xff]   ;;  %v1388_v30 = vld [vmem:[%s1736_s5 + $0x174] ss:$8 sps:$4 sm:$0xff]  }
  0x56   : > { %959 = vmatpush1.bf16.msra.mxu0 %v1360_v11  ;;  %v1390_v31 = vld [vmem:[%s1736_s5 + $0x70] ss:$8 sps:$4 sm:$0xff]   ;;  %v1392_v33 = vld [vmem:[%s1736_s5 + $0x84] ss:$8 sps:$4 sm:$0xff]   ;;  %v1396_v35 = vld [vmem:[%s1736_s5 + $0x80] ss:$8 sps:$4 sm:$0xff]  }
  0x57   : > { %1000 = vmatpush1.bf16.msra.mxu1 %v1361_v12  ;;  %960 = vmatprep.subr.bf16.mxu0 %v1362_v13  ;;  %v1391_v32 = vld [vmem:[%s1736_s5 + $0x170] ss:$8 sps:$4 sm:$0xff]   ;;  %v1394_v34 = vld [vmem:[%s1736_s5 + $0x184] ss:$8 sps:$4 sm:$0xff]   ;;  %v1397_v36 = vld [vmem:[%s1736_s5 + $0x180] ss:$8 sps:$4 sm:$0xff]  }
  0x58   : > { %1001 = vmatprep.subr.bf16.mxu1 %v1364_v14  ;;  %v1398_v37 = vld [vmem:[%s1736_s5 + $0x94] ss:$8 sps:$4 sm:$0xff]   ;;  %v1402_v39 = vld [vmem:[%s1736_s5 + $0x90] ss:$8 sps:$4 sm:$0xff]   ;;  %v1404_v41 = vld [vmem:[%s1736_s5 + $0xa4] ss:$8 sps:$4 sm:$0xff]  }
  0x59   : > { %v1400_v38 = vld [vmem:[%s1736_s5 + $0x194] ss:$8 sps:$4 sm:$0xff]   ;;  %v1403_v40 = vld [vmem:[%s1736_s5 + $0x190] ss:$8 sps:$4 sm:$0xff]   ;;  %v1406_v42 = vld [vmem:[%s1736_s5 + $0x1a4] ss:$8 sps:$4 sm:$0xff]  }
  0x5a   : > { %961 = vmatpush1.bf16.msra.mxu0 %v1366_v15  ;;  %v1408_v43 = vld [vmem:[%s1736_s5 + $0xa0] ss:$8 sps:$4 sm:$0xff]   ;;  %v1410_v45 = vld [vmem:[%s1736_s5 + $0xb4] ss:$8 sps:$4 sm:$0xff]   ;;  %v1414_v50 = vld [vmem:[%s1736_s5 + $0xb0] ss:$8 sps:$4 sm:$0xff]  }
  0x5b   : > { %1002 = vmatpush1.bf16.msra.mxu1 %v1367_v16  ;;  %962 = vmatprep.subr.bf16.mxu0 %v1368_v17  ;;  %v1409_v44 = vld [vmem:[%s1736_s5 + $0x1a0] ss:$8 sps:$4 sm:$0xff]   ;;  %v1412_v46 = vld [vmem:[%s1736_s5 + $0x1b4] ss:$8 sps:$4 sm:$0xff]   ;;  %v1415_v51 = vld [vmem:[%s1736_s5 + $0x1b0] ss:$8 sps:$4 sm:$0xff]  }
  0x5c   : > { %1003 = vmatprep.subr.bf16.mxu1 %v1370_v18  ;;  %v554_v47 = vld [vmem:[%s1724_s26] sm:$0xff]  ;;  %v555_v49 = vld [vmem:[%s1724_s26 + $0x8] sm:$0xff]  ;;  %v1416_v53 = vld [vmem:[%s1736_s5 + $0xc4] ss:$8 sps:$4 sm:$0xff]   ;;  %p1281_p13 = scmp.ne.s32.totalorder %s1482_s14, 8 }
  0x5d   : > { %v1214_v48 = vcombine.high %v554_v47, %v554_v47  ;;  %v1216_v52 = vcombine.high %v555_v49, %v555_v49  ;;  %v1418_v54 = vld [vmem:[%s1736_s5 + $0x1c4] ss:$8 sps:$4 sm:$0xff]   ;;  %v1420_v55 = vld [vmem:[%s1736_s5 + $0xc0] ss:$8 sps:$4 sm:$0xff]   ;;  %v1422_v57 = vld [vmem:[%s1736_s5 + $0xd4] ss:$8 sps:$4 sm:$0xff]   ;;  %v1213_v5 = vcombine.low %v554_v47, %v554_v47  ;;  %v1215_v6 = vcombine.low %v555_v49, %v555_v49 }
  0x5e   : > { %963 = vmatpush1.bf16.msra.mxu0 %v1372_v19  ;;  %v1421_v56 = vld [vmem:[%s1736_s5 + $0x1c0] ss:$8 sps:$4 sm:$0xff]   ;;  %v1424_v58 = vld [vmem:[%s1736_s5 + $0x1d4] ss:$8 sps:$4 sm:$0xff]   ;;  %v1426_v59 = vld [vmem:[%s1736_s5 + $0xd0] ss:$8 sps:$4 sm:$0xff]  }
  0x5f   : > { %1004 = vmatpush1.bf16.msra.mxu1 %v1373_v20  ;;  %964 = vmatprep.subr.bf16.mxu0 %v1374_v21  ;;  %v1427_v60 = vld [vmem:[%s1736_s5 + $0x1d0] ss:$8 sps:$4 sm:$0xff]   ;;  %v1428_v61 = vld [vmem:[%s1736_s5 + $0xe4] ss:$8 sps:$4 sm:$0xff]   ;;  %v1432_v63 = vld [vmem:[%s1736_s5 + $0xe0] ss:$8 sps:$4 sm:$0xff]   ;;  %v1048_v21 = vlaneseq (!%p1281_p13) }
  0x60   : > { %1005 = vmatprep.subr.bf16.mxu1 %v1376_v22  ;;  %986 = vmatprep.mubr.bf16.mxu0 %v1214_v48  ;;  %v1430_v62 = vld [vmem:[%s1736_s5 + $0x1e4] ss:$8 sps:$4 sm:$0xff]   ;;  %v1433_v0 = vld [vmem:[%s1736_s5 + $0x1e0] ss:$8 sps:$4 sm:$0xff]   ;;  %v1434_v1 = vld [vmem:[%s1736_s5 + $0xf4] ss:$8 sps:$4 sm:$0xff]  }
  0x61   : > { %1027 = vmatprep.mubr.bf16.mxu1 %v1216_v52  ;;  %v1436_v2 = vld [vmem:[%s1736_s5 + $0x1f4] ss:$8 sps:$4 sm:$0xff]   ;;  %v1438_v3 = vld [vmem:[%s1736_s5 + $0xf0] ss:$8 sps:$4 sm:$0xff]   ;;  %v1049_v22 = vshrl.u32 (!%p1281_p13), %v1048_v21, 7 }
  0x62   : > { %965 = vmatpush1.bf16.msra.mxu0 %v1378_v23  ;;  %v1439_v4 = vld [vmem:[%s1736_s5 + $0x1f0] ss:$8 sps:$4 sm:$0xff]  }
  0x63   : > { %1006 = vmatpush1.bf16.msra.mxu1 %v1379_v24  ;;  %966 = vmatprep.subr.bf16.mxu0 %v1380_v25  ;;  %v552_v8 = vld [vmem:[#allocation2] sm:$0xff]  ;;  %v553_v12 = vld [vmem:[#allocation2 + $0x8] sm:$0xff]  ;;  %v1050_v24 = vsub.s32 (!%p1281_p13), 0, %v1049_v22  ;;  %v1054_v25 = vsub.s32 (!%p1281_p13), 1, %v1049_v22 }
  0x64   : > { %1007 = vmatprep.subr.bf16.mxu1 %v1382_v26  ;;  %v1046_v23 = vld [vmem:[%s534_s29] sm:$0x3] (!%p1281_p13) }
  0x66   : > { %967 = vmatpush1.bf16.msra.mxu0 %v1384_v27 }
  0x67   : > { %1008 = vmatpush1.bf16.msra.mxu1 %v1385_v28  ;;  %968 = vmatprep.subr.bf16.mxu0 %v1386_v29  ;;  %v1051_v28 = vrot.slane (!%p1281_p13), %v1046_v23, %v1050_v24  ;;  %v1055_v29 = vrot.slane (!%p1281_p13), %v1046_v23, %v1054_v25 }
  0x68   : > { %1009 = vmatprep.subr.bf16.mxu1 %v1388_v30 }
  0x6a   : > { %969 = vmatpush1.bf16.msra.mxu0 %v1390_v31 }
  0x6b   : > { %1010 = vmatpush1.bf16.msra.mxu1 %v1391_v32  ;;  %970 = vmatprep.subr.bf16.mxu0 %v1392_v33 }
  0x6c   : > { %1011 = vmatprep.subr.bf16.mxu1 %v1394_v34 }
  0x6e   : > { %971 = vmatpush1.bf16.msra.mxu0 %v1396_v35 }
  0x6f   : > { %1012 = vmatpush1.bf16.msra.mxu1 %v1397_v36  ;;  %972 = vmatprep.subr.bf16.mxu0 %v1398_v37 }
  0x70   : > { %1013 = vmatprep.subr.bf16.mxu1 %v1400_v38 }
  0x72   : > { %973 = vmatpush1.bf16.msra.mxu0 %v1402_v39 }
  0x73   : > { %1014 = vmatpush1.bf16.msra.mxu1 %v1403_v40  ;;  %974 = vmatprep.subr.bf16.mxu0 %v1404_v41 }
  0x74   : > { %1015 = vmatprep.subr.bf16.mxu1 %v1406_v42 }
  0x76   : > { %975 = vmatpush1.bf16.msra.mxu0 %v1408_v43 }
  0x77   : > { %1016 = vmatpush1.bf16.msra.mxu1 %v1409_v44  ;;  %976 = vmatprep.subr.bf16.mxu0 %v1410_v45 }
  0x78   : > { %1017 = vmatprep.subr.bf16.mxu1 %v1412_v46 }
  0x7a   : > { %977 = vmatpush1.bf16.msra.mxu0 %v1414_v50 }
  0x7b   : > { %1018 = vmatpush1.bf16.msra.mxu1 %v1415_v51  ;;  %978 = vmatprep.subr.bf16.mxu0 %v1416_v53 }
  0x7c   : > { %1019 = vmatprep.subr.bf16.mxu1 %v1418_v54 }
  0x7e   : > { %979 = vmatpush1.bf16.msra.mxu0 %v1420_v55 }
  0x7f   : > { %1020 = vmatpush1.bf16.msra.mxu1 %v1421_v56  ;;  %980 = vmatprep.subr.bf16.mxu0 %v1422_v57 }
  0x80   : > { %1021 = vmatprep.subr.bf16.mxu1 %v1424_v58 }
  0x82   : > { %981 = vmatpush1.bf16.msra.mxu0 %v1426_v59 }
  0x83   : > { %1022 = vmatpush1.bf16.msra.mxu1 %v1427_v60  ;;  %982 = vmatprep.subr.bf16.mxu0 %v1428_v61 }
  0x84   : > { %1023 = vmatprep.subr.bf16.mxu1 %v1430_v62 }
  0x86   : > { %983 = vmatpush1.bf16.msra.mxu0 %v1432_v63 }
  0x87   : > { %1024 = vmatpush1.bf16.msra.mxu1 %v1433_v0  ;;  %984 = vmatprep.subr.bf16.mxu0 %v1434_v1 }
  0x88   : > { %1025 = vmatprep.subr.bf16.mxu1 %v1436_v2 }
  0x8a   : > { %985 = vmatpush1.bf16.msra.mxu0 %v1438_v3 }
  0x8b   : > { %1026 = vmatpush1.bf16.msra.mxu1 %v1439_v4 }
  0x8d   : > { %987 = vmatmul.mubr.bf16.vlgmr.msra.gmra.mrb[0].mxu0 %v1213_v5 }
  0x8e   : > { %1028 = vmatmul.mubr.bf16.vlgmr.msra.gmra.mrb[0].mxu1 %v1215_v6 }
 0x160   : > { %v988_v7 = vpop.f32.mrb[0].mxu0 }
 0x161   : > { %v1029_v9 = vpop.f32.mrb[0].mxu1  ;;  %v990_v11 = vpop.f32.mrb[1].mxu0  ;;  %1043 = sbr.rel (%p1281_p13) target bundleno = 374 (0x176), region = 78 }
 0x162   : > { %v1030_v10 = vadd.f32 %v1029_v9, %v988_v7  ;;  %v1031_v13 = vpop.f32.mrb[1].mxu1  ;;  %v992_v15 = vpop.f32.mrb[2].mxu0 }
 0x163   : > { %v1032_v14 = vadd.f32 %v1031_v13, %v990_v11  ;;  %v1033_v16 = vpop.f32.mrb[2].mxu1  ;;  %v993_v18 = vpop.f32.mrb[3].mxu0 }
 0x164   : > { %v1036_v17 = vadd.f32 %v1030_v10, %v552_v8  ;;  %v1034_v19 = vpop.f32.mrb[3].mxu1 }
 0x165   : > { %v1037_v20 = vadd.f32 %v1032_v14, %v553_v12 }
 0x166   : > { %1038 = vst [vmem:[#allocation2] sm:$0xff] %v1036_v17 }
 0x167   : > { %1039 = vst [vmem:[#allocation2 + $0x8] sm:$0xff] %v1037_v20 }
 0x16d   : > { %v1044_v26 = vld [vmem:[#allocation2] sm:$0xff] }
 0x16e   : > { %v1045_v27 = vld [vmem:[#allocation2 + $0x8] sm:$0xff]  ;;  %v1058_v30 = vadd.f32 %v1051_v28, %v1044_v26 }
 0x16f   : > { %v1059_v31 = vadd.f32 %v1055_v29, %v1045_v27 }
 0x170   : > { %v1060_v32 = vmax.f32 %v1058_v30, 0.0 }
 0x171   : > { %v1061_v33 = vmax.f32 %v1059_v31, 0.0 }
 0x173   : > { %v1286_v34 = vpack.c.bf16 %v1061_v33, %v1060_v32 }
 0x175   : > { %1070 = vst [vmem:[%s1734_s15] sm:$0xff] %v1286_v34 }
 0x176 PF: > { %s13_s18 = sadd.s32 1, %s1498_s18   ;;  %s1837_s12 = smov %s1478_s13 }
 0x177   : > { %p10_p0 = scmp.ge.s32.totalorder %s13_s18, 20   ;;  %s1838_s13 = smov %s1572_s25 }
 0x178   : > { %s1839_s14 = smov %s1490_s16  ;;  %s1840_s15 = smov %s1494_s17 }
 0x179   : > { %s1841_s16 = smov %s1844_s19  ;;  %s1842_s17 = smov %s1848_s20 }
 0x17a   :  { %12 = sbr.rel (!%p10_p0) target bundleno = 4 (0x4), region = 119 }

// kernel: resnet34_forward.76
= control target key start
LH: loop header
LB: loop body
LE: loop exit
PB: predicated region body
PF: predicated region fallthrough
CT: control target
= control target key end

     0   :  { %vm21_vm0 = vcmask 1041409   ;;  %vm23_vm1 = vcmask 1043459   ;;  %vm25_vm2 = vcmask 1045509   ;;  %vm27_vm3 = vcmask 1047559   ;;  %s55_s0 = inlined_call_operand.vmem [shape: bf16[2,1,512], index: 0, kind: input, shape index: {}]   ;;  %s56_s1 = inlined_call_operand.vmem [shape: f32[2,512], index: 1, kind: output, shape index: {}]  }
   0x1   :  { %v36_v0 = vld [vmem:[%s55_s0] sm:$0xff]  }
   0x2   :  { %v37_v1 = vunpack.c.l.bf16 %v36_v0  ;;  %v38_v2 = vunpack.c.h.bf16 %v36_v0 }
   0x4   :  { %v20_v3 = vrot.slane %v38_v2, 7 }
   0x6   :  { %v22_v4 = vsel %vm21_vm0, %v20_v3, %v37_v1 }
   0x7   :  { %v24_v5 = vsel %vm23_vm1, %v20_v3, %v22_v4 }
   0x8   :  { %v26_v6 = vsel %vm25_vm2, %v20_v3, %v24_v5 }
   0x9   :  { %v28_v7 = vsel %vm27_vm3, %v20_v3, %v26_v6 }
   0xa   :  { %30 = vst [vmem:[%s56_s1] sm:$0xff] %v28_v7 }

// kernel: resnet34_forward.77
= control target key start
LH: loop header
LB: loop body
LE: loop exit
PB: predicated region body
PF: predicated region fallthrough
CT: control target
= control target key end

     0   :  { %s637_s1 = inlined_call_operand.vmem [shape: bf16[1,512,128], index: 1, kind: input, shape index: {}]   ;;  %s638_s0 = inlined_call_operand.vmem [shape: bf16[1,8,512], index: 0, kind: input, shape index: {}]   ;;  %s639_s2 = inlined_call_operand.vmem [shape: f32[1,128], index: 2, kind: input, shape index: {}]   ;;  %s640_s3 = inlined_call_operand.vmem [shape: f32[8,128], index: 3, kind: output, shape index: {}]  }
   0x1   :  { %v473_v0 = vld [vmem:[%s637_s1 + $0x40] sm:$0xff]   ;;  %v477_v4 = vld [vmem:[%s637_s1 + $0x48] sm:$0xff]   ;;  %v481_v8 = vld [vmem:[%s637_s1 + $0x50] sm:$0xff]  }
   0x2   :  { %v474_v1 = vld [vmem:[%s637_s1 + $0xc0] sm:$0xff]   ;;  %429 = vmatprep.subr.bf16.mxu0 %v473_v0  ;;  %v478_v5 = vld [vmem:[%s637_s1 + $0xc8] sm:$0xff]   ;;  %v482_v9 = vld [vmem:[%s637_s1 + $0xd0] sm:$0xff]  }
   0x3   :  { %v475_v2 = vld [vmem:[%s637_s1] sm:$0xff]   ;;  %451 = vmatprep.subr.bf16.mxu1 %v474_v1  ;;  %v479_v6 = vld [vmem:[%s637_s1 + $0x8] sm:$0xff]   ;;  %v483_v10 = vld [vmem:[%s637_s1 + $0x10] sm:$0xff]  }
   0x4   :  { %v476_v3 = vld [vmem:[%s637_s1 + $0x80] sm:$0xff]   ;;  %430 = vmatpush3.bf16.msra.mxu0 %v475_v2  ;;  %v480_v7 = vld [vmem:[%s637_s1 + $0x88] sm:$0xff]   ;;  %v484_v11 = vld [vmem:[%s637_s1 + $0x90] sm:$0xff]  }
   0x5   :  { %452 = vmatpush3.bf16.msra.mxu1 %v476_v3  ;;  %431 = vmatprep.subr.bf16.mxu0 %v477_v4  ;;  %v485_v12 = vld [vmem:[%s637_s1 + $0x58] sm:$0xff]   ;;  %v489_v16 = vld [vmem:[%s637_s1 + $0x60] sm:$0xff]   ;;  %v493_v20 = vld [vmem:[%s637_s1 + $0x68] sm:$0xff]  }
   0x6   :  { %453 = vmatprep.subr.bf16.mxu1 %v478_v5  ;;  %v486_v13 = vld [vmem:[%s637_s1 + $0xd8] sm:$0xff]   ;;  %v490_v17 = vld [vmem:[%s637_s1 + $0xe0] sm:$0xff]   ;;  %v494_v21 = vld [vmem:[%s637_s1 + $0xe8] sm:$0xff]  }
   0x7   :  { %v487_v14 = vld [vmem:[%s637_s1 + $0x18] sm:$0xff]   ;;  %v491_v18 = vld [vmem:[%s637_s1 + $0x20] sm:$0xff]   ;;  %v495_v22 = vld [vmem:[%s637_s1 + $0x28] sm:$0xff]  }
   0x8   :  { %432 = vmatpush3.bf16.msra.mxu0 %v479_v6  ;;  %v488_v15 = vld [vmem:[%s637_s1 + $0x98] sm:$0xff]   ;;  %v492_v19 = vld [vmem:[%s637_s1 + $0xa0] sm:$0xff]   ;;  %v496_v23 = vld [vmem:[%s637_s1 + $0xa8] sm:$0xff]  }
   0x9   :  { %454 = vmatpush3.bf16.msra.mxu1 %v480_v7  ;;  %433 = vmatprep.subr.bf16.mxu0 %v481_v8  ;;  %v497_v24 = vld [vmem:[%s637_s1 + $0x70] sm:$0xff]   ;;  %v501_v28 = vld [vmem:[%s637_s1 + $0x78] sm:$0xff]   ;;  %v21_v32 = vld [vmem:[%s638_s0] sm:$0xff] }
   0xa   :  { %455 = vmatprep.subr.bf16.mxu1 %v482_v9  ;;  %v498_v25 = vld [vmem:[%s637_s1 + $0xf0] sm:$0xff]   ;;  %v502_v29 = vld [vmem:[%s637_s1 + $0xf8] sm:$0xff]   ;;  %v22_v33 = vld [vmem:[%s638_s0 + $0x8] sm:$0xff]  ;;  %v392_v34 = vcombine.low %v21_v32, %v21_v32  ;;  %v393_v35 = vcombine.high %v21_v32, %v21_v32 }
   0xb   :  { %v499_v26 = vld [vmem:[%s637_s1 + $0x30] sm:$0xff]   ;;  %v503_v30 = vld [vmem:[%s637_s1 + $0x38] sm:$0xff]   ;;  %v394_v36 = vcombine.low %v22_v33, %v22_v33  ;;  %v395_v37 = vcombine.high %v22_v33, %v22_v33  ;;  %v428_v46 = vld [vmem:[%s639_s2] ss:$0 sm:$0xff] }
   0xc   :  { %434 = vmatpush3.bf16.msra.mxu0 %v483_v10  ;;  %v500_v27 = vld [vmem:[%s637_s1 + $0xb0] sm:$0xff]   ;;  %v504_v31 = vld [vmem:[%s637_s1 + $0xb8] sm:$0xff]   ;;  %325 = vmatprep.mubr.bf16.mxu0 %v393_v35 }
   0xd   :  { %456 = vmatpush3.bf16.msra.mxu1 %v484_v11  ;;  %435 = vmatprep.subr.bf16.mxu0 %v485_v12 }
   0xe   :  { %457 = vmatprep.subr.bf16.mxu1 %v486_v13  ;;  %365 = vmatprep.mubr.bf16.mxu1 %v395_v37 }
  0x10   :  { %436 = vmatpush3.bf16.msra.mxu0 %v487_v14 }
  0x11   :  { %458 = vmatpush3.bf16.msra.mxu1 %v488_v15  ;;  %437 = vmatprep.subr.bf16.mxu0 %v489_v16 }
  0x12   :  { %459 = vmatprep.subr.bf16.mxu1 %v490_v17 }
  0x14   :  { %438 = vmatpush3.bf16.msra.mxu0 %v491_v18 }
  0x15   :  { %460 = vmatpush3.bf16.msra.mxu1 %v492_v19  ;;  %439 = vmatprep.subr.bf16.mxu0 %v493_v20 }
  0x16   :  { %461 = vmatprep.subr.bf16.mxu1 %v494_v21 }
  0x18   :  { %440 = vmatpush3.bf16.msra.mxu0 %v495_v22 }
  0x19   :  { %462 = vmatpush3.bf16.msra.mxu1 %v496_v23  ;;  %441 = vmatprep.subr.bf16.mxu0 %v497_v24 }
  0x1a   :  { %463 = vmatprep.subr.bf16.mxu1 %v498_v25 }
  0x1c   :  { %442 = vmatpush3.bf16.msra.mxu0 %v499_v26 }
  0x1d   :  { %464 = vmatpush3.bf16.msra.mxu1 %v500_v27  ;;  %443 = vmatprep.subr.bf16.mxu0 %v501_v28 }
  0x1e   :  { %465 = vmatprep.subr.bf16.mxu1 %v502_v29 }
  0x20   :  { %444 = vmatpush3.bf16.msra.mxu0 %v503_v30 }
  0x21   :  { %466 = vmatpush3.bf16.msra.mxu1 %v504_v31 }
  0x23   :  { %326 = vmatmul.mubr.bf16.vlgmr.msra.gmra.mrb[0].mxu0 %v392_v34 }
  0x24   :  { %366 = vmatmul.mubr.bf16.vlgmr.msra.gmra.mrb[0].mxu1 %v394_v36 }
  0xf6   :  { %v445_v38 = vpop.f32.mrb[0].mxu0 }
  0xf7   :  { %v467_v39 = vpop.f32.mrb[0].mxu1  ;;  %v446_v40 = vpop.f32.mrb[1].mxu0 }
  0xf8   :  { %v468_v41 = vpop.f32.mrb[1].mxu1  ;;  %v447_v42 = vadd.f32 %v446_v40, %v445_v38  ;;  %v448_v44 = vpop.f32.mrb[2].mxu0 }
  0xf9   :  { %v469_v43 = vadd.f32 %v468_v41, %v467_v39  ;;  %v470_v45 = vpop.f32.mrb[2].mxu1  ;;  %v449_v47 = vpop.f32.mrb[3].mxu0 }
  0xfa   :  { %v471_v48 = vpop.f32.mrb[3].mxu1 }
  0xfb   :  { %v368_v49 = vadd.f32 %v469_v43, %v447_v42 }
  0xfd   :  { %v386_v50 = vadd.f32 %v428_v46, %v368_v49 }
  0xff   :  { %387 = vst [vmem:[%s640_s3] sm:$0xff] %v386_v50 }

</bundles_post_ra>
